<compile_context>
chip_gen: v7x
topology: tpu7x:2x2x1
jax: 0.10.0
libtpu: 0.0.40
codegen_flags: <defaults>
</compile_context>

<pallas_src>
import functools

import jax
import jax.numpy as jnp
from jax.experimental import pallas as pl
from jax.experimental.pallas import tpu as pltpu


# ---------------------------------------------------------------------------
# Fused InceptionA kernel (one grid step per batch element)
# ---------------------------------------------------------------------------
def _inception_a_kernel(x_ref,
                        w1x1, b1x1,           # fused [s1 | t1 | b1x1] 1x1 convs
                        ws2, bs2, ws3, bs3,   # branch3x3stack 3x3 convs
                        wt2, bt2,             # branch3x3 3x3 conv
                        wp1, bp1,             # branchpool 1x1 conv
                        o_ref,
                        xpad_ref, pad64_ref, pad96_ref,
                        *, H, W, Cin):
    HW = H * W

    # Zero padded scratch (interiors are fully overwritten before every read;
    # only the 1-pixel borders need these zeros).
    xpad_ref[...] = jnp.zeros_like(xpad_ref)
    pad64_ref[...] = jnp.zeros_like(pad64_ref)
    pad96_ref[...] = jnp.zeros_like(pad96_ref)

    def bias_relu(acc, b_ref):
        return jnp.maximum(acc + b_ref[...], 0.0)              # f32 epilogue

    def conv3x3(act_f32, pad_ref, w_ref, b_ref):
        # 3x3 conv, stride 1, pad 1, via zero-padded scratch + im2col matmul.
        C = act_f32.shape[-1]
        pad_ref[1:H + 1, 1:W + 1, :] = act_f32.reshape(H, W, C)
        taps = [pad_ref[kh:kh + H, kw:kw + W, :].reshape(HW, C).astype(jnp.bfloat16)
                for kh in range(3) for kw in range(3)]
        patch = jnp.concatenate(taps, axis=-1)                 # (HW, 9*C) bf16
        acc = jnp.dot(patch, w_ref[...], preferred_element_type=jnp.float32)
        return bias_relu(acc, b_ref)                           # (HW, Cout) f32

    x = x_ref[0]                                               # (H, W, Cin) f32
    x2d_bf = x.reshape(HW, Cin).astype(jnp.bfloat16)

    # All three 1x1 convs that read x as ONE matmul: [s1(64) | t1(64) | b1x1(96)].
    y = bias_relu(jnp.dot(x2d_bf, w1x1[...],
                          preferred_element_type=jnp.float32), b1x1)   # (HW, 224)
    a = y[:, 0:64]          # branch3x3stack after its 1x1
    d = y[:, 64:128]        # branch3x3 after its 1x1
    f = y[:, 128:224]       # branch1x1 output

    # branch3x3stack: 1x1 -> 3x3(pad=1) -> 3x3(pad=1)
    b = conv3x3(a, pad64_ref, ws2, bs2)                        # (HW, 96)
    c = conv3x3(b, pad96_ref, ws3, bs3)                        # (HW, 96)

    # branch3x3: 1x1 -> 3x3(pad=1)   (re-uses pad64_ref after b consumed it)
    e = conv3x3(d, pad64_ref, wt2, bt2)                        # (HW, 96)

    # branchpool: 3x3/s1 avg-pool (pad=1, count_include_pad) -> 1x1 conv
    xpad_ref[1:H + 1, 1:W + 1, :] = x
    psum = xpad_ref[0:H, 0:W, :]
    for kh in range(3):
        for kw in range(3):
            if kh == 0 and kw == 0:
                continue
            psum = psum + xpad_ref[kh:kh + H, kw:kw + W, :]
    pooled = (psum * (1.0 / 9.0)).reshape(HW, Cin).astype(jnp.bfloat16)
    g = bias_relu(jnp.dot(pooled, wp1[...],
                          preferred_element_type=jnp.float32), bp1)    # (HW, 96)

    # Channel concat (384 = 3*128 lanes), then a single lane-aligned transpose
    # so the store is channel-major: the wrapper's NCHW output needs only a
    # free reshape (no XLA transpose of the 384-channel activation).
    out = jnp.concatenate([c, e, f, g], axis=-1)               # (HW, 384) f32
    o_ref[0] = out.T.astype(o_ref.dtype)                       # (384, HW)


# ---------------------------------------------------------------------------
# Wrapper: one pallas_call for the whole block (NCHW in / NCHW out)
# ---------------------------------------------------------------------------
def inception_a_forward(x_nchw, params):
    """Matches InceptionA.forward: cat([3x3stack, 3x3, 1x1, pool], channel)."""
    x = jnp.transpose(x_nchw, (0, 2, 3, 1)).astype(jnp.float32)   # small NCHW->NHWC
    N, H, W, Cin = x.shape
    HW = H * W
    Cout_total = 4 * 96

    # Fuse the three pointwise convs that read x into one weight matrix.
    w1x1 = jnp.concatenate([params["s1"]["w_mat"], params["t1"]["w_mat"],
                            params["b1x1"]["w_mat"]], axis=1)        # (Cin, 224) bf16
    b1x1 = jnp.concatenate([params["s1"]["bias"], params["t1"]["bias"],
                            params["b1x1"]["bias"]], axis=1)         # (1, 224) f32

    flat = [w1x1, b1x1,
            params["s2"]["w_mat"], params["s2"]["bias"],
            params["s3"]["w_mat"], params["s3"]["bias"],
            params["t2"]["w_mat"], params["t2"]["bias"],
            params["pool1x1"]["w_mat"], params["pool1x1"]["bias"]]

    in_specs = [pl.BlockSpec((1, H, W, Cin), lambda n: (n, 0, 0, 0))]
    for arr in flat:
        in_specs.append(pl.BlockSpec(arr.shape, lambda n: (0, 0)))

    flops_per_n = 2 * HW * (Cin * 224 + 9 * 64 * 96 + 9 * 96 * 96 +
                            9 * 64 * 96 + Cin * 96) + 9 * HW * Cin
    bytes_accessed = (N * HW * Cin * 4
                      + sum(int(a.size) * a.dtype.itemsize for a in flat)
                      + N * HW * Cout_total * 4)
    cost = pl.CostEstimate(flops=int(N * flops_per_n), transcendentals=0,
                           bytes_accessed=int(bytes_accessed))

    kern = functools.partial(_inception_a_kernel, H=H, W=W, Cin=Cin)

    out_cm = pl.pallas_call(
        kern,
        out_shape=jax.ShapeDtypeStruct((N, Cout_total, HW), jnp.float32),
        grid=(N,),
        in_specs=in_specs,
        out_specs=pl.BlockSpec((1, Cout_total, HW), lambda n: (n, 0, 0)),
        scratch_shapes=[
            pltpu.VMEM((H + 2, W + 2, Cin), jnp.float32),   # padded input (pool)
            pltpu.VMEM((H + 2, W + 2, 64), jnp.float32),    # padded 64-ch acts
            pltpu.VMEM((H + 2, W + 2, 96), jnp.float32),    # padded 96-ch acts
        ],
        compiler_params=pltpu.CompilerParams(
            dimension_semantics=("parallel",)),
        cost_estimate=cost,
    )(x, *flat)
    # (N, 384, H*W) -> (N, 384, H, W): pure reshape, no data movement.
    return out_cm.reshape(N, Cout_total, H, W)


# ---------------------------------------------------------------------------
# Parameters (deterministic, synthetic); BN scale folded into weights
# ---------------------------------------------------------------------------
def make_conv_bn_params(key, cin, cout, ksize):
    k1, k2, k3, k4, k5 = jax.random.split(key, 5)
    w = 0.1 * jax.random.normal(k1, (ksize, ksize, cin, cout), jnp.float32)
    gamma = 1.0 + 0.1 * jax.random.normal(k2, (cout,), jnp.float32)
    beta = 0.1 * jax.random.normal(k3, (cout,), jnp.float32)
    mean = 0.1 * jax.random.normal(k4, (cout,), jnp.float32)
    var = jax.random.uniform(k5, (cout,), jnp.float32, 0.5, 1.5)
    scale = gamma / jnp.sqrt(var + 1e-5)
    w_fold = (w * scale).astype(jnp.bfloat16)        # fold BN scale, cast bf16
    bias = (beta - mean * scale).reshape(1, cout)    # f32 epilogue bias
    return {
        "w_mat": w_fold.reshape(ksize * ksize * cin, cout),   # kernel (im2col)
        "w_hwio": w_fold,                                     # reference
        "bias": bias,
        "ksize": ksize,
    }


def init_inception_a(key, input_channels):
    keys = jax.random.split(key, 7)
    return {
        "s1": make_conv_bn_params(keys[0], input_channels, 64, 1),
        "s2": make_conv_bn_params(keys[1], 64, 96, 3),
        "s3": make_conv_bn_params(keys[2], 96, 96, 3),
        "t1": make_conv_bn_params(keys[3], input_channels, 64, 1),
        "t2": make_conv_bn_params(keys[4], 64, 96, 3),
        "b1x1": make_conv_bn_params(keys[5], input_channels, 96, 1),
        "pool1x1": make_conv_bn_params(keys[6], input_channels, 96, 1),
    }


# ---------------------------------------------------------------------------
# Pure-JAX reference (same bf16 matmul inputs / f32 accumulation)
# ---------------------------------------------------------------------------
def _ref_conv_bn_relu(x, p):
    pad = (p["ksize"] - 1) // 2
    y = jax.lax.conv_general_dilated(
        x.astype(jnp.bfloat16), p["w_hwio"], (1, 1),
        [(pad, pad), (pad, pad)],
        dimension_numbers=("NHWC", "HWIO", "NHWC"),
        preferred_element_type=jnp.float32)
    return jnp.maximum(y + p["bias"].reshape(1, 1, 1, -1), 0.0)


def _ref_forward(x_nchw, params):
    x = jnp.transpose(x_nchw, (0, 2, 3, 1)).astype(jnp.float32)
    b1 = _ref_conv_bn_relu(x, params["s1"])
    b1 = _ref_conv_bn_relu(b1, params["s2"])
    b1 = _ref_conv_bn_relu(b1, params["s3"])
    b2 = _ref_conv_bn_relu(x, params["t1"])
    b2 = _ref_conv_bn_relu(b2, params["t2"])
    b3 = _ref_conv_bn_relu(x, params["b1x1"])
    s = jax.lax.reduce_window(x, 0.0, jax.lax.add, (1, 3, 3, 1), (1, 1, 1, 1),
                              padding=((0, 0), (1, 1), (1, 1), (0, 0)))
    b4 = _ref_conv_bn_relu(s * (1.0 / 9.0), params["pool1x1"])
    out = jnp.concatenate([b1, b2, b3, b4], axis=-1)
    return jnp.transpose(out, (0, 3, 1, 2))


# ---------------------------------------------------------------------------
if __name__ == "__main__":
    # Small shapes: batch=2, input_channels=32, spatial 16x16 (module fixes the
    # branch widths at 64/96 -> 384 output channels).
    N, Cin, H, W = 2, 32, 16, 16

    key = jax.random.PRNGKey(0)
    kx, kp = jax.random.split(key)
    x = jax.random.normal(kx, (N, Cin, H, W), jnp.float32)   # NCHW like PyTorch
    params = init_inception_a(kp, Cin)

    out = jax.block_until_ready(inception_a_forward(x, params))
    assert out.shape == (N, 4 * 96, H, W), out.shape

    ref = jax.block_until_ready(_ref_forward(x, params))
    max_err = float(jnp.max(jnp.abs(out - ref)))
    assert jnp.allclose(out, ref, atol=1e-2, rtol=1e-2), max_err

    print("KERNEL_OK")
</pallas_src>

<mosaic_0001>
module attributes {stable_mosaic.version = 11 : i64} {
  func.func @_inception_a_kernel(%arg0: i32, %arg1: memref<1x16x16x32xf32, #tpu.memory_space<vmem>>, %arg2: memref<32x224xbf16, #tpu.memory_space<vmem>>, %arg3: memref<1x224xf32, #tpu.memory_space<vmem>>, %arg4: memref<576x96xbf16, #tpu.memory_space<vmem>>, %arg5: memref<1x96xf32, #tpu.memory_space<vmem>>, %arg6: memref<864x96xbf16, #tpu.memory_space<vmem>>, %arg7: memref<1x96xf32, #tpu.memory_space<vmem>>, %arg8: memref<576x96xbf16, #tpu.memory_space<vmem>>, %arg9: memref<1x96xf32, #tpu.memory_space<vmem>>, %arg10: memref<32x96xbf16, #tpu.memory_space<vmem>>, %arg11: memref<1x96xf32, #tpu.memory_space<vmem>>, %arg12: memref<1x384x256xf32, #tpu.memory_space<vmem>>, %arg13: memref<18x18x32xf32, #tpu.memory_space<vmem>>, %arg14: memref<18x18x64xf32, #tpu.memory_space<vmem>>, %arg15: memref<18x18x96xf32, #tpu.memory_space<vmem>>) attributes {dimension_semantics = [#tpu.dimension_semantics<parallel>], iteration_bounds = array<i64: 2>, scalar_prefetch = 0 : i64, scratch_operands = 3 : i64, tpu.core_type = #tpu.core_type<tc>, window_params = [{transform_indices = @transform_0, window_bounds = array<i64: 1, 16, 16, 32>}, {pipeline_mode = #tpu.pipeline_mode<synchronous>, transform_indices = @transform_1, window_bounds = array<i64: 32, 224>}, {pipeline_mode = #tpu.pipeline_mode<synchronous>, transform_indices = @transform_2, window_bounds = array<i64: 1, 224>}, {pipeline_mode = #tpu.pipeline_mode<synchronous>, transform_indices = @transform_3, window_bounds = array<i64: 576, 96>}, {pipeline_mode = #tpu.pipeline_mode<synchronous>, transform_indices = @transform_4, window_bounds = array<i64: 1, 96>}, {pipeline_mode = #tpu.pipeline_mode<synchronous>, transform_indices = @transform_5, window_bounds = array<i64: 864, 96>}, {pipeline_mode = #tpu.pipeline_mode<synchronous>, transform_indices = @transform_6, window_bounds = array<i64: 1, 96>}, {pipeline_mode = #tpu.pipeline_mode<synchronous>, transform_indices = @transform_7, window_bounds = array<i64: 576, 96>}, {pipeline_mode = #tpu.pipeline_mode<synchronous>, transform_indices = @transform_8, window_bounds = array<i64: 1, 96>}, {pipeline_mode = #tpu.pipeline_mode<synchronous>, transform_indices = @transform_9, window_bounds = array<i64: 32, 96>}, {pipeline_mode = #tpu.pipeline_mode<synchronous>, transform_indices = @transform_10, window_bounds = array<i64: 1, 96>}, {transform_indices = @transform_11, window_bounds = array<i64: 1, 384, 256>}]} {
    %cst = arith.constant 0.000000e+00 : f32
    %0 = vector.broadcast %cst : f32 to vector<18x18x32xf32>
    %c0 = arith.constant 0 : index
    %c0_0 = arith.constant 0 : index
    %c0_1 = arith.constant 0 : index
    %1 = vector.load %arg13[%c0, %c0_0, %c0_1] : memref<18x18x32xf32, #tpu.memory_space<vmem>>, vector<18x18x32xf32>
    tpu.vector_store %arg13[%c0, %c0_0, %c0_1], %0 {strides = array<i32>} : memref<18x18x32xf32, #tpu.memory_space<vmem>>, vector<18x18x32xf32>,
    %cst_2 = arith.constant 0.000000e+00 : f32
    %2 = vector.broadcast %cst_2 : f32 to vector<18x18x64xf32>
    %c0_3 = arith.constant 0 : index
    %c0_4 = arith.constant 0 : index
    %c0_5 = arith.constant 0 : index
    %3 = vector.load %arg14[%c0_3, %c0_4, %c0_5] : memref<18x18x64xf32, #tpu.memory_space<vmem>>, vector<18x18x64xf32>
    tpu.vector_store %arg14[%c0_3, %c0_4, %c0_5], %2 {strides = array<i32>} : memref<18x18x64xf32, #tpu.memory_space<vmem>>, vector<18x18x64xf32>,
    %cst_6 = arith.constant 0.000000e+00 : f32
    %4 = vector.broadcast %cst_6 : f32 to vector<18x18x96xf32>
    %c0_7 = arith.constant 0 : index
    %c0_8 = arith.constant 0 : index
    %c0_9 = arith.constant 0 : index
    %5 = vector.load %arg15[%c0_7, %c0_8, %c0_9] : memref<18x18x96xf32, #tpu.memory_space<vmem>>, vector<18x18x96xf32>
    tpu.vector_store %arg15[%c0_7, %c0_8, %c0_9], %4 {strides = array<i32>} : memref<18x18x96xf32, #tpu.memory_space<vmem>>, vector<18x18x96xf32>,
    %c0_10 = arith.constant 0 : index
    %c0_11 = arith.constant 0 : index
    %c0_12 = arith.constant 0 : index
    %c0_13 = arith.constant 0 : index
    %6 = vector.load %arg1[%c0_10, %c0_11, %c0_12, %c0_13] : memref<1x16x16x32xf32, #tpu.memory_space<vmem>>, vector<1x16x16x32xf32>
    %7 = vector.shape_cast %6 : vector<1x16x16x32xf32> to vector<16x16x32xf32>
    %8 = vector.shape_cast %7 : vector<16x16x32xf32> to vector<256x32xf32>
    %9 = arith.truncf %8 : vector<256x32xf32> to vector<256x32xbf16>
    %c0_14 = arith.constant 0 : index
    %c0_15 = arith.constant 0 : index
    %10 = vector.load %arg2[%c0_14, %c0_15] : memref<32x224xbf16, #tpu.memory_space<vmem>>, vector<32x224xbf16>
    %cst_16 = arith.constant dense<0.000000e+00> : vector<256x224xf32>
    %11 = tpu.matmul %9, %10, %cst_16 {dimension_numbers = #tpu.dot_dimension_numbers<[1], [0], [0], [1], [0, 0, 1, 1], [], []>} : vector<256x32xbf16>, vector<32x224xbf16>, vector<256x224xf32> -> vector<256x224xf32>
    %c0_17 = arith.constant 0 : index
    %c0_18 = arith.constant 0 : index
    %12 = vector.load %arg3[%c0_17, %c0_18] : memref<1x224xf32, #tpu.memory_space<vmem>>, vector<1x224xf32>
    %13 = vector.broadcast %12 : vector<1x224xf32> to vector<256x224xf32>
    %14 = arith.addf %11, %13 : vector<256x224xf32>
    %cst_19 = arith.constant 0.000000e+00 : f32
    %15 = vector.broadcast %cst_19 : f32 to vector<256x224xf32>
    %16 = arith.maximumf %14, %15 : vector<256x224xf32>
    %17 = vector.extract_strided_slice %16 {offsets = [0, 0], sizes = [256, 64], strides = [1, 1]} : vector<256x224xf32> to vector<256x64xf32>
    %18 = vector.extract_strided_slice %16 {offsets = [0, 64], sizes = [256, 64], strides = [1, 1]} : vector<256x224xf32> to vector<256x64xf32>
    %19 = vector.extract_strided_slice %16 {offsets = [0, 128], sizes = [256, 96], strides = [1, 1]} : vector<256x224xf32> to vector<256x96xf32>
    %20 = vector.shape_cast %17 : vector<256x64xf32> to vector<16x16x64xf32>
    %c1 = arith.constant 1 : index
    %c1_20 = arith.constant 1 : index
    %c0_21 = arith.constant 0 : index
    %21 = vector.load %arg14[%c1, %c1_20, %c0_21] : memref<18x18x64xf32, #tpu.memory_space<vmem>>, vector<16x16x64xf32>
    tpu.vector_store %arg14[%c1, %c1_20, %c0_21], %20 {strides = array<i32>} : memref<18x18x64xf32, #tpu.memory_space<vmem>>, vector<16x16x64xf32>,
    %c0_22 = arith.constant 0 : index
    %c0_23 = arith.constant 0 : index
    %c0_24 = arith.constant 0 : index
    %22 = vector.load %arg14[%c0_22, %c0_23, %c0_24] : memref<18x18x64xf32, #tpu.memory_space<vmem>>, vector<16x16x64xf32>
    %23 = vector.shape_cast %22 : vector<16x16x64xf32> to vector<256x64xf32>
    %24 = arith.truncf %23 : vector<256x64xf32> to vector<256x64xbf16>
    %c0_25 = arith.constant 0 : index
    %c1_26 = arith.constant 1 : index
    %c0_27 = arith.constant 0 : index
    %25 = vector.load %arg14[%c0_25, %c1_26, %c0_27] : memref<18x18x64xf32, #tpu.memory_space<vmem>>, vector<16x16x64xf32>
    %26 = vector.shape_cast %25 : vector<16x16x64xf32> to vector<256x64xf32>
    %27 = arith.truncf %26 : vector<256x64xf32> to vector<256x64xbf16>
    %c0_28 = arith.constant 0 : index
    %c2 = arith.constant 2 : index
    %c0_29 = arith.constant 0 : index
    %28 = vector.load %arg14[%c0_28, %c2, %c0_29] : memref<18x18x64xf32, #tpu.memory_space<vmem>>, vector<16x16x64xf32>
    %29 = vector.shape_cast %28 : vector<16x16x64xf32> to vector<256x64xf32>
    %30 = arith.truncf %29 : vector<256x64xf32> to vector<256x64xbf16>
    %c1_30 = arith.constant 1 : index
    %c0_31 = arith.constant 0 : index
    %c0_32 = arith.constant 0 : index
    %31 = vector.load %arg14[%c1_30, %c0_31, %c0_32] : memref<18x18x64xf32, #tpu.memory_space<vmem>>, vector<16x16x64xf32>
    %32 = vector.shape_cast %31 : vector<16x16x64xf32> to vector<256x64xf32>
    %33 = arith.truncf %32 : vector<256x64xf32> to vector<256x64xbf16>
    %c1_33 = arith.constant 1 : index
    %c1_34 = arith.constant 1 : index
    %c0_35 = arith.constant 0 : index
    %34 = vector.load %arg14[%c1_33, %c1_34, %c0_35] : memref<18x18x64xf32, #tpu.memory_space<vmem>>, vector<16x16x64xf32>
    %35 = vector.shape_cast %34 : vector<16x16x64xf32> to vector<256x64xf32>
    %36 = arith.truncf %35 : vector<256x64xf32> to vector<256x64xbf16>
    %c1_36 = arith.constant 1 : index
    %c2_37 = arith.constant 2 : index
    %c0_38 = arith.constant 0 : index
    %37 = vector.load %arg14[%c1_36, %c2_37, %c0_38] : memref<18x18x64xf32, #tpu.memory_space<vmem>>, vector<16x16x64xf32>
    %38 = vector.shape_cast %37 : vector<16x16x64xf32> to vector<256x64xf32>
    %39 = arith.truncf %38 : vector<256x64xf32> to vector<256x64xbf16>
    %c2_39 = arith.constant 2 : index
    %c0_40 = arith.constant 0 : index
    %c0_41 = arith.constant 0 : index
    %40 = vector.load %arg14[%c2_39, %c0_40, %c0_41] : memref<18x18x64xf32, #tpu.memory_space<vmem>>, vector<16x16x64xf32>
    %41 = vector.shape_cast %40 : vector<16x16x64xf32> to vector<256x64xf32>
    %42 = arith.truncf %41 : vector<256x64xf32> to vector<256x64xbf16>
    %c2_42 = arith.constant 2 : index
    %c1_43 = arith.constant 1 : index
    %c0_44 = arith.constant 0 : index
    %43 = vector.load %arg14[%c2_42, %c1_43, %c0_44] : memref<18x18x64xf32, #tpu.memory_space<vmem>>, vector<16x16x64xf32>
    %44 = vector.shape_cast %43 : vector<16x16x64xf32> to vector<256x64xf32>
    %45 = arith.truncf %44 : vector<256x64xf32> to vector<256x64xbf16>
    %c2_45 = arith.constant 2 : index
    %c2_46 = arith.constant 2 : index
    %c0_47 = arith.constant 0 : index
    %46 = vector.load %arg14[%c2_45, %c2_46, %c0_47] : memref<18x18x64xf32, #tpu.memory_space<vmem>>, vector<16x16x64xf32>
    %47 = vector.shape_cast %46 : vector<16x16x64xf32> to vector<256x64xf32>
    %48 = arith.truncf %47 : vector<256x64xf32> to vector<256x64xbf16>
    %49 = tpu.concatenate %24, %27, %30, %33, %36, %39, %42, %45, %48 in 1 : vector<256x64xbf16>, vector<256x64xbf16>, vector<256x64xbf16>, vector<256x64xbf16>, vector<256x64xbf16>, vector<256x64xbf16>, vector<256x64xbf16>, vector<256x64xbf16>, vector<256x64xbf16> -> vector<256x576xbf16>
    %c0_48 = arith.constant 0 : index
    %c0_49 = arith.constant 0 : index
    %50 = vector.load %arg4[%c0_48, %c0_49] : memref<576x96xbf16, #tpu.memory_space<vmem>>, vector<576x96xbf16>
    %cst_50 = arith.constant dense<0.000000e+00> : vector<256x96xf32>
    %51 = tpu.matmul %49, %50, %cst_50 {dimension_numbers = #tpu.dot_dimension_numbers<[1], [0], [0], [1], [0, 0, 1, 1], [], []>} : vector<256x576xbf16>, vector<576x96xbf16>, vector<256x96xf32> -> vector<256x96xf32>
    %c0_51 = arith.constant 0 : index
    %c0_52 = arith.constant 0 : index
    %52 = vector.load %arg5[%c0_51, %c0_52] : memref<1x96xf32, #tpu.memory_space<vmem>>, vector<1x96xf32>
    %53 = vector.broadcast %52 : vector<1x96xf32> to vector<256x96xf32>
    %54 = arith.addf %51, %53 : vector<256x96xf32>
    %cst_53 = arith.constant 0.000000e+00 : f32
    %55 = vector.broadcast %cst_53 : f32 to vector<256x96xf32>
    %56 = arith.maximumf %54, %55 : vector<256x96xf32>
    %57 = vector.shape_cast %56 : vector<256x96xf32> to vector<16x16x96xf32>
    %c1_54 = arith.constant 1 : index
    %c1_55 = arith.constant 1 : index
    %c0_56 = arith.constant 0 : index
    %58 = vector.load %arg15[%c1_54, %c1_55, %c0_56] : memref<18x18x96xf32, #tpu.memory_space<vmem>>, vector<16x16x96xf32>
    tpu.vector_store %arg15[%c1_54, %c1_55, %c0_56], %57 {strides = array<i32>} : memref<18x18x96xf32, #tpu.memory_space<vmem>>, vector<16x16x96xf32>,
    %c0_57 = arith.constant 0 : index
    %c0_58 = arith.constant 0 : index
    %c0_59 = arith.constant 0 : index
    %59 = vector.load %arg15[%c0_57, %c0_58, %c0_59] : memref<18x18x96xf32, #tpu.memory_space<vmem>>, vector<16x16x96xf32>
    %60 = vector.shape_cast %59 : vector<16x16x96xf32> to vector<256x96xf32>
    %61 = arith.truncf %60 : vector<256x96xf32> to vector<256x96xbf16>
    %c0_60 = arith.constant 0 : index
    %c1_61 = arith.constant 1 : index
    %c0_62 = arith.constant 0 : index
    %62 = vector.load %arg15[%c0_60, %c1_61, %c0_62] : memref<18x18x96xf32, #tpu.memory_space<vmem>>, vector<16x16x96xf32>
    %63 = vector.shape_cast %62 : vector<16x16x96xf32> to vector<256x96xf32>
    %64 = arith.truncf %63 : vector<256x96xf32> to vector<256x96xbf16>
    %c0_63 = arith.constant 0 : index
    %c2_64 = arith.constant 2 : index
    %c0_65 = arith.constant 0 : index
    %65 = vector.load %arg15[%c0_63, %c2_64, %c0_65] : memref<18x18x96xf32, #tpu.memory_space<vmem>>, vector<16x16x96xf32>
    %66 = vector.shape_cast %65 : vector<16x16x96xf32> to vector<256x96xf32>
    %67 = arith.truncf %66 : vector<256x96xf32> to vector<256x96xbf16>
    %c1_66 = arith.constant 1 : index
    %c0_67 = arith.constant 0 : index
    %c0_68 = arith.constant 0 : index
    %68 = vector.load %arg15[%c1_66, %c0_67, %c0_68] : memref<18x18x96xf32, #tpu.memory_space<vmem>>, vector<16x16x96xf32>
    %69 = vector.shape_cast %68 : vector<16x16x96xf32> to vector<256x96xf32>
    %70 = arith.truncf %69 : vector<256x96xf32> to vector<256x96xbf16>
    %c1_69 = arith.constant 1 : index
    %c1_70 = arith.constant 1 : index
    %c0_71 = arith.constant 0 : index
    %71 = vector.load %arg15[%c1_69, %c1_70, %c0_71] : memref<18x18x96xf32, #tpu.memory_space<vmem>>, vector<16x16x96xf32>
    %72 = vector.shape_cast %71 : vector<16x16x96xf32> to vector<256x96xf32>
    %73 = arith.truncf %72 : vector<256x96xf32> to vector<256x96xbf16>
    %c1_72 = arith.constant 1 : index
    %c2_73 = arith.constant 2 : index
    %c0_74 = arith.constant 0 : index
    %74 = vector.load %arg15[%c1_72, %c2_73, %c0_74] : memref<18x18x96xf32, #tpu.memory_space<vmem>>, vector<16x16x96xf32>
    %75 = vector.shape_cast %74 : vector<16x16x96xf32> to vector<256x96xf32>
    %76 = arith.truncf %75 : vector<256x96xf32> to vector<256x96xbf16>
    %c2_75 = arith.constant 2 : index
    %c0_76 = arith.constant 0 : index
    %c0_77 = arith.constant 0 : index
    %77 = vector.load %arg15[%c2_75, %c0_76, %c0_77] : memref<18x18x96xf32, #tpu.memory_space<vmem>>, vector<16x16x96xf32>
    %78 = vector.shape_cast %77 : vector<16x16x96xf32> to vector<256x96xf32>
    %79 = arith.truncf %78 : vector<256x96xf32> to vector<256x96xbf16>
    %c2_78 = arith.constant 2 : index
    %c1_79 = arith.constant 1 : index
    %c0_80 = arith.constant 0 : index
    %80 = vector.load %arg15[%c2_78, %c1_79, %c0_80] : memref<18x18x96xf32, #tpu.memory_space<vmem>>, vector<16x16x96xf32>
    %81 = vector.shape_cast %80 : vector<16x16x96xf32> to vector<256x96xf32>
    %82 = arith.truncf %81 : vector<256x96xf32> to vector<256x96xbf16>
    %c2_81 = arith.constant 2 : index
    %c2_82 = arith.constant 2 : index
    %c0_83 = arith.constant 0 : index
    %83 = vector.load %arg15[%c2_81, %c2_82, %c0_83] : memref<18x18x96xf32, #tpu.memory_space<vmem>>, vector<16x16x96xf32>
    %84 = vector.shape_cast %83 : vector<16x16x96xf32> to vector<256x96xf32>
    %85 = arith.truncf %84 : vector<256x96xf32> to vector<256x96xbf16>
    %86 = tpu.concatenate %61, %64, %67, %70, %73, %76, %79, %82, %85 in 1 : vector<256x96xbf16>, vector<256x96xbf16>, vector<256x96xbf16>, vector<256x96xbf16>, vector<256x96xbf16>, vector<256x96xbf16>, vector<256x96xbf16>, vector<256x96xbf16>, vector<256x96xbf16> -> vector<256x864xbf16>
    %c0_84 = arith.constant 0 : index
    %c0_85 = arith.constant 0 : index
    %87 = vector.load %arg6[%c0_84, %c0_85] : memref<864x96xbf16, #tpu.memory_space<vmem>>, vector<864x96xbf16>
    %cst_86 = arith.constant dense<0.000000e+00> : vector<256x96xf32>
    %88 = tpu.matmul %86, %87, %cst_86 {dimension_numbers = #tpu.dot_dimension_numbers<[1], [0], [0], [1], [0, 0, 1, 1], [], []>} : vector<256x864xbf16>, vector<864x96xbf16>, vector<256x96xf32> -> vector<256x96xf32>
    %c0_87 = arith.constant 0 : index
    %c0_88 = arith.constant 0 : index
    %89 = vector.load %arg7[%c0_87, %c0_88] : memref<1x96xf32, #tpu.memory_space<vmem>>, vector<1x96xf32>
    %90 = vector.broadcast %89 : vector<1x96xf32> to vector<256x96xf32>
    %91 = arith.addf %88, %90 : vector<256x96xf32>
    %cst_89 = arith.constant 0.000000e+00 : f32
    %92 = vector.broadcast %cst_89 : f32 to vector<256x96xf32>
    %93 = arith.maximumf %91, %92 : vector<256x96xf32>
    %94 = vector.shape_cast %18 : vector<256x64xf32> to vector<16x16x64xf32>
    %c1_90 = arith.constant 1 : index
    %c1_91 = arith.constant 1 : index
    %c0_92 = arith.constant 0 : index
    %95 = vector.load %arg14[%c1_90, %c1_91, %c0_92] : memref<18x18x64xf32, #tpu.memory_space<vmem>>, vector<16x16x64xf32>
    tpu.vector_store %arg14[%c1_90, %c1_91, %c0_92], %94 {strides = array<i32>} : memref<18x18x64xf32, #tpu.memory_space<vmem>>, vector<16x16x64xf32>,
    %c0_93 = arith.constant 0 : index
    %c0_94 = arith.constant 0 : index
    %c0_95 = arith.constant 0 : index
    %96 = vector.load %arg14[%c0_93, %c0_94, %c0_95] : memref<18x18x64xf32, #tpu.memory_space<vmem>>, vector<16x16x64xf32>
    %97 = vector.shape_cast %96 : vector<16x16x64xf32> to vector<256x64xf32>
    %98 = arith.truncf %97 : vector<256x64xf32> to vector<256x64xbf16>
    %c0_96 = arith.constant 0 : index
    %c1_97 = arith.constant 1 : index
    %c0_98 = arith.constant 0 : index
    %99 = vector.load %arg14[%c0_96, %c1_97, %c0_98] : memref<18x18x64xf32, #tpu.memory_space<vmem>>, vector<16x16x64xf32>
    %100 = vector.shape_cast %99 : vector<16x16x64xf32> to vector<256x64xf32>
    %101 = arith.truncf %100 : vector<256x64xf32> to vector<256x64xbf16>
    %c0_99 = arith.constant 0 : index
    %c2_100 = arith.constant 2 : index
    %c0_101 = arith.constant 0 : index
    %102 = vector.load %arg14[%c0_99, %c2_100, %c0_101] : memref<18x18x64xf32, #tpu.memory_space<vmem>>, vector<16x16x64xf32>
    %103 = vector.shape_cast %102 : vector<16x16x64xf32> to vector<256x64xf32>
    %104 = arith.truncf %103 : vector<256x64xf32> to vector<256x64xbf16>
    %c1_102 = arith.constant 1 : index
    %c0_103 = arith.constant 0 : index
    %c0_104 = arith.constant 0 : index
    %105 = vector.load %arg14[%c1_102, %c0_103, %c0_104] : memref<18x18x64xf32, #tpu.memory_space<vmem>>, vector<16x16x64xf32>
    %106 = vector.shape_cast %105 : vector<16x16x64xf32> to vector<256x64xf32>
    %107 = arith.truncf %106 : vector<256x64xf32> to vector<256x64xbf16>
    %c1_105 = arith.constant 1 : index
    %c1_106 = arith.constant 1 : index
    %c0_107 = arith.constant 0 : index
    %108 = vector.load %arg14[%c1_105, %c1_106, %c0_107] : memref<18x18x64xf32, #tpu.memory_space<vmem>>, vector<16x16x64xf32>
    %109 = vector.shape_cast %108 : vector<16x16x64xf32> to vector<256x64xf32>
    %110 = arith.truncf %109 : vector<256x64xf32> to vector<256x64xbf16>
    %c1_108 = arith.constant 1 : index
    %c2_109 = arith.constant 2 : index
    %c0_110 = arith.constant 0 : index
    %111 = vector.load %arg14[%c1_108, %c2_109, %c0_110] : memref<18x18x64xf32, #tpu.memory_space<vmem>>, vector<16x16x64xf32>
    %112 = vector.shape_cast %111 : vector<16x16x64xf32> to vector<256x64xf32>
    %113 = arith.truncf %112 : vector<256x64xf32> to vector<256x64xbf16>
    %c2_111 = arith.constant 2 : index
    %c0_112 = arith.constant 0 : index
    %c0_113 = arith.constant 0 : index
    %114 = vector.load %arg14[%c2_111, %c0_112, %c0_113] : memref<18x18x64xf32, #tpu.memory_space<vmem>>, vector<16x16x64xf32>
    %115 = vector.shape_cast %114 : vector<16x16x64xf32> to vector<256x64xf32>
    %116 = arith.truncf %115 : vector<256x64xf32> to vector<256x64xbf16>
    %c2_114 = arith.constant 2 : index
    %c1_115 = arith.constant 1 : index
    %c0_116 = arith.constant 0 : index
    %117 = vector.load %arg14[%c2_114, %c1_115, %c0_116] : memref<18x18x64xf32, #tpu.memory_space<vmem>>, vector<16x16x64xf32>
    %118 = vector.shape_cast %117 : vector<16x16x64xf32> to vector<256x64xf32>
    %119 = arith.truncf %118 : vector<256x64xf32> to vector<256x64xbf16>
    %c2_117 = arith.constant 2 : index
    %c2_118 = arith.constant 2 : index
    %c0_119 = arith.constant 0 : index
    %120 = vector.load %arg14[%c2_117, %c2_118, %c0_119] : memref<18x18x64xf32, #tpu.memory_space<vmem>>, vector<16x16x64xf32>
    %121 = vector.shape_cast %120 : vector<16x16x64xf32> to vector<256x64xf32>
    %122 = arith.truncf %121 : vector<256x64xf32> to vector<256x64xbf16>
    %123 = tpu.concatenate %98, %101, %104, %107, %110, %113, %116, %119, %122 in 1 : vector<256x64xbf16>, vector<256x64xbf16>, vector<256x64xbf16>, vector<256x64xbf16>, vector<256x64xbf16>, vector<256x64xbf16>, vector<256x64xbf16>, vector<256x64xbf16>, vector<256x64xbf16> -> vector<256x576xbf16>
    %c0_120 = arith.constant 0 : index
    %c0_121 = arith.constant 0 : index
    %124 = vector.load %arg8[%c0_120, %c0_121] : memref<576x96xbf16, #tpu.memory_space<vmem>>, vector<576x96xbf16>
    %cst_122 = arith.constant dense<0.000000e+00> : vector<256x96xf32>
    %125 = tpu.matmul %123, %124, %cst_122 {dimension_numbers = #tpu.dot_dimension_numbers<[1], [0], [0], [1], [0, 0, 1, 1], [], []>} : vector<256x576xbf16>, vector<576x96xbf16>, vector<256x96xf32> -> vector<256x96xf32>
    %c0_123 = arith.constant 0 : index
    %c0_124 = arith.constant 0 : index
    %126 = vector.load %arg9[%c0_123, %c0_124] : memref<1x96xf32, #tpu.memory_space<vmem>>, vector<1x96xf32>
    %127 = vector.broadcast %126 : vector<1x96xf32> to vector<256x96xf32>
    %128 = arith.addf %125, %127 : vector<256x96xf32>
    %cst_125 = arith.constant 0.000000e+00 : f32
    %129 = vector.broadcast %cst_125 : f32 to vector<256x96xf32>
    %130 = arith.maximumf %128, %129 : vector<256x96xf32>
    %c1_126 = arith.constant 1 : index
    %c1_127 = arith.constant 1 : index
    %c0_128 = arith.constant 0 : index
    %131 = vector.load %arg13[%c1_126, %c1_127, %c0_128] : memref<18x18x32xf32, #tpu.memory_space<vmem>>, vector<16x16x32xf32>
    tpu.vector_store %arg13[%c1_126, %c1_127, %c0_128], %7 {strides = array<i32>} : memref<18x18x32xf32, #tpu.memory_space<vmem>>, vector<16x16x32xf32>,
    %c0_129 = arith.constant 0 : index
    %c0_130 = arith.constant 0 : index
    %c0_131 = arith.constant 0 : index
    %132 = vector.load %arg13[%c0_129, %c0_130, %c0_131] : memref<18x18x32xf32, #tpu.memory_space<vmem>>, vector<16x16x32xf32>
    %c0_132 = arith.constant 0 : index
    %c1_133 = arith.constant 1 : index
    %c0_134 = arith.constant 0 : index
    %133 = vector.load %arg13[%c0_132, %c1_133, %c0_134] : memref<18x18x32xf32, #tpu.memory_space<vmem>>, vector<16x16x32xf32>
    %134 = arith.addf %132, %133 : vector<16x16x32xf32>
    %c0_135 = arith.constant 0 : index
    %c2_136 = arith.constant 2 : index
    %c0_137 = arith.constant 0 : index
    %135 = vector.load %arg13[%c0_135, %c2_136, %c0_137] : memref<18x18x32xf32, #tpu.memory_space<vmem>>, vector<16x16x32xf32>
    %136 = arith.addf %134, %135 : vector<16x16x32xf32>
    %c1_138 = arith.constant 1 : index
    %c0_139 = arith.constant 0 : index
    %c0_140 = arith.constant 0 : index
    %137 = vector.load %arg13[%c1_138, %c0_139, %c0_140] : memref<18x18x32xf32, #tpu.memory_space<vmem>>, vector<16x16x32xf32>
    %138 = arith.addf %136, %137 : vector<16x16x32xf32>
    %c1_141 = arith.constant 1 : index
    %c1_142 = arith.constant 1 : index
    %c0_143 = arith.constant 0 : index
    %139 = vector.load %arg13[%c1_141, %c1_142, %c0_143] : memref<18x18x32xf32, #tpu.memory_space<vmem>>, vector<16x16x32xf32>
    %140 = arith.addf %138, %139 : vector<16x16x32xf32>
    %c1_144 = arith.constant 1 : index
    %c2_145 = arith.constant 2 : index
    %c0_146 = arith.constant 0 : index
    %141 = vector.load %arg13[%c1_144, %c2_145, %c0_146] : memref<18x18x32xf32, #tpu.memory_space<vmem>>, vector<16x16x32xf32>
    %142 = arith.addf %140, %141 : vector<16x16x32xf32>
    %c2_147 = arith.constant 2 : index
    %c0_148 = arith.constant 0 : index
    %c0_149 = arith.constant 0 : index
    %143 = vector.load %arg13[%c2_147, %c0_148, %c0_149] : memref<18x18x32xf32, #tpu.memory_space<vmem>>, vector<16x16x32xf32>
    %144 = arith.addf %142, %143 : vector<16x16x32xf32>
    %c2_150 = arith.constant 2 : index
    %c1_151 = arith.constant 1 : index
    %c0_152 = arith.constant 0 : index
    %145 = vector.load %arg13[%c2_150, %c1_151, %c0_152] : memref<18x18x32xf32, #tpu.memory_space<vmem>>, vector<16x16x32xf32>
    %146 = arith.addf %144, %145 : vector<16x16x32xf32>
    %c2_153 = arith.constant 2 : index
    %c2_154 = arith.constant 2 : index
    %c0_155 = arith.constant 0 : index
    %147 = vector.load %arg13[%c2_153, %c2_154, %c0_155] : memref<18x18x32xf32, #tpu.memory_space<vmem>>, vector<16x16x32xf32>
    %148 = arith.addf %146, %147 : vector<16x16x32xf32>
    %cst_156 = arith.constant 0.111111112 : f32
    %149 = vector.broadcast %cst_156 : f32 to vector<16x16x32xf32>
    %150 = arith.mulf %148, %149 : vector<16x16x32xf32>
    %151 = vector.shape_cast %150 : vector<16x16x32xf32> to vector<256x32xf32>
    %152 = arith.truncf %151 : vector<256x32xf32> to vector<256x32xbf16>
    %c0_157 = arith.constant 0 : index
    %c0_158 = arith.constant 0 : index
    %153 = vector.load %arg10[%c0_157, %c0_158] : memref<32x96xbf16, #tpu.memory_space<vmem>>, vector<32x96xbf16>
    %cst_159 = arith.constant dense<0.000000e+00> : vector<256x96xf32>
    %154 = tpu.matmul %152, %153, %cst_159 {dimension_numbers = #tpu.dot_dimension_numbers<[1], [0], [0], [1], [0, 0, 1, 1], [], []>} : vector<256x32xbf16>, vector<32x96xbf16>, vector<256x96xf32> -> vector<256x96xf32>
    %c0_160 = arith.constant 0 : index
    %c0_161 = arith.constant 0 : index
    %155 = vector.load %arg11[%c0_160, %c0_161] : memref<1x96xf32, #tpu.memory_space<vmem>>, vector<1x96xf32>
    %156 = vector.broadcast %155 : vector<1x96xf32> to vector<256x96xf32>
    %157 = arith.addf %154, %156 : vector<256x96xf32>
    %cst_162 = arith.constant 0.000000e+00 : f32
    %158 = vector.broadcast %cst_162 : f32 to vector<256x96xf32>
    %159 = arith.maximumf %157, %158 : vector<256x96xf32>
    %160 = tpu.concatenate %93, %130, %19, %159 in 1 : vector<256x96xf32>, vector<256x96xf32>, vector<256x96xf32>, vector<256x96xf32> -> vector<256x384xf32>
    %161 = tpu.transpose %160, [1, 0] : vector<256x384xf32> -> vector<384x256xf32>
    %c0_163 = arith.constant 0 : index
    %c0_164 = arith.constant 0 : index
    %c0_165 = arith.constant 0 : index
    %162 = vector.load %arg12[%c0_163, %c0_164, %c0_165] : memref<1x384x256xf32, #tpu.memory_space<vmem>>, vector<1x384x256xf32>
    %163 = vector.shape_cast %162 : vector<1x384x256xf32> to vector<384x256xf32>
    %164 = vector.shape_cast %161 : vector<384x256xf32> to vector<1x384x256xf32>
    tpu.vector_store %arg12[%c0_163, %c0_164, %c0_165], %164 {strides = array<i32>} : memref<1x384x256xf32, #tpu.memory_space<vmem>>, vector<1x384x256xf32>,
    return
  }
  func.func @transform_0(%arg0: i32) -> (i32, i32, i32, i32) {
    %c0_i32 = arith.constant 0 : i32
    %c0_i32_0 = arith.constant 0 : i32
    %c0_i32_1 = arith.constant 0 : i32
    %c0_i32_2 = arith.constant 0 : i32
    return %arg0, %c0_i32, %c0_i32_0, %c0_i32_1 : i32, i32, i32, i32
  }
  func.func @transform_1(%arg0: i32) -> (i32, i32) {
    %c0_i32 = arith.constant 0 : i32
    %c0_i32_0 = arith.constant 0 : i32
    %c0_i32_1 = arith.constant 0 : i32
    return %c0_i32, %c0_i32_0 : i32, i32
  }
  func.func @transform_2(%arg0: i32) -> (i32, i32) {
    %c0_i32 = arith.constant 0 : i32
    %c0_i32_0 = arith.constant 0 : i32
    %c0_i32_1 = arith.constant 0 : i32
    return %c0_i32, %c0_i32_0 : i32, i32
  }
  func.func @transform_3(%arg0: i32) -> (i32, i32) {
    %c0_i32 = arith.constant 0 : i32
    %c0_i32_0 = arith.constant 0 : i32
    %c0_i32_1 = arith.constant 0 : i32
    return %c0_i32, %c0_i32_0 : i32, i32
  }
  func.func @transform_4(%arg0: i32) -> (i32, i32) {
    %c0_i32 = arith.constant 0 : i32
    %c0_i32_0 = arith.constant 0 : i32
    %c0_i32_1 = arith.constant 0 : i32
    return %c0_i32, %c0_i32_0 : i32, i32
  }
  func.func @transform_5(%arg0: i32) -> (i32, i32) {
    %c0_i32 = arith.constant 0 : i32
    %c0_i32_0 = arith.constant 0 : i32
    %c0_i32_1 = arith.constant 0 : i32
    return %c0_i32, %c0_i32_0 : i32, i32
  }
  func.func @transform_6(%arg0: i32) -> (i32, i32) {
    %c0_i32 = arith.constant 0 : i32
    %c0_i32_0 = arith.constant 0 : i32
    %c0_i32_1 = arith.constant 0 : i32
    return %c0_i32, %c0_i32_0 : i32, i32
  }
  func.func @transform_7(%arg0: i32) -> (i32, i32) {
    %c0_i32 = arith.constant 0 : i32
    %c0_i32_0 = arith.constant 0 : i32
    %c0_i32_1 = arith.constant 0 : i32
    return %c0_i32, %c0_i32_0 : i32, i32
  }
  func.func @transform_8(%arg0: i32) -> (i32, i32) {
    %c0_i32 = arith.constant 0 : i32
    %c0_i32_0 = arith.constant 0 : i32
    %c0_i32_1 = arith.constant 0 : i32
    return %c0_i32, %c0_i32_0 : i32, i32
  }
  func.func @transform_9(%arg0: i32) -> (i32, i32) {
    %c0_i32 = arith.constant 0 : i32
    %c0_i32_0 = arith.constant 0 : i32
    %c0_i32_1 = arith.constant 0 : i32
    return %c0_i32, %c0_i32_0 : i32, i32
  }
  func.func @transform_10(%arg0: i32) -> (i32, i32) {
    %c0_i32 = arith.constant 0 : i32
    %c0_i32_0 = arith.constant 0 : i32
    %c0_i32_1 = arith.constant 0 : i32
    return %c0_i32, %c0_i32_0 : i32, i32
  }
  func.func @transform_11(%arg0: i32) -> (i32, i32, i32) {
    %c0_i32 = arith.constant 0 : i32
    %c0_i32_0 = arith.constant 0 : i32
    %c0_i32_1 = arith.constant 0 : i32
    return %arg0, %c0_i32, %c0_i32_0 : i32, i32, i32
  }
}

</mosaic_0001>

<bundles_post_ra>
// kernel: tpu_custom_call.1
= control target key start
LH: loop header
LB: loop body
LE: loop exit
PB: predicated region body
PF: predicated region fallthrough
CT: control target
= control target key end

     0   :  { %16 = vsyncpa [#allocation6], 0  ;;  %s14895_s0 = inlined_call_operand.vmem [shape: f32[2,16,16,32], index: 0, kind: input, shape index: {}]   ;;  %s14896_s1 = inlined_call_operand.vmem [shape: bf16[32,224], index: 1, kind: input, shape index: {}]   ;;  %s14897_s2 = inlined_call_operand.vmem [shape: f32[1,224], index: 2, kind: input, shape index: {}]   ;;  %s14898_s3 = inlined_call_operand.vmem [shape: bf16[576,96], index: 3, kind: input, shape index: {}]   ;;  %s14899_s4 = inlined_call_operand.vmem [shape: f32[1,96], index: 4, kind: input, shape index: {}]   ;;  %s14900_s5 = inlined_call_operand.vmem [shape: bf16[864,96], index: 5, kind: input, shape index: {}]   ;;  %s14901_s6 = inlined_call_operand.vmem [shape: f32[1,96], index: 6, kind: input, shape index: {}]   ;;  %s14902_s7 = inlined_call_operand.vmem [shape: bf16[576,96], index: 7, kind: input, shape index: {}]   ;;  %s14903_s8 = inlined_call_operand.vmem [shape: f32[1,96], index: 8, kind: input, shape index: {}]   ;;  %s14904_s9 = inlined_call_operand.vmem [shape: bf16[32,96], index: 9, kind: input, shape index: {}]   ;;  %s14905_s10 = inlined_call_operand.vmem [shape: f32[1,96], index: 10, kind: input, shape index: {}]   ;;  %s14906_s11 = inlined_call_operand.hbm [shape: f32[2,384,256], index: 11, kind: output, shape index: {}]  }
   0x1   :  { %18 = vsyncpa [#allocation6 + $0x1], 0  ;;  %s10156_s17 = smov 0   ;;  %s10158_s18 = smov 0  }
   0x2   :  { %s10160_s19 = smov 0   ;;  %s10162_s20 = smov 0  }
   0x3 LB: > { %s10177_s21 = sadd.s32 4294967295, %s10086_s20   ;;  %s8584_s22 = sadd.s32 4294967294, %s10086_s20   ;;  %s10086_s20 = sphi %s10162_s20, %s15318_s20   ;;  %s10082_s19 = sphi %s10160_s19, %s15317_s19   ;;  %s10078_s18 = sphi %s10158_s18, %s15316_s18   ;;  %s10074_s17 = sphi %s10156_s17, %s15315_s17  }
   0x4   : > { %s10181_s23 = sadd.s32 1, %s10086_s20   ;;  %s267_s24 = sadd.s32 1, %s10082_s19 }
   0x5   : > { %s264_s25 = ssub.s32 %s10086_s20, %s10181_s23  ;;  %p277_p0 = scmp.ne.s32.totalorder %s10082_s19, %s10078_s18 }
   0x6   : > { %p265_p1 = scmp.eq.s32.totalorder %s264_s25, 0  ;;  %p278_p2 = scmp.eq.s32.totalorder %s10177_s21, 1 }
   0x7   : > { %p283_p3 = scmp.ne.s32.totalorder %s10078_s18, %s10074_s17  ;;  %p284_p4 = scmp.eq.s32.totalorder %s8584_s22, 1 }
   0x8   : > { %s10192_s26 = scalar_select %p265_p1, %s10082_s19, %s267_s24  }
   0x9   : > { %p10194_p5 = por %p278_p2, %p277_p0  ;;  %p10198_p6 = por %p284_p4, %p283_p3 }
   0xa   : > { %p8587_p7 = scmp.ge.s32.totalorder %s10086_s20, 1  ;;  %p340_p8 = scmp.lt.s32.totalorder %s10086_s20, 3 }
   0xc   : > { %p341_p9 = pnand %p8587_p7, %p340_p8 }
   0xe   : > { %344 = sbr.rel (%p341_p9) target bundleno = 2041 (0x7f9), region = 64 }
  0x15   : > { %v9886_v0 = vld [vmem:[%s14896_s1 + $0x4] ss:$8 sps:$4 sm:$0xff]   ;;  %p380_p10 = scmp.lt.s32.totalorder %s10177_s21, 1  ;;  %v9888_v1 = vld [vmem:[%s14896_s1] ss:$8 sps:$4 sm:$0xff]   ;;  %v10088_v2 = vmov 0   ;;  %v608_v60 = vlaneseq }
  0x16   : > { %718 = vmatprep.mubr.bf16.mxu0 %v10088_v2  ;;  %vm386_vm0 = vcmask 261120   ;;  %686 = vmatprep.subr.bf16.mxu0 %v9886_v0  ;;  %v9889_v3 = vld [vmem:[%s14896_s1 + $0x14] ss:$8 sps:$4 sm:$0xff]   ;;  %vm389_vm1 = vcmask 254976   ;;  %v10089_v4 = vmov 0.0   ;;  %vm442_vm2 = vcmask 523264  }
  0x17   : > { %s10216_s16 = scalar_select %p380_p10, %s10177_s21, 1  ;;  %391 = vst.msk [vmem:[#allocation2 + $0x18] sm:$0xff] %vm386_vm0, %v10089_v4  ;;  %392 = vst.msk [vmem:[#allocation2 + $0x20] sm:$0xff] %vm386_vm0, %v10089_v4  ;;  %687 = vmatpush1.bf16.msra.mxu0 %v9888_v1  ;;  %v9891_v5 = vld [vmem:[%s14896_s1 + $0x10] ss:$8 sps:$4 sm:$0xff]   ;;  %vm445_vm3 = vcmask 517120  }
  0x18   : > { %387 = vst.msk [vmem:[#allocation2] sm:$0xff] %vm386_vm0, %v10089_v4  ;;  %388 = vst.msk [vmem:[#allocation2 + $0x8] sm:$0xff] %vm386_vm0, %v10089_v4  ;;  %688 = vmatprep.subr.bf16.mxu0 %v9889_v3  ;;  %v9892_v54 = vld [vmem:[%s14898_s3 + $0x40] sm:$0xff]   ;;  %v9894_v56 = vld [vmem:[%s14898_s3 + $0x48] sm:$0xff]   ;;  %v10600_v63 = vshrl.u32 %v608_v60, 7  ;;  %s10090_s15 = smov 64  }
  0x19   : > { %394 = vst.msk [vmem:[#allocation2 + $0x30] sm:$0xff] %vm386_vm0, %v10089_v4  ;;  %395 = vst.msk [vmem:[#allocation2 + $0x38] sm:$0xff] %vm386_vm0, %v10089_v4  ;;  %s8809_s25 = sshll.u32 %s10216_s16, 8  ;;  %v9893_v55 = vld [vmem:[%s14898_s3] sm:$0xff]   ;;  %8810 = vmatprep.subr.bf16.mxu1 %v9892_v54  ;;  %v9895_v57 = vld [vmem:[%s14898_s3 + $0x8] sm:$0xff]   ;;  %vm498_vm4 = vcmask 785408  }
  0x1a   : > { %397 = vst.msk [vmem:[#allocation2 + $0x48] sm:$0xff] %vm386_vm0, %v10089_v4  ;;  %398 = vst.msk [vmem:[#allocation2 + $0x50] sm:$0xff] %vm386_vm0, %v10089_v4  ;;  %s10407_s12 = scalar_lea.vmem %s14895_s0, %s8809_s25  ;;  %8811 = vmatpush3.bf16.msra.mxu1 %v9893_v55  ;;  %v9896_v58 = vld [vmem:[%s14898_s3 + $0x50] sm:$0xff]   ;;  %v9898_v61 = vld [vmem:[%s14898_s3 + $0x58] sm:$0xff]   ;;  %vm501_vm5 = vcmask 779264   ;;  %s10091_s30 = smov 96  }
  0x1b   : > { %400 = vst.msk [vmem:[#allocation2 + $0x60] sm:$0xff] %vm386_vm0, %v10089_v4  ;;  %401 = vst.msk [vmem:[#allocation2 + $0x68] sm:$0xff] %vm386_vm0, %v10089_v4  ;;  %v554_v6 = vld [vmem:[%s10407_s12] sm:$0xff]  ;;  %v555_v7 = vld [vmem:[%s10407_s12 + $0x8] sm:$0xff]  ;;  %689 = vmatpush1.bf16.msra.mxu0 %v9891_v5  ;;  %8812 = vmatprep.subr.bf16.mxu1 %v9894_v56  ;;  %s10092_s14 = smov 32   ;;  %s9839_s16 = smul.u32 12288, %s10177_s21 }
  0x1c   : > { %403 = vst.msk [vmem:[#allocation2 + $0x78] sm:$0xff] %vm386_vm0, %v10089_v4  ;;  %404 = vst.msk [vmem:[#allocation2 + $0x80] sm:$0xff] %vm386_vm0, %v10089_v4  ;;  %v556_v8 = vld [vmem:[%s10407_s12 + $0x10] sm:$0xff]  ;;  %v586_v9 = vpack.c.bf16 %v555_v7, %v554_v6  ;;  %v557_v10 = vld [vmem:[%s10407_s12 + $0x18] sm:$0xff]  ;;  %s10093_s21 = smov [#allocation5]  }
  0x1d   : > { %406 = vst.msk [vmem:[#allocation2 + $0x90] sm:$0xff] %vm386_vm0, %v10089_v4  ;;  %407 = vst.msk [vmem:[#allocation2 + $0x98] sm:$0xff] %vm386_vm0, %v10089_v4  ;;  %v558_v11 = vld [vmem:[%s10407_s12 + $0x20] sm:$0xff]  ;;  %v559_v12 = vld [vmem:[%s10407_s12 + $0x28] sm:$0xff]  ;;  %v587_v32 = vpack.c.bf16 %v557_v10, %v556_v8  ;;  %s14847_s29 = scalar_lea.hbm %s14906_s11, %s9839_s16 }
  0x1e   : > { %409 = vst.msk [vmem:[#allocation2 + $0xa8] sm:$0xff] %vm386_vm0, %v10089_v4  ;;  %410 = vst.msk [vmem:[#allocation2 + $0xb0] sm:$0xff] %vm386_vm0, %v10089_v4  ;;  %v560_v13 = vld [vmem:[%s10407_s12 + $0x30] sm:$0xff]  ;;  %v561_v14 = vld [vmem:[%s10407_s12 + $0x38] sm:$0xff]  ;;  %8594 = vmatmul.mubr.msk.bf16.vlgmr.msra.gmra.mrb[0].mxu0 %vm386_vm0, %v586_v9  ;;  %v588_v35 = vpack.c.bf16 %v559_v12, %v558_v11  ;;  %8813 = vmatpush3.bf16.msra.mxu1 %v9895_v57 }
  0x1f   : > { %412 = vst.msk [vmem:[#allocation2 + $0xc0] sm:$0xff] %vm386_vm0, %v10089_v4  ;;  %413 = vst.msk [vmem:[#allocation2 + $0xc8] sm:$0xff] %vm386_vm0, %v10089_v4  ;;  %v10424_v15 = vld [vmem:[%s10407_s12 + $0x40] sm:$0xff]  ;;  %v10429_v16 = vld [vmem:[%s10407_s12 + $0x48] sm:$0xff]  ;;  %728 = vmatprep.mubr.bf16.mxu0 %v10088_v2  ;;  %v589_v36 = vpack.c.bf16 %v561_v14, %v560_v13  ;;  %8814 = vmatprep.subr.bf16.mxu1 %v9896_v58 }
  0x20   : > { %415 = vst.msk [vmem:[#allocation2 + $0xd8] sm:$0xff] %vm386_vm0, %v10089_v4  ;;  %416 = vst.msk [vmem:[#allocation2 + $0xe0] sm:$0xff] %vm386_vm0, %v10089_v4  ;;  %v10434_v17 = vld [vmem:[%s10407_s12 + $0x50] sm:$0xff]  ;;  %v10437_v18 = vld [vmem:[%s10407_s12 + $0x58] sm:$0xff]  ;;  %v590_v49 = vpack.c.bf16 %v10429_v16, %v10424_v15 }
  0x21   : > { %418 = vst.msk [vmem:[#allocation2 + $0xf0] sm:$0xff] %vm386_vm0, %v10089_v4  ;;  %419 = vst.msk [vmem:[#allocation2 + $0xf8] sm:$0xff] %vm386_vm0, %v10089_v4  ;;  %v10447_v19 = vld [vmem:[%s10407_s12 + $0x60] sm:$0xff]  ;;  %v10450_v20 = vld [vmem:[%s10407_s12 + $0x68] sm:$0xff]  ;;  %v591_v50 = vpack.c.bf16 %v10437_v18, %v10434_v17 }
  0x22   : > { %421 = vst.msk [vmem:[#allocation2 + $0x108] sm:$0xff] %vm386_vm0, %v10089_v4  ;;  %422 = vst.msk [vmem:[#allocation2 + $0x110] sm:$0xff] %vm386_vm0, %v10089_v4  ;;  %v10453_v21 = vld [vmem:[%s10407_s12 + $0x70] sm:$0xff]  ;;  %v569_v22 = vld [vmem:[%s10407_s12 + $0x78] sm:$0xff]  ;;  %v592_v51 = vpack.c.bf16 %v10450_v20, %v10447_v19 }
  0x23   : > { %424 = vst.msk [vmem:[#allocation2 + $0x120] sm:$0xff] %vm386_vm0, %v10089_v4  ;;  %425 = vst.msk [vmem:[#allocation2 + $0x128] sm:$0xff] %vm386_vm0, %v10089_v4  ;;  %v10464_v23 = vld [vmem:[%s10407_s12 + $0x80] sm:$0xff]  ;;  %v571_v24 = vld [vmem:[%s10407_s12 + $0x88] sm:$0xff]  ;;  %v593_v52 = vpack.c.bf16 %v569_v22, %v10453_v21 }
  0x24   : > { %427 = vst.msk [vmem:[#allocation2 + $0x138] sm:$0xff] %vm386_vm0, %v10089_v4  ;;  %428 = vst.msk [vmem:[#allocation2 + $0x140] sm:$0xff] %vm386_vm0, %v10089_v4  ;;  %v572_v25 = vld [vmem:[%s10407_s12 + $0x90] sm:$0xff]  ;;  %v573_v26 = vld [vmem:[%s10407_s12 + $0x98] sm:$0xff]  ;;  %v594_v53 = vpack.c.bf16 %v571_v24, %v10464_v23 }
  0x25   : > { %430 = vst.msk [vmem:[#allocation2 + $0x150] sm:$0xff] %vm386_vm0, %v10089_v4  ;;  %431 = vst.msk [vmem:[#allocation2 + $0x158] sm:$0xff] %vm386_vm0, %v10089_v4  ;;  %v574_v27 = vld [vmem:[%s10407_s12 + $0xa0] sm:$0xff]  ;;  %v595_v28 = vpack.c.bf16 %v573_v26, %v572_v25  ;;  %v575_v29 = vld [vmem:[%s10407_s12 + $0xa8] sm:$0xff] }
  0x26   : > { %433 = vst.msk [vmem:[#allocation2 + $0x168] sm:$0xff] %vm386_vm0, %v10089_v4  ;;  %434 = vst.msk [vmem:[#allocation2 + $0x170] sm:$0xff] %vm386_vm0, %v10089_v4  ;;  %v576_v30 = vld [vmem:[%s10407_s12 + $0xb0] sm:$0xff]  ;;  %v577_v31 = vld [vmem:[%s10407_s12 + $0xb8] sm:$0xff]  ;;  %v596_v33 = vpack.c.bf16 %v575_v29, %v574_v27  ;;  %8595 = vmatmul.mubr.msk.bf16.gmra.mrb[4].mxu0 %vm386_vm0, %v587_v32 }
  0x27   : > { %436 = vst.msk [vmem:[#allocation2 + $0x180] sm:$0xff] %vm386_vm0, %v10089_v4  ;;  %437 = vst.msk [vmem:[#allocation2 + $0x188] sm:$0xff] %vm386_vm0, %v10089_v4  ;;  %v597_v34 = vpack.c.bf16 %v577_v31, %v576_v30  ;;  %738 = vmatprep.mubr.bf16.mxu0 %v10088_v2  ;;  %v10488_v37 = vld [vmem:[%s10407_s12 + $0xc0] sm:$0xff]  ;;  %v579_v38 = vld [vmem:[%s10407_s12 + $0xc8] sm:$0xff] }
  0x28   : > { %439 = vst.msk [vmem:[#allocation2 + $0x198] sm:$0xff] %vm386_vm0, %v10089_v4  ;;  %440 = vst.msk [vmem:[#allocation2 + $0x1a0] sm:$0xff] %vm386_vm0, %v10089_v4  ;;  %v580_v39 = vld [vmem:[%s10407_s12 + $0xd0] sm:$0xff]  ;;  %v581_v40 = vld [vmem:[%s10407_s12 + $0xd8] sm:$0xff]  ;;  %v598_v41 = vpack.c.bf16 %v579_v38, %v10488_v37 }
  0x29   : > { %393 = vst.msk [vmem:[#allocation2 + $0x28] sm:$0x3] %vm389_vm1, %v10089_v4  ;;  %390 = vst.msk [vmem:[#allocation2 + $0x10] sm:$0x3] %vm389_vm1, %v10089_v4  ;;  %v582_v42 = vld [vmem:[%s10407_s12 + $0xe0] sm:$0xff]  ;;  %v583_v43 = vld [vmem:[%s10407_s12 + $0xe8] sm:$0xff]  ;;  %v599_v45 = vpack.c.bf16 %v581_v40, %v580_v39 }
  0x2a   : > { %396 = vst.msk [vmem:[#allocation2 + $0x40] sm:$0x3] %vm389_vm1, %v10089_v4  ;;  %399 = vst.msk [vmem:[#allocation2 + $0x58] sm:$0x3] %vm389_vm1, %v10089_v4  ;;  %v584_v44 = vld [vmem:[%s10407_s12 + $0xf0] sm:$0xff]  ;;  %v600_v46 = vpack.c.bf16 %v583_v43, %v582_v42  ;;  %v585_v47 = vld [vmem:[%s10407_s12 + $0xf8] sm:$0xff] }
  0x2b   : > { %402 = vst.msk [vmem:[#allocation2 + $0x70] sm:$0x3] %vm389_vm1, %v10089_v4  ;;  %405 = vst.msk [vmem:[#allocation2 + $0x88] sm:$0x3] %vm389_vm1, %v10089_v4  ;;  %v601_v48 = vpack.c.bf16 %v585_v47, %v584_v44  ;;  %v9897_v59 = vld [vmem:[%s14898_s3 + $0x10] sm:$0xff]   ;;  %v9899_v62 = vld [vmem:[%s14898_s3 + $0x18] sm:$0xff]  }
  0x2c   : > { %408 = vst.msk [vmem:[#allocation2 + $0xa0] sm:$0x3] %vm389_vm1, %v10089_v4  ;;  %411 = vst.msk [vmem:[#allocation2 + $0xb8] sm:$0x3] %vm389_vm1, %v10089_v4  ;;  %8815 = vmatpush3.bf16.msra.mxu1 %v9897_v59  ;;  %v9900_v0 = vld [vmem:[%s14898_s3 + $0x60] sm:$0xff]   ;;  %v9902_v5 = vld [vmem:[%s14898_s3 + $0x68] sm:$0xff]  }
  0x2d   : > { %414 = vst.msk [vmem:[#allocation2 + $0xd0] sm:$0x3] %vm389_vm1, %v10089_v4  ;;  %417 = vst.msk [vmem:[#allocation2 + $0xe8] sm:$0x3] %vm389_vm1, %v10089_v4  ;;  %8816 = vmatprep.subr.bf16.mxu1 %v9898_v61  ;;  %v9901_v1 = vld [vmem:[%s14898_s3 + $0x20] sm:$0xff]  }
  0x2e   : > { %420 = vst.msk [vmem:[#allocation2 + $0x100] sm:$0x3] %vm389_vm1, %v10089_v4  ;;  %423 = vst.msk [vmem:[#allocation2 + $0x118] sm:$0x3] %vm389_vm1, %v10089_v4  ;;  %8596 = vmatmul.mubr.msk.bf16.gmra.mrb[8].mxu0 %vm386_vm0, %v588_v35  ;;  %v606_v3 = vld [vmem:[%s14897_s2] sm:$0x3] }
  0x2f   : > { %426 = vst.msk [vmem:[#allocation2 + $0x130] sm:$0x3] %vm389_vm1, %v10089_v4  ;;  %429 = vst.msk [vmem:[#allocation2 + $0x148] sm:$0x3] %vm389_vm1, %v10089_v4  ;;  %748 = vmatprep.mubr.bf16.mxu0 %v10088_v2  ;;  %v9905_v9 = vld [vmem:[%s14898_s3 + $0xc0] sm:$0xff]  }
  0x30   : > { %432 = vst.msk [vmem:[#allocation2 + $0x160] sm:$0x3] %vm389_vm1, %v10089_v4  ;;  %435 = vst.msk [vmem:[#allocation2 + $0x178] sm:$0x3] %vm389_vm1, %v10089_v4  ;;  %8817 = vmatpush3.bf16.msra.mxu1 %v9899_v62  ;;  %8922 = vmatprep.subr.bf16.mxu0 %v9905_v9  ;;  %v10679_v35 = vld [vmem:[%s14898_s3 + $0x100] sm:$0xff]  }
  0x31   : > { %438 = vst.msk [vmem:[#allocation2 + $0x190] sm:$0x3] %vm389_vm1, %v10089_v4  ;;  %441 = vst.msk [vmem:[#allocation2 + $0x1a8] sm:$0x3] %vm389_vm1, %v10089_v4  ;;  %8818 = vmatprep.subr.bf16.mxu1 %v9900_v0 }
  0x32   : > { %447 = vst.msk [vmem:[#allocation3 + $0x18] sm:$0xff] %vm442_vm2, %v10089_v4  ;;  %448 = vst.msk [vmem:[#allocation3 + $0x20] sm:$0xff] %vm442_vm2, %v10089_v4 }
  0x33   : > { %443 = vst.msk [vmem:[#allocation3] sm:$0xff] %vm442_vm2, %v10089_v4  ;;  %444 = vst.msk [vmem:[#allocation3 + $0x8] sm:$0xff] %vm442_vm2, %v10089_v4 }
  0x34   : > { %450 = vst.msk [vmem:[#allocation3 + $0x30] sm:$0xff] %vm442_vm2, %v10089_v4  ;;  %451 = vst.msk [vmem:[#allocation3 + $0x38] sm:$0xff] %vm442_vm2, %v10089_v4  ;;  %8819 = vmatpush3.bf16.msra.mxu1 %v9901_v1 }
  0x35   : > { %453 = vst.msk [vmem:[#allocation3 + $0x48] sm:$0xff] %vm442_vm2, %v10089_v4  ;;  %454 = vst.msk [vmem:[#allocation3 + $0x50] sm:$0xff] %vm442_vm2, %v10089_v4  ;;  %8820 = vmatprep.subr.bf16.mxu1 %v9902_v5  ;;  %v9913_v5 = vld [vmem:[%s14898_s3 + $0xd0] sm:$0xff]  }
  0x36   : > { %456 = vst.msk [vmem:[#allocation3 + $0x60] sm:$0xff] %vm442_vm2, %v10089_v4  ;;  %457 = vst.msk [vmem:[#allocation3 + $0x68] sm:$0xff] %vm442_vm2, %v10089_v4  ;;  %8597 = vmatmul.mubr.msk.bf16.gmra.mrb[12].mxu0 %vm386_vm0, %v589_v36  ;;  %v9911_v36 = vld [vmem:[%s14898_s3 + $0xc8] sm:$0xff]  }
  0x37   : > { %459 = vst.msk [vmem:[#allocation3 + $0x78] sm:$0xff] %vm442_vm2, %v10089_v4  ;;  %460 = vst.msk [vmem:[#allocation3 + $0x80] sm:$0xff] %vm442_vm2, %v10089_v4  ;;  %758 = vmatprep.mubr.bf16.mxu0 %v10088_v2 }
  0x38   : > { %462 = vst.msk [vmem:[#allocation3 + $0x90] sm:$0xff] %vm442_vm2, %v10089_v4  ;;  %463 = vst.msk [vmem:[#allocation3 + $0x98] sm:$0xff] %vm442_vm2, %v10089_v4 }
  0x39   : > { %465 = vst.msk [vmem:[#allocation3 + $0xa8] sm:$0xff] %vm442_vm2, %v10089_v4  ;;  %466 = vst.msk [vmem:[#allocation3 + $0xb0] sm:$0xff] %vm442_vm2, %v10089_v4 }
  0x3a   : > { %468 = vst.msk [vmem:[#allocation3 + $0xc0] sm:$0xff] %vm442_vm2, %v10089_v4  ;;  %469 = vst.msk [vmem:[#allocation3 + $0xc8] sm:$0xff] %vm442_vm2, %v10089_v4 }
  0x3b   : > { %471 = vst.msk [vmem:[#allocation3 + $0xd8] sm:$0xff] %vm442_vm2, %v10089_v4  ;;  %472 = vst.msk [vmem:[#allocation3 + $0xe0] sm:$0xff] %vm442_vm2, %v10089_v4 }
  0x3c   : > { %474 = vst.msk [vmem:[#allocation3 + $0xf0] sm:$0xff] %vm442_vm2, %v10089_v4  ;;  %475 = vst.msk [vmem:[#allocation3 + $0xf8] sm:$0xff] %vm442_vm2, %v10089_v4 }
  0x3d   : > { %477 = vst.msk [vmem:[#allocation3 + $0x108] sm:$0xff] %vm442_vm2, %v10089_v4  ;;  %478 = vst.msk [vmem:[#allocation3 + $0x110] sm:$0xff] %vm442_vm2, %v10089_v4 }
  0x3e   : > { %480 = vst.msk [vmem:[#allocation3 + $0x120] sm:$0xff] %vm442_vm2, %v10089_v4  ;;  %481 = vst.msk [vmem:[#allocation3 + $0x128] sm:$0xff] %vm442_vm2, %v10089_v4  ;;  %8598 = vmatmul.mubr.msk.bf16.gmra.mrb[16].mxu0 %vm386_vm0, %v590_v49 }
  0x3f   : > { %483 = vst.msk [vmem:[#allocation3 + $0x138] sm:$0xff] %vm442_vm2, %v10089_v4  ;;  %484 = vst.msk [vmem:[#allocation3 + $0x140] sm:$0xff] %vm442_vm2, %v10089_v4  ;;  %768 = vmatprep.mubr.bf16.mxu0 %v10088_v2 }
  0x40   : > { %486 = vst.msk [vmem:[#allocation3 + $0x150] sm:$0xff] %vm442_vm2, %v10089_v4  ;;  %487 = vst.msk [vmem:[#allocation3 + $0x158] sm:$0xff] %vm442_vm2, %v10089_v4 }
  0x41   : > { %489 = vst.msk [vmem:[#allocation3 + $0x168] sm:$0xff] %vm442_vm2, %v10089_v4  ;;  %490 = vst.msk [vmem:[#allocation3 + $0x170] sm:$0xff] %vm442_vm2, %v10089_v4 }
  0x42   : > { %492 = vst.msk [vmem:[#allocation3 + $0x180] sm:$0xff] %vm442_vm2, %v10089_v4  ;;  %493 = vst.msk [vmem:[#allocation3 + $0x188] sm:$0xff] %vm442_vm2, %v10089_v4 }
  0x43   : > { %495 = vst.msk [vmem:[#allocation3 + $0x198] sm:$0xff] %vm442_vm2, %v10089_v4  ;;  %496 = vst.msk [vmem:[#allocation3 + $0x1a0] sm:$0xff] %vm442_vm2, %v10089_v4 }
  0x44   : > { %6851 = vst.msk [vmem:[#allocation2 + $0x19] sm:$0xff] %vm386_vm0, %v554_v6  ;;  %6852 = vst.msk [vmem:[#allocation2 + $0x21] sm:$0xff] %vm386_vm0, %v555_v7  ;;  %v9903_v6 = vld [vmem:[%s14898_s3 + $0x28] sm:$0xff]  }
  0x45   : > { %6853 = vst.msk [vmem:[#allocation2 + $0x31] sm:$0xff] %vm386_vm0, %v556_v8  ;;  %6854 = vst.msk [vmem:[#allocation2 + $0x39] sm:$0xff] %vm386_vm0, %v557_v10  ;;  %8821 = vmatpush3.bf16.msra.mxu1 %v9903_v6  ;;  %v9904_v8 = vld [vmem:[%s14898_s3 + $0x70] sm:$0xff]  }
  0x46   : > { %6855 = vst.msk [vmem:[#allocation2 + $0x49] sm:$0xff] %vm386_vm0, %v558_v11  ;;  %6856 = vst.msk [vmem:[#allocation2 + $0x51] sm:$0xff] %vm386_vm0, %v559_v12  ;;  %8599 = vmatmul.mubr.msk.bf16.gmra.mrb[20].mxu0 %vm386_vm0, %v591_v50  ;;  %v9906_v11 = vld [vmem:[%s14898_s3 + $0x30] sm:$0xff]   ;;  %8822 = vmatprep.subr.bf16.mxu1 %v9904_v8 }
  0x47   : > { %6857 = vst.msk [vmem:[#allocation2 + $0x61] sm:$0xff] %vm386_vm0, %v560_v13  ;;  %6858 = vst.msk [vmem:[#allocation2 + $0x69] sm:$0xff] %vm386_vm0, %v561_v14  ;;  %778 = vmatprep.mubr.bf16.mxu0 %v10088_v2  ;;  %v9907_v14 = vld [vmem:[%s14898_s3 + $0x80] sm:$0xff]  }
  0x48   : > { %6859 = vst.msk [vmem:[#allocation2 + $0x79] sm:$0xff] %vm386_vm0, %v10424_v15  ;;  %6860 = vst.msk [vmem:[#allocation2 + $0x81] sm:$0xff] %vm386_vm0, %v10429_v16  ;;  %8923 = vmatpush3.bf16.msra.mxu0 %v9907_v14 }
  0x49   : > { %6861 = vst.msk [vmem:[#allocation2 + $0x91] sm:$0xff] %vm386_vm0, %v10434_v17  ;;  %6862 = vst.msk [vmem:[#allocation2 + $0x99] sm:$0xff] %vm386_vm0, %v10437_v18  ;;  %8823 = vmatpush3.bf16.msra.mxu1 %v9906_v11  ;;  %8924 = vmatprep.subr.bf16.mxu0 %v9911_v36 }
  0x4a   : > { %6863 = vst.msk [vmem:[#allocation2 + $0xa9] sm:$0xff] %vm386_vm0, %v10447_v19  ;;  %6864 = vst.msk [vmem:[#allocation2 + $0xb1] sm:$0xff] %vm386_vm0, %v10450_v20  ;;  %v9908_v19 = vld [vmem:[%s14898_s3 + $0x78] sm:$0xff]  }
  0x4b   : > { %6865 = vst.msk [vmem:[#allocation2 + $0xc1] sm:$0xff] %vm386_vm0, %v10453_v21  ;;  %6866 = vst.msk [vmem:[#allocation2 + $0xc9] sm:$0xff] %vm386_vm0, %v569_v22  ;;  %8824 = vmatprep.subr.bf16.mxu1 %v9908_v19  ;;  %v9909_v21 = vld [vmem:[%s14898_s3 + $0x38] sm:$0xff]  }
  0x4c   : > { %6867 = vst.msk [vmem:[#allocation2 + $0xd9] sm:$0xff] %vm386_vm0, %v10464_v23  ;;  %6868 = vst.msk [vmem:[#allocation2 + $0xe1] sm:$0xff] %vm386_vm0, %v571_v24 }
  0x4d   : > { %6869 = vst.msk [vmem:[#allocation2 + $0xf1] sm:$0xff] %vm386_vm0, %v572_v25  ;;  %6870 = vst.msk [vmem:[#allocation2 + $0xf9] sm:$0xff] %vm386_vm0, %v573_v26  ;;  %8825 = vmatpush3.bf16.msra.mxu1 %v9909_v21 }
  0x4e   : > { %6871 = vst.msk [vmem:[#allocation2 + $0x109] sm:$0xff] %vm386_vm0, %v574_v27  ;;  %6872 = vst.msk [vmem:[#allocation2 + $0x111] sm:$0xff] %vm386_vm0, %v575_v29  ;;  %8600 = vmatmul.mubr.msk.bf16.gmra.mrb[24].mxu0 %vm386_vm0, %v592_v51  ;;  %9674 = vmatprep.subr.bf16.mxu1 %v10679_v35 }
  0x4f   : > { %6873 = vst.msk [vmem:[#allocation2 + $0x121] sm:$0xff] %vm386_vm0, %v576_v30  ;;  %6874 = vst.msk [vmem:[#allocation2 + $0x129] sm:$0xff] %vm386_vm0, %v577_v31  ;;  %788 = vmatprep.mubr.bf16.mxu0 %v10088_v2  ;;  %v1024_v30 = vld [vmem:[#allocation3 + $0x1] sm:$0xff] }
  0x50   : > { %6875 = vst.msk [vmem:[#allocation2 + $0x139] sm:$0xff] %vm386_vm0, %v10488_v37  ;;  %6876 = vst.msk [vmem:[#allocation2 + $0x141] sm:$0xff] %vm386_vm0, %v579_v38 }
  0x51   : > { %6877 = vst.msk [vmem:[#allocation2 + $0x151] sm:$0xff] %vm386_vm0, %v580_v39  ;;  %6878 = vst.msk [vmem:[#allocation2 + $0x159] sm:$0xff] %vm386_vm0, %v581_v40 }
  0x52   : > { %6879 = vst.msk [vmem:[#allocation2 + $0x169] sm:$0xff] %vm386_vm0, %v582_v42  ;;  %6880 = vst.msk [vmem:[#allocation2 + $0x171] sm:$0xff] %vm386_vm0, %v583_v43  ;;  %v9912_v42 = vld [vmem:[%s14898_s3 + $0x88] sm:$0xff]  }
  0x53   : > { %6881 = vst.msk [vmem:[#allocation2 + $0x181] sm:$0xff] %vm386_vm0, %v584_v44  ;;  %6882 = vst.msk [vmem:[#allocation2 + $0x189] sm:$0xff] %vm386_vm0, %v585_v47  ;;  %8925 = vmatpush3.bf16.msra.mxu0 %v9912_v42 }
  0x54   : > { %449 = vst.msk [vmem:[#allocation3 + $0x28] sm:$0x3] %vm445_vm3, %v10089_v4  ;;  %446 = vst.msk [vmem:[#allocation3 + $0x10] sm:$0x3] %vm445_vm3, %v10089_v4  ;;  %8926 = vmatprep.subr.bf16.mxu0 %v9913_v5 }
  0x55   : > { %452 = vst.msk [vmem:[#allocation3 + $0x40] sm:$0x3] %vm445_vm3, %v10089_v4  ;;  %455 = vst.msk [vmem:[#allocation3 + $0x58] sm:$0x3] %vm445_vm3, %v10089_v4 }
  0x56   : > { %8601 = vmatmul.mubr.msk.bf16.gmra.mrb[28].mxu0 %vm386_vm0, %v593_v52  ;;  %458 = vst.msk [vmem:[#allocation3 + $0x70] sm:$0x3] %vm445_vm3, %v10089_v4  ;;  %461 = vst.msk [vmem:[#allocation3 + $0x88] sm:$0x3] %vm445_vm3, %v10089_v4 }
  0x57   : > { %798 = vmatprep.mubr.bf16.mxu0 %v10088_v2  ;;  %464 = vst.msk [vmem:[#allocation3 + $0xa0] sm:$0x3] %vm445_vm3, %v10089_v4  ;;  %467 = vst.msk [vmem:[#allocation3 + $0xb8] sm:$0x3] %vm445_vm3, %v10089_v4 }
  0x58   : > { %470 = vst.msk [vmem:[#allocation3 + $0xd0] sm:$0x3] %vm445_vm3, %v10089_v4  ;;  %473 = vst.msk [vmem:[#allocation3 + $0xe8] sm:$0x3] %vm445_vm3, %v10089_v4 }
  0x59   : > { %476 = vst.msk [vmem:[#allocation3 + $0x100] sm:$0x3] %vm445_vm3, %v10089_v4  ;;  %479 = vst.msk [vmem:[#allocation3 + $0x118] sm:$0x3] %vm445_vm3, %v10089_v4 }
  0x5a   : > { %482 = vst.msk [vmem:[#allocation3 + $0x130] sm:$0x3] %vm445_vm3, %v10089_v4  ;;  %485 = vst.msk [vmem:[#allocation3 + $0x148] sm:$0x3] %vm445_vm3, %v10089_v4 }
  0x5b   : > { %488 = vst.msk [vmem:[#allocation3 + $0x160] sm:$0x3] %vm445_vm3, %v10089_v4  ;;  %491 = vst.msk [vmem:[#allocation3 + $0x178] sm:$0x3] %vm445_vm3, %v10089_v4 }
  0x5c   : > { %494 = vst.msk [vmem:[#allocation3 + $0x190] sm:$0x3] %vm445_vm3, %v10089_v4  ;;  %497 = vst.msk [vmem:[#allocation3 + $0x1a8] sm:$0x3] %vm445_vm3, %v10089_v4 }
  0x5d   : > { %14998 = vst [vmem:[#allocation8_spill] sm:$0xff] %v10600_v63  ;;  %499 = vst.msk [vmem:[#allocation4] sm:$0xff] %vm498_vm4, %v10089_v4 }
  0x5e   : > { %8602 = vmatmul.mubr.msk.bf16.gmra.mrb[32].mxu0 %vm386_vm0, %v594_v53  ;;  %500 = vst.msk [vmem:[#allocation4 + $0x8] sm:$0xff] %vm498_vm4, %v10089_v4  ;;  %503 = vst.msk [vmem:[#allocation4 + $0x18] sm:$0xff] %vm498_vm4, %v10089_v4 }
  0x5f   : > { %808 = vmatprep.mubr.bf16.mxu0 %v10088_v2  ;;  %502 = vst.msk [vmem:[#allocation4 + $0x10] sm:$0x3] %vm501_vm5, %v10089_v4  ;;  %505 = vst.msk [vmem:[#allocation4 + $0x28] sm:$0x3] %vm501_vm5, %v10089_v4 }
  0x60   : > { %504 = vst.msk [vmem:[#allocation4 + $0x20] sm:$0xff] %vm498_vm4, %v10089_v4  ;;  %506 = vst.msk [vmem:[#allocation4 + $0x30] sm:$0xff] %vm498_vm4, %v10089_v4 }
  0x61   : > { %507 = vst.msk [vmem:[#allocation4 + $0x38] sm:$0xff] %vm498_vm4, %v10089_v4  ;;  %509 = vst.msk [vmem:[#allocation4 + $0x48] sm:$0xff] %vm498_vm4, %v10089_v4 }
  0x62   : > { %508 = vst.msk [vmem:[#allocation4 + $0x40] sm:$0x3] %vm501_vm5, %v10089_v4  ;;  %511 = vst.msk [vmem:[#allocation4 + $0x58] sm:$0x3] %vm501_vm5, %v10089_v4 }
  0x63   : > { %510 = vst.msk [vmem:[#allocation4 + $0x50] sm:$0xff] %vm498_vm4, %v10089_v4  ;;  %512 = vst.msk [vmem:[#allocation4 + $0x60] sm:$0xff] %vm498_vm4, %v10089_v4 }
  0x64   : > { %513 = vst.msk [vmem:[#allocation4 + $0x68] sm:$0xff] %vm498_vm4, %v10089_v4  ;;  %515 = vst.msk [vmem:[#allocation4 + $0x78] sm:$0xff] %vm498_vm4, %v10089_v4 }
  0x65   : > { %514 = vst.msk [vmem:[#allocation4 + $0x70] sm:$0x3] %vm501_vm5, %v10089_v4  ;;  %517 = vst.msk [vmem:[#allocation4 + $0x88] sm:$0x3] %vm501_vm5, %v10089_v4 }
  0x66   : > { %8603 = vmatmul.mubr.msk.bf16.gmra.mrb[36].mxu0 %vm386_vm0, %v595_v28  ;;  %516 = vst.msk [vmem:[#allocation4 + $0x80] sm:$0xff] %vm498_vm4, %v10089_v4  ;;  %518 = vst.msk [vmem:[#allocation4 + $0x90] sm:$0xff] %vm498_vm4, %v10089_v4 }
  0x67   : > { %818 = vmatprep.mubr.bf16.mxu0 %v10088_v2  ;;  %519 = vst.msk [vmem:[#allocation4 + $0x98] sm:$0xff] %vm498_vm4, %v10089_v4  ;;  %521 = vst.msk [vmem:[#allocation4 + $0xa8] sm:$0xff] %vm498_vm4, %v10089_v4 }
  0x68   : > { %520 = vst.msk [vmem:[#allocation4 + $0xa0] sm:$0x3] %vm501_vm5, %v10089_v4  ;;  %523 = vst.msk [vmem:[#allocation4 + $0xb8] sm:$0x3] %vm501_vm5, %v10089_v4 }
  0x69   : > { %522 = vst.msk [vmem:[#allocation4 + $0xb0] sm:$0xff] %vm498_vm4, %v10089_v4  ;;  %524 = vst.msk [vmem:[#allocation4 + $0xc0] sm:$0xff] %vm498_vm4, %v10089_v4 }
  0x6a   : > { %525 = vst.msk [vmem:[#allocation4 + $0xc8] sm:$0xff] %vm498_vm4, %v10089_v4  ;;  %527 = vst.msk [vmem:[#allocation4 + $0xd8] sm:$0xff] %vm498_vm4, %v10089_v4 }
  0x6b   : > { %526 = vst.msk [vmem:[#allocation4 + $0xd0] sm:$0x3] %vm501_vm5, %v10089_v4  ;;  %529 = vst.msk [vmem:[#allocation4 + $0xe8] sm:$0x3] %vm501_vm5, %v10089_v4 }
  0x6c   : > { %528 = vst.msk [vmem:[#allocation4 + $0xe0] sm:$0xff] %vm498_vm4, %v10089_v4  ;;  %530 = vst.msk [vmem:[#allocation4 + $0xf0] sm:$0xff] %vm498_vm4, %v10089_v4 }
  0x6d   : > { %531 = vst.msk [vmem:[#allocation4 + $0xf8] sm:$0xff] %vm498_vm4, %v10089_v4  ;;  %533 = vst.msk [vmem:[#allocation4 + $0x108] sm:$0xff] %vm498_vm4, %v10089_v4 }
  0x6e   : > { %8604 = vmatmul.mubr.msk.bf16.gmra.mrb[40].mxu0 %vm386_vm0, %v596_v33  ;;  %v1025_v33 = vld [vmem:[#allocation3 + $0x9] sm:$0xff]  ;;  %532 = vst.msk [vmem:[#allocation4 + $0x100] sm:$0x3] %vm501_vm5, %v10089_v4  ;;  %535 = vst.msk [vmem:[#allocation4 + $0x118] sm:$0x3] %vm501_vm5, %v10089_v4 }
  0x6f   : > { %828 = vmatprep.mubr.bf16.mxu0 %v10088_v2  ;;  %v1056_v40 = vpack.c.bf16 %v1025_v33, %v1024_v30  ;;  %534 = vst.msk [vmem:[#allocation4 + $0x110] sm:$0xff] %vm498_vm4, %v10089_v4  ;;  %536 = vst.msk [vmem:[#allocation4 + $0x120] sm:$0xff] %vm498_vm4, %v10089_v4 }
  0x70   : > { %537 = vst.msk [vmem:[#allocation4 + $0x128] sm:$0xff] %vm498_vm4, %v10089_v4  ;;  %539 = vst.msk [vmem:[#allocation4 + $0x138] sm:$0xff] %vm498_vm4, %v10089_v4 }
  0x71   : > { %538 = vst.msk [vmem:[#allocation4 + $0x130] sm:$0x3] %vm501_vm5, %v10089_v4  ;;  %541 = vst.msk [vmem:[#allocation4 + $0x148] sm:$0x3] %vm501_vm5, %v10089_v4 }
  0x72   : > { %540 = vst.msk [vmem:[#allocation4 + $0x140] sm:$0xff] %vm498_vm4, %v10089_v4  ;;  %542 = vst.msk [vmem:[#allocation4 + $0x150] sm:$0xff] %vm498_vm4, %v10089_v4 }
  0x73   : > { %543 = vst.msk [vmem:[#allocation4 + $0x158] sm:$0xff] %vm498_vm4, %v10089_v4  ;;  %545 = vst.msk [vmem:[#allocation4 + $0x168] sm:$0xff] %vm498_vm4, %v10089_v4 }
  0x74   : > { %544 = vst.msk [vmem:[#allocation4 + $0x160] sm:$0x3] %vm501_vm5, %v10089_v4  ;;  %547 = vst.msk [vmem:[#allocation4 + $0x178] sm:$0x3] %vm501_vm5, %v10089_v4 }
  0x75   : > { %546 = vst.msk [vmem:[#allocation4 + $0x170] sm:$0xff] %vm498_vm4, %v10089_v4  ;;  %548 = vst.msk [vmem:[#allocation4 + $0x180] sm:$0xff] %vm498_vm4, %v10089_v4 }
  0x76   : > { %8605 = vmatmul.mubr.msk.bf16.gmra.mrb[44].mxu0 %vm386_vm0, %v597_v34  ;;  %549 = vst.msk [vmem:[#allocation4 + $0x188] sm:$0xff] %vm498_vm4, %v10089_v4  ;;  %551 = vst.msk [vmem:[#allocation4 + $0x198] sm:$0xff] %vm498_vm4, %v10089_v4 }
  0x77   : > { %838 = vmatprep.mubr.bf16.mxu0 %v10088_v2  ;;  %550 = vst.msk [vmem:[#allocation4 + $0x190] sm:$0x3] %vm501_vm5, %v10089_v4  ;;  %553 = vst.msk [vmem:[#allocation4 + $0x1a8] sm:$0x3] %vm501_vm5, %v10089_v4 }
  0x78   : > { %552 = vst.msk [vmem:[#allocation4 + $0x1a0] sm:$0xff] %vm498_vm4, %v10089_v4  ;;  %v9918_v4 = vld [vmem:[%s14898_s3 + $0xe0] sm:$0xff]  }
  0x7e   : > { %8606 = vmatmul.mubr.msk.bf16.gmra.mrb[48].mxu0 %vm386_vm0, %v598_v41 }
  0x7f   : > { %848 = vmatprep.mubr.bf16.mxu0 %v10088_v2 }
  0x86   : > { %8607 = vmatmul.mubr.msk.bf16.gmra.mrb[52].mxu0 %vm386_vm0, %v599_v45 }
  0x87   : > { %858 = vmatprep.mubr.bf16.mxu0 %v10088_v2 }
  0x8e   : > { %8608 = vmatmul.mubr.msk.bf16.gmra.mrb[56].mxu0 %vm386_vm0, %v600_v46 }
  0x8f   : > { %868 = vmatprep.mubr.bf16.mxu0 %v10088_v2  ;;  %v610_v2 = vsub.s32 0, %v10600_v63 }
  0x91   : > { %v10618_v7 = vrot.slane %v606_v3, %v610_v2 }
  0x96   : > { %8609 = vmatmul.mubr.msk.bf16.gmra.mrb[60].mxu0 %vm386_vm0, %v601_v48 }
  0xf1   : > { %v720_v10 = vpop.f32.mrb[0].mxu0 }
  0xf2   : > { %v10630_v12 = vadd.f32 %v720_v10, %v10618_v7  ;;  %v10632_v13 = vpop.f32.mrb[1].mxu0 }
  0xf3   : > { %14999 = vst [vmem:[#allocation9_spill] sm:$0xff] %v10632_v13  ;;  %v724_v15 = vpop.f32.mrb[2].mxu0 }
  0xf4   : > { %v14921_v16 = vmax.f32 %v10630_v12, 0.0  ;;  %v10639_v17 = vadd.f32 %v724_v15, %v10618_v7  ;;  %v10641_v18 = vpop.f32.mrb[3].mxu0  ;;  %v9914_v15 = vld [vmem:[%s14898_s3 + $0x90] sm:$0xff]  }
  0xf5   : > { %15000 = vst [vmem:[#allocation10_spill] sm:$0xff] %v10641_v18  ;;  %8927 = vmatpush3.bf16.msra.mxu0 %v9914_v15 }
  0xf6   : > { %944 = vst.msk [vmem:[#allocation3 + $0x19] sm:$0xff] %vm442_vm2, %v14921_v16  ;;  %v14923_v20 = vmax.f32 %v10639_v17, 0.0 }
  0xf8   : > { %945 = vst.msk [vmem:[#allocation3 + $0x21] sm:$0xff] %vm442_vm2, %v14923_v20 }
  0xf9   : > { %v730_v22 = vpop.f32.mrb[4].mxu0 }
  0xfa   : > { %v10657_v23 = vadd.f32 %v730_v22, %v10618_v7  ;;  %v10659_v24 = vpop.f32.mrb[5].mxu0 }
  0xfb   : > { %15001 = vst [vmem:[#allocation11_spill] sm:$0xff] %v10659_v24  ;;  %v734_v25 = vpop.f32.mrb[6].mxu0 }
  0xfc   : > { %v14919_v26 = vmax.f32 %v10657_v23, 0.0  ;;  %v10663_v27 = vadd.f32 %v734_v25, %v10618_v7  ;;  %v10665_v28 = vpop.f32.mrb[7].mxu0 }
  0xfd   : > { %15002 = vst [vmem:[#allocation12_spill] sm:$0xff] %v10665_v28  ;;  %v1120_v31 = vld [vmem:[#allocation3 + $0x18] sm:$0xff] }
  0xfe   : > { %946 = vst.msk [vmem:[#allocation3 + $0x31] sm:$0xff] %vm442_vm2, %v14919_v26  ;;  %v14920_v29 = vmax.f32 %v10663_v27, 0.0  ;;  %v1026_v55 = vld [vmem:[#allocation3 + $0x19] sm:$0xff] }
  0xff   : > { %v1121_v32 = vld [vmem:[#allocation3 + $0x20] sm:$0xff] }
 0x100   : > { %947 = vst.msk [vmem:[#allocation3 + $0x39] sm:$0xff] %vm442_vm2, %v14920_v29  ;;  %v10674_v34 = vpack.c.bf16 %v1121_v32, %v1120_v31  ;;  %v1027_v51 = vld [vmem:[#allocation3 + $0x21] sm:$0xff] }
 0x101   : > { %v740_v37 = vpop.f32.mrb[8].mxu0  ;;  %v1057_v59 = vpack.c.bf16 %v1027_v51, %v1026_v55 }
 0x102   : > { %v10685_v38 = vadd.f32 %v740_v37, %v10618_v7  ;;  %v10687_v39 = vpop.f32.mrb[9].mxu0  ;;  %1473 = vrot.lane.b32.xlu0 %v10674_v34, %s10090_s15 }
 0x103   : > { %15003 = vst [vmem:[#allocation13_spill] sm:$0xff] %v10687_v39  ;;  %v744_v41 = vpop.f32.mrb[10].mxu0 }
 0x104   : > { %v14917_v43 = vmax.f32 %v10685_v38, 0.0  ;;  %v10697_v44 = vadd.f32 %v744_v41, %v10618_v7  ;;  %v10699_v45 = vpop.f32.mrb[11].mxu0 }
 0x105   : > { %15004 = vst [vmem:[#allocation14_spill] sm:$0xff] %v10699_v45  ;;  %v1122_v47 = vld [vmem:[#allocation3 + $0x30] sm:$0xff] }
 0x106   : > { %948 = vst.msk [vmem:[#allocation3 + $0x49] sm:$0xff] %vm442_vm2, %v14917_v43  ;;  %v14918_v46 = vmax.f32 %v10697_v44, 0.0  ;;  %1425 = vrot.lane.b32.xlu0 %v1056_v40, %s10090_s15  ;;  %v1028_v1 = vld [vmem:[#allocation3 + $0x31] sm:$0xff] }
 0x107   : > { %v1123_v48 = vld [vmem:[#allocation3 + $0x38] sm:$0xff] }
 0x108   : > { %949 = vst.msk [vmem:[#allocation3 + $0x51] sm:$0xff] %vm442_vm2, %v14918_v46  ;;  %v10709_v49 = vpack.c.bf16 %v1123_v48, %v1122_v47  ;;  %v1029_v60 = vld [vmem:[#allocation3 + $0x39] sm:$0xff] }
 0x109   : > { %v750_v50 = vpop.f32.mrb[12].mxu0  ;;  %v10734_v3 = vpack.c.bf16 %v1029_v60, %v1028_v1 }
 0x10a   : > { %v10712_v52 = vadd.f32 %v750_v50, %v10618_v7  ;;  %v10714_v53 = vpop.f32.mrb[13].mxu0  ;;  %1475 = vrot.lane.b32.xlu1 %v10709_v49, %s10090_s15 }
 0x10b   : > { %15005 = vst [vmem:[#allocation15_spill] sm:$0xff] %v10714_v53  ;;  %v754_v54 = vpop.f32.mrb[14].mxu0 }
 0x10c   : > { %v14914_v56 = vmax.f32 %v10712_v52, 0.0  ;;  %v10720_v57 = vadd.f32 %v754_v54, %v10618_v7  ;;  %v10722_v58 = vpop.f32.mrb[15].mxu0 }
 0x10d   : > { %15006 = vst [vmem:[#allocation16_spill] sm:$0xff] %v10722_v58  ;;  %v1124_v62 = vld [vmem:[#allocation3 + $0x48] sm:$0xff] }
 0x10e   : > { %950 = vst.msk [vmem:[#allocation3 + $0x61] sm:$0xff] %vm442_vm2, %v14914_v56  ;;  %v14916_v61 = vmax.f32 %v10720_v57, 0.0  ;;  %1427 = vrot.lane.b32.xlu1 %v1057_v59, %s10090_s15  ;;  %v1030_v14 = vld [vmem:[#allocation3 + $0x49] sm:$0xff] }
 0x10f   : > { %v1125_v0 = vld [vmem:[#allocation3 + $0x50] sm:$0xff] }
 0x110   : > { %951 = vst.msk [vmem:[#allocation3 + $0x69] sm:$0xff] %vm442_vm2, %v14916_v61  ;;  %v10732_v2 = vpack.c.bf16 %v1125_v0, %v1124_v62  ;;  %v1031_v8 = vld [vmem:[#allocation3 + $0x51] sm:$0xff] }
 0x111   : > { %v760_v6 = vpop.f32.mrb[16].mxu0  ;;  %v10757_v25 = vpack.c.bf16 %v1031_v8, %v1030_v14 }
 0x112   : > { %v10740_v9 = vadd.f32 %v760_v6, %v10618_v7  ;;  %v10742_v10 = vpop.f32.mrb[17].mxu0  ;;  %1477 = vrot.lane.b32.xlu0 %v10732_v2, %s10090_s15  ;;  %1429 = vrot.lane.b32.xlu1 %v10734_v3, %s10090_s15  ;;  %v9916_v6 = vld [vmem:[%s14898_s3 + $0xd8] sm:$0xff]  }
 0x113   : > { %15007 = vst [vmem:[#allocation17_spill] sm:$0xff] %v10742_v10  ;;  %v764_v11 = vpop.f32.mrb[18].mxu0  ;;  %8928 = vmatprep.subr.bf16.mxu0 %v9916_v6 }
 0x114   : > { %v14911_v19 = vmax.f32 %v10740_v9, 0.0  ;;  %v10753_v21 = vadd.f32 %v764_v11, %v10618_v7  ;;  %v10755_v22 = vpop.f32.mrb[19].mxu0 }
 0x115   : > { %15008 = vst [vmem:[#allocation18_spill] sm:$0xff] %v10755_v22  ;;  %v1126_v31 = vld [vmem:[#allocation3 + $0x60] sm:$0xff] }
 0x116   : > { %952 = vst.msk [vmem:[#allocation3 + $0x79] sm:$0xff] %vm442_vm2, %v14911_v19  ;;  %v14912_v30 = vmax.f32 %v10753_v21, 0.0  ;;  %1431 = vrot.lane.b32.xlu1 %v10757_v25, %s10090_s15  ;;  %v1032_v33 = vld [vmem:[#allocation3 + $0x61] sm:$0xff] }
 0x117   : > { %v1127_v32 = vld [vmem:[#allocation3 + $0x68] sm:$0xff] }
 0x118   : > { %v1033_v36 = vld [vmem:[#allocation3 + $0x69] sm:$0xff]  ;;  %953 = vst.msk [vmem:[#allocation3 + $0x81] sm:$0xff] %vm442_vm2, %v14912_v30  ;;  %v10768_v37 = vpack.c.bf16 %v1127_v32, %v1126_v31 }
 0x119   : > { %v10770_v40 = vpack.c.bf16 %v1033_v36, %v1032_v33  ;;  %v770_v41 = vpop.f32.mrb[20].mxu0  ;;  %v9917_v31 = vld [vmem:[%s14898_s3 + $0x98] sm:$0xff]  }
 0x11a   : > { %v10773_v42 = vadd.f32 %v770_v41, %v10618_v7  ;;  %v10775_v47 = vpop.f32.mrb[21].mxu0  ;;  %1479 = vrot.lane.b32.xlu0 %v10768_v37, %s10090_s15  ;;  %8929 = vmatpush3.bf16.msra.mxu0 %v9917_v31 }
 0x11b   : > { %15009 = vst [vmem:[#allocation19_spill] sm:$0xff] %v10775_v47  ;;  %1433 = vrot.lane.b32.xlu1 %v10770_v40, %s10090_s15  ;;  %v774_v48 = vpop.f32.mrb[22].mxu0  ;;  %8930 = vmatprep.subr.bf16.mxu0 %v9918_v4  ;;  %v9922_v47 = vld [vmem:[%s14898_s3 + $0xa8] sm:$0xff]  }
 0x11c   : > { %v14908_v50 = vmax.f32 %v10773_v42, 0.0  ;;  %v10783_v51 = vadd.f32 %v774_v48, %v10618_v7  ;;  %v10785_v54 = vpop.f32.mrb[23].mxu0 }
 0x11d   : > { %15010 = vst [vmem:[#allocation20_spill] sm:$0xff] %v10785_v54  ;;  %v1128_v59 = vld [vmem:[#allocation3 + $0x78] sm:$0xff] }
 0x11e   : > { %954 = vst.msk [vmem:[#allocation3 + $0x91] sm:$0xff] %vm442_vm2, %v14908_v50  ;;  %v14910_v55 = vmax.f32 %v10783_v51, 0.0  ;;  %v1034_v62 = vld [vmem:[#allocation3 + $0x79] sm:$0xff] }
 0x11f   : > { %v1129_v60 = vld [vmem:[#allocation3 + $0x80] sm:$0xff] }
 0x120   : > { %v1035_v0 = vld [vmem:[#allocation3 + $0x81] sm:$0xff]  ;;  %955 = vst.msk [vmem:[#allocation3 + $0x99] sm:$0xff] %vm442_vm2, %v14910_v55  ;;  %v10794_v1 = vpack.c.bf16 %v1129_v60, %v1128_v59 }
 0x121   : > { %v10796_v5 = vpack.c.bf16 %v1035_v0, %v1034_v62  ;;  %v780_v8 = vpop.f32.mrb[24].mxu0 }
 0x122   : > { %v10802_v11 = vadd.f32 %v780_v8, %v10618_v7  ;;  %v10804_v14 = vpop.f32.mrb[25].mxu0  ;;  %1481 = vrot.lane.b32.xlu0 %v10794_v1, %s10090_s15 }
 0x123   : > { %15012 = vst [vmem:[#allocation22_spill] sm:$0xff] %v10804_v14  ;;  %1435 = vrot.lane.b32.xlu1 %v10796_v5, %s10090_s15  ;;  %v784_v15 = vpop.f32.mrb[26].mxu0 }
 0x124   : > { %15011 = vst [vmem:[#allocation21_spill] sm:$0xff] %v10802_v11  ;;  %v14907_v32 = vmax.f32 %v10802_v11, 0.0  ;;  %v10815_v33 = vadd.f32 %v784_v15, %v10618_v7  ;;  %v10817_v36 = vpop.f32.mrb[27].mxu0 }
 0x125   : > { %15014 = vst [vmem:[#allocation24_spill] sm:$0xff] %v10817_v36  ;;  %v1130_v48 = vld [vmem:[#allocation3 + $0x90] sm:$0xff] }
 0x126   : > { %15013 = vst [vmem:[#allocation23_spill] sm:$0xff] %v10815_v33  ;;  %956 = vst.msk [vmem:[#allocation3 + $0xa9] sm:$0xff] %vm442_vm2, %v14907_v32  ;;  %v14909_v41 = vmax.f32 %v10815_v33, 0.0  ;;  %v1036_v60 = vld [vmem:[#allocation3 + $0x91] sm:$0xff] }
 0x127   : > { %v1131_v59 = vld [vmem:[#allocation3 + $0x98] sm:$0xff] }
 0x128   : > { %v1037_v62 = vld [vmem:[#allocation3 + $0x99] sm:$0xff]  ;;  %957 = vst.msk [vmem:[#allocation3 + $0xb1] sm:$0xff] %vm442_vm2, %v14909_v41  ;;  %v10826_v0 = vpack.c.bf16 %v1131_v59, %v1130_v48 }
 0x129   : > { %v10828_v6 = vpack.c.bf16 %v1037_v62, %v1036_v60  ;;  %v790_v8 = vpop.f32.mrb[28].mxu0 }
 0x12a   : > { %v10831_v15 = vadd.f32 %v790_v8, %v10618_v7  ;;  %v10833_v31 = vpop.f32.mrb[29].mxu0  ;;  %1483 = vrot.lane.b32.xlu0 %v10826_v0, %s10090_s15 }
 0x12b   : > { %15016 = vst [vmem:[#allocation26_spill] sm:$0xff] %v10833_v31  ;;  %1437 = vrot.lane.b32.xlu1 %v10828_v6, %s10090_s15  ;;  %v794_v32 = vpop.f32.mrb[30].mxu0 }
 0x12c   : > { %15015 = vst [vmem:[#allocation25_spill] sm:$0xff] %v10831_v15  ;;  %v14913_v50 = vmax.f32 %v10831_v15, 0.0  ;;  %v10841_v48 = vadd.f32 %v794_v32, %v10618_v7  ;;  %v10843_v59 = vpop.f32.mrb[31].mxu0  ;;  %v9942_v15 = vld [vmem:[%s14900_s5 + $0x78] sm:$0xff]  }
 0x12d   : > { %15018 = vst [vmem:[#allocation28_spill] sm:$0xff] %v10843_v59  ;;  %v1132_v60 = vld [vmem:[#allocation3 + $0xa8] sm:$0xff] }
 0x12e   : > { %15017 = vst [vmem:[#allocation27_spill] sm:$0xff] %v10841_v48  ;;  %958 = vst.msk [vmem:[#allocation3 + $0xc1] sm:$0xff] %vm442_vm2, %v14913_v50  ;;  %v14915_v32 = vmax.f32 %v10841_v48, 0.0  ;;  %v1038_v8 = vld [vmem:[#allocation3 + $0xa9] sm:$0xff] }
 0x12f   : > { %v1133_v62 = vld [vmem:[#allocation3 + $0xb0] sm:$0xff] }
 0x130   : > { %v1039_v41 = vld [vmem:[#allocation3 + $0xb1] sm:$0xff]  ;;  %959 = vst.msk [vmem:[#allocation3 + $0xc9] sm:$0xff] %vm442_vm2, %v14915_v32  ;;  %v10960_v55 = vpack.c.bf16 %v1133_v62, %v1132_v60 }
 0x131   : > { %v10962_v19 = vpack.c.bf16 %v1039_v41, %v1038_v8  ;;  %v800_v30 = vpop.f32.mrb[32].mxu0  ;;  %v9919_v41 = vld [vmem:[%s14898_s3 + $0xa0] sm:$0xff]  }
 0x132   : > { %v10968_v50 = vadd.f32 %v800_v30, %v10618_v7  ;;  %v10970_v56 = vpop.f32.mrb[33].mxu0  ;;  %1485 = vrot.lane.b32.xlu0 %v10960_v55, %s10090_s15  ;;  %8931 = vmatpush3.bf16.msra.mxu0 %v9919_v41 }
 0x133   : > { %15020 = vst [vmem:[#allocation30_spill] sm:$0xff] %v10970_v56  ;;  %1439 = vrot.lane.b32.xlu1 %v10962_v19, %s10090_s15  ;;  %v804_v60 = vpop.f32.mrb[34].mxu0 }
 0x134   : > { %15019 = vst [vmem:[#allocation29_spill] sm:$0xff] %v10968_v50  ;;  %v14922_v62 = vmax.f32 %v10968_v50, 0.0  ;;  %v10981_v8 = vadd.f32 %v804_v60, %v10618_v7  ;;  %v10983_v30 = vpop.f32.mrb[35].mxu0 }
 0x135   : > { %15022 = vst [vmem:[#allocation32_spill] sm:$0xff] %v10983_v30  ;;  %v1134_v61 = vld [vmem:[#allocation3 + $0xc0] sm:$0xff] }
 0x136   : > { %15021 = vst [vmem:[#allocation31_spill] sm:$0xff] %v10981_v8  ;;  %960 = vst.msk [vmem:[#allocation3 + $0xd9] sm:$0xff] %vm442_vm2, %v14922_v62  ;;  %v14924_v32 = vmax.f32 %v10981_v8, 0.0  ;;  %v1040_v43 = vld [vmem:[#allocation3 + $0xc1] sm:$0xff] }
 0x137   : > { %v1135_v4 = vld [vmem:[#allocation3 + $0xc8] sm:$0xff] }
 0x138   : > { %v1041_v46 = vld [vmem:[#allocation3 + $0xc9] sm:$0xff]  ;;  %961 = vst.msk [vmem:[#allocation3 + $0xe1] sm:$0xff] %vm442_vm2, %v14924_v32  ;;  %v1159_v26 = vpack.c.bf16 %v1135_v4, %v1134_v61 }
 0x139   : > { %v10992_v60 = vpack.c.bf16 %v1041_v46, %v1040_v43  ;;  %v810_v29 = vpop.f32.mrb[36].mxu0 }
 0x13a   : > { %v10995_v41 = vadd.f32 %v810_v29, %v10618_v7  ;;  %v10997_v16 = vpop.f32.mrb[37].mxu0  ;;  %1487 = vrot.lane.b32.xlu0 %v1159_v26, %s10090_s15  ;;  %v9921_v26 = vld [vmem:[%s14898_s3 + $0xe8] sm:$0xff]  }
 0x13b   : > { %15024 = vst [vmem:[#allocation34_spill] sm:$0xff] %v10997_v16  ;;  %1441 = vrot.lane.b32.xlu1 %v10992_v60, %s10090_s15  ;;  %v814_v62 = vpop.f32.mrb[38].mxu0  ;;  %8932 = vmatprep.subr.bf16.mxu0 %v9921_v26 }
 0x13c   : > { %15023 = vst [vmem:[#allocation33_spill] sm:$0xff] %v10995_v41  ;;  %v14925_v20 = vmax.f32 %v10995_v41, 0.0  ;;  %v11004_v56 = vadd.f32 %v814_v62, %v10618_v7  ;;  %v11006_v61 = vpop.f32.mrb[39].mxu0  ;;  %8933 = vmatpush3.bf16.msra.mxu0 %v9922_v47 }
 0x13d   : > { %15026 = vst [vmem:[#allocation36_spill] sm:$0xff] %v11006_v61  ;;  %v1136_v43 = vld [vmem:[#allocation3 + $0xd8] sm:$0xff] }
 0x13e   : > { %15025 = vst [vmem:[#allocation35_spill] sm:$0xff] %v11004_v56  ;;  %962 = vst.msk [vmem:[#allocation3 + $0xf1] sm:$0xff] %vm442_vm2, %v14925_v20  ;;  %v14926_v29 = vmax.f32 %v11004_v56, 0.0  ;;  %v1042_v4 = vld [vmem:[#allocation3 + $0xd9] sm:$0xff] }
 0x13f   : > { %v1137_v46 = vld [vmem:[#allocation3 + $0xe0] sm:$0xff] }
 0x140   : > { %v1043_v32 = vld [vmem:[#allocation3 + $0xe1] sm:$0xff]  ;;  %963 = vst.msk [vmem:[#allocation3 + $0xf9] sm:$0xff] %vm442_vm2, %v14926_v29  ;;  %v1160_v62 = vpack.c.bf16 %v1137_v46, %v1136_v43 }
 0x141   : > { %v11018_v16 = vpack.c.bf16 %v1043_v32, %v1042_v4  ;;  %v820_v31 = vpop.f32.mrb[40].mxu0 }
 0x142   : > { %v11021_v20 = vadd.f32 %v820_v31, %v10618_v7  ;;  %v11023_v14 = vpop.f32.mrb[41].mxu0  ;;  %1489 = vrot.lane.b32.xlu0 %v1160_v62, %s10090_s15 }
 0x143   : > { %15028 = vst [vmem:[#allocation38_spill] sm:$0xff] %v11023_v14  ;;  %1443 = vrot.lane.b32.xlu1 %v11018_v16, %s10090_s15  ;;  %v824_v29 = vpop.f32.mrb[42].mxu0 }
 0x144   : > { %15027 = vst [vmem:[#allocation37_spill] sm:$0xff] %v11021_v20  ;;  %v14927_v32 = vmax.f32 %v11021_v20, 0.0  ;;  %v11033_v43 = vadd.f32 %v824_v29, %v10618_v7  ;;  %v11035_v26 = vpop.f32.mrb[43].mxu0 }
 0x145   : > { %15030 = vst [vmem:[#allocation40_spill] sm:$0xff] %v11035_v26  ;;  %v1138_v46 = vld [vmem:[#allocation3 + $0xf0] sm:$0xff] }
 0x146   : > { %15029 = vst [vmem:[#allocation39_spill] sm:$0xff] %v11033_v43  ;;  %964 = vst.msk [vmem:[#allocation3 + $0x109] sm:$0xff] %vm442_vm2, %v14927_v32  ;;  %v14928_v31 = vmax.f32 %v11033_v43, 0.0  ;;  %v1044_v62 = vld [vmem:[#allocation3 + $0xf1] sm:$0xff] }
 0x147   : > { %v1139_v4 = vld [vmem:[#allocation3 + $0xf8] sm:$0xff] }
 0x148   : > { %v1045_v14 = vld [vmem:[#allocation3 + $0xf9] sm:$0xff]  ;;  %965 = vst.msk [vmem:[#allocation3 + $0x111] sm:$0xff] %vm442_vm2, %v14928_v31  ;;  %v1161_v10 = vpack.c.bf16 %v1139_v4, %v1138_v46 }
 0x149   : > { %v11044_v29 = vpack.c.bf16 %v1045_v14, %v1044_v62  ;;  %v830_v61 = vpop.f32.mrb[44].mxu0 }
 0x14a   : > { %v11047_v47 = vadd.f32 %v830_v61, %v10618_v7  ;;  %v11049_v26 = vpop.f32.mrb[45].mxu0  ;;  %1491 = vrot.lane.b32.xlu0 %v1161_v10, %s10090_s15 }
 0x14b   : > { %15032 = vst [vmem:[#allocation42_spill] sm:$0xff] %v11049_v26  ;;  %1445 = vrot.lane.b32.xlu1 %v11044_v29, %s10090_s15  ;;  %v834_v32 = vpop.f32.mrb[46].mxu0 }
 0x14c   : > { %15031 = vst [vmem:[#allocation41_spill] sm:$0xff] %v11047_v47  ;;  %v14929_v53 = vmax.f32 %v11047_v47, 0.0  ;;  %v11056_v30 = vadd.f32 %v834_v32, %v10618_v7  ;;  %v11058_v46 = vpop.f32.mrb[47].mxu0 }
 0x14d   : > { %15034 = vst [vmem:[#allocation44_spill] sm:$0xff] %v11058_v46  ;;  %v1140_v61 = vld [vmem:[#allocation3 + $0x108] sm:$0xff] }
 0x14e   : > { %15033 = vst [vmem:[#allocation43_spill] sm:$0xff] %v11056_v30  ;;  %966 = vst.msk [vmem:[#allocation3 + $0x121] sm:$0xff] %vm442_vm2, %v14929_v53  ;;  %v14930_v14 = vmax.f32 %v11056_v30, 0.0  ;;  %v1046_v10 = vld [vmem:[#allocation3 + $0x109] sm:$0xff]  ;;  %v9923_v53 = vld [vmem:[%s14898_s3 + $0xf0] sm:$0xff]  }
 0x14f   : > { %v1141_v4 = vld [vmem:[#allocation3 + $0x110] sm:$0xff]  ;;  %8934 = vmatprep.subr.bf16.mxu0 %v9923_v53 }
 0x150   : > { %v1047_v62 = vld [vmem:[#allocation3 + $0x111] sm:$0xff]  ;;  %967 = vst.msk [vmem:[#allocation3 + $0x129] sm:$0xff] %vm442_vm2, %v14930_v14  ;;  %v1162_v31 = vpack.c.bf16 %v1141_v4, %v1140_v61  ;;  %v9924_v61 = vld [vmem:[%s14898_s3 + $0xb0] sm:$0xff]  }
 0x151   : > { %v11067_v26 = vpack.c.bf16 %v1047_v62, %v1046_v10  ;;  %v840_v32 = vpop.f32.mrb[48].mxu0  ;;  %8935 = vmatpush3.bf16.msra.mxu0 %v9924_v61 }
 0x152   : > { %v11070_v46 = vadd.f32 %v840_v32, %v10618_v7  ;;  %v11072_v39 = vpop.f32.mrb[49].mxu0  ;;  %1493 = vrot.lane.b32.xlu0 %v1162_v31, %s10090_s15 }
 0x153   : > { %15036 = vst [vmem:[#allocation46_spill] sm:$0xff] %v11072_v39  ;;  %1447 = vrot.lane.b32.xlu1 %v11067_v26, %s10090_s15  ;;  %v844_v4 = vpop.f32.mrb[50].mxu0 }
 0x154   : > { %15035 = vst [vmem:[#allocation45_spill] sm:$0xff] %v11070_v46  ;;  %v14931_v10 = vmax.f32 %v11070_v46, 0.0  ;;  %v11085_v62 = vadd.f32 %v844_v4, %v10618_v7  ;;  %v11087_v32 = vpop.f32.mrb[51].mxu0  ;;  %v9915_v46 = vld [vmem:[%s14898_s3 + $0x108] sm:$0xff]  }
 0x155   : > { %15038 = vst [vmem:[#allocation48_spill] sm:$0xff] %v11087_v32  ;;  %v1142_v14 = vld [vmem:[#allocation3 + $0x120] sm:$0xff] }
 0x156   : > { %15037 = vst [vmem:[#allocation47_spill] sm:$0xff] %v11085_v62  ;;  %968 = vst.msk [vmem:[#allocation3 + $0x139] sm:$0xff] %vm442_vm2, %v14931_v10  ;;  %v14932_v31 = vmax.f32 %v11085_v62, 0.0  ;;  %v1048_v59 = vld [vmem:[#allocation3 + $0x121] sm:$0xff] }
 0x157   : > { %v1143_v39 = vld [vmem:[#allocation3 + $0x128] sm:$0xff] }
 0x158   : > { %v1049_v24 = vld [vmem:[#allocation3 + $0x129] sm:$0xff]  ;;  %969 = vst.msk [vmem:[#allocation3 + $0x141] sm:$0xff] %vm442_vm2, %v14932_v31  ;;  %v1163_v4 = vpack.c.bf16 %v1143_v39, %v1142_v14 }
 0x159   : > { %v11096_v36 = vpack.c.bf16 %v1049_v24, %v1048_v59  ;;  %v850_v32 = vpop.f32.mrb[52].mxu0 }
 0x15a   : > { %v11099_v53 = vadd.f32 %v850_v32, %v10618_v7  ;;  %v11101_v61 = vpop.f32.mrb[53].mxu0  ;;  %1495 = vrot.lane.b32.xlu0 %v1163_v4, %s10090_s15 }
 0x15b   : > { %15040 = vst [vmem:[#allocation50_spill] sm:$0xff] %v11101_v61  ;;  %1449 = vrot.lane.b32.xlu1 %v11096_v36, %s10090_s15  ;;  %v854_v10 = vpop.f32.mrb[54].mxu0 }
 0x15c   : > { %15039 = vst [vmem:[#allocation49_spill] sm:$0xff] %v11099_v53  ;;  %v14933_v13 = vmax.f32 %v11099_v53, 0.0  ;;  %v11108_v54 = vadd.f32 %v854_v10, %v10618_v7  ;;  %v11110_v39 = vpop.f32.mrb[55].mxu0 }
 0x15d   : > { %15042 = vst [vmem:[#allocation52_spill] sm:$0xff] %v11110_v39  ;;  %v1144_v59 = vld [vmem:[#allocation3 + $0x138] sm:$0xff] }
 0x15e   : > { %15041 = vst [vmem:[#allocation51_spill] sm:$0xff] %v11108_v54  ;;  %970 = vst.msk [vmem:[#allocation3 + $0x151] sm:$0xff] %vm442_vm2, %v14933_v13  ;;  %v14934_v24 = vmax.f32 %v11108_v54, 0.0  ;;  %v1050_v32 = vld [vmem:[#allocation3 + $0x139] sm:$0xff]  ;;  %v9926_v13 = vld [vmem:[%s14898_s3 + $0xf8] sm:$0xff]  }
 0x15f   : > { %v1145_v14 = vld [vmem:[#allocation3 + $0x140] sm:$0xff]  ;;  %8936 = vmatprep.subr.bf16.mxu0 %v9926_v13 }
 0x160   : > { %v1051_v4 = vld [vmem:[#allocation3 + $0x141] sm:$0xff]  ;;  %971 = vst.msk [vmem:[#allocation3 + $0x159] sm:$0xff] %vm442_vm2, %v14934_v24  ;;  %v1164_v31 = vpack.c.bf16 %v1145_v14, %v1144_v59 }
 0x161   : > { %v11119_v61 = vpack.c.bf16 %v1051_v4, %v1050_v32  ;;  %v860_v10 = vpop.f32.mrb[56].mxu0  ;;  %v9927_v59 = vld [vmem:[%s14898_s3 + $0xb8] sm:$0xff]  }
 0x162   : > { %v11122_v39 = vadd.f32 %v860_v10, %v10618_v7  ;;  %v11124_v22 = vpop.f32.mrb[57].mxu0  ;;  %1497 = vrot.lane.b32.xlu0 %v1164_v31, %s10090_s15  ;;  %8937 = vmatpush3.bf16.msra.mxu0 %v9927_v59 }
 0x163   : > { %15044 = vst [vmem:[#allocation54_spill] sm:$0xff] %v11124_v22  ;;  %1451 = vrot.lane.b32.xlu1 %v11119_v61, %s10090_s15  ;;  %v864_v14 = vpop.f32.mrb[58].mxu0 }
 0x164   : > { %15043 = vst [vmem:[#allocation53_spill] sm:$0xff] %v11122_v39  ;;  %v14935_v32 = vmax.f32 %v11122_v39, 0.0  ;;  %v11137_v4 = vadd.f32 %v864_v14, %v10618_v7  ;;  %v11139_v10 = vpop.f32.mrb[59].mxu0  ;;  %v1217_v39 = vld [vmem:[#allocation3 + $0x22] sm:$0xff] }
 0x165   : > { %15046 = vst [vmem:[#allocation56_spill] sm:$0xff] %v11139_v10  ;;  %v1146_v24 = vld [vmem:[#allocation3 + $0x150] sm:$0xff] }
 0x166   : > { %15045 = vst [vmem:[#allocation55_spill] sm:$0xff] %v11137_v4  ;;  %972 = vst.msk [vmem:[#allocation3 + $0x169] sm:$0xff] %vm442_vm2, %v14935_v32  ;;  %v14937_v31 = vmax.f32 %v11137_v4, 0.0  ;;  %v1052_v58 = vld [vmem:[#allocation3 + $0x151] sm:$0xff]  ;;  %v977_v4 = vld [vmem:[#allocation3 + $0x8] sm:$0xff] }
 0x167   : > { %v1147_v22 = vld [vmem:[#allocation3 + $0x158] sm:$0xff] }
 0x168   : > { %v1053_v45 = vld [vmem:[#allocation3 + $0x159] sm:$0xff]  ;;  %973 = vst.msk [vmem:[#allocation3 + $0x171] sm:$0xff] %vm442_vm2, %v14937_v31  ;;  %v1165_v14 = vpack.c.bf16 %v1147_v22, %v1146_v24  ;;  %v1072_v24 = vld [vmem:[#allocation3 + $0x2] sm:$0xff] }
 0x169   : > { %v11148_v28 = vpack.c.bf16 %v1053_v45, %v1052_v58  ;;  %v870_v10 = vpop.f32.mrb[60].mxu0 }
 0x16a   : > { %v11151_v13 = vadd.f32 %v870_v10, %v10618_v7  ;;  %v11153_v59 = vpop.f32.mrb[61].mxu0  ;;  %1499 = vrot.lane.b32.xlu0 %v1165_v14, %s10090_s15  ;;  %v1073_v10 = vld [vmem:[#allocation3 + $0xa] sm:$0xff] }
 0x16b   : > { %15048 = vst [vmem:[#allocation58_spill] sm:$0xff] %v11153_v59  ;;  %1453 = vrot.lane.b32.xlu1 %v11148_v28, %s10090_s15  ;;  %v874_v32 = vpop.f32.mrb[62].mxu0 }
 0x16c   : > { %15047 = vst [vmem:[#allocation57_spill] sm:$0xff] %v11151_v13  ;;  %v14940_v18 = vmax.f32 %v11151_v13, 0.0  ;;  %v11160_v63 = vadd.f32 %v874_v32, %v10618_v7  ;;  %v11162_v22 = vpop.f32.mrb[63].mxu0  ;;  %v1216_v13 = vld [vmem:[#allocation3 + $0x1a] sm:$0xff] }
 0x16d   : > { %15050 = vst [vmem:[#allocation60_spill] sm:$0xff] %v11162_v22  ;;  %v1148_v58 = vld [vmem:[#allocation3 + $0x168] sm:$0xff]  ;;  %v1104_v22 = vpack.c.bf16 %v1073_v10, %v1072_v24  ;;  %v1248_v54 = vpack.c.bf16 %v1217_v39, %v1216_v13  ;;  %v9920_v39 = vld [vmem:[%s14898_s3 + $0x110] sm:$0xff]  }
 0x16e   : > { %15049 = vst [vmem:[#allocation59_spill] sm:$0xff] %v11160_v63  ;;  %974 = vst.msk [vmem:[#allocation3 + $0x181] sm:$0xff] %vm442_vm2, %v14940_v18  ;;  %v14945_v45 = vmax.f32 %v11160_v63, 0.0  ;;  %v1054_v31 = vld [vmem:[#allocation3 + $0x169] sm:$0xff]  ;;  %v976_v18 = vld [vmem:[#allocation3] sm:$0xff] }
 0x16f   : > { %v1149_v14 = vld [vmem:[#allocation3 + $0x170] sm:$0xff] }
 0x170   : > { %v1055_v59 = vld [vmem:[#allocation3 + $0x171] sm:$0xff]  ;;  %975 = vst.msk [vmem:[#allocation3 + $0x189] sm:$0xff] %vm442_vm2, %v14945_v45  ;;  %v11171_v7 = vpack.c.bf16 %v1149_v14, %v1148_v58  ;;  %v1008_v45 = vpack.c.bf16 %v977_v4, %v976_v18 }
 0x171   : > { %v11173_v32 = vpack.c.bf16 %v1055_v59, %v1054_v31  ;;  %v1218_v31 = vld [vmem:[#allocation3 + $0x32] sm:$0xff]  ;;  %v1219_v59 = vld [vmem:[#allocation3 + $0x3a] sm:$0xff] }
 0x172   : > { %1501 = vrot.lane.b32.xlu0 %v11171_v7, %s10090_s15  ;;  %v11185_v47 = vpack.c.bf16 %v1219_v59, %v1218_v31  ;;  %v1221_v18 = vld [vmem:[#allocation3 + $0x52] sm:$0xff]  ;;  %v1225_v59 = vld [vmem:[#allocation3 + $0x82] sm:$0xff] }
 0x173   : > { %1455 = vrot.lane.b32.xlu1 %v11173_v32, %s10090_s15 }
 0x174   : > { %v1474_v53 = vpop.permute.xlu0 %1473 }
 0x175   : > { %v1667_v63 = vsel %vm442_vm2, %v1104_v22, %v1474_v53  ;;  %v1150_v58 = vld [vmem:[#allocation3 + $0x180] sm:$0xff]  ;;  %v1223_v22 = vld [vmem:[#allocation3 + $0x6a] sm:$0xff] }
 0x176   : > { %2232 = vmatprep.mubr.bf16.mxu1 %v1667_v63  ;;  %v1220_v63 = vld [vmem:[#allocation3 + $0x4a] sm:$0xff] }
 0x177   : > { %1521 = vrot.lane.b32.xlu1 %v1248_v54, %s10090_s15  ;;  %v1151_v24 = vld [vmem:[#allocation3 + $0x188] sm:$0xff]  ;;  %v11195_v13 = vpack.c.bf16 %v1221_v18, %v1220_v63 }
 0x178   : > { %v1426_v10 = vpop.permute.xlu0 %1425  ;;  %v1167_v14 = vpack.c.bf16 %v1151_v24, %v1150_v58  ;;  %v1228_v18 = vld [vmem:[#allocation3 + $0xaa] sm:$0xff] }
 0x179   : > { %v1603_v62 = vsel %vm442_vm2, %v1008_v45, %v1426_v10  ;;  %v9925_v45 = vld [vmem:[%s14898_s3 + $0x118] sm:$0xff]  }
 0x17a   : > { %1503 = vrot.lane.b32.xlu0 %v1167_v14, %s10090_s15  ;;  %2233 = vmatmul.mubr.bf16.vlgmr.msra.gmra.mrb[0].mxu1 %v1603_v62  ;;  %v1222_v62 = vld [vmem:[#allocation3 + $0x62] sm:$0xff] }
 0x17b   : > { %1523 = vrot.lane.b32.xlu1 %v11185_v47, %s10090_s15  ;;  %9675 = vmatpush3.bf16.msra.mxu1 %v10679_v35  ;;  %v11204_v31 = vpack.c.bf16 %v1223_v22, %v1222_v62  ;;  %v1231_v22 = vld [vmem:[#allocation3 + $0xca] sm:$0xff] }
 0x17c   : > { %v1476_v53 = vpop.permute.xlu1 %1475  ;;  %9676 = vmatprep.subr.bf16.mxu1 %v9915_v46 }
 0x17d   : > { %v1671_v4 = vsel %vm442_vm2, %v1248_v54, %v1476_v53  ;;  %v1229_v53 = vld [vmem:[#allocation3 + $0xb2] sm:$0xff] }
 0x17e   : > { %1569 = vrot.lane.b32.xlu0 %v10734_v3, %s10090_s15  ;;  %2240 = vmatprep.mubr.bf16.mxu1 %v1671_v4  ;;  %v1224_v3 = vld [vmem:[#allocation3 + $0x7a] sm:$0xff] }
 0x17f   : > { %1525 = vrot.lane.b32.xlu1 %v11195_v13, %s10090_s15  ;;  %9677 = vmatpush3.bf16.msra.mxu1 %v9915_v46  ;;  %v11212_v58 = vpack.c.bf16 %v1225_v59, %v1224_v3 }
 0x180   : > { %v1428_v35 = vpop.permute.xlu1 %1427  ;;  %9678 = vmatprep.subr.bf16.mxu1 %v9920_v39 }
 0x181   : > { %v1607_v54 = vsel %vm442_vm2, %v10674_v34, %v1428_v35  ;;  %v1226_v34 = vld [vmem:[#allocation3 + $0x92] sm:$0xff] }
 0x182   : > { %1571 = vrot.lane.b32.xlu0 %v10757_v25, %s10090_s15  ;;  %2241 = vmatmul.mubr.bf16.gmra.mrb[4].mxu1 %v1607_v54  ;;  %v1227_v25 = vld [vmem:[#allocation3 + $0x9a] sm:$0xff]  ;;  %v1233_v54 = vld [vmem:[#allocation3 + $0xe2] sm:$0xff] }
 0x183   : > { %1527 = vrot.lane.b32.xlu1 %v11204_v31, %s10090_s15  ;;  %9679 = vmatpush3.bf16.msra.mxu1 %v9920_v39  ;;  %v11220_v14 = vpack.c.bf16 %v1227_v25, %v1226_v34  ;;  %v11228_v39 = vpack.c.bf16 %v1229_v53, %v1228_v18  ;;  %v1236_v34 = vld [vmem:[#allocation3 + $0x10a] sm:$0xff]  ;;  %v1237_v25 = vld [vmem:[#allocation3 + $0x112] sm:$0xff] }
 0x184   : > { %v1478_v46 = vpop.permute.xlu0 %1477  ;;  %9680 = vmatprep.subr.bf16.mxu1 %v9925_v45  ;;  %v1430_v10 = vpop.permute.xlu1 %1429 }
 0x185   : > { %v1675_v24 = vsel %vm442_vm2, %v11185_v47, %v1478_v46  ;;  %v1611_v63 = vsel %vm442_vm2, %v10709_v49, %v1430_v10  ;;  %v1230_v49 = vld [vmem:[#allocation3 + $0xc2] sm:$0xff] }
 0x186   : > { %1573 = vrot.lane.b32.xlu0 %v10770_v40, %s10090_s15  ;;  %2248 = vmatprep.mubr.bf16.mxu1 %v1675_v24  ;;  %v1235_v24 = vld [vmem:[#allocation3 + $0xfa] sm:$0xff] }
 0x187   : > { %1529 = vrot.lane.b32.xlu1 %v11212_v58, %s10090_s15  ;;  %9681 = vmatpush3.bf16.msra.mxu1 %v9925_v45  ;;  %v1232_v45 = vld [vmem:[#allocation3 + $0xda] sm:$0xff] }
 0x188   : > { %v1432_v62 = vpop.permute.xlu1 %1431  ;;  %v11244_v3 = vpack.c.bf16 %v1233_v54, %v1232_v45  ;;  %v1243_v54 = vld [vmem:[#allocation3 + $0x15a] sm:$0xff] }
 0x189   : > { %v1615_v35 = vsel %vm442_vm2, %v10732_v2, %v1432_v62  ;;  %v1234_v2 = vld [vmem:[#allocation3 + $0xf2] sm:$0xff]  ;;  %v1240_v62 = vld [vmem:[#allocation3 + $0x13a] sm:$0xff] }
 0x18a   : > { %1575 = vrot.lane.b32.xlu0 %v10796_v5, %s10090_s15  ;;  %2249 = vmatmul.mubr.bf16.gmra.mrb[8].mxu1 %v1611_v63  ;;  %v11236_v5 = vpack.c.bf16 %v1231_v22, %v1230_v49  ;;  %v11260_v63 = vpack.c.bf16 %v1237_v25, %v1236_v34  ;;  %v1241_v49 = vld [vmem:[#allocation3 + $0x142] sm:$0xff]  ;;  %v1247_v34 = vld [vmem:[#allocation3 + $0x18a] sm:$0xff]  ;;  %v2845_v25 = vld [vmem:[#allocation4 + $0xa] sm:$0xff] }
 0x18b   : > { %1531 = vrot.lane.b32.xlu1 %v11220_v14, %s10090_s15  ;;  %v11276_v22 = vpack.c.bf16 %v1241_v49, %v1240_v62 }
 0x18c   : > { %v1480_v40 = vpop.permute.xlu0 %1479 }
 0x18d   : > { %v1679_v4 = vsel %vm442_vm2, %v11195_v13, %v1480_v40  ;;  %v1434_v46 = vpop.permute.xlu1 %1433  ;;  %v1239_v40 = vld [vmem:[#allocation3 + $0x12a] sm:$0xff] }
 0x18e   : > { %1577 = vrot.lane.b32.xlu0 %v10828_v6, %s10090_s15  ;;  %2256 = vmatprep.mubr.bf16.mxu1 %v1679_v4  ;;  %v1619_v10 = vsel %vm442_vm2, %v10768_v37, %v1434_v46  ;;  %v1238_v37 = vld [vmem:[#allocation3 + $0x122] sm:$0xff]  ;;  %v1245_v46 = vld [vmem:[#allocation3 + $0x172] sm:$0xff] }
 0x18f   : > { %1533 = vrot.lane.b32.xlu1 %v11228_v39, %s10090_s15 }
 0x192   : > { %1579 = vrot.lane.b32.xlu0 %v10962_v19, %s10090_s15  ;;  %2257 = vmatmul.mubr.bf16.gmra.mrb[12].mxu1 %v1615_v35  ;;  %v11252_v19 = vpack.c.bf16 %v1235_v24, %v1234_v2 }
 0x193   : > { %1535 = vrot.lane.b32.xlu1 %v11236_v5, %s10090_s15 }
 0x194   : > { %v1482_v6 = vpop.permute.xlu0 %1481 }
 0x195   : > { %v1683_v59 = vsel %vm442_vm2, %v11204_v31, %v1482_v6  ;;  %v1436_v53 = vpop.permute.xlu1 %1435 }
 0x196   : > { %1581 = vrot.lane.b32.xlu0 %v10992_v60, %s10090_s15  ;;  %2264 = vmatprep.mubr.bf16.mxu1 %v1683_v59  ;;  %v1623_v4 = vsel %vm442_vm2, %v10794_v1, %v1436_v53  ;;  %v1242_v1 = vld [vmem:[#allocation3 + $0x152] sm:$0xff]  ;;  %v1244_v59 = vld [vmem:[#allocation3 + $0x16a] sm:$0xff] }
 0x197   : > { %1537 = vrot.lane.b32.xlu1 %v11244_v3, %s10090_s15  ;;  %v11292_v2 = vpack.c.bf16 %v1245_v46, %v1244_v59  ;;  %v1342_v53 = vld [vmem:[#allocation3 + $0x189] sm:$0xff] }
 0x19a   : > { %1583 = vrot.lane.b32.xlu0 %v11018_v16, %s10090_s15  ;;  %2265 = vmatmul.mubr.bf16.gmra.mrb[16].mxu1 %v1619_v10  ;;  %v11268_v16 = vpack.c.bf16 %v1239_v40, %v1238_v37  ;;  %v1343_v40 = vld [vmem:[#allocation3 + $0x199] sm:$0xff] }
 0x19b   : > { %1539 = vrot.lane.b32.xlu1 %v11252_v19, %s10090_s15 }
 0x19c   : > { %v1484_v60 = vpop.permute.xlu0 %1483 }
 0x19d   : > { %v1687_v18 = vsel %vm442_vm2, %v11212_v58, %v1484_v60  ;;  %v1438_v45 = vpop.permute.xlu1 %1437 }
 0x19e   : > { %1585 = vrot.lane.b32.xlu0 %v11044_v29, %s10090_s15  ;;  %2272 = vmatprep.mubr.bf16.mxu1 %v1687_v18  ;;  %v1627_v6 = vsel %vm442_vm2, %v10826_v0, %v1438_v45  ;;  %v1246_v0 = vld [vmem:[#allocation3 + $0x182] sm:$0xff] }
 0x19f   : > { %1541 = vrot.lane.b32.xlu1 %v11260_v63, %s10090_s15  ;;  %v11300_v60 = vpack.c.bf16 %v1247_v34, %v1246_v0  ;;  %v992_v45 = vld [vmem:[#allocation3 + $0xc0] sm:$0xff] }
 0x1a2   : > { %1587 = vrot.lane.b32.xlu0 %v11067_v26, %s10090_s15  ;;  %2273 = vmatmul.mubr.bf16.gmra.mrb[20].mxu1 %v1623_v4  ;;  %v11284_v26 = vpack.c.bf16 %v1243_v54, %v1242_v1  ;;  %v1344_v4 = vld [vmem:[#allocation3 + $0x1a1] sm:$0xff]  ;;  %v2796_v54 = vld [vmem:[#allocation4 + $0x1] sm:$0xff] }
 0x1a3   : > { %1543 = vrot.lane.b32.xlu1 %v11268_v16, %s10090_s15 }
 0x1a4   : > { %v1486_v29 = vpop.permute.xlu0 %1485 }
 0x1a5   : > { %v1691_v35 = vsel %vm442_vm2, %v11220_v14, %v1486_v29  ;;  %v1440_v10 = vpop.permute.xlu1 %1439  ;;  %v993_v29 = vld [vmem:[#allocation3 + $0xc8] sm:$0xff] }
 0x1a6   : > { %1589 = vrot.lane.b32.xlu0 %v11096_v36, %s10090_s15  ;;  %2280 = vmatprep.mubr.bf16.mxu1 %v1691_v35  ;;  %v1631_v18 = vsel %vm442_vm2, %v10960_v55, %v1440_v10  ;;  %v11315_v1 = vpack.c.bf16 %v993_v29, %v992_v45  ;;  %v995_v10 = vld [vmem:[#allocation3 + $0xe0] sm:$0xff]  ;;  %v998_v45 = vld [vmem:[#allocation3 + $0x108] sm:$0xff] }
 0x1a7   : > { %1545 = vrot.lane.b32.xlu1 %v11276_v22, %s10090_s15 }
 0x1aa   : > { %1591 = vrot.lane.b32.xlu0 %v11119_v61, %s10090_s15  ;;  %2281 = vmatmul.mubr.bf16.gmra.mrb[24].mxu1 %v1627_v6  ;;  %v2844_v61 = vld [vmem:[#allocation4 + $0x2] sm:$0xff] }
 0x1ab   : > { %1547 = vrot.lane.b32.xlu1 %v11284_v26, %s10090_s15  ;;  %v2876_v37 = vpack.c.bf16 %v2845_v25, %v2844_v61  ;;  %v2797_v6 = vld [vmem:[#allocation4 + $0x9] sm:$0xff] }
 0x1ac   : > { %v1488_v36 = vpop.permute.xlu0 %1487  ;;  %v2828_v46 = vpack.c.bf16 %v2797_v6, %v2796_v54  ;;  %v994_v61 = vld [vmem:[#allocation3 + $0xd8] sm:$0xff] }
 0x1ad   : > { %v1695_v24 = vsel %vm442_vm2, %v11228_v39, %v1488_v36  ;;  %v1442_v55 = vpop.permute.xlu1 %1441  ;;  %v15051_v36 = vmax.f32 %v10639_v17, 0.0  ;;  %v11326_v25 = vpack.c.bf16 %v995_v10, %v994_v61  ;;  %v15052_v17 = vmax.f32 %v10630_v12, 0.0  ;;  %v1000_v10 = vld [vmem:[#allocation3 + $0x120] sm:$0xff] }
 0x1ae   : > { %1593 = vrot.lane.b32.xlu0 %v11148_v28, %s10090_s15  ;;  %2288 = vmatprep.mubr.bf16.mxu1 %v1695_v24  ;;  %v1341_v28 = vld [vmem:[#allocation3 + $0x181] sm:$0xff]  ;;  %v1635_v59 = vsel %vm442_vm2, %v11315_v1, %v1442_v55  ;;  %v999_v55 = vld [vmem:[#allocation3 + $0x110] sm:$0xff] }
 0x1af   : > { %1549 = vrot.lane.b32.xlu1 %v11292_v2, %s10090_s15  ;;  %v11308_v49 = vpack.c.bf16 %v1342_v53, %v1341_v28  ;;  %v997_v28 = vld [vmem:[#allocation3 + $0xf8] sm:$0xff]  ;;  %v11341_v54 = vpack.c.bf16 %v999_v55, %v998_v45 }
 0x1b0   : > { %v1005_v55 = vld [vmem:[#allocation3 + $0x158] sm:$0xff] }
 0x1b2   : > { %1595 = vrot.lane.b32.xlu0 %v11173_v32, %s10090_s15  ;;  %2289 = vmatmul.mubr.bf16.gmra.mrb[28].mxu1 %v1631_v18  ;;  %v1360_v32 = vpack.c.bf16 %v1344_v4, %v1343_v40  ;;  %v996_v4 = vld [vmem:[#allocation3 + $0xf0] sm:$0xff] }
 0x1b3   : > { %1551 = vrot.lane.b32.xlu1 %v11300_v60, %s10090_s15 }
 0x1b4   : > { %v1490_v62 = vpop.permute.xlu0 %1489 }
 0x1b5   : > { %v1699_v35 = vsel %vm442_vm2, %v11236_v5, %v1490_v62  ;;  %v1444_v34 = vpop.permute.xlu1 %1443  ;;  %v11335_v62 = vpack.c.bf16 %v997_v28, %v996_v4  ;;  %v1002_v28 = vld [vmem:[#allocation3 + $0x138] sm:$0xff] }
 0x1b6   : > { %1597 = vrot.lane.b32.xlu0 %v11308_v49, %s10090_s15  ;;  %2296 = vmatprep.mubr.bf16.mxu1 %v1699_v35  ;;  %v1639_v18 = vsel %vm442_vm2, %v11326_v25, %v1444_v34 }
 0x1b7   : > { %3245 = vrot.lane.b32.xlu1 %v2876_v37, %s10090_s15 }
 0x1ba   : > { %1599 = vrot.lane.b32.xlu0 %v1360_v32, %s10090_s15  ;;  %2297 = vmatmul.mubr.bf16.gmra.mrb[32].mxu1 %v1635_v59 }
 0x1bb   : > { %4986 = vrot.lane.b32.xlu1 %v15051_v36, %s10090_s15 }
 0x1bc   : > { %v1492_v24 = vpop.permute.xlu0 %1491 }
 0x1bd   : > { %v1703_v0 = vsel %vm442_vm2, %v11244_v3, %v1492_v24  ;;  %v1446_v40 = vpop.permute.xlu1 %1445 }
 0x1be   : > { %3197 = vrot.lane.b32.xlu0 %v2828_v46, %s10091_s30  ;;  %2304 = vmatprep.mubr.bf16.mxu1 %v1703_v0  ;;  %v1643_v29 = vsel %vm442_vm2, %v11335_v62, %v1446_v40  ;;  %v1001_v46 = vld [vmem:[#allocation3 + $0x128] sm:$0xff] }
 0x1bf   : > { %v11347_v0 = vpack.c.bf16 %v1001_v46, %v1000_v10 }
 0x1c2   : > { %4984 = vrot.lane.b32.xlu0 %v15052_v17, %s10090_s15  ;;  %2305 = vmatmul.mubr.bf16.gmra.mrb[36].mxu1 %v1639_v18  ;;  %v1003_v17 = vld [vmem:[#allocation3 + $0x140] sm:$0xff] }
 0x1c4   : > { %v1494_v53 = vpop.permute.xlu0 %1493 }
 0x1c5   : > { %v1707_v37 = vsel %vm442_vm2, %v11252_v19, %v1494_v53  ;;  %v1448_v32 = vpop.permute.xlu1 %1447 }
 0x1c6   : > { %2312 = vmatprep.mubr.bf16.mxu1 %v1707_v37  ;;  %v1647_v6 = vsel %vm442_vm2, %v11341_v54, %v1448_v32  ;;  %v11353_v37 = vpack.c.bf16 %v1003_v17, %v1002_v28  ;;  %v1004_v32 = vld [vmem:[#allocation3 + $0x150] sm:$0xff] }
 0x1c7   : > { %v11359_v45 = vpack.c.bf16 %v1005_v55, %v1004_v32  ;;  %v1267_v32 = vld [vmem:[#allocation3 + $0x48] sm:$0xff] }
 0x1ca   : > { %2313 = vmatmul.mubr.bf16.gmra.mrb[40].mxu1 %v1643_v29 }
 0x1cc   : > { %v1496_v35 = vpop.permute.xlu0 %1495 }
 0x1cd   : > { %v1711_v12 = vsel %vm442_vm2, %v11260_v63, %v1496_v35  ;;  %v1450_v24 = vpop.permute.xlu1 %1449 }
 0x1ce   : > { %2320 = vmatprep.mubr.bf16.mxu1 %v1711_v12  ;;  %v1651_v34 = vsel %vm442_vm2, %v11347_v0, %v1450_v24  ;;  %v1169_v24 = vld [vmem:[#allocation3 + $0x21] sm:$0xff] }
 0x1d2   : > { %2321 = vmatmul.mubr.bf16.gmra.mrb[44].mxu1 %v1647_v6 }
 0x1d4   : > { %v1498_v59 = vpop.permute.xlu0 %1497 }
 0x1d5   : > { %v1715_v36 = vsel %vm442_vm2, %v11268_v16, %v1498_v59  ;;  %v1452_v61 = vpop.permute.xlu1 %1451 }
 0x1d6   : > { %2328 = vmatprep.mubr.bf16.mxu1 %v1715_v36  ;;  %v1655_v4 = vsel %vm442_vm2, %v11353_v37, %v1452_v61  ;;  %v1266_v36 = vld [vmem:[#allocation3 + $0x38] sm:$0xff]  ;;  %v1265_v61 = vld [vmem:[#allocation3 + $0x30] sm:$0xff] }
 0x1d7   : > { %v1297_v17 = vpack.c.bf16 %v1266_v36, %v1265_v61  ;;  %v1270_v61 = vld [vmem:[#allocation3 + $0x68] sm:$0xff] }
 0x1da   : > { %2329 = vmatmul.mubr.bf16.gmra.mrb[48].mxu1 %v1651_v34 }
 0x1dc   : > { %v1500_v18 = vpop.permute.xlu0 %1499 }
 0x1dd   : > { %v1719_v53 = vsel %vm442_vm2, %v11276_v22, %v1500_v18  ;;  %v1454_v40 = vpop.permute.xlu1 %1453  ;;  %v1168_v18 = vld [vmem:[#allocation3 + $0x19] sm:$0xff] }
 0x1de   : > { %2336 = vmatprep.mubr.bf16.mxu1 %v1719_v53  ;;  %v1659_v59 = vsel %vm442_vm2, %v11359_v45, %v1454_v40  ;;  %v1200_v53 = vpack.c.bf16 %v1169_v24, %v1168_v18 }
 0x1e2   : > { %2337 = vmatmul.mubr.bf16.gmra.mrb[52].mxu1 %v1655_v4  ;;  %v1268_v4 = vld [vmem:[#allocation3 + $0x50] sm:$0xff] }
 0x1e4   : > { %v1502_v29 = vpop.permute.xlu0 %1501 }
 0x1e5   : > { %v1456_v35 = vpop.permute.xlu1 %1455  ;;  %v1723_v12 = vsel %vm442_vm2, %v11284_v26, %v1502_v29 }
 0x1e6   : > { %2344 = vmatprep.mubr.bf16.mxu1 %v1723_v12  ;;  %v1663_v55 = vsel %vm442_vm2, %v11171_v7, %v1456_v35  ;;  %v1170_v7 = vld [vmem:[#allocation3 + $0x31] sm:$0xff] }
 0x1e9   : > { %v1522_v6 = vpop.permute.xlu1 %1521 }
 0x1ea   : > { %2345 = vmatmul.mubr.bf16.gmra.mrb[56].mxu1 %v1659_v59  ;;  %v1731_v12 = vsel %vm442_vm2, %v1200_v53, %v1522_v6  ;;  %v1298_v59 = vpack.c.bf16 %v1268_v4, %v1267_v32  ;;  %v1172_v32 = vld [vmem:[#allocation3 + $0x49] sm:$0xff] }
 0x1ec   : > { %v1504_v46 = vpop.permute.xlu0 %1503 }
 0x1ed   : > { %v1524_v10 = vpop.permute.xlu1 %1523  ;;  %v1727_v34 = vsel %vm442_vm2, %v11292_v2, %v1504_v46 }
 0x1ee   : > { %2352 = vmatprep.mubr.bf16.mxu1 %v1727_v34  ;;  %v1171_v34 = vld [vmem:[#allocation3 + $0x39] sm:$0xff] }
 0x1ef   : > { %v1201_v18 = vpack.c.bf16 %v1171_v34, %v1170_v7 }
 0x1f0   : > { %v1570_v28 = vpop.permute.xlu0 %1569 }
 0x1f1   : > { %v1526_v29 = vpop.permute.xlu1 %1525  ;;  %v1795_v40 = vsel %vm442_vm2, %v1297_v17, %v1570_v28  ;;  %v1269_v17 = vld [vmem:[#allocation3 + $0x60] sm:$0xff]  ;;  %v1735_v28 = vsel %vm442_vm2, %v1201_v18, %v1524_v10  ;;  %v1274_v18 = vld [vmem:[#allocation3 + $0x98] sm:$0xff] }
 0x1f2   : > { %2353 = vmatmul.mubr.bf16.gmra.mrb[60].mxu1 %v1663_v55  ;;  %2393 = vmatprep.mubr.bf16.mxu0 %v1795_v40  ;;  %v1299_v53 = vpack.c.bf16 %v1270_v61, %v1269_v17  ;;  %v1173_v40 = vld [vmem:[#allocation3 + $0x51] sm:$0xff]  ;;  %v1174_v17 = vld [vmem:[#allocation3 + $0x61] sm:$0xff] }
 0x1f3   : > { %2394 = vmatmul.mubr.bf16.vlgmr.msra.gmra.mrb[64].mxu0 %v1731_v12  ;;  %9682 = vmatprep.mubr.msk.bf16.mxu1 %vm442_vm2, %v11185_v47  ;;  %v1272_v12 = vld [vmem:[#allocation3 + $0x80] sm:$0xff] }
 0x1f4   : > { %v1572_v46 = vpop.permute.xlu0 %1571 }
 0x1f5   : > { %v1528_v36 = vpop.permute.xlu1 %1527  ;;  %v1799_v24 = vsel %vm442_vm2, %v1298_v59, %v1572_v46  ;;  %v1202_v46 = vpack.c.bf16 %v1173_v40, %v1172_v32  ;;  %v1177_v32 = vld [vmem:[#allocation3 + $0x81] sm:$0xff] }
 0x1f6   : > { %2401 = vmatprep.mubr.bf16.mxu0 %v1799_v24  ;;  %v1271_v24 = vld [vmem:[#allocation3 + $0x78] sm:$0xff] }
 0x1f7   : > { %v1300_v61 = vpack.c.bf16 %v1272_v12, %v1271_v24  ;;  %v1176_v24 = vld [vmem:[#allocation3 + $0x79] sm:$0xff] }
 0x1f8   : > { %v1574_v35 = vpop.permute.xlu0 %1573 }
 0x1f9   : > { %v1530_v6 = vpop.permute.xlu1 %1529  ;;  %v1803_v47 = vsel %vm442_vm2, %v1299_v53, %v1574_v35  ;;  %v1175_v35 = vld [vmem:[#allocation3 + $0x69] sm:$0xff] }
 0x1fa   : > { %9683 = vmatmul.mubr.msk.bf16.vlgmr.msra.gmra.mrb[64].mxu1 %vm442_vm2, %v11195_v13  ;;  %v1739_v13 = vsel %vm442_vm2, %v1202_v46, %v1526_v29  ;;  %v1276_v46 = vld [vmem:[#allocation3 + $0xb0] sm:$0xff] }
 0x1fb   : > { %2402 = vmatmul.mubr.bf16.gmra.mrb[68].mxu0 %v1735_v28  ;;  %9686 = vmatprep.mubr.msk.bf16.mxu1 %vm442_vm2, %v11204_v31  ;;  %v1203_v28 = vpack.c.bf16 %v1175_v35, %v1174_v17  ;;  %v1179_v17 = vld [vmem:[#allocation3 + $0x99] sm:$0xff] }
 0x1fc   : > { %v1576_v4 = vpop.permute.xlu0 %1575  ;;  %2409 = vmatprep.mubr.bf16.mxu0 %v1803_v47  ;;  %v1273_v47 = vld [vmem:[#allocation3 + $0x90] sm:$0xff] }
 0x1fd   : > { %v1532_v55 = vpop.permute.xlu1 %1531  ;;  %v1807_v31 = vsel %vm442_vm2, %v1300_v61, %v1576_v4 }
 0x200   : > { %v1578_v59 = vpop.permute.xlu0 %1577 }
 0x201   : > { %v1534_v34 = vpop.permute.xlu1 %1533 }
 0x202   : > { %9687 = vmatmul.mubr.msk.bf16.gmra.mrb[68].mxu1 %vm442_vm2, %v11212_v58  ;;  %v1301_v58 = vpack.c.bf16 %v1274_v18, %v1273_v47 }
 0x203   : > { %2410 = vmatmul.mubr.bf16.gmra.mrb[72].mxu0 %v1739_v13  ;;  %9690 = vmatprep.mubr.msk.bf16.mxu1 %vm442_vm2, %v11220_v14  ;;  %v1743_v14 = vsel %vm442_vm2, %v1203_v28, %v1528_v36  ;;  %v1204_v13 = vpack.c.bf16 %v1177_v32, %v1176_v24  ;;  %v1178_v28 = vld [vmem:[#allocation3 + $0x91] sm:$0xff]  ;;  %v1180_v32 = vld [vmem:[#allocation3 + $0xa9] sm:$0xff] }
 0x204   : > { %v1580_v10 = vpop.permute.xlu0 %1579  ;;  %2417 = vmatprep.mubr.bf16.mxu0 %v1807_v31  ;;  %v1811_v29 = vsel %vm442_vm2, %v1301_v58, %v1578_v59  ;;  %v1275_v31 = vld [vmem:[#allocation3 + $0xa8] sm:$0xff]  ;;  %v1205_v58 = vpack.c.bf16 %v1179_v17, %v1178_v28 }
 0x205   : > { %v11384_v7 = vpop.permute.xlu1 %1535  ;;  %v1185_v28 = vld [vmem:[#allocation3 + $0xe1] sm:$0xff] }
 0x208   : > { %v1582_v53 = vpop.permute.xlu0 %1581 }
 0x209   : > { %v11386_v40 = vpop.permute.xlu1 %1537 }
 0x20a   : > { %9691 = vmatmul.mubr.msk.bf16.gmra.mrb[72].mxu1 %vm442_vm2, %v11228_v39  ;;  %v1302_v39 = vpack.c.bf16 %v1276_v46, %v1275_v31  ;;  %v1182_v31 = vld [vmem:[#allocation3 + $0xc1] sm:$0xff] }
 0x20b   : > { %2418 = vmatmul.mubr.bf16.gmra.mrb[76].mxu0 %v1743_v14  ;;  %9694 = vmatprep.mubr.msk.bf16.mxu1 %vm442_vm2, %v11236_v5  ;;  %v1747_v5 = vsel %vm442_vm2, %v1204_v13, %v1530_v6 }
 0x20c   : > { %v1584_v4 = vpop.permute.xlu0 %1583  ;;  %2425 = vmatprep.mubr.bf16.mxu0 %v1811_v29  ;;  %v1815_v36 = vsel %vm442_vm2, %v1302_v39, %v1580_v10  ;;  %v1181_v29 = vld [vmem:[#allocation3 + $0xb1] sm:$0xff] }
 0x20d   : > { %v11394_v12 = vpop.permute.xlu1 %1539  ;;  %v1206_v24 = vpack.c.bf16 %v1181_v29, %v1180_v32  ;;  %v1186_v29 = vld [vmem:[#allocation3 + $0xf1] sm:$0xff] }
 0x210   : > { %v1586_v61 = vpop.permute.xlu0 %1585 }
 0x211   : > { %v11396_v35 = vpop.permute.xlu1 %1541 }
 0x212   : > { %9695 = vmatmul.mubr.msk.bf16.gmra.mrb[76].mxu1 %vm442_vm2, %v11244_v3  ;;  %v1751_v3 = vsel %vm442_vm2, %v1205_v58, %v1532_v55  ;;  %v1184_v58 = vld [vmem:[#allocation3 + $0xd9] sm:$0xff] }
 0x213   : > { %2426 = vmatmul.mubr.bf16.gmra.mrb[80].mxu0 %v1747_v5  ;;  %9698 = vmatprep.mubr.msk.bf16.mxu1 %vm442_vm2, %v11252_v19  ;;  %v1819_v19 = vsel %vm442_vm2, %v11315_v1, %v1582_v53  ;;  %v1183_v53 = vld [vmem:[#allocation3 + $0xc9] sm:$0xff] }
 0x214   : > { %v1588_v59 = vpop.permute.xlu0 %1587  ;;  %2433 = vmatprep.mubr.bf16.mxu0 %v1815_v36  ;;  %v1207_v5 = vpack.c.bf16 %v1183_v53, %v1182_v31  ;;  %v1191_v31 = vld [vmem:[#allocation3 + $0x129] sm:$0xff] }
 0x215   : > { %v11404_v18 = vpop.permute.xlu1 %1543 }
 0x218   : > { %v1590_v47 = vpop.permute.xlu0 %1589 }
 0x219   : > { %v11406_v14 = vpop.permute.xlu1 %1545 }
 0x21a   : > { %9699 = vmatmul.mubr.msk.bf16.gmra.mrb[80].mxu1 %vm442_vm2, %v11260_v63  ;;  %v1755_v63 = vsel %vm442_vm2, %v1206_v24, %v1534_v34  ;;  %v1391_v34 = vld [vmem:[#allocation3 + $0x19a] sm:$0xff] }
 0x21b   : > { %2434 = vmatmul.mubr.bf16.gmra.mrb[84].mxu0 %v1751_v3  ;;  %9702 = vmatprep.mubr.msk.bf16.mxu1 %vm442_vm2, %v11268_v16  ;;  %v1823_v16 = vsel %vm442_vm2, %v11326_v25, %v1584_v4  ;;  %v1827_v25 = vsel %vm442_vm2, %v11335_v62, %v1586_v61  ;;  %v1392_v4 = vld [vmem:[#allocation3 + $0x1a2] sm:$0xff]  ;;  %v1831_v62 = vsel %vm442_vm2, %v11341_v54, %v1588_v59 }
 0x21c   : > { %v1592_v6 = vpop.permute.xlu0 %1591  ;;  %2441 = vmatprep.mubr.bf16.mxu0 %v1819_v19  ;;  %v1187_v19 = vld [vmem:[#allocation3 + $0xf9] sm:$0xff] }
 0x21d   : > { %v11415_v10 = vpop.permute.xlu1 %1547  ;;  %v1209_v32 = vpack.c.bf16 %v1187_v19, %v1186_v29  ;;  %v1839_v59 = vsel %vm442_vm2, %v11353_v37, %v1592_v6  ;;  %v1192_v37 = vld [vmem:[#allocation3 + $0x139] sm:$0xff] }
 0x21f   : > { %v1767_v24 = vsel %vm442_vm2, %v1209_v32, %v11394_v12  ;;  %v1194_v32 = vld [vmem:[#allocation3 + $0x151] sm:$0xff] }
 0x220   : > { %v1594_v46 = vpop.permute.xlu0 %1593 }
 0x221   : > { %v11417_v13 = vpop.permute.xlu1 %1549 }
 0x222   : > { %9703 = vmatmul.mubr.msk.bf16.gmra.mrb[84].mxu1 %vm442_vm2, %v11276_v22 }
 0x223   : > { %2442 = vmatmul.mubr.bf16.gmra.mrb[88].mxu0 %v1755_v63  ;;  %9706 = vmatprep.mubr.msk.bf16.mxu1 %vm442_vm2, %v11284_v26  ;;  %v1759_v26 = vsel %vm442_vm2, %v1207_v5, %v11384_v7  ;;  %v1208_v7 = vpack.c.bf16 %v1185_v28, %v1184_v58  ;;  %v1189_v63 = vld [vmem:[#allocation3 + $0x111] sm:$0xff]  ;;  %v1190_v5 = vld [vmem:[#allocation3 + $0x121] sm:$0xff] }
 0x224   : > { %v11426_v1 = vpop.permute.xlu0 %1595  ;;  %2449 = vmatprep.mubr.bf16.mxu0 %v1823_v16  ;;  %v1188_v16 = vld [vmem:[#allocation3 + $0x109] sm:$0xff] }
 0x225   : > { %v11428_v55 = vpop.permute.xlu1 %1551  ;;  %v1210_v53 = vpack.c.bf16 %v1189_v63, %v1188_v16  ;;  %v1293_v63 = vld [vmem:[#allocation3 + $0x180] sm:$0xff] }
 0x227   : > { %v1771_v54 = vsel %vm442_vm2, %v1210_v53, %v11396_v35  ;;  %v1292_v35 = vld [vmem:[#allocation3 + $0x170] sm:$0xff] }
 0x228   : > { %v11430_v39 = vpop.permute.xlu0 %1597 }
 0x229   : > { %v11432_v22 = vpop.permute.xlu1 %3245 }
 0x22a   : > { %9707 = vmatmul.mubr.msk.bf16.gmra.mrb[88].mxu1 %vm442_vm2, %v11292_v2  ;;  %v1408_v2 = vpack.c.bf16 %v1392_v4, %v1391_v34 }
 0x22b   : > { %2450 = vmatmul.mubr.bf16.gmra.mrb[92].mxu0 %v1759_v26  ;;  %9710 = vmatprep.mubr.msk.bf16.mxu1 %vm442_vm2, %v11300_v60  ;;  %v1763_v60 = vsel %vm442_vm2, %v1208_v7, %v11386_v40  ;;  %v1835_v40 = vsel %vm442_vm2, %v11347_v0, %v1590_v47  ;;  %v1211_v26 = vpack.c.bf16 %v1191_v31, %v1190_v5  ;;  %v1197_v5 = vld [vmem:[#allocation3 + $0x171] sm:$0xff] }
 0x22c   : > { %v11442_v36 = vpop.permute.xlu0 %1599  ;;  %2457 = vmatprep.mubr.bf16.mxu0 %v1827_v25  ;;  %v1843_v0 = vsel %vm442_vm2, %v11359_v45, %v1594_v46  ;;  %v1193_v25 = vld [vmem:[#allocation3 + $0x141] sm:$0xff] }
 0x22d   : > { %v4987_v17 = vpop.permute.xlu1 %4986  ;;  %v1775_v12 = vsel %vm442_vm2, %v1211_v26, %v11404_v18  ;;  %v1212_v28 = vpack.c.bf16 %v1193_v25, %v1192_v37  ;;  %v1196_v25 = vld [vmem:[#allocation3 + $0x169] sm:$0xff] }
 0x22e   : > { %5081 = vst.msk [vmem:[#allocation3 + $0x21] sm:$0xff] %vm442_vm2, %v4987_v17 }
 0x22f   : > { %v1779_v18 = vsel %vm442_vm2, %v1212_v28, %v11406_v14 }
 0x230   : > { %v11445_v3 = vpop.permute.xlu0 %3197 }
 0x232   : > { %9711 = vmatmul.mubr.msk.bf16.gmra.mrb[92].mxu1 %vm442_vm2, %v1408_v2  ;;  %v1291_v2 = vld [vmem:[#allocation3 + $0x168] sm:$0xff] }
 0x233   : > { %2458 = vmatmul.mubr.bf16.gmra.mrb[96].mxu0 %v1763_v60  ;;  %v1310_v7 = vpack.c.bf16 %v1292_v35, %v1291_v2  ;;  %v1195_v60 = vld [vmem:[#allocation3 + $0x159] sm:$0xff]  ;;  %v1214_v35 = vpack.c.bf16 %v1197_v5, %v1196_v25 }
 0x234   : > { %v4985_v61 = vpop.permute.xlu0 %4984  ;;  %2465 = vmatprep.mubr.bf16.mxu0 %v1831_v62 }
 0x235   : > { %5080 = vst.msk [vmem:[#allocation3 + $0x19] sm:$0xff] %vm442_vm2, %v4985_v61  ;;  %v1847_v45 = vsel %vm442_vm2, %v1310_v7, %v11426_v1  ;;  %v1294_v61 = vld [vmem:[#allocation3 + $0x188] sm:$0xff]  ;;  %v1296_v1 = vld [vmem:[#allocation3 + $0x1a0] sm:$0xff]  ;;  %v1787_v37 = vsel %vm442_vm2, %v1214_v35, %v11417_v13 }
 0x236   : > { %v1311_v53 = vpack.c.bf16 %v1294_v61, %v1293_v63 }
 0x23b   : > { %2466 = vmatmul.mubr.bf16.gmra.mrb[100].mxu0 %v1767_v24 }
 0x23c   : > { %2473 = vmatprep.mubr.bf16.mxu0 %v1835_v40  ;;  %v1213_v40 = vpack.c.bf16 %v1195_v60, %v1194_v32 }
 0x23e   : > { %v1783_v14 = vsel %vm442_vm2, %v1213_v40, %v11415_v10 }
 0x243   : > { %2474 = vmatmul.mubr.bf16.gmra.mrb[104].mxu0 %v1771_v54  ;;  %v1295_v54 = vld [vmem:[#allocation3 + $0x198] sm:$0xff] }
 0x244   : > { %2481 = vmatprep.mubr.bf16.mxu0 %v1839_v59  ;;  %v1851_v59 = vsel %vm442_vm2, %v1311_v53, %v11430_v39  ;;  %v1312_v26 = vpack.c.bf16 %v1296_v1, %v1295_v54 }
 0x246   : > { %v1855_v10 = vsel %vm442_vm2, %v1312_v26, %v11442_v36 }
 0x24b   : > { %2482 = vmatmul.mubr.bf16.gmra.mrb[108].mxu0 %v1775_v12 }
 0x24c   : > { %2489 = vmatprep.mubr.bf16.mxu0 %v1843_v0 }
 0x24d   : > { %v8826_v47 = vpop.f32.mrb[0].mxu1 }
 0x24e   : > { %v8827_v34 = vpop.f32.mrb[1].mxu1 }
 0x24f   : > { %v11465_v4 = vadd.f32 %v8827_v34, %v8826_v47  ;;  %v8829_v17 = vpop.f32.mrb[2].mxu1 }
 0x250   : > { %v8830_v6 = vpop.f32.mrb[3].mxu1 }
 0x251   : > { %v11467_v58 = vadd.f32 %v8830_v6, %v8829_v17 }
 0x253   : > { %2490 = vmatmul.mubr.bf16.gmra.mrb[112].mxu0 %v1779_v18 }
 0x254   : > { %2497 = vmatprep.mubr.bf16.mxu0 %v1847_v45  ;;  %v1791_v45 = vsel %vm442_vm2, %v11308_v49, %v11428_v55 }
 0x255   : > { %v8832_v46 = vpop.f32.mrb[4].mxu1 }
 0x256   : > { %v8833_v62 = vpop.f32.mrb[5].mxu1 }
 0x257   : > { %v11473_v19 = vadd.f32 %v8833_v62, %v8832_v46  ;;  %v8835_v29 = vpop.f32.mrb[6].mxu1 }
 0x258   : > { %v8836_v24 = vpop.f32.mrb[7].mxu1 }
 0x259   : > { %v11475_v16 = vadd.f32 %v8836_v24, %v8835_v29 }
 0x25b   : > { %2498 = vmatmul.mubr.bf16.gmra.mrb[116].mxu0 %v1783_v14 }
 0x25c   : > { %2505 = vmatprep.mubr.bf16.mxu0 %v1851_v59 }
 0x25d   : > { %v8838_v31 = vpop.f32.mrb[8].mxu1 }
 0x25e   : > { %v8839_v12 = vpop.f32.mrb[9].mxu1 }
 0x25f   : > { %v11481_v0 = vadd.f32 %v8839_v12, %v8838_v31  ;;  %v8841_v47 = vpop.f32.mrb[10].mxu1 }
 0x260   : > { %v8842_v34 = vpop.f32.mrb[11].mxu1 }
 0x261   : > { %v11483_v17 = vadd.f32 %v8842_v34, %v8841_v47 }
 0x263   : > { %2506 = vmatmul.mubr.bf16.gmra.mrb[120].mxu0 %v1787_v37 }
 0x264   : > { %2513 = vmatprep.mubr.bf16.mxu0 %v1855_v10 }
 0x265   : > { %v8844_v39 = vpop.f32.mrb[12].mxu1 }
 0x266   : > { %v8845_v6 = vpop.f32.mrb[13].mxu1 }
 0x267   : > { %v11489_v28 = vadd.f32 %v8845_v6, %v8844_v39  ;;  %v8847_v2 = vpop.f32.mrb[14].mxu1 }
 0x268   : > { %v8848_v7 = vpop.f32.mrb[15].mxu1 }
 0x269   : > { %v11491_v18 = vadd.f32 %v8848_v7, %v8847_v2 }
 0x26b   : > { %2514 = vmatmul.mubr.bf16.gmra.mrb[124].mxu0 %v1791_v45 }
 0x26d   : > { %v8850_v46 = vpop.f32.mrb[16].mxu1 }
 0x26e   : > { %v8851_v36 = vpop.f32.mrb[17].mxu1 }
 0x26f   : > { %v11496_v60 = vadd.f32 %v8851_v36, %v8850_v46  ;;  %v8853_v13 = vpop.f32.mrb[18].mxu1 }
 0x270   : > { %v8854_v62 = vpop.f32.mrb[19].mxu1 }
 0x271   : > { %v11498_v61 = vadd.f32 %v8854_v62, %v8853_v13 }
 0x275   : > { %v8856_v29 = vpop.f32.mrb[20].mxu1 }
 0x276   : > { %v8857_v32 = vpop.f32.mrb[21].mxu1 }
 0x277   : > { %v11500_v24 = vadd.f32 %v8857_v32, %v8856_v29  ;;  %v8859_v40 = vpop.f32.mrb[22].mxu1 }
 0x278   : > { %v8860_v63 = vpop.f32.mrb[23].mxu1 }
 0x279   : > { %v11502_v53 = vadd.f32 %v8860_v63, %v8859_v40 }
 0x27d   : > { %v8862_v14 = vpop.f32.mrb[24].mxu1 }
 0x27e   : > { %v8863_v54 = vpop.f32.mrb[25].mxu1 }
 0x27f   : > { %v11504_v49 = vadd.f32 %v8863_v54, %v8862_v14  ;;  %v8865_v55 = vpop.f32.mrb[26].mxu1 }
 0x280   : > { %v8866_v1 = vpop.f32.mrb[27].mxu1 }
 0x281   : > { %v11506_v59 = vadd.f32 %v8866_v1, %v8865_v55 }
 0x285   : > { %v8868_v31 = vpop.f32.mrb[28].mxu1 }
 0x286   : > { %v8869_v5 = vpop.f32.mrb[29].mxu1 }
 0x287   : > { %v11508_v26 = vadd.f32 %v8869_v5, %v8868_v31  ;;  %v8871_v12 = vpop.f32.mrb[30].mxu1 }
 0x288   : > { %v8872_v47 = vpop.f32.mrb[31].mxu1 }
 0x289   : > { %v11510_v25 = vadd.f32 %v8872_v47, %v8871_v12 }
 0x28d   : > { %v8874_v34 = vpop.f32.mrb[32].mxu1 }
 0x28e   : > { %v8875_v35 = vpop.f32.mrb[33].mxu1 }
 0x28f   : > { %v11512_v10 = vadd.f32 %v8875_v35, %v8874_v34  ;;  %v8877_v37 = vpop.f32.mrb[34].mxu1  ;;  %v9928_v34 = vld [vmem:[%s14900_s5 + $0x40] sm:$0xff]  }
 0x290   : > { %v8878_v39 = vpop.f32.mrb[35].mxu1  ;;  %9054 = vmatprep.subr.bf16.mxu1 %v9928_v34  ;;  %v9934_v34 = vld [vmem:[%s14900_s5 + $0x58] sm:$0xff]  }
 0x291   : > { %v11514_v6 = vadd.f32 %v8878_v39, %v8877_v37  ;;  %v9929_v37 = vld [vmem:[%s14900_s5] sm:$0xff]  }
 0x292   : > { %9055 = vmatpush3.bf16.msra.mxu1 %v9929_v37 }
 0x295   : > { %v8880_v2 = vpop.f32.mrb[36].mxu1 }
 0x296   : > { %v8881_v7 = vpop.f32.mrb[37].mxu1 }
 0x297   : > { %v11516_v45 = vadd.f32 %v8881_v7, %v8880_v2  ;;  %v8883_v46 = vpop.f32.mrb[38].mxu1 }
 0x298   : > { %v8884_v36 = vpop.f32.mrb[39].mxu1 }
 0x299   : > { %v11518_v13 = vadd.f32 %v8884_v36, %v8883_v46  ;;  %v9930_v36 = vld [vmem:[%s14900_s5 + $0x48] sm:$0xff]  }
 0x29a   : > { %9056 = vmatprep.subr.bf16.mxu1 %v9930_v36  ;;  %v9937_v36 = vld [vmem:[%s14900_s5 + $0x20] sm:$0xff]  }
 0x29d   : > { %v8886_v62 = vpop.f32.mrb[40].mxu1 }
 0x29e   : > { %v8887_v29 = vpop.f32.mrb[41].mxu1 }
 0x29f   : > { %v11520_v32 = vadd.f32 %v8887_v29, %v8886_v62  ;;  %v8889_v40 = vpop.f32.mrb[42].mxu1  ;;  %v9931_v62 = vld [vmem:[%s14900_s5 + $0x8] sm:$0xff]  }
 0x2a0   : > { %v8890_v63 = vpop.f32.mrb[43].mxu1  ;;  %9057 = vmatpush3.bf16.msra.mxu1 %v9931_v62 }
 0x2a1   : > { %v11522_v14 = vadd.f32 %v8890_v63, %v8889_v40  ;;  %v9932_v40 = vld [vmem:[%s14900_s5 + $0x50] sm:$0xff]  }
 0x2a2   : > { %9058 = vmatprep.subr.bf16.mxu1 %v9932_v40 }
 0x2a5   : > { %v8892_v54 = vpop.f32.mrb[44].mxu1 }
 0x2a6   : > { %v8893_v55 = vpop.f32.mrb[45].mxu1 }
 0x2a7   : > { %v11524_v1 = vadd.f32 %v8893_v55, %v8892_v54  ;;  %v8895_v31 = vpop.f32.mrb[46].mxu1  ;;  %v9933_v54 = vld [vmem:[%s14900_s5 + $0x10] sm:$0xff]  }
 0x2a8   : > { %v8896_v5 = vpop.f32.mrb[47].mxu1  ;;  %9059 = vmatpush3.bf16.msra.mxu1 %v9933_v54  ;;  %v9938_v54 = vld [vmem:[%s14900_s5 + $0x68] sm:$0xff]  }
 0x2a9   : > { %v11526_v12 = vadd.f32 %v8896_v5, %v8895_v31  ;;  %9060 = vmatprep.subr.bf16.mxu1 %v9934_v34  ;;  %v2749_v34 = vld [vmem:[#allocation4 + $0x8] sm:$0xff] }
 0x2ad   : > { %v8898_v47 = vpop.f32.mrb[48].mxu1 }
 0x2ae   : > { %v8899_v35 = vpop.f32.mrb[49].mxu1 }
 0x2af   : > { %v11534_v39 = vadd.f32 %v8899_v35, %v8898_v47  ;;  %v8901_v2 = vpop.f32.mrb[50].mxu1  ;;  %v9935_v35 = vld [vmem:[%s14900_s5 + $0x18] sm:$0xff]  }
 0x2b0   : > { %v8902_v7 = vpop.f32.mrb[51].mxu1  ;;  %9061 = vmatpush3.bf16.msra.mxu1 %v9935_v35 }
 0x2b1   : > { %v11536_v46 = vadd.f32 %v8902_v7, %v8901_v2  ;;  %v9936_v2 = vld [vmem:[%s14900_s5 + $0x60] sm:$0xff]  }
 0x2b2   : > { %9062 = vmatprep.subr.bf16.mxu1 %v9936_v2  ;;  %v9940_v2 = vld [vmem:[%s14900_s5 + $0x70] sm:$0xff]  }
 0x2b4   : > { %9063 = vmatpush3.bf16.msra.mxu1 %v9937_v36 }
 0x2b5   : > { %v8904_v29 = vpop.f32.mrb[52].mxu1  ;;  %9064 = vmatprep.subr.bf16.mxu1 %v9938_v54 }
 0x2b6   : > { %v8905_v63 = vpop.f32.mrb[53].mxu1 }
 0x2b7   : > { %v11550_v55 = vadd.f32 %v8905_v63, %v8904_v29  ;;  %v8907_v31 = vpop.f32.mrb[54].mxu1 }
 0x2b8   : > { %v8908_v5 = vpop.f32.mrb[55].mxu1 }
 0x2b9   : > { %v11552_v47 = vadd.f32 %v8908_v5, %v8907_v31  ;;  %v9939_v31 = vld [vmem:[%s14900_s5 + $0x28] sm:$0xff]   ;;  %v2748_v5 = vld [vmem:[#allocation4] sm:$0xff] }
 0x2ba   : > { %9065 = vmatpush3.bf16.msra.mxu1 %v9939_v31  ;;  %v2780_v30 = vpack.c.bf16 %v2749_v34, %v2748_v5 }
 0x2bb   : > { %9066 = vmatprep.subr.bf16.mxu1 %v9940_v2 }
 0x2bd   : > { %v8910_v37 = vpop.f32.mrb[56].mxu1 }
 0x2be   : > { %v8911_v7 = vpop.f32.mrb[57].mxu1 }
 0x2bf   : > { %v11566_v62 = vadd.f32 %v8911_v7, %v8910_v37  ;;  %v8913_v29 = vpop.f32.mrb[58].mxu1  ;;  %v11579_v37 = vld [vmem:[%s14899_s4] ss:$0 sm:$0xff] }
 0x2c0   : > { %v8914_v40 = vpop.f32.mrb[59].mxu1  ;;  %v2235_v56 = vadd.f32 %v11465_v4, %v11579_v37  ;;  %v2238_v34 = vadd.f32 %v11467_v58, %v11579_v37  ;;  %v9944_v4 = vld [vmem:[%s14900_s5 + $0x38] sm:$0xff]  }
 0x2c1   : > { %v11568_v63 = vadd.f32 %v8914_v40, %v8913_v29  ;;  %v9941_v29 = vld [vmem:[%s14900_s5 + $0x30] sm:$0xff]  }
 0x2c2   : > { %9067 = vmatpush3.bf16.msra.mxu1 %v9941_v29 }
 0x2c3   : > { %9068 = vmatprep.subr.bf16.mxu1 %v9942_v15 }
 0x2c5   : > { %v8916_v35 = vpop.f32.mrb[60].mxu1 }
 0x2c6   : > { %v8917_v7 = vpop.f32.mrb[61].mxu1  ;;  %v8938_v36 = vpop.f32.mrb[64].mxu0  ;;  %9069 = vmatpush3.bf16.msra.mxu1 %v9944_v4  ;;  %v9949_v4 = vld [vmem:[%s14900_s5 + $0x90] sm:$0xff]  }
 0x2c7   : > { %v11587_v40 = vadd.f32 %v8917_v7, %v8916_v35  ;;  %v8919_v54 = vpop.f32.mrb[62].mxu1  ;;  %v8939_v31 = vpop.f32.mrb[65].mxu0  ;;  %v9943_v35 = vld [vmem:[%s14900_s5 + $0xc0] sm:$0xff]   ;;  %v3534_v7 = vsel %vm442_vm2, %v11445_v3, %v11432_v22 }
 0x2c8   : > { %v8940_v20 = vadd.f32 %v8939_v31, %v8938_v36  ;;  %v8920_v43 = vpop.f32.mrb[63].mxu1  ;;  %v8941_v41 = vpop.f32.mrb[66].mxu0  ;;  %9166 = vmatprep.subr.bf16.mxu0 %v9943_v35  ;;  %4308 = vmatprep.mubr.bf16.mxu1 %v3534_v7 }
 0x2c9   : > { %v11591_v50 = vadd.f32 %v8920_v43, %v8919_v54  ;;  %v8942_v8 = vpop.f32.mrb[67].mxu0  ;;  %v9945_v43 = vld [vmem:[%s14900_s5 + $0x80] sm:$0xff]  }
 0x2ca   : > { %v8943_v2 = vadd.f32 %v8942_v8, %v8941_v41  ;;  %v2396_v5 = vadd.f32 %v8940_v20, %v2235_v56  ;;  %v3471_v20 = vsel %vm498_vm4, %v2780_v30, %v11445_v3  ;;  %9167 = vmatpush3.bf16.msra.mxu0 %v9945_v43  ;;  %v9946_v8 = vld [vmem:[%s14900_s5 + $0xc8] sm:$0xff]   ;;  %v2243_v30 = vadd.f32 %v11473_v19, %v11579_v37 }
 0x2cb   : > { %v9947_v41 = vld [vmem:[%s14900_s5 + $0x88] sm:$0xff]   ;;  %9168 = vmatprep.subr.bf16.mxu0 %v9946_v8  ;;  %4309 = vmatmul.mubr.bf16.vlgmr.msra.gmra.mrb[96].mxu1 %v3471_v20  ;;  %v2246_v20 = vadd.f32 %v11475_v16, %v11579_v37 }
 0x2cc   : > { %v2399_v56 = vadd.f32 %v8943_v2, %v2238_v34  ;;  %v9948_v34 = vld [vmem:[%s14900_s5 + $0xd0] sm:$0xff]  }
 0x2cd   : > { %v9684_v58 = vpop.f32.mrb[64].mxu1 }
 0x2ce   : > { %v8944_v36 = vpop.f32.mrb[68].mxu0  ;;  %v2556_v29 = vpop.f32.mrb[65].mxu1  ;;  %9169 = vmatpush3.bf16.msra.mxu0 %v9947_v41 }
 0x2cf   : > { %v2557_v15 = vadd.f32 %v2556_v29, %v2396_v5  ;;  %v8945_v54 = vpop.f32.mrb[69].mxu0  ;;  %v9685_v31 = vpop.f32.mrb[66].mxu1  ;;  %9170 = vmatprep.subr.bf16.mxu0 %v9948_v34 }
 0x2d0   : > { %v8946_v3 = vadd.f32 %v8945_v54, %v8944_v36  ;;  %v8947_v35 = vpop.f32.mrb[70].mxu0  ;;  %v2559_v2 = vpop.f32.mrb[67].mxu1  ;;  %v9950_v54 = vld [vmem:[%s14900_s5 + $0xd8] sm:$0xff]  }
 0x2d1   : > { %v2683_v43 = vmax.f32 %v2557_v15, 0.0  ;;  %v2560_v5 = vadd.f32 %v2559_v2, %v2399_v56  ;;  %v8948_v7 = vpop.f32.mrb[71].mxu0  ;;  %v9951_v56 = vld [vmem:[%s14900_s5 + $0x98] sm:$0xff]  }
 0x2d2   : > { %v2404_v8 = vadd.f32 %v8946_v3, %v2243_v30  ;;  %v8949_v19 = vadd.f32 %v8948_v7, %v8947_v35  ;;  %9171 = vmatpush3.bf16.msra.mxu0 %v9949_v4  ;;  %v2251_v4 = vadd.f32 %v11481_v0, %v11579_v37 }
 0x2d3   : > { %2716 = vst.msk [vmem:[#allocation4 + $0x19] sm:$0xff] %vm498_vm4, %v2683_v43  ;;  %v2684_v41 = vmax.f32 %v2560_v5, 0.0  ;;  %9172 = vmatprep.subr.bf16.mxu0 %v9950_v54 }
 0x2d4   : > { %v2565_v36 = vadd.f32 %v9684_v58, %v2404_v8  ;;  %v2407_v29 = vadd.f32 %v8949_v19, %v2246_v20  ;;  %v9952_v8 = vld [vmem:[%s14900_s5 + $0xe0] sm:$0xff]  }
 0x2d5   : > { %2717 = vst.msk [vmem:[#allocation4 + $0x21] sm:$0xff] %vm498_vm4, %v2684_v41  ;;  %v9688_v15 = vpop.f32.mrb[68].mxu1  ;;  %v2254_v41 = vadd.f32 %v11483_v17, %v11579_v37 }
 0x2d6   : > { %v2685_v16 = vmax.f32 %v2565_v36, 0.0  ;;  %v2568_v30 = vadd.f32 %v9685_v31, %v2407_v29  ;;  %v8950_v3 = vpop.f32.mrb[72].mxu0  ;;  %v2572_v35 = vpop.f32.mrb[69].mxu1  ;;  %9173 = vmatpush3.bf16.msra.mxu0 %v9951_v56  ;;  %v9953_v31 = vld [vmem:[%s14900_s5 + $0xa0] sm:$0xff]   ;;  %v9954_v56 = vld [vmem:[%s14900_s5 + $0xe8] sm:$0xff]  }
 0x2d7   : > { %v8951_v2 = vpop.f32.mrb[73].mxu0  ;;  %v9689_v58 = vpop.f32.mrb[70].mxu1  ;;  %9174 = vmatprep.subr.bf16.mxu0 %v9952_v8 }
 0x2d8   : > { %2718 = vst.msk [vmem:[#allocation4 + $0x31] sm:$0xff] %vm498_vm4, %v2685_v16  ;;  %v2686_v34 = vmax.f32 %v2568_v30, 0.0  ;;  %v8952_v43 = vadd.f32 %v8951_v2, %v8950_v3  ;;  %v8953_v5 = vpop.f32.mrb[74].mxu0  ;;  %v2575_v7 = vpop.f32.mrb[71].mxu1  ;;  %v9955_v16 = vld [vmem:[%s14900_s5 + $0xa8] sm:$0xff]  }
 0x2d9   : > { %v8954_v20 = vpop.f32.mrb[75].mxu0 }
 0x2da   : > { %2719 = vst.msk [vmem:[#allocation4 + $0x39] sm:$0xff] %vm498_vm4, %v2686_v34  ;;  %v2412_v19 = vadd.f32 %v8952_v43, %v2251_v4  ;;  %v8955_v0 = vadd.f32 %v8954_v20, %v8953_v5  ;;  %9175 = vmatpush3.bf16.msra.mxu0 %v9953_v31  ;;  %v2259_v43 = vadd.f32 %v11489_v28, %v11579_v37 }
 0x2db   : > { %9176 = vmatprep.subr.bf16.mxu0 %v9954_v56 }
 0x2dc   : > { %v2573_v36 = vadd.f32 %v2572_v35, %v2412_v19  ;;  %v2415_v29 = vadd.f32 %v8955_v0, %v2254_v41  ;;  %v9957_v19 = vld [vmem:[%s14900_s5 + $0xb0] sm:$0xff]   ;;  %v2262_v41 = vadd.f32 %v11491_v18, %v11579_v37 }
 0x2dd   : > { %v11648_v54 = vpop.f32.mrb[72].mxu1 }
 0x2de   : > { %v2687_v30 = vmax.f32 %v2573_v36, 0.0  ;;  %v2576_v3 = vadd.f32 %v2575_v7, %v2415_v29  ;;  %v8956_v2 = vpop.f32.mrb[76].mxu0  ;;  %v2588_v34 = vpop.f32.mrb[73].mxu1  ;;  %9177 = vmatpush3.bf16.msra.mxu0 %v9955_v16  ;;  %v9956_v7 = vld [vmem:[%s14900_s5 + $0xf0] sm:$0xff]  }
 0x2df   : > { %v8957_v17 = vpop.f32.mrb[77].mxu0  ;;  %v11656_v4 = vpop.f32.mrb[74].mxu1  ;;  %v2800_v20 = vld [vmem:[#allocation4 + $0x31] sm:$0xff]  ;;  %9178 = vmatprep.subr.bf16.mxu0 %v9956_v7 }
 0x2e0   : > { %2720 = vst.msk [vmem:[#allocation4 + $0x49] sm:$0xff] %vm498_vm4, %v2687_v30  ;;  %v2688_v35 = vmax.f32 %v2576_v3, 0.0  ;;  %v8958_v5 = vadd.f32 %v8957_v17, %v8956_v2  ;;  %v8959_v8 = vpop.f32.mrb[78].mxu0  ;;  %v2591_v31 = vpop.f32.mrb[75].mxu1  ;;  %v2894_v18 = vld [vmem:[#allocation4 + $0x30] sm:$0xff] }
 0x2e1   : > { %v8960_v0 = vpop.f32.mrb[79].mxu0  ;;  %v2848_v36 = vld [vmem:[#allocation4 + $0x32] sm:$0xff]  ;;  %v2849_v29 = vld [vmem:[#allocation4 + $0x3a] sm:$0xff] }
 0x2e2   : > { %v2801_v28 = vld [vmem:[#allocation4 + $0x39] sm:$0xff]  ;;  %2721 = vst.msk [vmem:[#allocation4 + $0x51] sm:$0xff] %vm498_vm4, %v2688_v35  ;;  %v2420_v56 = vadd.f32 %v8958_v5, %v2259_v43  ;;  %v8961_v30 = vadd.f32 %v8960_v0, %v8959_v8  ;;  %v2878_v16 = vpack.c.bf16 %v2849_v29, %v2848_v36  ;;  %9179 = vmatpush3.bf16.msra.mxu0 %v9957_v19 }
 0x2e3   : > { %v2830_v3 = vpack.c.bf16 %v2801_v28, %v2800_v20  ;;  %v2895_v2 = vld [vmem:[#allocation4 + $0x38] sm:$0xff]  ;;  %v2267_v36 = vadd.f32 %v11496_v60, %v11579_v37  ;;  %v2847_v60 = vld [vmem:[#allocation4 + $0x22] sm:$0xff] }
 0x2e4   : > { %v2581_v17 = vadd.f32 %v9688_v15, %v2420_v56  ;;  %v2423_v48 = vadd.f32 %v8961_v30, %v2262_v41  ;;  %3249 = vrot.lane.b32.xlu1 %v2878_v16, %s10090_s15  ;;  %v9958_v35 = vld [vmem:[%s14900_s5 + $0xf8] sm:$0xff]   ;;  %v2925_v7 = vpack.c.bf16 %v2895_v2, %v2894_v18  ;;  %v2270_v30 = vadd.f32 %v11498_v61, %v11579_v37  ;;  %v2799_v18 = vld [vmem:[#allocation4 + $0x21] sm:$0xff] }
 0x2e5   : > { %3201 = vrot.lane.b32.xlu0 %v2830_v3, %s10091_s30  ;;  %v11672_v11 = vpop.f32.mrb[76].mxu1  ;;  %v9959_v15 = vld [vmem:[%s14900_s5 + $0xb8] sm:$0xff]   ;;  %9180 = vmatprep.subr.bf16.mxu0 %v9958_v35 }
 0x2e6   : > { %v2689_v43 = vmax.f32 %v2581_v17, 0.0  ;;  %v2584_v5 = vadd.f32 %v9689_v58, %v2423_v48  ;;  %v8962_v8 = vpop.f32.mrb[80].mxu0  ;;  %v11677_v20 = vpop.f32.mrb[77].mxu1  ;;  %9181 = vmatpush3.bf16.msra.mxu0 %v9959_v15  ;;  %v2846_v17 = vld [vmem:[#allocation4 + $0x1a] sm:$0xff] }
 0x2e7   : > { %v8963_v41 = vpop.f32.mrb[81].mxu0  ;;  %v11682_v0 = vpop.f32.mrb[78].mxu1 }
 0x2e8   : > { %2722 = vst.msk [vmem:[#allocation4 + $0x61] sm:$0xff] %vm498_vm4, %v2689_v43  ;;  %v2690_v19 = vmax.f32 %v2584_v5, 0.0  ;;  %v8964_v29 = vadd.f32 %v8963_v41, %v8962_v8  ;;  %v8965_v48 = vpop.f32.mrb[82].mxu0  ;;  %v11687_v58 = vpop.f32.mrb[79].mxu1  ;;  %3295 = vrot.lane.b32.xlu1 %v2925_v7, %s10092_s14 }
 0x2e9   : > { %3343 = vrot.lane.b32.xlu0 %v2878_v16, %s10091_s30  ;;  %v8966_v28 = vpop.f32.mrb[83].mxu0  ;;  %v2798_v16 = vld [vmem:[#allocation4 + $0x19] sm:$0xff] }
 0x2ea   : > { %2723 = vst.msk [vmem:[#allocation4 + $0x69] sm:$0xff] %vm498_vm4, %v2690_v19  ;;  %v2428_v56 = vadd.f32 %v8964_v29, %v2267_v36  ;;  %v8967_v2 = vadd.f32 %v8966_v28, %v8965_v48  ;;  %v2877_v36 = vpack.c.bf16 %v2847_v60, %v2846_v17  ;;  %v2829_v61 = vpack.c.bf16 %v2799_v18, %v2798_v16  ;;  %v2893_v28 = vld [vmem:[#allocation4 + $0x20] sm:$0xff] }
 0x2eb   : > { %v2278_v60 = vadd.f32 %v11502_v53, %v11579_v37 }
 0x2ec   : > { %v2589_v35 = vadd.f32 %v2588_v34, %v2428_v56  ;;  %v2431_v43 = vadd.f32 %v8967_v2, %v2270_v30  ;;  %3389 = vrot.lane.b32.xlu1 %v2925_v7, %s10090_s15  ;;  %v2892_v2 = vld [vmem:[#allocation4 + $0x18] sm:$0xff] }
 0x2ed   : > { %3437 = vrot.lane.b32.xlu0 %v2830_v3, %s10092_s14  ;;  %v11696_v5 = vpop.f32.mrb[80].mxu1  ;;  %v2275_v3 = vadd.f32 %v11500_v24, %v11579_v37 }
 0x2ee   : > { %v2691_v8 = vmax.f32 %v2589_v35, 0.0  ;;  %v2592_v15 = vadd.f32 %v2591_v31, %v2431_v43  ;;  %v8968_v41 = vpop.f32.mrb[84].mxu0  ;;  %v11698_v19 = vpop.f32.mrb[81].mxu1  ;;  %v2924_v35 = vpack.c.bf16 %v2893_v28, %v2892_v2 }
 0x2ef   : > { %v8969_v29 = vpop.f32.mrb[85].mxu0  ;;  %v11700_v48 = vpop.f32.mrb[82].mxu1 }
 0x2f0   : > { %2724 = vst.msk [vmem:[#allocation4 + $0x79] sm:$0xff] %vm498_vm4, %v2691_v8  ;;  %v2692_v34 = vmax.f32 %v2592_v15, 0.0  ;;  %v8970_v7 = vadd.f32 %v8969_v29, %v8968_v41  ;;  %v8971_v56 = vpop.f32.mrb[86].mxu0  ;;  %v11705_v30 = vpop.f32.mrb[83].mxu1  ;;  %3247 = vrot.lane.b32.xlu1 %v2877_v36, %s10090_s15 }
 0x2f1   : > { %3199 = vrot.lane.b32.xlu0 %v2829_v61, %s10091_s30  ;;  %v8972_v31 = vpop.f32.mrb[87].mxu0  ;;  %v2852_v43 = vld [vmem:[#allocation4 + $0x62] sm:$0xff]  ;;  %v2853_v24 = vld [vmem:[#allocation4 + $0x6a] sm:$0xff] }
 0x2f2   : > { %2725 = vst.msk [vmem:[#allocation4 + $0x81] sm:$0xff] %vm498_vm4, %v2692_v34  ;;  %v2436_v17 = vadd.f32 %v8970_v7, %v2275_v3  ;;  %v8973_v18 = vadd.f32 %v8972_v31, %v8971_v56  ;;  %v2805_v16 = vld [vmem:[#allocation4 + $0x69] sm:$0xff]  ;;  %v2804_v61 = vld [vmem:[#allocation4 + $0x61] sm:$0xff]  ;;  %v2880_v28 = vpack.c.bf16 %v2853_v24, %v2852_v43  ;;  %v2286_v24 = vadd.f32 %v11506_v59, %v11579_v37 }
 0x2f3   : > { %v2832_v7 = vpack.c.bf16 %v2805_v16, %v2804_v61  ;;  %v2850_v59 = vld [vmem:[#allocation4 + $0x4a] sm:$0xff] }
 0x2f4   : > { %v2597_v8 = vadd.f32 %v11648_v54, %v2436_v17  ;;  %v2439_v15 = vadd.f32 %v8973_v18, %v2278_v60  ;;  %3293 = vrot.lane.b32.xlu1 %v2924_v35, %s10092_s14  ;;  %v2899_v54 = vld [vmem:[#allocation4 + $0x68] sm:$0xff]  ;;  %v2898_v35 = vld [vmem:[#allocation4 + $0x60] sm:$0xff] }
 0x2f5   : > { %3341 = vrot.lane.b32.xlu0 %v2877_v36, %s10091_s30  ;;  %v11715_v41 = vpop.f32.mrb[84].mxu1  ;;  %v2283_v36 = vadd.f32 %v11504_v49, %v11579_v37 }
 0x2f6   : > { %v2693_v29 = vmax.f32 %v2597_v8, 0.0  ;;  %v2600_v34 = vadd.f32 %v11656_v4, %v2439_v15  ;;  %v8974_v3 = vpop.f32.mrb[88].mxu0  ;;  %v11718_v53 = vpop.f32.mrb[85].mxu1  ;;  %v2927_v8 = vpack.c.bf16 %v2899_v54, %v2898_v35  ;;  %v2851_v54 = vld [vmem:[#allocation4 + $0x52] sm:$0xff] }
 0x2f7   : > { %v8975_v56 = vpop.f32.mrb[89].mxu0  ;;  %v11720_v31 = vpop.f32.mrb[86].mxu1 }
 0x2f8   : > { %2726 = vst.msk [vmem:[#allocation4 + $0x91] sm:$0xff] %vm498_vm4, %v2693_v29  ;;  %v2694_v2 = vmax.f32 %v2600_v34, 0.0  ;;  %v8976_v17 = vadd.f32 %v8975_v56, %v8974_v3  ;;  %v8977_v60 = vpop.f32.mrb[90].mxu0  ;;  %v11725_v18 = vpop.f32.mrb[87].mxu1  ;;  %3253 = vrot.lane.b32.xlu1 %v2880_v28, %s10090_s15 }
 0x2f9   : > { %3205 = vrot.lane.b32.xlu0 %v2832_v7, %s10091_s30  ;;  %v8978_v4 = vpop.f32.mrb[91].mxu0 }
 0x2fa   : > { %2727 = vst.msk [vmem:[#allocation4 + $0x99] sm:$0xff] %vm498_vm4, %v2694_v2  ;;  %v2444_v43 = vadd.f32 %v8976_v17, %v2283_v36  ;;  %v8979_v16 = vadd.f32 %v8978_v4, %v8977_v60  ;;  %v2803_v17 = vld [vmem:[#allocation4 + $0x51] sm:$0xff] }
 0x2fc   : > { %v2605_v49 = vadd.f32 %v11677_v20, %v2444_v43  ;;  %v2447_v15 = vadd.f32 %v8979_v16, %v2286_v24  ;;  %3299 = vrot.lane.b32.xlu1 %v2927_v8, %s10092_s14  ;;  %v2802_v24 = vld [vmem:[#allocation4 + $0x49] sm:$0xff] }
 0x2fd   : > { %3347 = vrot.lane.b32.xlu0 %v2880_v28, %s10091_s30  ;;  %v11735_v61 = vpop.f32.mrb[88].mxu1  ;;  %v2291_v28 = vadd.f32 %v11508_v26, %v11579_v37  ;;  %v2897_v26 = vld [vmem:[#allocation4 + $0x50] sm:$0xff] }
 0x2fe   : > { %v2695_v29 = vmax.f32 %v2605_v49, 0.0  ;;  %v2608_v34 = vadd.f32 %v11687_v58, %v2447_v15  ;;  %v8980_v3 = vpop.f32.mrb[92].mxu0  ;;  %v11738_v56 = vpop.f32.mrb[89].mxu1  ;;  %v2294_v58 = vadd.f32 %v11510_v25, %v11579_v37  ;;  %v2879_v15 = vpack.c.bf16 %v2851_v54, %v2850_v59 }
 0x2ff   : > { %v8981_v2 = vpop.f32.mrb[93].mxu0  ;;  %v11740_v36 = vpop.f32.mrb[90].mxu1 }
 0x300   : > { %2728 = vst.msk [vmem:[#allocation4 + $0xa9] sm:$0xff] %vm498_vm4, %v2695_v29  ;;  %v2696_v20 = vmax.f32 %v2608_v34, 0.0  ;;  %v8982_v60 = vadd.f32 %v8981_v2, %v8980_v3  ;;  %v8983_v4 = vpop.f32.mrb[94].mxu0  ;;  %v11745_v35 = vpop.f32.mrb[91].mxu1  ;;  %3393 = vrot.lane.b32.xlu1 %v2927_v8, %s10090_s15  ;;  %v2831_v29 = vpack.c.bf16 %v2803_v17, %v2802_v24  ;;  %v2299_v17 = vadd.f32 %v11512_v10, %v11579_v37 }
 0x301   : > { %3441 = vrot.lane.b32.xlu0 %v2832_v7, %s10092_s14  ;;  %v8984_v43 = vpop.f32.mrb[95].mxu0  ;;  %v2896_v7 = vld [vmem:[#allocation4 + $0x48] sm:$0xff]  ;;  %v2302_v24 = vadd.f32 %v11514_v6, %v11579_v37 }
 0x302   : > { %2729 = vst.msk [vmem:[#allocation4 + $0xb1] sm:$0xff] %vm498_vm4, %v2696_v20  ;;  %v2452_v16 = vadd.f32 %v8982_v60, %v2291_v28  ;;  %v8985_v49 = vadd.f32 %v8984_v43, %v8983_v4  ;;  %v2926_v20 = vpack.c.bf16 %v2897_v26, %v2896_v7  ;;  %v2857_v26 = vld [vmem:[#allocation4 + $0x9a] sm:$0xff] }
 0x304   : > { %v2613_v34 = vadd.f32 %v11672_v11, %v2452_v16  ;;  %v2455_v3 = vadd.f32 %v8985_v49, %v2294_v58  ;;  %3251 = vrot.lane.b32.xlu1 %v2879_v15, %s10090_s15  ;;  %v2856_v49 = vld [vmem:[#allocation4 + $0x92] sm:$0xff] }
 0x305   : > { %3203 = vrot.lane.b32.xlu0 %v2831_v29, %s10091_s30  ;;  %v11755_v8 = vpop.f32.mrb[92].mxu1 }
 0x306   : > { %v2697_v25 = vmax.f32 %v2613_v34, 0.0  ;;  %v2616_v2 = vadd.f32 %v11682_v0, %v2455_v3  ;;  %v8986_v33 = vpop.f32.mrb[96].mxu0  ;;  %v11758_v28 = vpop.f32.mrb[93].mxu1  ;;  %v2809_v34 = vld [vmem:[#allocation4 + $0x99] sm:$0xff] }
 0x307   : > { %v8987_v59 = vpop.f32.mrb[97].mxu0  ;;  %v11760_v54 = vpop.f32.mrb[94].mxu1 }
 0x308   : > { %2730 = vst.msk [vmem:[#allocation4 + $0xc1] sm:$0xff] %vm498_vm4, %v2697_v25  ;;  %v2698_v11 = vmax.f32 %v2616_v2, 0.0  ;;  %v8988_v60 = vadd.f32 %v8987_v59, %v8986_v33  ;;  %v8989_v4 = vpop.f32.mrb[98].mxu0  ;;  %3297 = vrot.lane.b32.xlu1 %v2926_v20, %s10092_s14  ;;  %v11767_v0 = vpop.f32.mrb[95].mxu1  ;;  %v2882_v2 = vpack.c.bf16 %v2857_v26, %v2856_v49  ;;  %v2807_v49 = vld [vmem:[#allocation4 + $0x81] sm:$0xff] }
 0x309   : > { %3345 = vrot.lane.b32.xlu0 %v2879_v15, %s10091_s30  ;;  %v8990_v58 = vpop.f32.mrb[99].mxu0  ;;  %v2808_v15 = vld [vmem:[#allocation4 + $0x91] sm:$0xff] }
 0x30a   : > { %2731 = vst.msk [vmem:[#allocation4 + $0xc9] sm:$0xff] %vm498_vm4, %v2698_v11  ;;  %v2460_v43 = vadd.f32 %v8988_v60, %v2299_v17  ;;  %v8991_v16 = vadd.f32 %v8990_v58, %v8989_v4  ;;  %v11776_v59 = vpack.c.bf16 %v2809_v34, %v2808_v15  ;;  %v2903_v11 = vld [vmem:[#allocation4 + $0x98] sm:$0xff]  ;;  %v2310_v58 = vadd.f32 %v11518_v13, %v11579_v37 }
 0x30c   : > { %v2621_v33 = vadd.f32 %v11698_v19, %v2460_v43  ;;  %v2463_v10 = vadd.f32 %v8991_v16, %v2302_v24  ;;  %3391 = vrot.lane.b32.xlu1 %v2926_v20, %s10090_s15  ;;  %v2307_v19 = vadd.f32 %v11516_v45, %v11579_v37  ;;  %v2854_v16 = vld [vmem:[#allocation4 + $0x7a] sm:$0xff]  ;;  %v2855_v45 = vld [vmem:[#allocation4 + $0x82] sm:$0xff] }
 0x30d   : > { %3439 = vrot.lane.b32.xlu0 %v2831_v29, %s10092_s14  ;;  %v2902_v29 = vld [vmem:[#allocation4 + $0x90] sm:$0xff]  ;;  %v2881_v13 = vpack.c.bf16 %v2855_v45, %v2854_v16 }
 0x30e   : > { %v2699_v3 = vmax.f32 %v2621_v33, 0.0  ;;  %v2624_v7 = vadd.f32 %v11705_v30, %v2463_v10  ;;  %v8992_v25 = vpop.f32.mrb[100].mxu0  ;;  %v11787_v24 = vpack.c.bf16 %v2903_v11, %v2902_v29  ;;  %v2806_v33 = vld [vmem:[#allocation4 + $0x79] sm:$0xff] }
 0x30f   : > { %v8993_v6 = vpop.f32.mrb[101].mxu0  ;;  %v2812_v45 = vld [vmem:[#allocation4 + $0xc1] sm:$0xff] }
 0x310   : > { %2732 = vst.msk [vmem:[#allocation4 + $0xd9] sm:$0xff] %vm498_vm4, %v2699_v3  ;;  %v2700_v17 = vmax.f32 %v2624_v7, 0.0  ;;  %v8994_v60 = vadd.f32 %v8993_v6, %v8992_v25  ;;  %v8995_v20 = vpop.f32.mrb[102].mxu0  ;;  %3257 = vrot.lane.b32.xlu1 %v2882_v2, %s10090_s15  ;;  %v11794_v7 = vpack.c.bf16 %v2807_v49, %v2806_v33  ;;  %v2901_v6 = vld [vmem:[#allocation4 + $0x80] sm:$0xff] }
 0x311   : > { %3209 = vrot.lane.b32.xlu0 %v11776_v59, %s10091_s30  ;;  %v8996_v30 = vpop.f32.mrb[103].mxu0 }
 0x312   : > { %2733 = vst.msk [vmem:[#allocation4 + $0xe1] sm:$0xff] %vm498_vm4, %v2700_v17  ;;  %v2468_v4 = vadd.f32 %v8994_v60, %v2307_v19  ;;  %v8997_v43 = vadd.f32 %v8996_v30, %v8995_v20  ;;  %v2318_v20 = vadd.f32 %v11522_v14, %v11579_v37 }
 0x314   : > { %v2629_v26 = vadd.f32 %v11696_v5, %v2468_v4  ;;  %v2471_v34 = vadd.f32 %v8997_v43, %v2310_v58  ;;  %3303 = vrot.lane.b32.xlu1 %v11787_v24, %s10092_s14  ;;  %v2315_v5 = vadd.f32 %v11520_v32, %v11579_v37  ;;  %v2860_v4 = vld [vmem:[#allocation4 + $0xc2] sm:$0xff]  ;;  %v2861_v32 = vld [vmem:[#allocation4 + $0xca] sm:$0xff] }
 0x315   : > { %3351 = vrot.lane.b32.xlu0 %v2882_v2, %s10091_s30  ;;  %v2900_v2 = vld [vmem:[#allocation4 + $0x78] sm:$0xff]  ;;  %v2813_v58 = vld [vmem:[#allocation4 + $0xc9] sm:$0xff]  ;;  %v2884_v14 = vpack.c.bf16 %v2861_v32, %v2860_v4 }
 0x316   : > { %v2701_v10 = vmax.f32 %v2629_v26, 0.0  ;;  %v2632_v15 = vadd.f32 %v11700_v48, %v2471_v34  ;;  %v8998_v3 = vpop.f32.mrb[104].mxu0  ;;  %v11805_v29 = vpack.c.bf16 %v2901_v6, %v2900_v2  ;;  %v11812_v33 = vpack.c.bf16 %v2813_v58, %v2812_v45  ;;  %v2811_v2 = vld [vmem:[#allocation4 + $0xb1] sm:$0xff] }
 0x317   : > { %v8999_v25 = vpop.f32.mrb[105].mxu0  ;;  %v2905_v45 = vld [vmem:[#allocation4 + $0xb0] sm:$0xff] }
 0x318   : > { %2734 = vst.msk [vmem:[#allocation4 + $0xf1] sm:$0xff] %vm498_vm4, %v2701_v10  ;;  %v2702_v11 = vmax.f32 %v2632_v15, 0.0  ;;  %v9000_v17 = vadd.f32 %v8999_v25, %v8998_v3  ;;  %v9001_v19 = vpop.f32.mrb[106].mxu0  ;;  %3255 = vrot.lane.b32.xlu1 %v2881_v13, %s10090_s15  ;;  %v2907_v15 = vld [vmem:[#allocation4 + $0xc8] sm:$0xff] }
 0x319   : > { %3207 = vrot.lane.b32.xlu0 %v11794_v7, %s10091_s30  ;;  %v9002_v48 = vpop.f32.mrb[107].mxu0 }
 0x31a   : > { %2735 = vst.msk [vmem:[#allocation4 + $0xf9] sm:$0xff] %vm498_vm4, %v2702_v11  ;;  %v2476_v60 = vadd.f32 %v9000_v17, %v2315_v5  ;;  %v9003_v30 = vadd.f32 %v9002_v48, %v9001_v19  ;;  %v2326_v5 = vadd.f32 %v11526_v12, %v11579_v37  ;;  %v2858_v48 = vld [vmem:[#allocation4 + $0xaa] sm:$0xff] }
 0x31c   : > { %v2637_v43 = vadd.f32 %v11718_v53, %v2476_v60  ;;  %v2479_v16 = vadd.f32 %v9003_v30, %v2318_v20  ;;  %3301 = vrot.lane.b32.xlu1 %v11805_v29, %s10092_s14  ;;  %v2323_v53 = vadd.f32 %v11524_v1, %v11579_v37  ;;  %v2859_v1 = vld [vmem:[#allocation4 + $0xb2] sm:$0xff]  ;;  %v2810_v30 = vld [vmem:[#allocation4 + $0xa9] sm:$0xff] }
 0x31d   : > { %3349 = vrot.lane.b32.xlu0 %v2881_v13, %s10091_s30  ;;  %v2906_v13 = vld [vmem:[#allocation4 + $0xc0] sm:$0xff]  ;;  %v2883_v12 = vpack.c.bf16 %v2859_v1, %v2858_v48 }
 0x31e   : > { %v2703_v49 = vmax.f32 %v2637_v43, 0.0  ;;  %v2640_v26 = vadd.f32 %v11725_v18, %v2479_v16  ;;  %v9004_v34 = vpop.f32.mrb[108].mxu0  ;;  %v11823_v19 = vpack.c.bf16 %v2907_v15, %v2906_v13  ;;  %v11830_v43 = vpack.c.bf16 %v2811_v2, %v2810_v30 }
 0x31f   : > { %v9005_v10 = vpop.f32.mrb[109].mxu0  ;;  %v2334_v15 = vadd.f32 %v11536_v46, %v11579_v37 }
 0x320   : > { %2736 = vst.msk [vmem:[#allocation4 + $0x109] sm:$0xff] %vm498_vm4, %v2703_v49  ;;  %v2704_v3 = vmax.f32 %v2640_v26, 0.0  ;;  %v9006_v25 = vadd.f32 %v9005_v10, %v9004_v34  ;;  %v9007_v6 = vpop.f32.mrb[110].mxu0  ;;  %3261 = vrot.lane.b32.xlu1 %v2884_v14, %s10090_s15 }
 0x321   : > { %3213 = vrot.lane.b32.xlu0 %v11812_v33, %s10091_s30  ;;  %v9008_v18 = vpop.f32.mrb[111].mxu0 }
 0x322   : > { %2737 = vst.msk [vmem:[#allocation4 + $0x111] sm:$0xff] %vm498_vm4, %v2704_v3  ;;  %v2484_v11 = vadd.f32 %v9006_v25, %v2323_v53  ;;  %v9009_v17 = vadd.f32 %v9008_v18, %v9007_v6  ;;  %v2864_v25 = vld [vmem:[#allocation4 + $0xf2] sm:$0xff] }
 0x323   : > { %v2817_v6 = vld [vmem:[#allocation4 + $0xf9] sm:$0xff] }
 0x324   : > { %v2645_v60 = vadd.f32 %v11715_v41, %v2484_v11  ;;  %v2487_v20 = vadd.f32 %v9009_v17, %v2326_v5  ;;  %3307 = vrot.lane.b32.xlu1 %v11823_v19, %s10092_s14  ;;  %v2331_v41 = vadd.f32 %v11534_v39, %v11579_v37  ;;  %v2865_v39 = vld [vmem:[#allocation4 + $0xfa] sm:$0xff]  ;;  %v2816_v11 = vld [vmem:[#allocation4 + $0xf1] sm:$0xff] }
 0x325   : > { %3355 = vrot.lane.b32.xlu0 %v2884_v14, %s10091_s30  ;;  %v2904_v14 = vld [vmem:[#allocation4 + $0xa8] sm:$0xff]  ;;  %v2886_v46 = vpack.c.bf16 %v2865_v39, %v2864_v25  ;;  %v11848_v1 = vpack.c.bf16 %v2817_v6, %v2816_v11  ;;  %v2909_v39 = vld [vmem:[#allocation4 + $0xe0] sm:$0xff]  ;;  %v2908_v11 = vld [vmem:[#allocation4 + $0xd8] sm:$0xff] }
 0x326   : > { %v2705_v4 = vmax.f32 %v2645_v60, 0.0  ;;  %v2648_v32 = vadd.f32 %v11720_v31, %v2487_v20  ;;  %v9010_v58 = vpop.f32.mrb[112].mxu0  ;;  %v11841_v53 = vpack.c.bf16 %v2905_v45, %v2904_v14  ;;  %v2911_v60 = vld [vmem:[#allocation4 + $0xf8] sm:$0xff] }
 0x327   : > { %v9011_v16 = vpop.f32.mrb[113].mxu0 }
 0x328   : > { %2738 = vst.msk [vmem:[#allocation4 + $0x121] sm:$0xff] %vm498_vm4, %v2705_v4  ;;  %v2706_v49 = vmax.f32 %v2648_v32, 0.0  ;;  %v9012_v26 = vadd.f32 %v9011_v16, %v9010_v58  ;;  %v9013_v34 = vpop.f32.mrb[114].mxu0  ;;  %3259 = vrot.lane.b32.xlu1 %v2883_v12, %s10090_s15  ;;  %v2910_v32 = vld [vmem:[#allocation4 + $0xf0] sm:$0xff] }
 0x329   : > { %3211 = vrot.lane.b32.xlu0 %v11830_v43, %s10091_s30  ;;  %v9014_v31 = vpop.f32.mrb[115].mxu0  ;;  %v11859_v45 = vpack.c.bf16 %v2911_v60, %v2910_v32 }
 0x32a   : > { %2739 = vst.msk [vmem:[#allocation4 + $0x129] sm:$0xff] %vm498_vm4, %v2706_v49  ;;  %v2492_v10 = vadd.f32 %v9012_v26, %v2331_v41  ;;  %v9015_v3 = vadd.f32 %v9014_v31, %v9013_v34  ;;  %v2862_v49 = vld [vmem:[#allocation4 + $0xda] sm:$0xff] }
 0x32b   : > { %v2815_v41 = vld [vmem:[#allocation4 + $0xe1] sm:$0xff]  ;;  %v2814_v31 = vld [vmem:[#allocation4 + $0xd9] sm:$0xff] }
 0x32c   : > { %v2653_v18 = vadd.f32 %v11738_v56, %v2492_v10  ;;  %v2495_v13 = vadd.f32 %v9015_v3, %v2334_v15  ;;  %3305 = vrot.lane.b32.xlu1 %v11841_v53, %s10092_s14  ;;  %v2339_v56 = vadd.f32 %v11550_v55, %v11579_v37  ;;  %v2863_v55 = vld [vmem:[#allocation4 + $0xe2] sm:$0xff]  ;;  %v11866_v3 = vpack.c.bf16 %v2815_v41, %v2814_v31 }
 0x32d   : > { %3353 = vrot.lane.b32.xlu0 %v2883_v12, %s10091_s30  ;;  %v2342_v12 = vadd.f32 %v11552_v47, %v11579_v37  ;;  %v2885_v47 = vpack.c.bf16 %v2863_v55, %v2862_v49  ;;  %v2355_v49 = vadd.f32 %v11587_v40, %v11579_v37 }
 0x32e   : > { %v2707_v5 = vmax.f32 %v2653_v18, 0.0  ;;  %v2656_v17 = vadd.f32 %v11745_v35, %v2495_v13  ;;  %v9016_v48 = vpop.f32.mrb[116].mxu0  ;;  %v2347_v13 = vadd.f32 %v11566_v62, %v11579_v37 }
 0x32f   : > { %v9017_v2 = vpop.f32.mrb[117].mxu0 }
 0x330   : > { %2740 = vst.msk [vmem:[#allocation4 + $0x139] sm:$0xff] %vm498_vm4, %v2707_v5  ;;  %v2708_v20 = vmax.f32 %v2656_v17, 0.0  ;;  %v9018_v30 = vadd.f32 %v9017_v2, %v9016_v48  ;;  %v9019_v4 = vpop.f32.mrb[118].mxu0  ;;  %3265 = vrot.lane.b32.xlu1 %v2886_v46, %s10090_s15  ;;  %v11875_v48 = vpack.c.bf16 %v2909_v39, %v2908_v11 }
 0x331   : > { %3217 = vrot.lane.b32.xlu0 %v11848_v1, %s10091_s30  ;;  %v9020_v35 = vpop.f32.mrb[119].mxu0  ;;  %v2868_v2 = vld [vmem:[#allocation4 + $0x122] sm:$0xff]  ;;  %v2869_v60 = vld [vmem:[#allocation4 + $0x12a] sm:$0xff] }
 0x332   : > { %2741 = vst.msk [vmem:[#allocation4 + $0x141] sm:$0xff] %vm498_vm4, %v2708_v20  ;;  %v2500_v58 = vadd.f32 %v9018_v30, %v2339_v56  ;;  %v9021_v16 = vadd.f32 %v9020_v35, %v9019_v4  ;;  %v2821_v20 = vld [vmem:[#allocation4 + $0x129] sm:$0xff]  ;;  %v2820_v30 = vld [vmem:[#allocation4 + $0x121] sm:$0xff] }
 0x334   : > { %v2661_v26 = vadd.f32 %v11735_v61, %v2500_v58  ;;  %v2503_v34 = vadd.f32 %v9021_v16, %v2342_v12  ;;  %3311 = vrot.lane.b32.xlu1 %v11859_v45, %s10092_s14  ;;  %v2888_v58 = vpack.c.bf16 %v2869_v60, %v2868_v2  ;;  %v11884_v12 = vpack.c.bf16 %v2821_v20, %v2820_v30  ;;  %v2915_v16 = vld [vmem:[#allocation4 + $0x128] sm:$0xff] }
 0x335   : > { %3359 = vrot.lane.b32.xlu0 %v2886_v46, %s10091_s30  ;;  %v2350_v46 = vadd.f32 %v11568_v63, %v11579_v37  ;;  %v9962_v60 = vld [vmem:[%s14900_s5 + $0x148] sm:$0xff]  }
 0x336   : > { %v2709_v14 = vmax.f32 %v2661_v26, 0.0  ;;  %v2664_v10 = vadd.f32 %v11740_v36, %v2503_v34  ;;  %v9022_v15 = vpop.f32.mrb[120].mxu0  ;;  %v2914_v26 = vld [vmem:[#allocation4 + $0x120] sm:$0xff]  ;;  %v2358_v34 = vadd.f32 %v11591_v50, %v11579_v37  ;;  %v9963_v30 = vld [vmem:[%s14900_s5 + $0x108] sm:$0xff]  }
 0x337   : > { %v9023_v25 = vpop.f32.mrb[121].mxu0  ;;  %v11895_v40 = vpack.c.bf16 %v2915_v16, %v2914_v26  ;;  %v9967_v26 = vld [vmem:[%s14900_s5 + $0x118] sm:$0xff]  }
 0x338   : > { %2742 = vst.msk [vmem:[#allocation4 + $0x151] sm:$0xff] %vm498_vm4, %v2709_v14  ;;  %v2710_v6 = vmax.f32 %v2664_v10, 0.0  ;;  %v9024_v61 = vadd.f32 %v9023_v25, %v9022_v15  ;;  %v9025_v18 = vpop.f32.mrb[122].mxu0  ;;  %3263 = vrot.lane.b32.xlu1 %v2885_v47, %s10090_s15  ;;  %v2866_v10 = vld [vmem:[#allocation4 + $0x10a] sm:$0xff]  ;;  %v2867_v15 = vld [vmem:[#allocation4 + $0x112] sm:$0xff] }
 0x339   : > { %3215 = vrot.lane.b32.xlu0 %v11866_v3, %s10091_s30  ;;  %v9026_v36 = vpop.f32.mrb[123].mxu0  ;;  %v2887_v37 = vpack.c.bf16 %v2867_v15, %v2866_v10  ;;  %v2823_v16 = vld [vmem:[#allocation4 + $0x141] sm:$0xff] }
 0x33a   : > { %2743 = vst.msk [vmem:[#allocation4 + $0x159] sm:$0xff] %vm498_vm4, %v2710_v6  ;;  %v9027_v5 = vadd.f32 %v9026_v36, %v9025_v18  ;;  %v2508_v17 = vadd.f32 %v9024_v61, %v2347_v13  ;;  %v2818_v6 = vld [vmem:[#allocation4 + $0x109] sm:$0xff] }
 0x33b   : > { %v2913_v13 = vld [vmem:[#allocation4 + $0x110] sm:$0xff] }
 0x33c   : > { %v2669_v56 = vadd.f32 %v11758_v28, %v2508_v17  ;;  %3309 = vrot.lane.b32.xlu1 %v11875_v48, %s10092_s14  ;;  %v2511_v62 = vadd.f32 %v9027_v5, %v2350_v46  ;;  %v9961_v17 = vld [vmem:[%s14900_s5 + $0x100] sm:$0xff]  }
 0x33d   : > { %3357 = vrot.lane.b32.xlu0 %v2885_v47, %s10091_s30  ;;  %v2819_v47 = vld [vmem:[#allocation4 + $0x111] sm:$0xff] }
 0x33e   : > { %v2711_v4 = vmax.f32 %v2669_v56, 0.0  ;;  %v2672_v35 = vadd.f32 %v11767_v0, %v2511_v62  ;;  %v9028_v32 = vpop.f32.mrb[124].mxu0  ;;  %v11902_v18 = vpack.c.bf16 %v2819_v47, %v2818_v6  ;;  %v9970_v6 = vld [vmem:[%s14900_s5 + $0x168] sm:$0xff]  }
 0x33f   : > { %v9029_v63 = vpop.f32.mrb[125].mxu0  ;;  %v2824_v20 = vld [vmem:[#allocation4 + $0x151] sm:$0xff] }
 0x340   : > { %2744 = vst.msk [vmem:[#allocation4 + $0x169] sm:$0xff] %vm498_vm4, %v2711_v4  ;;  %v2712_v28 = vmax.f32 %v2672_v35, 0.0  ;;  %v9030_v55 = vadd.f32 %v9029_v63, %v9028_v32  ;;  %v9031_v41 = vpop.f32.mrb[126].mxu0  ;;  %3269 = vrot.lane.b32.xlu1 %v2888_v58, %s10090_s15  ;;  %v2918_v35 = vld [vmem:[#allocation4 + $0x150] sm:$0xff] }
 0x341   : > { %3221 = vrot.lane.b32.xlu0 %v11884_v12, %s10091_s30  ;;  %v9032_v0 = vpop.f32.mrb[127].mxu0  ;;  %v2872_v5 = vld [vmem:[#allocation4 + $0x152] sm:$0xff]  ;;  %v2873_v46 = vld [vmem:[#allocation4 + $0x15a] sm:$0xff] }
 0x342   : > { %2745 = vst.msk [vmem:[#allocation4 + $0x171] sm:$0xff] %vm498_vm4, %v2712_v28  ;;  %v2516_v31 = vadd.f32 %v9030_v55, %v2355_v49  ;;  %v9033_v14 = vadd.f32 %v9032_v0, %v9031_v41  ;;  %v2825_v2 = vld [vmem:[#allocation4 + $0x159] sm:$0xff]  ;;  %v2890_v56 = vpack.c.bf16 %v2873_v46, %v2872_v5  ;;  %v9965_v63 = vld [vmem:[%s14900_s5 + $0x110] sm:$0xff]  }
 0x343   : > { %v11923_v62 = vpack.c.bf16 %v2825_v2, %v2824_v20  ;;  %v2919_v4 = vld [vmem:[#allocation4 + $0x158] sm:$0xff] }
 0x344   : > { %v2677_v25 = vadd.f32 %v11755_v8, %v2516_v31  ;;  %v2519_v39 = vadd.f32 %v9033_v14, %v2358_v34  ;;  %3315 = vrot.lane.b32.xlu1 %v11895_v40, %s10092_s14  ;;  %v2912_v8 = vld [vmem:[#allocation4 + $0x108] sm:$0xff]  ;;  %v11931_v32 = vpack.c.bf16 %v2919_v4, %v2918_v35  ;;  %v2822_v49 = vld [vmem:[#allocation4 + $0x139] sm:$0xff] }
 0x345   : > { %3363 = vrot.lane.b32.xlu0 %v2888_v58, %s10091_s30  ;;  %v11909_v11 = vpack.c.bf16 %v2913_v13, %v2912_v8  ;;  %v9964_v58 = vld [vmem:[%s14900_s5 + $0x150] sm:$0xff]   ;;  %v9966_v28 = vld [vmem:[%s14900_s5 + $0x158] sm:$0xff]   ;;  %v11949_v0 = vpack.c.bf16 %v2823_v16, %v2822_v49  ;;  %v2871_v31 = vld [vmem:[#allocation4 + $0x142] sm:$0xff] }
 0x346   : > { %v2713_v61 = vmax.f32 %v2677_v25, 0.0  ;;  %v2680_v50 = vadd.f32 %v11760_v54, %v2519_v39  ;;  %v9960_v54 = vld [vmem:[%s14900_s5 + $0x140] sm:$0xff]  }
 0x347   : > { %9278 = vmatprep.subr.bf16.mxu1 %v9960_v54  ;;  %v2870_v34 = vld [vmem:[#allocation4 + $0x13a] sm:$0xff] }
 0x348   : > { %2746 = vst.msk [vmem:[#allocation4 + $0x181] sm:$0xff] %vm498_vm4, %v2713_v61  ;;  %v2714_v36 = vmax.f32 %v2680_v50, 0.0  ;;  %3267 = vrot.lane.b32.xlu1 %v2887_v37, %s10090_s15  ;;  %9279 = vmatpush3.bf16.msra.mxu1 %v9961_v17  ;;  %v9968_v14 = vld [vmem:[%s14900_s5 + $0x160] sm:$0xff]   ;;  %v2889_v47 = vpack.c.bf16 %v2871_v31, %v2870_v34  ;;  %v2750_v17 = vld [vmem:[#allocation4 + $0x18] sm:$0xff]  ;;  %v2826_v34 = vld [vmem:[#allocation4 + $0x169] sm:$0xff] }
 0x349   : > { %3219 = vrot.lane.b32.xlu0 %v11902_v18, %s10091_s30  ;;  %9280 = vmatprep.subr.bf16.mxu1 %v9962_v60  ;;  %v9969_v25 = vld [vmem:[%s14900_s5 + $0x120] sm:$0xff]   ;;  %v9972_v60 = vld [vmem:[%s14900_s5 + $0x170] sm:$0xff]  }
 0x34a   : > { %2747 = vst.msk [vmem:[#allocation4 + $0x189] sm:$0xff] %vm498_vm4, %v2714_v36  ;;  %v2917_v39 = vld [vmem:[#allocation4 + $0x140] sm:$0xff]  ;;  %v9971_v36 = vld [vmem:[%s14900_s5 + $0x128] sm:$0xff]   ;;  %v2827_v49 = vld [vmem:[#allocation4 + $0x171] sm:$0xff] }
 0x34b   : > { %v2751_v13 = vld [vmem:[#allocation4 + $0x20] sm:$0xff] }
 0x34c   : > { %3313 = vrot.lane.b32.xlu1 %v11909_v11, %s10092_s14  ;;  %9281 = vmatpush3.bf16.msra.mxu1 %v9963_v30  ;;  %v2781_v2 = vpack.c.bf16 %v2751_v13, %v2750_v17  ;;  %v2941_v35 = vld [vmem:[#allocation4 + $0x21] sm:$0xff]  ;;  %v2942_v13 = vld [vmem:[#allocation4 + $0x31] sm:$0xff] }
 0x34d   : > { %3361 = vrot.lane.b32.xlu0 %v2887_v37, %s10091_s30  ;;  %9282 = vmatprep.subr.bf16.mxu1 %v9964_v58  ;;  %v9975_v58 = vld [vmem:[%s14900_s5 + $0x180] sm:$0xff]   ;;  %v9976_v17 = vld [vmem:[%s14900_s5 + $0x138] sm:$0xff]  }
 0x34e   : > { %9714 = vmatprep.subr.bf16.mxu0 %v9975_v58 }
 0x34f   : > { %v2922_v46 = vld [vmem:[#allocation4 + $0x180] sm:$0xff] }
 0x350   : > { %3273 = vrot.lane.b32.xlu1 %v2890_v56, %s10090_s15  ;;  %9283 = vmatpush3.bf16.msra.mxu1 %v9965_v63 }
 0x351   : > { %3225 = vrot.lane.b32.xlu0 %v11923_v62, %s10091_s30  ;;  %9284 = vmatprep.subr.bf16.mxu1 %v9966_v28  ;;  %v2923_v8 = vld [vmem:[#allocation4 + $0x188] sm:$0xff]  ;;  %v9973_v28 = vld [vmem:[%s14900_s5 + $0x130] sm:$0xff]  }
 0x352   : > { %v3018_v5 = vld [vmem:[#allocation4 + $0x182] sm:$0xff]  ;;  %v3019_v54 = vld [vmem:[#allocation4 + $0x18a] sm:$0xff]  ;;  %v2939_v30 = vpack.c.bf16 %v2923_v8, %v2922_v46  ;;  %v15053_v46 = vmax.f32 %v10663_v27, 0.0 }
 0x353   : > { %v3035_v4 = vpack.c.bf16 %v3019_v54, %v3018_v5  ;;  %v2874_v5 = vld [vmem:[#allocation4 + $0x16a] sm:$0xff]  ;;  %v2875_v54 = vld [vmem:[#allocation4 + $0x172] sm:$0xff] }
 0x354   : > { %3319 = vrot.lane.b32.xlu1 %v11931_v32, %s10092_s14  ;;  %9285 = vmatpush3.bf16.msra.mxu1 %v9967_v26  ;;  %v2940_v26 = vld [vmem:[#allocation4 + $0x19] sm:$0xff] }
 0x355   : > { %3367 = vrot.lane.b32.xlu0 %v2890_v56, %s10091_s30  ;;  %9286 = vmatprep.subr.bf16.mxu1 %v9968_v14  ;;  %v2972_v31 = vpack.c.bf16 %v2941_v35, %v2940_v26  ;;  %v2943_v14 = vld [vmem:[#allocation4 + $0x39] sm:$0xff]  ;;  %v2752_v35 = vld [vmem:[#allocation4 + $0x30] sm:$0xff]  ;;  %v9977_v26 = vld [vmem:[%s14900_s5 + $0x188] sm:$0xff]  }
 0x356   : > { %v11945_v55 = vpop.permute.xlu1 %3249 }
 0x357   : > { %v11947_v41 = vpop.permute.xlu0 %3201 }
 0x358   : > { %3443 = vrot.lane.b32.xlu1 %v11794_v7, %s10092_s14  ;;  %v2916_v7 = vld [vmem:[#allocation4 + $0x138] sm:$0xff]  ;;  %9287 = vmatpush3.bf16.msra.mxu1 %v9969_v25 }
 0x359   : > { %3223 = vrot.lane.b32.xlu0 %v11949_v0, %s10091_s30  ;;  %v11978_v37 = vpack.c.bf16 %v2917_v39, %v2916_v7  ;;  %9288 = vmatprep.subr.bf16.mxu1 %v9970_v6  ;;  %v3540_v39 = vsel %vm442_vm2, %v11947_v41, %v11945_v55  ;;  %v12007_v6 = vpack.c.bf16 %v2827_v49, %v2826_v34  ;;  %v2755_v34 = vld [vmem:[#allocation4 + $0x50] sm:$0xff] }
 0x35a   : > { %v11961_v10 = vpop.permute.xlu1 %3295 }
 0x35b   : > { %v11963_v15 = vpop.permute.xlu0 %3343 }
 0x35c   : > { %3271 = vrot.lane.b32.xlu1 %v2889_v47, %s10090_s15  ;;  %9289 = vmatpush3.bf16.msra.mxu1 %v9971_v36 }
 0x35d   : > { %3395 = vrot.lane.b32.xlu0 %v11805_v29, %s10090_s15  ;;  %9290 = vmatprep.subr.bf16.mxu1 %v9972_v60 }
 0x35e   : > { %v11974_v61 = vpop.permute.xlu1 %3389 }
 0x35f   : > { %v11976_v50 = vpop.permute.xlu0 %3437 }
 0x360   : > { %3317 = vrot.lane.b32.xlu1 %v11978_v37, %s10092_s14  ;;  %9291 = vmatpush3.bf16.msra.mxu1 %v9973_v28 }
 0x361   : > { %3365 = vrot.lane.b32.xlu0 %v2889_v47, %s10091_s30  ;;  %v9974_v47 = vld [vmem:[%s14900_s5 + $0x178] sm:$0xff]  }
 0x362   : > { %v3248_v20 = vpop.permute.xlu1 %3247  ;;  %9292 = vmatprep.subr.bf16.mxu1 %v9974_v47 }
 0x363   : > { %v3200_v56 = vpop.permute.xlu0 %3199 }
 0x364   : > { %v3537_v63 = vsel %vm442_vm2, %v3200_v56, %v3248_v20  ;;  %v3475_v16 = vsel %vm498_vm4, %v2781_v2, %v3200_v56  ;;  %3323 = vrot.lane.b32.xlu1 %v2939_v30, %s10092_s14  ;;  %v2973_v2 = vpack.c.bf16 %v2943_v14, %v2942_v13  ;;  %9293 = vmatpush3.bf16.msra.mxu1 %v9976_v17 }
 0x365   : > { %3371 = vrot.lane.b32.xlu0 %v3035_v4, %s10091_s30  ;;  %4316 = vmatprep.mubr.bf16.mxu1 %v3537_v63  ;;  %v2891_v4 = vpack.c.bf16 %v2875_v54, %v2874_v5  ;;  %v15054_v63 = vmax.f32 %v10657_v23, 0.0  ;;  %v3585_v23 = vsel %vm386_vm0, %v3248_v20, %v11961_v10  ;;  %v9978_v10 = vld [vmem:[%s14900_s5 + $0x190] sm:$0xff]  }
 0x366   : > { %4317 = vmatmul.mubr.bf16.gmra.mrb[100].mxu1 %v3475_v16  ;;  %v3294_v25 = vpop.permute.xlu1 %3293  ;;  %v3635_v56 = vsel %vm498_vm4, %v2973_v2, %v11963_v15  ;;  %v2946_v2 = vld [vmem:[#allocation4 + $0x61] sm:$0xff] }
 0x367   : > { %v12005_v7 = vpop.permute.xlu0 %3341  ;;  %v3582_v36 = vsel %vm386_vm0, %v11432_v22, %v3294_v25  ;;  %4324 = vmatprep.mubr.bf16.mxu1 %v3540_v39  ;;  %v2753_v22 = vld [vmem:[#allocation4 + $0x38] sm:$0xff] }
 0x368   : > { %v3631_v8 = vsel %vm498_vm4, %v2972_v31, %v12005_v7  ;;  %4990 = vrot.lane.b32.xlu1 %v15053_v46, %s10090_s15  ;;  %v2782_v27 = vpack.c.bf16 %v2753_v22, %v2752_v35  ;;  %v15055_v31 = vmax.f32 %v10697_v44, 0.0  ;;  %v2945_v25 = vld [vmem:[#allocation4 + $0x51] sm:$0xff]  ;;  %v2757_v35 = vld [vmem:[#allocation4 + $0x68] sm:$0xff] }
 0x369   : > { %3227 = vrot.lane.b32.xlu0 %v12007_v6, %s10091_s30  ;;  %4469 = vmatprep.mubr.bf16.mxu0 %v3631_v8  ;;  %v9979_v39 = vld [vmem:[%s14900_s5 + $0x198] sm:$0xff]   ;;  %v2947_v8 = vld [vmem:[#allocation4 + $0x69] sm:$0xff] }
 0x36a   : > { %4470 = vmatmul.mubr.bf16.vlgmr.msra.gmra.mrb[128].mxu0 %v3582_v36  ;;  %v12021_v60 = vpop.permute.xlu1 %3253  ;;  %v3479_v16 = vsel %vm498_vm4, %v2782_v27, %v11947_v41  ;;  %v2921_v22 = vld [vmem:[#allocation4 + $0x170] sm:$0xff]  ;;  %v9980_v27 = vld [vmem:[%s14900_s5 + $0x1a0] sm:$0xff]  }
 0x36b   : > { %v12025_v30 = vpop.permute.xlu0 %3205  ;;  %4477 = vmatprep.mubr.bf16.mxu0 %v3635_v56  ;;  %9715 = vmatpush3.bf16.msra.mxu0 %v9975_v58  ;;  %v15057_v56 = vmax.f32 %v10720_v57, 0.0 }
 0x36c   : > { %3275 = vrot.lane.b32.xlu1 %v2891_v4, %s10090_s15  ;;  %9716 = vmatprep.subr.bf16.mxu0 %v9977_v26  ;;  %v3546_v17 = vsel %vm442_vm2, %v12025_v30, %v12021_v60 }
 0x36d   : > { %4988 = vrot.lane.b32.xlu0 %v15054_v63, %s10090_s15  ;;  %v2920_v63 = vld [vmem:[#allocation4 + $0x168] sm:$0xff] }
 0x36e   : > { %4325 = vmatmul.mubr.bf16.gmra.mrb[104].mxu1 %v3479_v16  ;;  %v12033_v49 = vpop.permute.xlu1 %3299  ;;  %v12090_v57 = vpack.c.bf16 %v2921_v22, %v2920_v63  ;;  %v2761_v22 = vld [vmem:[#allocation4 + $0x98] sm:$0xff] }
 0x36f   : > { %v12035_v28 = vpop.permute.xlu0 %3347  ;;  %9717 = vmatpush3.bf16.msra.mxu0 %v9977_v26 }
 0x370   : > { %3445 = vrot.lane.b32.xlu1 %v11776_v59, %s10092_s14  ;;  %v15056_v59 = vmax.f32 %v10685_v38, 0.0  ;;  %9718 = vmatprep.subr.bf16.mxu0 %v9978_v10  ;;  %v2944_v38 = vld [vmem:[#allocation4 + $0x49] sm:$0xff] }
 0x371   : > { %3397 = vrot.lane.b32.xlu0 %v11787_v24, %s10090_s15  ;;  %v2754_v24 = vld [vmem:[#allocation4 + $0x48] sm:$0xff]  ;;  %v2974_v36 = vpack.c.bf16 %v2945_v25, %v2944_v38  ;;  %v2951_v38 = vld [vmem:[#allocation4 + $0x99] sm:$0xff] }
 0x372   : > { %4478 = vmatmul.mubr.bf16.gmra.mrb[132].mxu0 %v3585_v23  ;;  %v12046_v41 = vpop.permute.xlu1 %3393  ;;  %v2783_v20 = vpack.c.bf16 %v2755_v34, %v2754_v24  ;;  %v2756_v23 = vld [vmem:[#allocation4 + $0x60] sm:$0xff]  ;;  %v9981_v34 = vld [vmem:[%s14900_s5 + $0x1a8] sm:$0xff]  }
 0x373   : > { %v12048_v58 = vpop.permute.xlu0 %3441  ;;  %9719 = vmatpush3.bf16.msra.mxu0 %v9978_v10 }
 0x374   : > { %4994 = vrot.lane.b32.xlu1 %v15055_v31, %s10090_s15  ;;  %9720 = vmatprep.subr.bf16.mxu0 %v9979_v39  ;;  %v2784_v31 = vpack.c.bf16 %v2757_v35, %v2756_v23 }
 0x375   : > { %4992 = vrot.lane.b32.xlu0 %v15056_v59, %s10090_s15  ;;  %v15058_v59 = vmax.f32 %v10712_v52, 0.0 }
 0x376   : > { %v3252_v14 = vpop.permute.xlu1 %3251  ;;  %v3487_v24 = vsel %vm498_vm4, %v2784_v31, %v12025_v30  ;;  %v15059_v30 = vmax.f32 %v10753_v21, 0.0  ;;  %v2948_v21 = vld [vmem:[#allocation4 + $0x79] sm:$0xff] }
 0x377   : > { %v3204_v47 = vpop.permute.xlu0 %3203  ;;  %9721 = vmatpush3.bf16.msra.mxu0 %v9979_v39  ;;  %v15060_v39 = vmax.f32 %v10740_v9, 0.0 }
 0x378   : > { %v3543_v44 = vsel %vm442_vm2, %v3204_v47, %v3252_v14  ;;  %v3483_v13 = vsel %vm498_vm4, %v2783_v20, %v3204_v47  ;;  %3447 = vrot.lane.b32.xlu1 %v11830_v43, %s10092_s14  ;;  %9722 = vmatprep.subr.bf16.mxu0 %v9980_v27  ;;  %v3591_v47 = vsel %vm386_vm0, %v3252_v14, %v12033_v49 }
 0x379   : > { %3369 = vrot.lane.b32.xlu0 %v2891_v4, %s10091_s30  ;;  %4332 = vmatprep.mubr.bf16.mxu1 %v3543_v44  ;;  %v2975_v4 = vpack.c.bf16 %v2947_v8, %v2946_v2 }
 0x37a   : > { %4333 = vmatmul.mubr.bf16.gmra.mrb[108].mxu1 %v3483_v13  ;;  %v3298_v5 = vpop.permute.xlu1 %3297  ;;  %v2949_v13 = vld [vmem:[#allocation4 + $0x81] sm:$0xff] }
 0x37b   : > { %v12067_v54 = vpop.permute.xlu0 %3345  ;;  %4340 = vmatprep.mubr.bf16.mxu1 %v3546_v17  ;;  %v3588_v43 = vsel %vm386_vm0, %v11945_v55, %v3298_v5  ;;  %v3643_v16 = vsel %vm498_vm4, %v2975_v4, %v12035_v28  ;;  %9723 = vmatpush3.bf16.msra.mxu0 %v9980_v27  ;;  %v2976_v14 = vpack.c.bf16 %v2949_v13, %v2948_v21  ;;  %v2950_v17 = vld [vmem:[#allocation4 + $0x91] sm:$0xff]  ;;  %v15067_v21 = vld [vmem:[#allocation27_spill] sm:$0xff] }
 0x37c   : > { %v3639_v46 = vsel %vm498_vm4, %v2974_v36, %v12067_v54  ;;  %4998 = vrot.lane.b32.xlu1 %v15057_v56, %s10090_s15  ;;  %9724 = vmatprep.subr.bf16.mxu0 %v9981_v34  ;;  %v2977_v2 = vpack.c.bf16 %v2951_v38, %v2950_v17  ;;  %v15069_v38 = vld [vmem:[#allocation25_spill] sm:$0xff] }
 0x37d   : > { %3399 = vrot.lane.b32.xlu0 %v11841_v53, %s10090_s15  ;;  %4485 = vmatprep.mubr.bf16.mxu0 %v3639_v46  ;;  %v15061_v46 = vmax.f32 %v10783_v51, 0.0 }
 0x37e   : > { %4486 = vmatmul.mubr.bf16.gmra.mrb[136].mxu0 %v3588_v43  ;;  %v12084_v55 = vpop.permute.xlu1 %3391  ;;  %v15062_v43 = vmax.f32 %v10773_v42, 0.0 }
 0x37f   : > { %v12088_v26 = vpop.permute.xlu0 %3439  ;;  %4493 = vmatprep.mubr.bf16.mxu0 %v3643_v16  ;;  %9725 = vmatpush3.bf16.msra.mxu0 %v9981_v34  ;;  %v15063_v16 = vld [vmem:[#allocation23_spill] sm:$0xff]  ;;  %v15065_v34 = vld [vmem:[#allocation21_spill] sm:$0xff] }
 0x380   : > { %3321 = vrot.lane.b32.xlu1 %v12090_v57, %s10092_s14  ;;  %v15064_v23 = vmax.f32 %v15063_v16, 0.0  ;;  %v15066_v31 = vmax.f32 %v15065_v34, 0.0  ;;  %v15071_v34 = vld [vmem:[#allocation31_spill] sm:$0xff] }
 0x381   : > { %4996 = vrot.lane.b32.xlu0 %v15058_v59, %s10090_s15 }
 0x382   : > { %4341 = vmatmul.mubr.bf16.gmra.mrb[112].mxu1 %v3487_v24  ;;  %v12102_v10 = vpop.permute.xlu1 %3257 }
 0x383   : > { %v3210_v20 = vpop.permute.xlu0 %3209 }
 0x384   : > { %3449 = vrot.lane.b32.xlu1 %v11812_v33, %s10092_s14  ;;  %v3552_v8 = vsel %vm442_vm2, %v3210_v20, %v12102_v10 }
 0x385   : > { %3401 = vrot.lane.b32.xlu0 %v11823_v19, %s10090_s15 }
 0x386   : > { %4494 = vmatmul.mubr.bf16.gmra.mrb[140].mxu0 %v3591_v47  ;;  %v3304_v52 = vpop.permute.xlu1 %3303 }
 0x387   : > { %v12110_v25 = vpop.permute.xlu0 %3351 }
 0x388   : > { %5002 = vrot.lane.b32.xlu1 %v15059_v30, %s10090_s15  ;;  %v3651_v4 = vsel %vm498_vm4, %v2977_v2, %v12110_v25  ;;  %v2952_v30 = vld [vmem:[#allocation4 + $0xa9] sm:$0xff] }
 0x389   : > { %5000 = vrot.lane.b32.xlu0 %v15060_v39, %s10090_s15 }
 0x38a   : > { %v3256_v44 = vpop.permute.xlu1 %3255 }
 0x38b   : > { %v3208_v33 = vpop.permute.xlu0 %3207  ;;  %v3597_v59 = vsel %vm386_vm0, %v3256_v44, %v3304_v52 }
 0x38c   : > { %v3549_v19 = vsel %vm442_vm2, %v3208_v33, %v3256_v44  ;;  %v3491_v49 = vsel %vm498_vm4, %v11805_v29, %v3208_v33  ;;  %3451 = vrot.lane.b32.xlu1 %v11866_v3, %s10092_s14  ;;  %v2955_v33 = vld [vmem:[#allocation4 + $0xc9] sm:$0xff] }
 0x38d   : > { %3403 = vrot.lane.b32.xlu0 %v11875_v48, %s10090_s15  ;;  %4348 = vmatprep.mubr.bf16.mxu1 %v3549_v19 }
 0x38e   : > { %4349 = vmatmul.mubr.bf16.gmra.mrb[116].mxu1 %v3491_v49  ;;  %v3302_v9 = vpop.permute.xlu1 %3301  ;;  %v2954_v49 = vld [vmem:[#allocation4 + $0xc1] sm:$0xff] }
 0x38f   : > { %v12125_v36 = vpop.permute.xlu0 %3349  ;;  %4356 = vmatprep.mubr.bf16.mxu1 %v3552_v8  ;;  %v3594_v5 = vsel %vm386_vm0, %v12021_v60, %v3302_v9  ;;  %v2760_v60 = vld [vmem:[#allocation4 + $0x90] sm:$0xff]  ;;  %v15070_v9 = vmax.f32 %v15069_v38, 0.0  ;;  %v2979_v8 = vpack.c.bf16 %v2955_v33, %v2954_v49 }
 0x390   : > { %v3647_v29 = vsel %vm498_vm4, %v2976_v14, %v12125_v36  ;;  %5006 = vrot.lane.b32.xlu1 %v15061_v46, %s10090_s15  ;;  %v2786_v27 = vpack.c.bf16 %v2761_v22, %v2760_v60  ;;  %v15068_v14 = vmax.f32 %v15067_v21, 0.0 }
 0x391   : > { %5004 = vrot.lane.b32.xlu0 %v15062_v43, %s10090_s15  ;;  %4501 = vmatprep.mubr.bf16.mxu0 %v3647_v29  ;;  %v2765_v29 = vld [vmem:[#allocation4 + $0xc8] sm:$0xff] }
 0x392   : > { %4502 = vmatmul.mubr.bf16.gmra.mrb[144].mxu0 %v3594_v5  ;;  %v12139_v56 = vpop.permute.xlu1 %3261  ;;  %v3495_v42 = vsel %vm498_vm4, %v2786_v27, %v3210_v20 }
 0x393   : > { %v3214_v35 = vpop.permute.xlu0 %3213  ;;  %4509 = vmatprep.mubr.bf16.mxu0 %v3651_v4 }
 0x394   : > { %3453 = vrot.lane.b32.xlu1 %v11848_v1, %s10092_s14  ;;  %v3558_v13 = vsel %vm442_vm2, %v3214_v35, %v12139_v56 }
 0x395   : > { %3405 = vrot.lane.b32.xlu0 %v11859_v45, %s10090_s15  ;;  %v2953_v45 = vld [vmem:[#allocation4 + $0xb1] sm:$0xff] }
 0x396   : > { %4357 = vmatmul.mubr.bf16.gmra.mrb[120].mxu1 %v3495_v42  ;;  %v3308_v51 = vpop.permute.xlu1 %3307  ;;  %v2978_v39 = vpack.c.bf16 %v2953_v45, %v2952_v30 }
 0x397   : > { %v12148_v63 = vpop.permute.xlu0 %3355 }
 0x398   : > { %5010 = vrot.lane.b32.xlu1 %v15064_v23, %s10090_s15  ;;  %v3659_v17 = vsel %vm498_vm4, %v2979_v8, %v12148_v63  ;;  %v2958_v8 = vld [vmem:[#allocation4 + $0xf1] sm:$0xff] }
 0x399   : > { %5008 = vrot.lane.b32.xlu0 %v15066_v31, %s10090_s15  ;;  %v15072_v31 = vmax.f32 %v15071_v34, 0.0 }
 0x39a   : > { %4510 = vmatmul.mubr.bf16.gmra.mrb[148].mxu0 %v3597_v59  ;;  %v3260_v1 = vpop.permute.xlu1 %3259  ;;  %v15073_v59 = vld [vmem:[#allocation29_spill] sm:$0xff] }
 0x39b   : > { %v3212_v24 = vpop.permute.xlu0 %3211 }
 0x39c   : > { %v3555_v20 = vsel %vm442_vm2, %v3212_v24, %v3260_v1  ;;  %v3499_v47 = vsel %vm498_vm4, %v11841_v53, %v3212_v24  ;;  %3455 = vrot.lane.b32.xlu1 %v11902_v18, %s10092_s14  ;;  %v15074_v24 = vmax.f32 %v15073_v59, 0.0 }
 0x39d   : > { %3407 = vrot.lane.b32.xlu0 %v11909_v11, %s10090_s15  ;;  %4364 = vmatprep.mubr.bf16.mxu1 %v3555_v20  ;;  %v5160_v20 = vld [vmem:[#allocation3 + $0x1] sm:$0xff] }
 0x39e   : > { %4365 = vmatmul.mubr.bf16.gmra.mrb[124].mxu1 %v3499_v47  ;;  %v3306_v52 = vpop.permute.xlu1 %3305  ;;  %v9070_v2 = vpop.f32.mrb[96].mxu1  ;;  %v5161_v47 = vld [vmem:[#allocation3 + $0x9] sm:$0xff] }
 0x39f   : > { %v12164_v44 = vpop.permute.xlu0 %3353  ;;  %4372 = vmatprep.mubr.bf16.mxu1 %v3558_v13  ;;  %v3600_v19 = vsel %vm386_vm0, %v12102_v10, %v3306_v52  ;;  %v2764_v10 = vld [vmem:[#allocation4 + $0xc0] sm:$0xff]  ;;  %v9071_v22 = vpop.f32.mrb[97].mxu1  ;;  %v5256_v13 = vld [vmem:[#allocation3 + $0x18] sm:$0xff] }
 0x3a0   : > { %v3655_v53 = vsel %vm498_vm4, %v2978_v39, %v12164_v44  ;;  %5014 = vrot.lane.b32.xlu1 %v15068_v14, %s10090_s15  ;;  %v2788_v43 = vpack.c.bf16 %v2765_v29, %v2764_v10  ;;  %v12187_v60 = vadd.f32 %v9071_v22, %v9070_v2  ;;  %v9073_v27 = vpop.f32.mrb[98].mxu1  ;;  %v2768_v22 = vld [vmem:[#allocation4 + $0xf0] sm:$0xff] }
 0x3a1   : > { %5012 = vrot.lane.b32.xlu0 %v15070_v9, %s10090_s15  ;;  %4517 = vmatprep.mubr.bf16.mxu0 %v3655_v53  ;;  %v9074_v23 = vpop.f32.mrb[99].mxu1  ;;  %v5257_v53 = vld [vmem:[#allocation3 + $0x20] sm:$0xff] }
 0x3a2   : > { %4518 = vmatmul.mubr.bf16.gmra.mrb[152].mxu0 %v3600_v19  ;;  %v12178_v5 = vpop.permute.xlu1 %3265  ;;  %v3503_v4 = vsel %vm498_vm4, %v2788_v43, %v3214_v35  ;;  %v12197_v45 = vadd.f32 %v9074_v23, %v9073_v27  ;;  %v3603_v35 = vsel %vm386_vm0, %v3260_v1, %v3308_v51  ;;  %v5192_v19 = vpack.c.bf16 %v5161_v47, %v5160_v20  ;;  %v2959_v51 = vld [vmem:[#allocation4 + $0xf9] sm:$0xff]  ;;  %v5163_v20 = vld [vmem:[#allocation3 + $0x21] sm:$0xff] }
 0x3a3   : > { %v3218_v46 = vpop.permute.xlu0 %3217  ;;  %4525 = vmatprep.mubr.bf16.mxu0 %v3659_v17  ;;  %v5288_v14 = vpack.c.bf16 %v5257_v53, %v5256_v13  ;;  %v2981_v29 = vpack.c.bf16 %v2959_v51, %v2958_v8  ;;  %v2769_v17 = vld [vmem:[#allocation4 + $0xf8] sm:$0xff]  ;;  %v15079_v51 = vld [vmem:[#allocation39_spill] sm:$0xff] }
 0x3a4   : > { %3457 = vrot.lane.b32.xlu1 %v11884_v12, %s10092_s14  ;;  %v3564_v21 = vsel %vm442_vm2, %v3218_v46, %v12178_v5  ;;  %v15077_v27 = vld [vmem:[#allocation33_spill] sm:$0xff] }
 0x3a5   : > { %3409 = vrot.lane.b32.xlu0 %v11895_v40, %s10090_s15  ;;  %v15078_v23 = vmax.f32 %v15077_v27, 0.0 }
 0x3a6   : > { %4373 = vmatmul.mubr.bf16.gmra.mrb[128].mxu1 %v3503_v4  ;;  %v3312_v42 = vpop.permute.xlu1 %3311 }
 0x3a7   : > { %v12189_v16 = vpop.permute.xlu0 %3359 }
 0x3a8   : > { %5018 = vrot.lane.b32.xlu1 %v15072_v31, %s10090_s15  ;;  %v3667_v43 = vsel %vm498_vm4, %v2981_v29, %v12189_v16 }
 0x3a9   : > { %5016 = vrot.lane.b32.xlu0 %v15074_v24, %s10090_s15  ;;  %v5162_v24 = vld [vmem:[#allocation3 + $0x19] sm:$0xff] }
 0x3aa   : > { %4526 = vmatmul.mubr.bf16.gmra.mrb[156].mxu0 %v3603_v35  ;;  %v3264_v30 = vpop.permute.xlu1 %3263 }
 0x3ab   : > { %v3216_v39 = vpop.permute.xlu0 %3215  ;;  %v3609_v35 = vsel %vm386_vm0, %v3264_v30, %v3312_v42 }
 0x3ac   : > { %v3561_v33 = vsel %vm442_vm2, %v3216_v39, %v3264_v30  ;;  %v3507_v52 = vsel %vm498_vm4, %v11875_v48, %v3216_v39  ;;  %3459 = vrot.lane.b32.xlu1 %v11949_v0, %s10092_s14  ;;  %v9982_v48 = vld [vmem:[%s14902_s7 + $0x40] sm:$0xff]  }
 0x3ad   : > { %3411 = vrot.lane.b32.xlu0 %v11978_v37, %s10090_s15  ;;  %4380 = vmatprep.mubr.bf16.mxu1 %v3561_v33  ;;  %v5193_v33 = vpack.c.bf16 %v5163_v20, %v5162_v24  ;;  %v9998_v20 = vld [vmem:[%s14902_s7 + $0xc0] sm:$0xff]  }
 0x3ae   : > { %4381 = vmatmul.mubr.bf16.gmra.mrb[132].mxu1 %v3507_v52  ;;  %v3310_v1 = vpop.permute.xlu1 %3309  ;;  %9412 = vmatprep.subr.bf16.mxu0 %v9982_v48 }
 0x3af   : > { %v12207_v49 = vpop.permute.xlu0 %3357  ;;  %4388 = vmatprep.mubr.bf16.mxu1 %v3564_v21  ;;  %v3606_v9 = vsel %vm386_vm0, %v12139_v56, %v3310_v1  ;;  %v15075_v56 = vld [vmem:[#allocation35_spill] sm:$0xff]  ;;  %9524 = vmatprep.subr.bf16.mxu1 %v9998_v20 }
 0x3b0   : > { %v3663_v38 = vsel %vm498_vm4, %v11866_v3, %v12207_v49  ;;  %5560 = vrot.lane.b32.xlu1 %v5192_v19, %s10090_s15  ;;  %v2790_v3 = vpack.c.bf16 %v2769_v17, %v2768_v22  ;;  %v15076_v4 = vmax.f32 %v15075_v56, 0.0 }
 0x3b1   : > { %5608 = vrot.lane.b32.xlu0 %v5288_v14, %s10090_s15  ;;  %4533 = vmatprep.mubr.bf16.mxu0 %v3663_v38 }
 0x3b2   : > { %4534 = vmatmul.mubr.bf16.gmra.mrb[160].mxu0 %v3606_v9  ;;  %v3270_v10 = vpop.permute.xlu1 %3269  ;;  %v3511_v34 = vsel %vm498_vm4, %v2790_v3, %v3218_v46 }
 0x3b3   : > { %v3222_v2 = vpop.permute.xlu0 %3221  ;;  %4541 = vmatprep.mubr.bf16.mxu0 %v3667_v43 }
 0x3b4   : > { %5022 = vrot.lane.b32.xlu1 %v15076_v4, %s10090_s15  ;;  %v3570_v19 = vsel %vm442_vm2, %v3222_v2, %v3270_v10 }
 0x3b5   : > { %5020 = vrot.lane.b32.xlu0 %v15078_v23, %s10090_s15 }
 0x3b6   : > { %4389 = vmatmul.mubr.bf16.gmra.mrb[136].mxu1 %v3511_v34  ;;  %v3316_v31 = vpop.permute.xlu1 %3315 }
 0x3b7   : > { %v12230_v59 = vpop.permute.xlu0 %3363 }
 0x3b8   : > { %3461 = vrot.lane.b32.xlu1 %v11923_v62, %s10092_s14  ;;  %v3675_v21 = vsel %vm498_vm4, %v11884_v12, %v12230_v59 }
 0x3b9   : > { %3413 = vrot.lane.b32.xlu0 %v11931_v32, %s10090_s15 }
 0x3ba   : > { %4542 = vmatmul.mubr.bf16.gmra.mrb[164].mxu0 %v3609_v35  ;;  %v3268_v47 = vpop.permute.xlu1 %3267  ;;  %v3742_v35 = vsel %vm386_vm0, %v11974_v61, %v11976_v50 }
 0x3bb   : > { %v3220_v39 = vpop.permute.xlu0 %3219  ;;  %v3615_v38 = vsel %vm386_vm0, %v3268_v47, %v3316_v31 }
 0x3bc   : > { %v3567_v46 = vsel %vm442_vm2, %v3220_v39, %v3268_v47  ;;  %v3515_v52 = vsel %vm498_vm4, %v11909_v11, %v3220_v39  ;;  %5562 = vrot.lane.b32.xlu1 %v5193_v33, %s10090_s15  ;;  %v15080_v11 = vmax.f32 %v15079_v51, 0.0  ;;  %v9999_v51 = vld [vmem:[%s14902_s7 + $0x80] sm:$0xff]  }
 0x3bd   : > { %4396 = vmatprep.mubr.bf16.mxu1 %v3567_v46 }
 0x3be   : > { %4397 = vmatmul.mubr.bf16.gmra.mrb[140].mxu1 %v3515_v52  ;;  %v3314_v13 = vpop.permute.xlu1 %3313 }
 0x3bf   : > { %v12241_v53 = vpop.permute.xlu0 %3361  ;;  %4404 = vmatprep.mubr.bf16.mxu1 %v3570_v19  ;;  %v3612_v30 = vsel %vm386_vm0, %v12178_v5, %v3314_v13 }
 0x3c0   : > { %v3671_v42 = vsel %vm498_vm4, %v11902_v18, %v12241_v53  ;;  %5026 = vrot.lane.b32.xlu1 %v15080_v11, %s10090_s15  ;;  %v3519_v18 = vsel %vm498_vm4, %v11895_v40, %v3222_v2  ;;  %v3694_v11 = vsel %vm442_vm2, %v12005_v7, %v11974_v61  ;;  %v3114_v61 = vld [vmem:[#allocation4 + $0x189] sm:$0xff]  ;;  %v15081_v7 = vld [vmem:[#allocation37_spill] sm:$0xff] }
 0x3c1   : > { %4549 = vmatprep.mubr.bf16.mxu0 %v3671_v42 }
 0x3c2   : > { %4550 = vmatmul.mubr.bf16.gmra.mrb[168].mxu0 %v3612_v30  ;;  %v12252_v1 = vpop.permute.xlu1 %3273 }
 0x3c3   : > { %v3226_v14 = vpop.permute.xlu0 %3225  ;;  %4557 = vmatprep.mubr.bf16.mxu0 %v3675_v21 }
 0x3c4   : > { %v3576_v40 = vsel %vm442_vm2, %v3226_v14, %v12252_v1  ;;  %v3527_v23 = vsel %vm498_vm4, %v11931_v32, %v3226_v14 }
 0x3c6   : > { %4405 = vmatmul.mubr.bf16.gmra.mrb[144].mxu1 %v3519_v18  ;;  %v3320_v48 = vpop.permute.xlu1 %3319  ;;  %v3745_v18 = vsel %vm386_vm0, %v12084_v55, %v12088_v26  ;;  %v3113_v26 = vld [vmem:[#allocation4 + $0x181] sm:$0xff] }
 0x3c7   : > { %v12259_v5 = vpop.permute.xlu0 %3367 }
 0x3ca   : > { %4558 = vmatmul.mubr.bf16.gmra.mrb[172].mxu0 %v3615_v38  ;;  %v12262_v9 = vpop.permute.xlu1 %3443  ;;  %v15082_v38 = vmax.f32 %v15081_v7, 0.0 }
 0x3cb   : > { %v3224_v8 = vpop.permute.xlu0 %3223 }
 0x3cc   : > { %v3523_v43 = vsel %vm498_vm4, %v11978_v37, %v3224_v8  ;;  %v3683_v37 = vsel %vm498_vm4, %v11923_v62, %v12259_v5 }
 0x3ce   : > { %v3272_v29 = vpop.permute.xlu1 %3271 }
 0x3cf   : > { %v12264_v17 = vpop.permute.xlu0 %3395  ;;  %v3573_v12 = vsel %vm442_vm2, %v3224_v8, %v3272_v29  ;;  %v15083_v8 = vld [vmem:[#allocation43_spill] sm:$0xff] }
 0x3d0   : > { %4412 = vmatprep.mubr.bf16.mxu1 %v3573_v12 }
 0x3d1   : > { %4413 = vmatmul.mubr.bf16.gmra.mrb[148].mxu1 %v3523_v43 }
 0x3d2   : > { %v3318_v2 = vpop.permute.xlu1 %3317  ;;  %4420 = vmatprep.mubr.bf16.mxu1 %v3576_v40 }
 0x3d3   : > { %v12271_v22 = vpop.permute.xlu0 %3365  ;;  %v3618_v56 = vsel %vm386_vm0, %v3270_v10, %v3318_v2 }
 0x3d4   : > { %v3679_v3 = vsel %vm498_vm4, %v11949_v0, %v12271_v22  ;;  %v3621_v0 = vsel %vm386_vm0, %v3272_v29, %v3320_v48  ;;  %v15084_v29 = vmax.f32 %v15083_v8, 0.0 }
 0x3d5   : > { %4565 = vmatprep.mubr.bf16.mxu0 %v3679_v3 }
 0x3d6   : > { %4566 = vmatmul.mubr.bf16.gmra.mrb[176].mxu0 %v3618_v56  ;;  %v12280_v4 = vpop.permute.xlu1 %3323 }
 0x3d7   : > { %4573 = vmatprep.mubr.bf16.mxu0 %v3683_v37  ;;  %v12282_v27 = vpop.permute.xlu0 %3371 }
 0x3d9   : > { %4421 = vmatmul.mubr.bf16.gmra.mrb[152].mxu1 %v3527_v23  ;;  %v3697_v23 = vsel %vm442_vm2, %v11963_v15, %v12084_v55  ;;  %v3066_v15 = vld [vmem:[#allocation4 + $0x188] sm:$0xff]  ;;  %v15085_v55 = vld [vmem:[#allocation41_spill] sm:$0xff] }
 0x3da   : > { %v4991_v34 = vpop.permute.xlu1 %4990 }
 0x3db   : > { %v3228_v31 = vpop.permute.xlu0 %3227  ;;  %5083 = vst.msk [vmem:[#allocation3 + $0x39] sm:$0xff] %vm442_vm2, %v4991_v34 }
 0x3dc   : > { %v3531_v32 = vsel %vm498_vm4, %v12090_v57, %v3228_v31 }
 0x3de   : > { %4574 = vmatmul.mubr.bf16.gmra.mrb[180].mxu0 %v3621_v0  ;;  %v12288_v10 = vpop.permute.xlu1 %3275  ;;  %v3748_v0 = vsel %vm386_vm0, %v12046_v41, %v12048_v58 }
 0x3df   : > { %v4989_v24 = vpop.permute.xlu0 %4988  ;;  %v3579_v62 = vsel %vm442_vm2, %v3228_v31, %v12288_v10 }
 0x3e0   : > { %5082 = vst.msk [vmem:[#allocation3 + $0x31] sm:$0xff] %vm442_vm2, %v4989_v24  ;;  %4428 = vmatprep.mubr.bf16.mxu1 %v3579_v62 }
 0x3e1   : > { %4429 = vmatmul.mubr.bf16.gmra.mrb[156].mxu1 %v3531_v32  ;;  %v10000_v32 = vld [vmem:[%s14902_s7 + $0xc8] sm:$0xff]  }
 0x3e2   : > { %v12301_v47 = vpop.permute.xlu1 %3445  ;;  %4630 = vmatprep.mubr.bf16.mxu1 %v3742_v35  ;;  %v5165_v33 = vld [vmem:[#allocation3 + $0x39] sm:$0xff]  ;;  %v15086_v35 = vmax.f32 %v15085_v55, 0.0 }
 0x3e3   : > { %v12303_v39 = vpop.permute.xlu0 %3397 }
 0x3e6   : > { %v4995_v46 = vpop.permute.xlu1 %4994 }
 0x3e7   : > { %v4993_v52 = vpop.permute.xlu0 %4992  ;;  %v5258_v13 = vld [vmem:[#allocation3 + $0x30] sm:$0xff]  ;;  %v5259_v19 = vld [vmem:[#allocation3 + $0x38] sm:$0xff]  ;;  %5085 = vst.msk [vmem:[#allocation3 + $0x51] sm:$0xff] %vm442_vm2, %v4995_v46 }
 0x3e8   : > { %v5164_v42 = vld [vmem:[#allocation3 + $0x31] sm:$0xff]  ;;  %5084 = vst.msk [vmem:[#allocation3 + $0x49] sm:$0xff] %vm442_vm2, %v4993_v52  ;;  %v5289_v50 = vpack.c.bf16 %v5259_v19, %v5258_v13  ;;  %v3115_v52 = vld [vmem:[#allocation4 + $0x199] sm:$0xff] }
 0x3e9   : > { %v12307_v30 = vpack.c.bf16 %v5165_v33, %v5164_v42  ;;  %4631 = vmatmul.mubr.bf16.vlgmr.msra.gmra.mrb[160].mxu1 %v3694_v11  ;;  %v3065_v46 = vld [vmem:[#allocation4 + $0x180] sm:$0xff]  ;;  %v3133_v42 = vld [vmem:[#allocation4 + $0x32] sm:$0xff] }
 0x3ea   : > { %5610 = vrot.lane.b32.xlu0 %v5289_v50, %s10090_s15  ;;  %v12318_v21 = vpop.permute.xlu1 %3447  ;;  %4638 = vmatprep.mubr.bf16.mxu1 %v3745_v18  ;;  %v3116_v13 = vld [vmem:[#allocation4 + $0x1a1] sm:$0xff]  ;;  %v3083_v19 = vpack.c.bf16 %v3066_v15, %v3065_v46  ;;  %v3700_v18 = vsel %vm442_vm2, %v12067_v54, %v12046_v41 }
 0x3eb   : > { %5564 = vrot.lane.b32.xlu1 %v12307_v30, %s10090_s15  ;;  %v12320_v14 = vpop.permute.xlu0 %3369  ;;  %9525 = vmatpush3.bf16.msra.mxu1 %v9999_v51  ;;  %v3134_v50 = vld [vmem:[#allocation4 + $0x3a] sm:$0xff]  ;;  %v15087_v51 = vld [vmem:[#allocation47_spill] sm:$0xff] }
 0x3ec   : > { %v3687_v48 = vsel %vm498_vm4, %v12007_v6, %v12320_v14  ;;  %v3131_v6 = vpack.c.bf16 %v3114_v61, %v3113_v26  ;;  %9526 = vmatprep.subr.bf16.mxu1 %v10000_v32  ;;  %v15088_v11 = vmax.f32 %v15087_v51, 0.0  ;;  %v3165_v41 = vpack.c.bf16 %v3134_v50, %v3133_v42  ;;  %v10002_v26 = vld [vmem:[%s14902_s7 + $0xd0] sm:$0xff]   ;;  %v15089_v32 = vld [vmem:[#allocation45_spill] sm:$0xff]  ;;  %v10006_v42 = vld [vmem:[%s14902_s7 + $0xe0] sm:$0xff]  }
 0x3ed   : > { %4581 = vmatprep.mubr.bf16.mxu0 %v3687_v48  ;;  %v3132_v48 = vpack.c.bf16 %v3116_v13, %v3115_v52  ;;  %v15090_v15 = vmax.f32 %v15089_v32, 0.0  ;;  %v9983_v52 = vld [vmem:[%s14902_s7] sm:$0xff]   ;;  %v3067_v13 = vld [vmem:[#allocation4 + $0x198] sm:$0xff] }
 0x3ee   : > { %5024 = vrot.lane.b32.xlu0 %v15082_v38, %s10090_s15  ;;  %v4999_v12 = vpop.permute.xlu1 %4998  ;;  %v5167_v37 = vld [vmem:[#allocation3 + $0x51] sm:$0xff]  ;;  %v3691_v58 = vsel %vm498_vm4, %v3131_v6, %v12282_v27  ;;  %v3751_v38 = vsel %vm386_vm0, %v12264_v17, %v12262_v9  ;;  %v10003_v9 = vld [vmem:[%s14902_s7 + $0x90] sm:$0xff]  }
 0x3ef   : > { %5030 = vrot.lane.b32.xlu1 %v15084_v29, %s10090_s15  ;;  %v12334_v43 = vpop.permute.xlu0 %3399  ;;  %v5260_v40 = vld [vmem:[#allocation3 + $0x48] sm:$0xff]  ;;  %v5261_v2 = vld [vmem:[#allocation3 + $0x50] sm:$0xff]  ;;  %5087 = vst.msk [vmem:[#allocation3 + $0x69] sm:$0xff] %vm442_vm2, %v4999_v12  ;;  %v3627_v12 = vsel %vm386_vm0, %v12288_v10, %v12280_v4  ;;  %v3111_v10 = vld [vmem:[#allocation4 + $0x169] sm:$0xff] }
 0x3f0   : > { %v5290_v3 = vpack.c.bf16 %v5261_v2, %v5260_v40  ;;  %v5166_v56 = vld [vmem:[#allocation3 + $0x49] sm:$0xff]  ;;  %v3112_v40 = vld [vmem:[#allocation4 + $0x171] sm:$0xff] }
 0x3f1   : > { %4639 = vmatmul.mubr.bf16.gmra.mrb[164].mxu1 %v3697_v23  ;;  %v12348_v62 = vpack.c.bf16 %v5167_v37, %v5166_v56  ;;  %v3136_v56 = vld [vmem:[#allocation4 + $0x52] sm:$0xff]  ;;  %v3137_v37 = vld [vmem:[#allocation4 + $0x62] sm:$0xff] }
 0x3f2   : > { %5612 = vrot.lane.b32.xlu0 %v5290_v3, %s10090_s15  ;;  %v3322_v34 = vpop.permute.xlu1 %3321  ;;  %4646 = vmatprep.mubr.bf16.mxu1 %v3748_v0  ;;  %v3130_v3 = vpack.c.bf16 %v3112_v40, %v3111_v10  ;;  %v10004_v23 = vld [vmem:[%s14902_s7 + $0xd8] sm:$0xff]   ;;  %v10007_v50 = vld [vmem:[%s14902_s7 + $0xa0] sm:$0xff]  }
 0x3f3   : > { %3465 = vrot.lane.b32.xlu1 %v3131_v6, %s10092_s14  ;;  %v4997_v31 = vpop.permute.xlu0 %4996  ;;  %v3624_v24 = vsel %vm386_vm0, %v12252_v1, %v3322_v34  ;;  %v10001_v1 = vld [vmem:[%s14902_s7 + $0x88] sm:$0xff]   ;;  %v10005_v0 = vld [vmem:[%s14902_s7 + $0x98] sm:$0xff]  }
 0x3f4   : > { %5086 = vst.msk [vmem:[#allocation3 + $0x61] sm:$0xff] %vm442_vm2, %v4997_v31  ;;  %4582 = vmatmul.mubr.bf16.gmra.mrb[184].mxu0 %v3624_v24  ;;  %9527 = vmatpush3.bf16.msra.mxu1 %v10001_v1  ;;  %v3135_v6 = vld [vmem:[#allocation4 + $0x4a] sm:$0xff]  ;;  %v3703_v24 = vsel %vm442_vm2, %v12035_v28, %v12264_v17 }
 0x3f5   : > { %4589 = vmatprep.mubr.bf16.mxu0 %v3691_v58  ;;  %9528 = vmatprep.subr.bf16.mxu1 %v10002_v26  ;;  %v3138_v34 = vld [vmem:[#allocation4 + $0x6a] sm:$0xff]  ;;  %v3754_v58 = vsel %vm386_vm0, %v12303_v39, %v12301_v47  ;;  %v3166_v1 = vpack.c.bf16 %v3136_v56, %v3135_v6  ;;  %v3757_v6 = vsel %vm386_vm0, %v12334_v43, %v12318_v21 }
 0x3f6   : > { %5028 = vrot.lane.b32.xlu0 %v15086_v35, %s10090_s15  ;;  %v12363_v20 = vpop.permute.xlu1 %3449  ;;  %v5169_v46 = vld [vmem:[#allocation3 + $0x69] sm:$0xff]  ;;  %v3167_v28 = vpack.c.bf16 %v3138_v34, %v3137_v37  ;;  %v9984_v47 = vld [vmem:[%s14902_s7 + $0x48] sm:$0xff]   ;;  %v10010_v34 = vld [vmem:[%s14902_s7 + $0xf0] sm:$0xff]  }
 0x3f7   : > { %5566 = vrot.lane.b32.xlu1 %v12348_v62, %s10090_s15  ;;  %v12365_v33 = vpop.permute.xlu0 %3401  ;;  %v10009_v56 = vld [vmem:[%s14902_s7 + $0xa8] sm:$0xff]  }
 0x3f8   : > { %9529 = vmatpush3.bf16.msra.mxu1 %v10003_v9  ;;  %v5352_v21 = vld [vmem:[#allocation3 + $0x1a] sm:$0xff] }
 0x3f9   : > { %4647 = vmatmul.mubr.bf16.gmra.mrb[168].mxu1 %v3700_v18  ;;  %9530 = vmatprep.subr.bf16.mxu1 %v10004_v23  ;;  %v9988_v23 = vld [vmem:[%s14902_s7 + $0x58] sm:$0xff]  }
 0x3fa   : > { %3417 = vrot.lane.b32.xlu0 %v3083_v19, %s10090_s15  ;;  %v5003_v61 = vpop.permute.xlu1 %5002  ;;  %4654 = vmatprep.mubr.bf16.mxu1 %v3751_v38  ;;  %v3068_v19 = vld [vmem:[#allocation4 + $0x1a0] sm:$0xff]  ;;  %v10008_v38 = vld [vmem:[%s14902_s7 + $0xe8] sm:$0xff]  }
 0x3fb   : > { %5034 = vrot.lane.b32.xlu1 %v15088_v11, %s10090_s15  ;;  %v5001_v7 = vpop.permute.xlu0 %5000  ;;  %v5262_v8 = vld [vmem:[#allocation3 + $0x60] sm:$0xff]  ;;  %v5263_v29 = vld [vmem:[#allocation3 + $0x68] sm:$0xff]  ;;  %5089 = vst.msk [vmem:[#allocation3 + $0x81] sm:$0xff] %vm442_vm2, %v5003_v61  ;;  %v3084_v18 = vpack.c.bf16 %v3068_v19, %v3067_v13  ;;  %v3140_v61 = vld [vmem:[#allocation4 + $0x82] sm:$0xff] }
 0x3fc   : > { %5088 = vst.msk [vmem:[#allocation3 + $0x79] sm:$0xff] %vm442_vm2, %v5001_v7  ;;  %v5291_v54 = vpack.c.bf16 %v5263_v29, %v5262_v8  ;;  %4590 = vmatmul.mubr.bf16.gmra.mrb[188].mxu0 %v3627_v12  ;;  %v5168_v31 = vld [vmem:[#allocation3 + $0x61] sm:$0xff]  ;;  %9531 = vmatpush3.bf16.msra.mxu1 %v10005_v0  ;;  %v9985_v7 = vld [vmem:[%s14902_s7 + $0x8] sm:$0xff]  }
 0x3fd   : > { %9726 = vmatprep.mubr.msk.bf16.mxu0 %vm498_vm4, %v3165_v41  ;;  %v12416_v17 = vpack.c.bf16 %v5169_v46, %v5168_v31  ;;  %9532 = vmatprep.subr.bf16.mxu1 %v10006_v42  ;;  %v3141_v8 = vld [vmem:[#allocation4 + $0x92] sm:$0xff]  ;;  %v15091_v12 = vld [vmem:[#allocation51_spill] sm:$0xff]  ;;  %v3709_v46 = vsel %vm442_vm2, %v12110_v25, %v12334_v43  ;;  %v9991_v43 = vld [vmem:[%s14902_s7 + $0x20] sm:$0xff]  }
 0x3fe   : > { %5614 = vrot.lane.b32.xlu0 %v5291_v54, %s10090_s15  ;;  %v12391_v2 = vpop.permute.xlu1 %3451  ;;  %v9986_v29 = vld [vmem:[%s14902_s7 + $0x50] sm:$0xff]   ;;  %v15092_v41 = vmax.f32 %v15091_v12, 0.0  ;;  %v3706_v54 = vsel %vm442_vm2, %v12125_v36, %v12303_v39  ;;  %v15093_v13 = vld [vmem:[#allocation49_spill] sm:$0xff] }
 0x3ff   : > { %3467 = vrot.lane.b32.xlu1 %v3132_v48, %s10092_s14  ;;  %v12393_v4 = vpop.permute.xlu0 %3403  ;;  %v3139_v48 = vld [vmem:[#allocation4 + $0x7a] sm:$0xff]  ;;  %v9987_v39 = vld [vmem:[%s14902_s7 + $0x10] sm:$0xff]   ;;  %v15094_v19 = vmax.f32 %v15093_v13, 0.0 }
 0x400   : > { %9533 = vmatpush3.bf16.msra.mxu1 %v10007_v50  ;;  %v3760_v50 = vsel %vm386_vm0, %v12365_v33, %v12363_v20  ;;  %v10012_v20 = vld [vmem:[%s14902_s7 + $0xf8] sm:$0xff]  }
 0x401   : > { %4655 = vmatmul.mubr.bf16.gmra.mrb[172].mxu1 %v3703_v24  ;;  %9534 = vmatprep.subr.bf16.mxu1 %v10008_v38  ;;  %v5353_v24 = vld [vmem:[#allocation3 + $0x22] sm:$0xff]  ;;  %v15095_v38 = vld [vmem:[#allocation55_spill] sm:$0xff] }
 0x402   : > { %5032 = vrot.lane.b32.xlu0 %v15090_v15, %s10090_s15  ;;  %v5007_v55 = vpop.permute.xlu1 %5006  ;;  %4662 = vmatprep.mubr.bf16.mxu1 %v3754_v58  ;;  %v12479_v32 = vpack.c.bf16 %v5353_v24, %v5352_v21  ;;  %v3143_v15 = vld [vmem:[#allocation4 + $0xaa] sm:$0xff]  ;;  %v3145_v58 = vld [vmem:[#allocation4 + $0xc2] sm:$0xff]  ;;  %v3763_v21 = vsel %vm386_vm0, %v12393_v4, %v12391_v2  ;;  %v9996_v2 = vld [vmem:[%s14902_s7 + $0x78] sm:$0xff]  }
 0x403   : > { %3463 = vrot.lane.b32.xlu1 %v3130_v3, %s10092_s14  ;;  %v5005_v35 = vpop.permute.xlu0 %5004  ;;  %5091 = vst.msk [vmem:[#allocation3 + $0x99] sm:$0xff] %vm442_vm2, %v5007_v55  ;;  %v5264_v26 = vld [vmem:[#allocation3 + $0x78] sm:$0xff]  ;;  %v5265_v40 = vld [vmem:[#allocation3 + $0x80] sm:$0xff]  ;;  %v3168_v3 = vpack.c.bf16 %v3140_v61, %v3139_v48 }
 0x404   : > { %5090 = vst.msk [vmem:[#allocation3 + $0x91] sm:$0xff] %vm442_vm2, %v5005_v35  ;;  %9727 = vmatmul.mubr.msk.bf16.vlgmr.msra.gmra.mrb[192].mxu0 %vm498_vm4, %v3166_v1  ;;  %v5292_v37 = vpack.c.bf16 %v5265_v40, %v5264_v26  ;;  %9535 = vmatpush3.bf16.msra.mxu1 %v10009_v56  ;;  %v3144_v55 = vld [vmem:[#allocation4 + $0xb2] sm:$0xff]  ;;  %v9990_v1 = vld [vmem:[%s14902_s7 + $0x60] sm:$0xff]  }
 0x405   : > { %9730 = vmatprep.mubr.msk.bf16.mxu0 %vm498_vm4, %v3167_v28  ;;  %9413 = vmatpush3.bf16.msra.mxu0 %v9983_v52  ;;  %v9989_v35 = vld [vmem:[%s14902_s7 + $0x18] sm:$0xff]   ;;  %v10011_v48 = vld [vmem:[%s14902_s7 + $0xb0] sm:$0xff]   ;;  %v3148_v26 = vld [vmem:[#allocation4 + $0xe2] sm:$0xff] }
 0x406   : > { %3415 = vrot.lane.b32.xlu0 %v12090_v57, %s10090_s15  ;;  %v12433_v51 = vpop.permute.xlu1 %3453  ;;  %9414 = vmatprep.subr.bf16.mxu0 %v9984_v47  ;;  %v3142_v57 = vld [vmem:[#allocation4 + $0x9a] sm:$0xff]  ;;  %v3149_v40 = vld [vmem:[#allocation4 + $0xf2] sm:$0xff] }
 0x407   : > { %5568 = vrot.lane.b32.xlu1 %v12416_v17, %s10090_s15  ;;  %v12435_v11 = vpop.permute.xlu0 %3405  ;;  %v3169_v36 = vpack.c.bf16 %v3142_v57, %v3141_v8  ;;  %9536 = vmatprep.subr.bf16.mxu1 %v10010_v34  ;;  %v15096_v8 = vmax.f32 %v15095_v38, 0.0  ;;  %v5170_v57 = vld [vmem:[#allocation3 + $0x79] sm:$0xff] }
 0x408   : > { %9537 = vmatpush3.bf16.msra.mxu1 %v10011_v48  ;;  %v9994_v56 = vld [vmem:[%s14902_s7 + $0x70] sm:$0xff]  }
 0x409   : > { %4663 = vmatmul.mubr.bf16.gmra.mrb[176].mxu1 %v3706_v54  ;;  %9415 = vmatpush3.bf16.msra.mxu0 %v9985_v7  ;;  %v9992_v7 = vld [vmem:[%s14902_s7 + $0x68] sm:$0xff]   ;;  %v3147_v54 = vld [vmem:[#allocation4 + $0xda] sm:$0xff]  ;;  %v9995_v24 = vld [vmem:[%s14902_s7 + $0x30] sm:$0xff]  }
 0x40a   : > { %3419 = vrot.lane.b32.xlu0 %v3084_v18, %s10090_s15  ;;  %v5011_v9 = vpop.permute.xlu1 %5010  ;;  %4670 = vmatprep.mubr.bf16.mxu1 %v3757_v6  ;;  %v3170_v18 = vpack.c.bf16 %v3144_v55, %v3143_v15  ;;  %v3150_v6 = vld [vmem:[#allocation4 + $0xfa] sm:$0xff]  ;;  %v5355_v34 = vld [vmem:[#allocation3 + $0x3a] sm:$0xff] }
 0x40b   : > { %5038 = vrot.lane.b32.xlu1 %v15092_v41, %s10090_s15  ;;  %v5009_v10 = vpop.permute.xlu0 %5008  ;;  %5093 = vst.msk [vmem:[#allocation3 + $0xb1] sm:$0xff] %vm442_vm2, %v5011_v9  ;;  %9416 = vmatprep.subr.bf16.mxu0 %v9986_v29  ;;  %v5266_v52 = vld [vmem:[#allocation3 + $0x90] sm:$0xff]  ;;  %v5267_v28 = vld [vmem:[#allocation3 + $0x98] sm:$0xff]  ;;  %v5171_v29 = vld [vmem:[#allocation3 + $0x81] sm:$0xff] }
 0x40c   : > { %5092 = vst.msk [vmem:[#allocation3 + $0xa9] sm:$0xff] %vm442_vm2, %v5009_v10  ;;  %9731 = vmatmul.mubr.msk.bf16.gmra.mrb[196].mxu0 %vm498_vm4, %v3168_v3  ;;  %v5293_v61 = vpack.c.bf16 %v5267_v28, %v5266_v52  ;;  %v9993_v9 = vld [vmem:[%s14902_s7 + $0x28] sm:$0xff]   ;;  %9538 = vmatprep.subr.bf16.mxu1 %v10012_v20  ;;  %v12525_v10 = vpack.c.bf16 %v5171_v29, %v5170_v57  ;;  %v3152_v52 = vld [vmem:[#allocation4 + $0x112] sm:$0xff] }
 0x40d   : > { %9734 = vmatprep.mubr.msk.bf16.mxu0 %vm498_vm4, %v3169_v36  ;;  %9417 = vmatpush3.bf16.msra.mxu0 %v9987_v39  ;;  %v5354_v3 = vld [vmem:[#allocation3 + $0x32] sm:$0xff]  ;;  %v3712_v36 = vsel %vm442_vm2, %v12164_v44, %v12365_v33  ;;  %v3173_v44 = vpack.c.bf16 %v3150_v6, %v3149_v40  ;;  %v9997_v28 = vld [vmem:[%s14902_s7 + $0x38] sm:$0xff]  }
 0x40e   : > { %5616 = vrot.lane.b32.xlu0 %v5292_v37, %s10090_s15  ;;  %v12475_v31 = vpop.permute.xlu1 %3455  ;;  %9418 = vmatprep.subr.bf16.mxu0 %v9988_v23  ;;  %v3172_v23 = vpack.c.bf16 %v3148_v26, %v3147_v54  ;;  %v12545_v33 = vpack.c.bf16 %v5355_v34, %v5354_v3  ;;  %v5172_v48 = vld [vmem:[#allocation3 + $0x91] sm:$0xff]  ;;  %v3157_v40 = vld [vmem:[#allocation4 + $0x152] sm:$0xff] }
 0x40f   : > { %5704 = vrot.lane.b32.xlu1 %v12307_v30, %s10090_s15  ;;  %v12477_v0 = vpop.permute.xlu0 %3407  ;;  %v3146_v30 = vld [vmem:[#allocation4 + $0xca] sm:$0xff]  ;;  %v3155_v54 = vld [vmem:[#allocation4 + $0x13a] sm:$0xff]  ;;  %v3156_v26 = vld [vmem:[#allocation4 + $0x142] sm:$0xff] }
 0x410   : > { %v3171_v25 = vpack.c.bf16 %v3146_v30, %v3145_v58  ;;  %v12596_v6 = vld [vmem:[%s14902_s7 + $0x100] sm:$0xff]  }
 0x411   : > { %4671 = vmatmul.mubr.bf16.gmra.mrb[180].mxu1 %v3709_v46  ;;  %9419 = vmatpush3.bf16.msra.mxu0 %v9989_v35  ;;  %v15097_v35 = vld [vmem:[#allocation53_spill] sm:$0xff]  ;;  %v3151_v46 = vld [vmem:[#allocation4 + $0x10a] sm:$0xff] }
 0x412   : > { %5036 = vrot.lane.b32.xlu0 %v15094_v19, %s10090_s15  ;;  %v5015_v47 = vpop.permute.xlu1 %5014  ;;  %4678 = vmatprep.mubr.bf16.mxu1 %v3760_v50  ;;  %v15098_v58 = vmax.f32 %v15097_v35, 0.0  ;;  %v3153_v19 = vld [vmem:[#allocation4 + $0x122] sm:$0xff] }
 0x413   : > { %5656 = vrot.lane.b32.xlu1 %v12479_v32, %s10090_s15  ;;  %v5013_v42 = vpop.permute.xlu0 %5012  ;;  %5095 = vst.msk [vmem:[#allocation3 + $0xc9] sm:$0xff] %vm442_vm2, %v5015_v47  ;;  %9420 = vmatprep.subr.bf16.mxu0 %v9990_v1  ;;  %v5268_v15 = vld [vmem:[#allocation3 + $0xa8] sm:$0xff]  ;;  %v5269_v55 = vld [vmem:[#allocation3 + $0xb0] sm:$0xff]  ;;  %v3154_v47 = vld [vmem:[#allocation4 + $0x12a] sm:$0xff] }
 0x414   : > { %5094 = vst.msk [vmem:[#allocation3 + $0xc1] sm:$0xff] %vm442_vm2, %v5013_v42  ;;  %9735 = vmatmul.mubr.msk.bf16.gmra.mrb[200].mxu0 %vm498_vm4, %v3170_v18  ;;  %v5294_v13 = vpack.c.bf16 %v5269_v55, %v5268_v15  ;;  %v15099_v42 = vld [vmem:[#allocation59_spill] sm:$0xff]  ;;  %v3715_v18 = vsel %vm442_vm2, %v12148_v63, %v12393_v4  ;;  %v3175_v38 = vpack.c.bf16 %v3154_v47, %v3153_v19  ;;  %v5356_v4 = vld [vmem:[#allocation3 + $0x4a] sm:$0xff]  ;;  %v3160_v55 = vld [vmem:[#allocation4 + $0x172] sm:$0xff] }
 0x415   : > { %9738 = vmatprep.mubr.msk.bf16.mxu0 %vm498_vm4, %v3171_v25  ;;  %9421 = vmatpush3.bf16.msra.mxu0 %v9991_v43  ;;  %v15100_v50 = vmax.f32 %v15099_v42, 0.0  ;;  %v5173_v25 = vld [vmem:[#allocation3 + $0x99] sm:$0xff] }
 0x416   : > { %5618 = vrot.lane.b32.xlu0 %v5293_v61, %s10090_s15  ;;  %v12518_v12 = vpop.permute.xlu1 %3457  ;;  %9422 = vmatprep.subr.bf16.mxu0 %v9992_v7  ;;  %v3766_v61 = vsel %vm386_vm0, %v12435_v11, %v12433_v51  ;;  %v3174_v7 = vpack.c.bf16 %v3152_v52, %v3151_v46  ;;  %v12582_v63 = vpack.c.bf16 %v5173_v25, %v5172_v48  ;;  %v3159_v15 = vld [vmem:[#allocation4 + $0x16a] sm:$0xff]  ;;  %v5361_v48 = vld [vmem:[#allocation3 + $0x82] sm:$0xff]  ;;  %v3163_v25 = vld [vmem:[#allocation4 + $0x19a] sm:$0xff] }
 0x417   : > { %5042 = vrot.lane.b32.xlu1 %v15096_v8, %s10090_s15  ;;  %v12520_v41 = vpop.permute.xlu0 %3409  ;;  %v5357_v8 = vld [vmem:[#allocation3 + $0x52] sm:$0xff]  ;;  %v3162_v46 = vld [vmem:[#allocation4 + $0x18a] sm:$0xff]  ;;  %v3178_v47 = vpack.c.bf16 %v3160_v55, %v3159_v15 }
 0x418   : > { %v12591_v29 = vpack.c.bf16 %v5357_v8, %v5356_v4  ;;  %v3772_v19 = vsel %vm386_vm0, %v12520_v41, %v12518_v12 }
 0x419   : > { %4679 = vmatmul.mubr.bf16.gmra.mrb[184].mxu1 %v3712_v36  ;;  %9423 = vmatpush3.bf16.msra.mxu0 %v9993_v9  ;;  %v3158_v9 = vld [vmem:[#allocation4 + $0x15a] sm:$0xff] }
 0x41a   : > { %5570 = vrot.lane.b32.xlu0 %v12525_v10, %s10090_s15  ;;  %v5019_v39 = vpop.permute.xlu1 %5018  ;;  %4686 = vmatprep.mubr.bf16.mxu1 %v3763_v21  ;;  %v15101_v36 = vld [vmem:[#allocation57_spill] sm:$0xff]  ;;  %v3769_v21 = vsel %vm386_vm0, %v12477_v0, %v12475_v31  ;;  %v3177_v34 = vpack.c.bf16 %v3158_v9, %v3157_v40  ;;  %v5112_v40 = vld [vmem:[#allocation3] sm:$0xff] }
 0x41b   : > { %5706 = vrot.lane.b32.xlu1 %v12348_v62, %s10090_s15  ;;  %v5017_v37 = vpop.permute.xlu0 %5016  ;;  %v10013_v62 = vld [vmem:[%s14902_s7 + $0xb8] sm:$0xff]   ;;  %5097 = vst.msk [vmem:[#allocation3 + $0xe1] sm:$0xff] %vm442_vm2, %v5019_v39  ;;  %9424 = vmatprep.subr.bf16.mxu0 %v9994_v56  ;;  %v5270_v3 = vld [vmem:[#allocation3 + $0xc0] sm:$0xff]  ;;  %v15102_v39 = vmax.f32 %v15101_v36, 0.0 }
 0x41c   : > { %5096 = vst.msk [vmem:[#allocation3 + $0xd9] sm:$0xff] %vm442_vm2, %v5017_v37  ;;  %9739 = vmatmul.mubr.msk.bf16.gmra.mrb[204].mxu0 %vm498_vm4, %v3172_v23  ;;  %9539 = vmatpush3.bf16.msra.mxu1 %v10013_v62  ;;  %v5271_v56 = vld [vmem:[#allocation3 + $0xc8] sm:$0xff]  ;;  %v3176_v23 = vpack.c.bf16 %v3156_v26, %v3155_v54  ;;  %v3724_v54 = vsel %vm442_vm2, %v12241_v53, %v12520_v41 }
 0x41d   : > { %9742 = vmatprep.mubr.msk.bf16.mxu0 %vm498_vm4, %v3173_v44  ;;  %9425 = vmatpush3.bf16.msra.mxu0 %v9995_v24  ;;  %v5174_v62 = vld [vmem:[#allocation3 + $0xa9] sm:$0xff]  ;;  %v5175_v44 = vld [vmem:[#allocation3 + $0xb1] sm:$0xff] }
 0x41e   : > { %5040 = vrot.lane.b32.xlu0 %v15098_v58, %s10090_s15  ;;  %v12560_v30 = vpop.permute.xlu1 %3459  ;;  %9426 = vmatprep.subr.bf16.mxu0 %v9996_v2  ;;  %v5359_v31 = vld [vmem:[#allocation3 + $0x6a] sm:$0xff]  ;;  %v5199_v35 = vpack.c.bf16 %v5175_v44, %v5174_v62  ;;  %v3161_v58 = vld [vmem:[#allocation4 + $0x182] sm:$0xff] }
 0x41f   : > { %5658 = vrot.lane.b32.xlu1 %v12545_v33, %s10090_s15  ;;  %v12562_v1 = vpop.permute.xlu0 %3411  ;;  %v3179_v42 = vpack.c.bf16 %v3162_v46, %v3161_v58  ;;  %v5177_v12 = vld [vmem:[#allocation3 + $0xc9] sm:$0xff] }
 0x420   : > { %v5113_v9 = vld [vmem:[#allocation3 + $0x8] sm:$0xff] }
 0x421   : > { %4687 = vmatmul.mubr.bf16.gmra.mrb[188].mxu1 %v3715_v18  ;;  %9427 = vmatpush3.bf16.msra.mxu0 %v9997_v28  ;;  %v5209_v18 = vld [vmem:[#allocation3 + $0xa] sm:$0xff] }
 0x422   : > { %5620 = vrot.lane.b32.xlu0 %v5294_v13, %s10090_s15  ;;  %v12574_v43 = vpop.permute.xlu1 %5560  ;;  %4694 = vmatprep.mubr.bf16.mxu1 %v3766_v61  ;;  %v5176_v61 = vld [vmem:[#allocation3 + $0xc1] sm:$0xff] }
 0x423   : > { %5046 = vrot.lane.b32.xlu1 %v15100_v50, %s10090_s15  ;;  %v12576_v20 = vpop.permute.xlu0 %5608  ;;  %9758 = vmatprep.subr.bf16.mxu0 %v12596_v6  ;;  %v5272_v52 = vld [vmem:[#allocation3 + $0xd8] sm:$0xff]  ;;  %v5273_v28 = vld [vmem:[#allocation3 + $0xe0] sm:$0xff]  ;;  %v5200_v4 = vpack.c.bf16 %v5177_v12, %v5176_v61 }
 0x424   : > { %9743 = vmatmul.mubr.msk.bf16.gmra.mrb[208].mxu0 %vm498_vm4, %v3174_v7  ;;  %v5208_v50 = vld [vmem:[#allocation3 + $0x2] sm:$0xff]  ;;  %v3164_v7 = vld [vmem:[#allocation4 + $0x1a2] sm:$0xff] }
 0x425   : > { %9746 = vmatprep.mubr.msk.bf16.mxu0 %vm498_vm4, %v3175_v38  ;;  %v3180_v8 = vpack.c.bf16 %v3164_v7, %v3163_v25  ;;  %v5178_v62 = vld [vmem:[#allocation3 + $0xd9] sm:$0xff]  ;;  %v5179_v44 = vld [vmem:[#allocation3 + $0xe1] sm:$0xff] }
 0x426   : > { %5572 = vrot.lane.b32.xlu0 %v12582_v63, %s10090_s15  ;;  %v5023_v57 = vpop.permute.xlu1 %5022 }
 0x427   : > { %5708 = vrot.lane.b32.xlu1 %v12416_v17, %s10090_s15  ;;  %v5021_v51 = vpop.permute.xlu0 %5020  ;;  %5099 = vst.msk [vmem:[#allocation3 + $0xf9] sm:$0xff] %vm442_vm2, %v5023_v57  ;;  %v3718_v17 = vsel %vm442_vm2, %v12207_v49, %v12435_v11  ;;  %v5295_v49 = vpack.c.bf16 %v5271_v56, %v5270_v3  ;;  %v5358_v11 = vld [vmem:[#allocation3 + $0x62] sm:$0xff]  ;;  %v5240_v57 = vpack.c.bf16 %v5209_v18, %v5208_v50 }
 0x428   : > { %5098 = vst.msk [vmem:[#allocation3 + $0xf1] sm:$0xff] %vm442_vm2, %v5021_v51  ;;  %v12619_v2 = vpack.c.bf16 %v5359_v31, %v5358_v11  ;;  %v3775_v3 = vsel %vm386_vm0, %v12562_v1, %v12560_v30 }
 0x429   : > { %4695 = vmatmul.mubr.bf16.gmra.mrb[192].mxu1 %v3718_v17  ;;  %v5802_v41 = vsel %vm442_vm2, %v5240_v57, %v12576_v20 }
 0x42a   : > { %5044 = vrot.lane.b32.xlu0 %v15102_v39, %s10090_s15  ;;  %v12606_v37 = vpop.permute.xlu1 %3461  ;;  %4702 = vmatprep.mubr.bf16.mxu1 %v3769_v21  ;;  %v12650_v39 = vld [vmem:[%s14901_s6] ss:$0 sm:$0xff] }
 0x42b   : > { %5660 = vrot.lane.b32.xlu1 %v12591_v29, %s10090_s15  ;;  %v4311_v15 = vadd.f32 %v12187_v60, %v12650_v39  ;;  %v3414_v55 = vpop.permute.xlu0 %3413  ;;  %v3727_v60 = vsel %vm442_vm2, %v12230_v59, %v12562_v1 }
 0x42c   : > { %9747 = vmatmul.mubr.msk.bf16.gmra.mrb[212].mxu0 %vm498_vm4, %v3176_v23  ;;  %v5362_v23 = vld [vmem:[#allocation3 + $0x92] sm:$0xff] }
 0x42d   : > { %9750 = vmatprep.mubr.msk.bf16.mxu0 %vm498_vm4, %v3177_v34  ;;  %v5363_v34 = vld [vmem:[#allocation3 + $0x9a] sm:$0xff] }
 0x42e   : > { %5622 = vrot.lane.b32.xlu0 %v5295_v49, %s10090_s15  ;;  %v12617_v24 = vpop.permute.xlu1 %5562  ;;  %v5144_v49 = vpack.c.bf16 %v5113_v9, %v5112_v40  ;;  %v12659_v46 = vpack.c.bf16 %v5363_v34, %v5362_v23  ;;  %v5367_v40 = vld [vmem:[#allocation3 + $0xca] sm:$0xff] }
 0x42f   : > { %5710 = vrot.lane.b32.xlu1 %v12525_v10, %s10090_s15  ;;  %v3721_v10 = vsel %vm442_vm2, %v12189_v16, %v12477_v0  ;;  %v5296_v16 = vpack.c.bf16 %v5273_v28, %v5272_v52  ;;  %v5360_v0 = vld [vmem:[#allocation3 + $0x7a] sm:$0xff]  ;;  %v5274_v26 = vld [vmem:[#allocation3 + $0xf0] sm:$0xff]  ;;  %v5201_v28 = vpack.c.bf16 %v5179_v44, %v5178_v62 }
 0x430   : > { %v12636_v38 = vpack.c.bf16 %v5361_v48, %v5360_v0  ;;  %v5364_v0 = vld [vmem:[#allocation3 + $0xaa] sm:$0xff]  ;;  %v5365_v48 = vld [vmem:[#allocation3 + $0xb2] sm:$0xff] }
 0x431   : > { %4703 = vmatmul.mubr.bf16.gmra.mrb[196].mxu1 %v3721_v10  ;;  %v4314_v10 = vadd.f32 %v12197_v45, %v12650_v39  ;;  %v3778_v45 = vsel %vm386_vm0, %v3414_v55, %v12606_v37  ;;  %v12680_v7 = vpack.c.bf16 %v5365_v48, %v5364_v0 }
 0x432   : > { %5574 = vrot.lane.b32.xlu0 %v5199_v35, %s10090_s15  ;;  %v5027_v13 = vpop.permute.xlu1 %5026  ;;  %4710 = vmatprep.mubr.bf16.mxu1 %v3772_v19 }
 0x433   : > { %5662 = vrot.lane.b32.xlu1 %v12619_v2, %s10090_s15  ;;  %5101 = vst.msk [vmem:[#allocation3 + $0x111] sm:$0xff] %vm442_vm2, %v5027_v13 }
 0x434   : > { %9751 = vmatmul.mubr.msk.bf16.gmra.mrb[216].mxu0 %vm498_vm4, %v3178_v47 }
 0x435   : > { %9754 = vmatprep.mubr.msk.bf16.mxu0 %vm498_vm4, %v3179_v42 }
 0x436   : > { %5624 = vrot.lane.b32.xlu0 %v5296_v16, %s10090_s15 }
 0x437   : > { %5712 = vrot.lane.b32.xlu1 %v12582_v63, %s10090_s15  ;;  %v5275_v63 = vld [vmem:[#allocation3 + $0xf8] sm:$0xff] }
 0x438   : > { %v5297_v21 = vpack.c.bf16 %v5275_v63, %v5274_v26  ;;  %v5366_v63 = vld [vmem:[#allocation3 + $0xc2] sm:$0xff] }
 0x439   : > { %v9076_v51 = vpop.f32.mrb[100].mxu1  ;;  %4711 = vmatmul.mubr.bf16.gmra.mrb[200].mxu1 %v3724_v54 }
 0x43a   : > { %v9077_v17 = vpop.f32.mrb[101].mxu1  ;;  %5576 = vrot.lane.b32.xlu0 %v5200_v4, %s10090_s15  ;;  %4718 = vmatprep.mubr.bf16.mxu1 %v3775_v3 }
 0x43b   : > { %5664 = vrot.lane.b32.xlu1 %v12636_v38, %s10090_s15  ;;  %v9078_v56 = vadd.f32 %v9077_v17, %v9076_v51  ;;  %v9079_v36 = vpop.f32.mrb[102].mxu1  ;;  %v3730_v51 = vsel %vm442_vm2, %v12271_v22, %v3414_v55 }
 0x43c   : > { %v9080_v53 = vpop.f32.mrb[103].mxu1  ;;  %9755 = vmatmul.mubr.msk.bf16.gmra.mrb[220].mxu0 %vm498_vm4, %v3180_v8  ;;  %v10015_v8 = vld [vmem:[%s14902_s7 + $0x108] sm:$0xff]  }
 0x43d   : > { %v9081_v11 = vadd.f32 %v9080_v53, %v9079_v36  ;;  %v9182_v30 = vpop.f32.mrb[128].mxu0  ;;  %6367 = vmatprep.mubr.bf16.mxu0 %v5802_v41  ;;  %v4319_v1 = vadd.f32 %v9078_v56, %v12650_v39  ;;  %v12695_v56 = vpack.c.bf16 %v5367_v40, %v5366_v63  ;;  %v5464_v53 = vld [vmem:[#allocation3 + $0xf1] sm:$0xff]  ;;  %v5465_v41 = vld [vmem:[#allocation3 + $0xf9] sm:$0xff] }
 0x43e   : > { %v9183_v31 = vpop.f32.mrb[129].mxu0  ;;  %5626 = vrot.lane.b32.xlu0 %v5297_v21, %s10090_s15  ;;  %v12700_v62 = vpack.c.bf16 %v5465_v41, %v5464_v53 }
 0x43f   : > { %5714 = vrot.lane.b32.xlu1 %v5199_v35, %s10090_s15  ;;  %v9184_v58 = vadd.f32 %v9183_v31, %v9182_v30  ;;  %v9185_v20 = vpop.f32.mrb[130].mxu0  ;;  %v5738_v35 = vsel %vm442_vm2, %v5144_v49, %v12574_v43  ;;  %v4322_v54 = vadd.f32 %v9081_v11, %v12650_v39  ;;  %v5368_v31 = vld [vmem:[#allocation3 + $0xda] sm:$0xff] }
 0x440   : > { %v9186_v52 = vpop.f32.mrb[131].mxu0 }
 0x441   : > { %v12665_v13 = vadd.f32 %v9184_v58, %v4311_v15  ;;  %v9187_v19 = vadd.f32 %v9186_v52, %v9185_v20  ;;  %v9082_v47 = vpop.f32.mrb[104].mxu1  ;;  %4719 = vmatmul.mubr.bf16.gmra.mrb[204].mxu1 %v3727_v60  ;;  %v5369_v15 = vld [vmem:[#allocation3 + $0xe2] sm:$0xff] }
 0x442   : > { %5578 = vrot.lane.b32.xlu0 %v5201_v28, %s10090_s15  ;;  %v9083_v42 = vpop.f32.mrb[105].mxu1  ;;  %4726 = vmatprep.mubr.bf16.mxu1 %v3778_v45 }
 0x443   : > { %5666 = vrot.lane.b32.xlu1 %v12659_v46, %s10090_s15  ;;  %v12675_v50 = vadd.f32 %v9187_v19, %v4314_v10  ;;  %v9084_v43 = vadd.f32 %v9083_v42, %v9082_v47  ;;  %v9085_v18 = vpop.f32.mrb[106].mxu1  ;;  %v5392_v47 = vpack.c.bf16 %v5369_v15, %v5368_v31 }
 0x444   : > { %v9086_v16 = vpop.f32.mrb[107].mxu1  ;;  %6368 = vmatmul.mubr.bf16.vlgmr.msra.gmra.mrb[224].mxu0 %v5738_v35 }
 0x445   : > { %v9087_v25 = vadd.f32 %v9086_v16, %v9085_v18  ;;  %v9188_v61 = vpop.f32.mrb[132].mxu0  ;;  %9759 = vmatpush3.bf16.msra.mxu0 %v12596_v6  ;;  %v4327_v49 = vadd.f32 %v9084_v43, %v12650_v39  ;;  %v5114_v43 = vld [vmem:[#allocation3 + $0x18] sm:$0xff]  ;;  %v5115_v18 = vld [vmem:[#allocation3 + $0x20] sm:$0xff] }
 0x446   : > { %v9189_v59 = vpop.f32.mrb[133].mxu0  ;;  %9760 = vmatprep.subr.bf16.mxu0 %v10015_v8 }
 0x447   : > { %5716 = vrot.lane.b32.xlu1 %v5200_v4, %s10090_s15  ;;  %v9190_v12 = vadd.f32 %v9189_v59, %v9188_v61  ;;  %v9191_v37 = vpop.f32.mrb[134].mxu0  ;;  %v4330_v55 = vadd.f32 %v9087_v25, %v12650_v39 }
 0x448   : > { %v9192_v57 = vpop.f32.mrb[135].mxu0 }
 0x449   : > { %v12688_v4 = vadd.f32 %v9190_v12, %v4319_v1  ;;  %v9193_v6 = vadd.f32 %v9192_v57, %v9191_v37  ;;  %4727 = vmatmul.mubr.bf16.gmra.mrb[208].mxu1 %v3730_v51  ;;  %9761 = vmatpush3.bf16.msra.mxu0 %v10015_v8  ;;  %v5145_v12 = vpack.c.bf16 %v5115_v18, %v5114_v43 }
 0x44b   : > { %5668 = vrot.lane.b32.xlu1 %v12680_v7, %s10090_s15  ;;  %v12692_v26 = vadd.f32 %v9193_v6, %v4322_v54  ;;  %v5742_v54 = vsel %vm442_vm2, %v5145_v12, %v12617_v24 }
 0x44d   : > { %v9088_v9 = vpop.f32.mrb[108].mxu1 }
 0x44e   : > { %v9089_v17 = vpop.f32.mrb[109].mxu1 }
 0x44f   : > { %5718 = vrot.lane.b32.xlu1 %v5201_v28, %s10090_s15  ;;  %v9090_v22 = vadd.f32 %v9089_v17, %v9088_v9  ;;  %v9091_v3 = vpop.f32.mrb[110].mxu1  ;;  %v5116_v17 = vld [vmem:[#allocation3 + $0x30] sm:$0xff] }
 0x450   : > { %v9092_v36 = vpop.f32.mrb[111].mxu1 }
 0x451   : > { %v9093_v21 = vadd.f32 %v9092_v36, %v9091_v3  ;;  %v9194_v23 = vpop.f32.mrb[136].mxu0  ;;  %v4335_v0 = vadd.f32 %v9090_v22, %v12650_v39  ;;  %v5117_v22 = vld [vmem:[#allocation3 + $0x38] sm:$0xff] }
 0x452   : > { %v9195_v34 = vpop.f32.mrb[137].mxu0  ;;  %v12724_v24 = vpack.c.bf16 %v5117_v22, %v5116_v17  ;;  %v5119_v17 = vld [vmem:[#allocation3 + $0x50] sm:$0xff] }
 0x453   : > { %5670 = vrot.lane.b32.xlu1 %v12695_v56, %s10090_s15  ;;  %v9196_v11 = vadd.f32 %v9195_v34, %v9194_v23  ;;  %v9197_v30 = vpop.f32.mrb[138].mxu0  ;;  %v4338_v37 = vadd.f32 %v9093_v21, %v12650_v39 }
 0x454   : > { %v9198_v44 = vpop.f32.mrb[139].mxu0 }
 0x455   : > { %v12703_v58 = vadd.f32 %v9196_v11, %v4327_v49  ;;  %v9199_v20 = vadd.f32 %v9198_v44, %v9197_v30  ;;  %v9094_v10 = vpop.f32.mrb[112].mxu1  ;;  %v12731_v11 = vld [vmem:[%s14904_s9] sm:$0xff]  }
 0x456   : > { %v9095_v52 = vpop.f32.mrb[113].mxu1  ;;  %9834 = vmatprep.subr.bf16.mxu1 %v12731_v11 }
 0x457   : > { %5720 = vrot.lane.b32.xlu1 %v12700_v62, %s10090_s15  ;;  %v12707_v28 = vadd.f32 %v9199_v20, %v4330_v55  ;;  %v9096_v35 = vadd.f32 %v9095_v52, %v9094_v10  ;;  %v9097_v19 = vpop.f32.mrb[114].mxu1  ;;  %v5467_v10 = vld [vmem:[#allocation3 + $0x111] sm:$0xff] }
 0x458   : > { %v9098_v60 = vpop.f32.mrb[115].mxu1 }
 0x459   : > { %v9099_v42 = vadd.f32 %v9098_v60, %v9097_v19  ;;  %v9200_v45 = vpop.f32.mrb[140].mxu0  ;;  %v4343_v31 = vadd.f32 %v9096_v35, %v12650_v39 }
 0x45a   : > { %v9201_v16 = vpop.f32.mrb[141].mxu0 }
 0x45b   : > { %5672 = vrot.lane.b32.xlu1 %v5392_v47, %s10090_s15  ;;  %v9202_v48 = vadd.f32 %v9201_v16, %v9200_v45  ;;  %v9203_v25 = vpop.f32.mrb[142].mxu0  ;;  %v4346_v52 = vadd.f32 %v9099_v42, %v12650_v39 }
 0x45c   : > { %v9204_v59 = vpop.f32.mrb[143].mxu0  ;;  %v5611_v1 = vpop.permute.xlu0 %5610 }
 0x45d   : > { %v5565_v61 = vpop.permute.xlu1 %5564  ;;  %v12712_v8 = vadd.f32 %v9202_v48, %v4335_v0  ;;  %v9205_v57 = vadd.f32 %v9204_v59, %v9203_v25  ;;  %v5806_v51 = vsel %vm442_vm2, %v12479_v32, %v5611_v1  ;;  %v5371_v59 = vld [vmem:[#allocation3 + $0xfa] sm:$0xff] }
 0x45e   : > { %6375 = vmatprep.mubr.bf16.mxu0 %v5806_v51  ;;  %v5746_v44 = vsel %vm442_vm2, %v12724_v24, %v5565_v61  ;;  %v5370_v61 = vld [vmem:[#allocation3 + $0xf2] sm:$0xff] }
 0x45f   : > { %v12718_v6 = vadd.f32 %v9205_v57, %v4338_v37  ;;  %6376 = vmatmul.mubr.bf16.gmra.mrb[228].mxu0 %v5742_v54 }
 0x460   : > { %v5025_v40 = vpop.permute.xlu0 %5024 }
 0x461   : > { %v5031_v63 = vpop.permute.xlu1 %5030  ;;  %5100 = vst.msk [vmem:[#allocation3 + $0x109] sm:$0xff] %vm442_vm2, %v5025_v40  ;;  %v9100_v9 = vpop.f32.mrb[116].mxu1  ;;  %v5393_v40 = vpack.c.bf16 %v5371_v59, %v5370_v61  ;;  %v5373_v61 = vld [vmem:[#allocation3 + $0x112] sm:$0xff] }
 0x462   : > { %5103 = vst.msk [vmem:[#allocation3 + $0x129] sm:$0xff] %vm442_vm2, %v5031_v63  ;;  %v9101_v3 = vpop.f32.mrb[117].mxu1 }
 0x463   : > { %v9102_v36 = vadd.f32 %v9101_v3, %v9100_v9  ;;  %v9103_v53 = vpop.f32.mrb[118].mxu1  ;;  %v5118_v9 = vld [vmem:[#allocation3 + $0x48] sm:$0xff] }
 0x464   : > { %v5613_v41 = vpop.permute.xlu0 %5612  ;;  %v9104_v21 = vpop.f32.mrb[119].mxu1 }
 0x465   : > { %v12722_v32 = vpop.permute.xlu1 %3465  ;;  %v9105_v23 = vadd.f32 %v9104_v21, %v9103_v53  ;;  %v9206_v34 = vpop.f32.mrb[144].mxu0  ;;  %v5810_v49 = vsel %vm442_vm2, %v12545_v33, %v5613_v41  ;;  %v10017_v33 = vld [vmem:[%s14902_s7 + $0x110] sm:$0xff]   ;;  %v4351_v3 = vadd.f32 %v9102_v36, %v12650_v39 }
 0x466   : > { %v9207_v30 = vpop.f32.mrb[145].mxu0  ;;  %6383 = vmatprep.mubr.bf16.mxu0 %v5810_v49  ;;  %9762 = vmatprep.subr.bf16.mxu0 %v10017_v33 }
 0x467   : > { %v9208_v15 = vadd.f32 %v9207_v30, %v9206_v34  ;;  %v9209_v55 = vpop.f32.mrb[146].mxu0  ;;  %6384 = vmatmul.mubr.bf16.gmra.mrb[232].mxu0 %v5746_v44  ;;  %v4354_v49 = vadd.f32 %v9105_v23, %v12650_v39 }
 0x468   : > { %v9210_v19 = vpop.f32.mrb[147].mxu0  ;;  %v5029_v47 = vpop.permute.xlu0 %5028  ;;  %v5466_v60 = vld [vmem:[#allocation3 + $0x109] sm:$0xff]  ;;  %9763 = vmatpush3.bf16.msra.mxu0 %v10017_v33 }
 0x469   : > { %v5567_v20 = vpop.permute.xlu1 %5566  ;;  %v5276_v45 = vld [vmem:[#allocation3 + $0x108] sm:$0xff]  ;;  %v5277_v43 = vld [vmem:[#allocation3 + $0x110] sm:$0xff]  ;;  %v12741_v18 = vadd.f32 %v9208_v15, %v4343_v31  ;;  %v9211_v35 = vadd.f32 %v9210_v19, %v9209_v55  ;;  %5102 = vst.msk [vmem:[#allocation3 + $0x121] sm:$0xff] %vm442_vm2, %v5029_v47  ;;  %v9106_v16 = vpop.f32.mrb[120].mxu1  ;;  %v12744_v0 = vpack.c.bf16 %v5467_v10, %v5466_v60  ;;  %v12761_v10 = vpack.c.bf16 %v5119_v17, %v5118_v9 }
 0x46a   : > { %v5298_v48 = vpack.c.bf16 %v5277_v43, %v5276_v45  ;;  %v9107_v25 = vpop.f32.mrb[121].mxu1  ;;  %v5469_v34 = vld [vmem:[#allocation3 + $0x129] sm:$0xff] }
 0x46b   : > { %v12746_v42 = vadd.f32 %v9211_v35, %v4346_v52  ;;  %v9108_v1 = vadd.f32 %v9107_v25, %v9106_v16  ;;  %5722 = vrot.lane.b32.xlu1 %v12744_v0, %s10090_s15  ;;  %v9109_v12 = vpop.f32.mrb[122].mxu1  ;;  %v5750_v23 = vsel %vm442_vm2, %v12761_v10, %v5567_v20  ;;  %v5372_v45 = vld [vmem:[#allocation3 + $0x10a] sm:$0xff] }
 0x46c   : > { %5628 = vrot.lane.b32.xlu0 %v5298_v48, %s10090_s15  ;;  %v12752_v57 = vpop.permute.xlu0 %3417  ;;  %v9110_v51 = vpop.f32.mrb[123].mxu1  ;;  %v5394_v20 = vpack.c.bf16 %v5373_v61, %v5372_v45  ;;  %v5120_v61 = vld [vmem:[#allocation3 + $0x60] sm:$0xff] }
 0x46d   : > { %v5035_v37 = vpop.permute.xlu1 %5034  ;;  %v9111_v54 = vadd.f32 %v9110_v51, %v9109_v12  ;;  %v9212_v63 = vpop.f32.mrb[148].mxu0 }
 0x46e   : > { %5105 = vst.msk [vmem:[#allocation3 + $0x141] sm:$0xff] %vm442_vm2, %v5035_v37  ;;  %v9213_v22 = vpop.f32.mrb[149].mxu0 }
 0x46f   : > { %v9214_v53 = vadd.f32 %v9213_v22, %v9212_v63  ;;  %v9215_v41 = vpop.f32.mrb[150].mxu0  ;;  %5674 = vrot.lane.b32.xlu1 %v5393_v40, %s10090_s15  ;;  %v4359_v63 = vadd.f32 %v9108_v1, %v12650_v39  ;;  %v5375_v22 = vld [vmem:[#allocation3 + $0x12a] sm:$0xff] }
 0x470   : > { %5580 = vrot.lane.b32.xlu0 %v12700_v62, %s10090_s15  ;;  %v9216_v30 = vpop.f32.mrb[151].mxu0  ;;  %v5615_v44 = vpop.permute.xlu0 %5614  ;;  %v5468_v31 = vld [vmem:[#allocation3 + $0x121] sm:$0xff] }
 0x471   : > { %v12758_v21 = vpop.permute.xlu1 %3467  ;;  %v5278_v15 = vld [vmem:[#allocation3 + $0x120] sm:$0xff]  ;;  %v5279_v55 = vld [vmem:[#allocation3 + $0x128] sm:$0xff]  ;;  %v12763_v36 = vadd.f32 %v9214_v53, %v4351_v3  ;;  %v9217_v33 = vadd.f32 %v9216_v30, %v9215_v41  ;;  %v9112_v52 = vpop.f32.mrb[124].mxu1  ;;  %v5814_v19 = vsel %vm442_vm2, %v12591_v29, %v5615_v44  ;;  %v12767_v62 = vpack.c.bf16 %v5469_v34, %v5468_v31 }
 0x472   : > { %v9113_v47 = vpop.f32.mrb[125].mxu1  ;;  %6391 = vmatprep.mubr.bf16.mxu0 %v5814_v19  ;;  %v5299_v60 = vpack.c.bf16 %v5279_v55, %v5278_v15  ;;  %v5374_v37 = vld [vmem:[#allocation3 + $0x122] sm:$0xff]  ;;  %v4362_v3 = vadd.f32 %v9111_v54, %v12650_v39 }
 0x473   : > { %v12771_v43 = vadd.f32 %v9217_v33, %v4354_v49  ;;  %v9114_v35 = vadd.f32 %v9113_v47, %v9112_v52  ;;  %5724 = vrot.lane.b32.xlu1 %v12767_v62, %s10090_s15  ;;  %v9115_v16 = vpop.f32.mrb[126].mxu1  ;;  %6392 = vmatmul.mubr.bf16.gmra.mrb[236].mxu0 %v5750_v23  ;;  %v5395_v34 = vpack.c.bf16 %v5375_v22, %v5374_v37 }
 0x474   : > { %5630 = vrot.lane.b32.xlu0 %v5299_v60, %s10090_s15  ;;  %v5033_v29 = vpop.permute.xlu0 %5032  ;;  %v9116_v25 = vpop.f32.mrb[127].mxu1  ;;  %v3784_v52 = vsel %vm386_vm0, %v12752_v57, %v12722_v32 }
 0x475   : > { %v3464_v48 = vpop.permute.xlu1 %3463  ;;  %5104 = vst.msk [vmem:[#allocation3 + $0x139] sm:$0xff] %vm442_vm2, %v5033_v29  ;;  %v9117_v59 = vadd.f32 %v9116_v25, %v9115_v16  ;;  %v9218_v12 = vpop.f32.mrb[152].mxu0  ;;  %v5377_v19 = vld [vmem:[#allocation3 + $0x142] sm:$0xff]  ;;  %v4367_v37 = vadd.f32 %v9114_v35, %v12650_v39 }
 0x476   : > { %v9219_v51 = vpop.f32.mrb[153].mxu0 }
 0x477   : > { %v9220_v40 = vadd.f32 %v9219_v51, %v9218_v12  ;;  %v9221_v9 = vpop.f32.mrb[154].mxu0  ;;  %5676 = vrot.lane.b32.xlu1 %v5394_v20, %s10090_s15  ;;  %v5121_v12 = vld [vmem:[#allocation3 + $0x68] sm:$0xff] }
 0x478   : > { %5582 = vrot.lane.b32.xlu0 %v12744_v0, %s10090_s15  ;;  %v9222_v53 = vpop.f32.mrb[155].mxu0  ;;  %v3416_v41 = vpop.permute.xlu0 %3415  ;;  %v12799_v22 = vpack.c.bf16 %v5121_v12, %v5120_v61 }
 0x479   : > { %v5569_v17 = vpop.permute.xlu1 %5568  ;;  %v12782_v49 = vadd.f32 %v9220_v40, %v4359_v63  ;;  %v9223_v30 = vadd.f32 %v9222_v53, %v9221_v9  ;;  %v9118_v44 = vpop.f32.mrb[128].mxu1  ;;  %v3781_v1 = vsel %vm386_vm0, %v3416_v41, %v3464_v48  ;;  %v3733_v31 = vsel %vm442_vm2, %v12259_v5, %v3416_v41 }
 0x47a   : > { %v9119_v15 = vpop.f32.mrb[129].mxu1  ;;  %4734 = vmatprep.mubr.bf16.mxu1 %v3781_v1  ;;  %v5754_v1 = vsel %vm442_vm2, %v12799_v22, %v5569_v17 }
 0x47b   : > { %v12787_v55 = vadd.f32 %v9223_v30, %v4362_v3  ;;  %v9120_v54 = vadd.f32 %v9119_v15, %v9118_v44  ;;  %5678 = vrot.lane.b32.xlu1 %v5395_v34, %s10090_s15  ;;  %v9121_v0 = vpop.f32.mrb[130].mxu1  ;;  %4735 = vmatmul.mubr.bf16.gmra.mrb[212].mxu1 %v3733_v31  ;;  %v4370_v3 = vadd.f32 %v9117_v59, %v12650_v39 }
 0x47c   : > { %v12794_v47 = vpop.permute.xlu0 %3419  ;;  %v9122_v5 = vpop.f32.mrb[131].mxu1  ;;  %4742 = vmatprep.mubr.bf16.mxu1 %v3784_v52  ;;  %v5376_v60 = vld [vmem:[#allocation3 + $0x13a] sm:$0xff]  ;;  %v3736_v44 = vsel %vm442_vm2, %v12320_v14, %v12752_v57 }
 0x47d   : > { %v5039_v33 = vpop.permute.xlu1 %5038  ;;  %v5280_v23 = vld [vmem:[#allocation3 + $0x138] sm:$0xff]  ;;  %v5281_v45 = vld [vmem:[#allocation3 + $0x140] sm:$0xff]  ;;  %v9123_v16 = vadd.f32 %v9122_v5, %v9121_v0  ;;  %v9224_v48 = vpop.f32.mrb[156].mxu0  ;;  %v5396_v29 = vpack.c.bf16 %v5377_v19, %v5376_v60  ;;  %v4375_v19 = vadd.f32 %v9120_v54, %v12650_v39  ;;  %v3739_v54 = vsel %vm442_vm2, %v12282_v27, %v12794_v47 }
 0x47e   : > { %5107 = vst.msk [vmem:[#allocation3 + $0x159] sm:$0xff] %vm442_vm2, %v5039_v33  ;;  %v5300_v25 = vpack.c.bf16 %v5281_v45, %v5280_v23  ;;  %v9225_v20 = vpop.f32.mrb[157].mxu0  ;;  %v5304_v27 = vld [vmem:[#allocation3 + $0x19] sm:$0xff] }
 0x47f   : > { %v9226_v32 = vadd.f32 %v9225_v20, %v9224_v48  ;;  %v9227_v51 = vpop.f32.mrb[158].mxu0  ;;  %5680 = vrot.lane.b32.xlu1 %v5396_v29, %s10090_s15  ;;  %v5122_v48 = vld [vmem:[#allocation3 + $0x78] sm:$0xff]  ;;  %v4378_v29 = vadd.f32 %v9123_v16, %v12650_v39 }
 0x480   : > { %5632 = vrot.lane.b32.xlu0 %v5300_v25, %s10090_s15  ;;  %v9228_v40 = vpop.f32.mrb[159].mxu0  ;;  %v5617_v9 = vpop.permute.xlu0 %5616 }
 0x481   : > { %v5705_v63 = vpop.permute.xlu1 %5704  ;;  %v12802_v53 = vadd.f32 %v9226_v32, %v4367_v37  ;;  %v9229_v41 = vadd.f32 %v9228_v40, %v9227_v51  ;;  %v9124_v34 = vpop.f32.mrb[132].mxu1  ;;  %v5818_v35 = vsel %vm442_vm2, %v12619_v2, %v5617_v9  ;;  %v3787_v2 = vsel %vm386_vm0, %v12794_v47, %v12758_v21  ;;  %v5123_v21 = vld [vmem:[#allocation3 + $0x80] sm:$0xff] }
 0x482   : > { %v9125_v30 = vpop.f32.mrb[133].mxu1  ;;  %6399 = vmatprep.mubr.bf16.mxu0 %v5818_v35  ;;  %v5930_v9 = vsel %vm442_vm2, %v12724_v24, %v5705_v63  ;;  %v10018_v24 = vld [vmem:[%s14902_s7 + $0x118] sm:$0xff]  }
 0x483   : > { %v12811_v31 = vadd.f32 %v9229_v41, %v4370_v3  ;;  %v9126_v15 = vadd.f32 %v9125_v30, %v9124_v34  ;;  %v9127_v59 = vpop.f32.mrb[134].mxu1  ;;  %4743 = vmatmul.mubr.bf16.gmra.mrb[216].mxu1 %v3736_v44  ;;  %6400 = vmatmul.mubr.bf16.gmra.mrb[240].mxu0 %v5754_v1  ;;  %v12837_v3 = vpack.c.bf16 %v5123_v21, %v5122_v48 }
 0x484   : > { %5584 = vrot.lane.b32.xlu0 %v12767_v62, %s10090_s15  ;;  %v5037_v33 = vpop.permute.xlu0 %5036  ;;  %v9128_v14 = vpop.f32.mrb[135].mxu1  ;;  %4750 = vmatprep.mubr.bf16.mxu1 %v3787_v2 }
 0x485   : > { %v12815_v0 = vpop.permute.xlu1 %5656  ;;  %5106 = vst.msk [vmem:[#allocation3 + $0x151] sm:$0xff] %vm442_vm2, %v5037_v33  ;;  %v9129_v57 = vadd.f32 %v9128_v14, %v9127_v59  ;;  %v9230_v17 = vpop.f32.mrb[160].mxu0  ;;  %v5379_v41 = vld [vmem:[#allocation3 + $0x15a] sm:$0xff]  ;;  %v4383_v14 = vadd.f32 %v9126_v15, %v12650_v39  ;;  %9764 = vmatprep.subr.bf16.mxu0 %v10018_v24 }
 0x486   : > { %v9231_v52 = vpop.f32.mrb[161].mxu0  ;;  %9765 = vmatpush3.bf16.msra.mxu0 %v10018_v24 }
 0x487   : > { %v9232_v62 = vadd.f32 %v9231_v52, %v9230_v17  ;;  %v9233_v5 = vpop.f32.mrb[162].mxu0  ;;  %v5305_v17 = vld [vmem:[#allocation3 + $0x21] sm:$0xff]  ;;  %v4386_v48 = vadd.f32 %v9129_v57, %v12650_v39  ;;  %9798 = vmatprep.subr.bf16.mxu0 %v12731_v11 }
 0x488   : > { %v9234_v23 = vpop.f32.mrb[163].mxu0  ;;  %v5619_v45 = vpop.permute.xlu0 %5618 }
 0x489   : > { %v5043_v60 = vpop.permute.xlu1 %5042  ;;  %v12824_v25 = vadd.f32 %v9232_v62, %v4375_v19  ;;  %v9235_v61 = vadd.f32 %v9234_v23, %v9233_v5  ;;  %v9130_v12 = vpop.f32.mrb[136].mxu1  ;;  %v5822_v20 = vsel %vm442_vm2, %v12636_v38, %v5619_v45  ;;  %v5186_v5 = vld [vmem:[#allocation3 + $0x139] sm:$0xff] }
 0x48a   : > { %5109 = vst.msk [vmem:[#allocation3 + $0x171] sm:$0xff] %vm442_vm2, %v5043_v60  ;;  %v9131_v37 = vpop.f32.mrb[137].mxu1  ;;  %6407 = vmatprep.mubr.bf16.mxu0 %v5822_v20  ;;  %v5336_v60 = vpack.c.bf16 %v5305_v17, %v5304_v27 }
 0x48b   : > { %v12831_v32 = vadd.f32 %v9235_v61, %v4378_v29  ;;  %v12833_v51 = vadd.f32 %v9131_v37, %v9130_v12  ;;  %v9133_v40 = vpop.f32.mrb[138].mxu1  ;;  %4751 = vmatmul.mubr.bf16.gmra.mrb[220].mxu1 %v3739_v54  ;;  %v5187_v61 = vld [vmem:[#allocation3 + $0x141] sm:$0xff] }
 0x48c   : > { %v5571_v38 = vpop.permute.xlu0 %5570  ;;  %v9134_v34 = vpop.f32.mrb[139].mxu1  ;;  %6528 = vmatprep.mubr.bf16.mxu1 %v5930_v9  ;;  %v5378_v35 = vld [vmem:[#allocation3 + $0x152] sm:$0xff]  ;;  %v5866_v12 = vsel %vm442_vm2, %v5336_v60, %v12815_v0  ;;  %v12854_v37 = vpack.c.bf16 %v5187_v61, %v5186_v5 }
 0x48d   : > { %v5707_v16 = vpop.permute.xlu1 %5706  ;;  %v5282_v30 = vld [vmem:[#allocation3 + $0x150] sm:$0xff]  ;;  %v5283_v44 = vld [vmem:[#allocation3 + $0x158] sm:$0xff]  ;;  %v9135_v47 = vadd.f32 %v9134_v34, %v9133_v40  ;;  %v9236_v1 = vpop.f32.mrb[164].mxu0  ;;  %v5758_v59 = vsel %vm442_vm2, %v12837_v3, %v5571_v38  ;;  %v5397_v2 = vpack.c.bf16 %v5379_v41, %v5378_v35 }
 0x48e   : > { %v9237_v63 = vpop.f32.mrb[165].mxu0  ;;  %6408 = vmatmul.mubr.bf16.gmra.mrb[244].mxu0 %v5758_v59  ;;  %v5301_v33 = vpack.c.bf16 %v5283_v44, %v5282_v30  ;;  %v5934_v41 = vsel %vm442_vm2, %v12761_v10, %v5707_v16  ;;  %v5124_v34 = vld [vmem:[#allocation3 + $0x90] sm:$0xff]  ;;  %v5125_v35 = vld [vmem:[#allocation3 + $0x98] sm:$0xff]  ;;  %v4391_v10 = vadd.f32 %v12833_v51, %v12650_v39 }
 0x48f   : > { %v9238_v52 = vadd.f32 %v9237_v63, %v9236_v1  ;;  %v9239_v19 = vpop.f32.mrb[166].mxu0  ;;  %5682 = vrot.lane.b32.xlu1 %v5397_v2, %s10090_s15  ;;  %v5306_v1 = vld [vmem:[#allocation3 + $0x31] sm:$0xff]  ;;  %v12870_v63 = vpack.c.bf16 %v5125_v35, %v5124_v34  ;;  %v4394_v17 = vadd.f32 %v9135_v47, %v12650_v39 }
 0x490   : > { %5634 = vrot.lane.b32.xlu0 %v5301_v33, %s10090_s15  ;;  %v9240_v23 = vpop.f32.mrb[167].mxu0  ;;  %v5041_v45 = vpop.permute.xlu0 %5040 }
 0x491   : > { %v5659_v62 = vpop.permute.xlu1 %5658  ;;  %v12848_v21 = vadd.f32 %v9238_v52, %v4383_v14  ;;  %v9241_v29 = vadd.f32 %v9240_v23, %v9239_v19  ;;  %5108 = vst.msk [vmem:[#allocation3 + $0x169] sm:$0xff] %vm442_vm2, %v5041_v45  ;;  %v9136_v15 = vpop.f32.mrb[140].mxu1  ;;  %v5381_v33 = vld [vmem:[#allocation3 + $0x172] sm:$0xff] }
 0x492   : > { %v9137_v20 = vpop.f32.mrb[141].mxu1  ;;  %v5307_v14 = vld [vmem:[#allocation3 + $0x39] sm:$0xff] }
 0x493   : > { %v12856_v54 = vadd.f32 %v9241_v29, %v4386_v48  ;;  %v12858_v40 = vadd.f32 %v9137_v20, %v9136_v15  ;;  %v9139_v57 = vpop.f32.mrb[142].mxu1  ;;  %6529 = vmatmul.mubr.bf16.vlgmr.msra.gmra.mrb[224].mxu1 %v5866_v12 }
 0x494   : > { %5586 = vrot.lane.b32.xlu0 %v12854_v37, %s10090_s15  ;;  %v5621_v38 = vpop.permute.xlu0 %5620  ;;  %v9140_v0 = vpop.f32.mrb[143].mxu1  ;;  %6536 = vmatprep.mubr.bf16.mxu1 %v5934_v41 }
 0x495   : > { %v5047_v9 = vpop.permute.xlu1 %5046  ;;  %v9141_v30 = vadd.f32 %v9140_v0, %v9139_v57  ;;  %v9242_v44 = vpop.f32.mrb[168].mxu0  ;;  %v5826_v27 = vsel %vm442_vm2, %v12659_v46, %v5621_v38  ;;  %9836 = vmatpush3.bf16.msra.mxu1 %v12731_v11  ;;  %v5337_v11 = vpack.c.bf16 %v5307_v14, %v5306_v1  ;;  %v5188_v38 = vld [vmem:[#allocation3 + $0x151] sm:$0xff] }
 0x496   : > { %5111 = vst.msk [vmem:[#allocation3 + $0x189] sm:$0xff] %vm442_vm2, %v5047_v9  ;;  %v9243_v59 = vpop.f32.mrb[169].mxu0  ;;  %6415 = vmatprep.mubr.bf16.mxu0 %v5826_v27  ;;  %v5308_v27 = vld [vmem:[#allocation3 + $0x49] sm:$0xff]  ;;  %v5309_v1 = vld [vmem:[#allocation3 + $0x51] sm:$0xff] }
 0x497   : > { %v9244_v16 = vadd.f32 %v9243_v59, %v9242_v44  ;;  %v9245_v2 = vpop.f32.mrb[170].mxu0  ;;  %v5870_v12 = vsel %vm442_vm2, %v5337_v11, %v5659_v62  ;;  %v5189_v44 = vld [vmem:[#allocation3 + $0x159] sm:$0xff] }
 0x498   : > { %v9246_v52 = vpop.f32.mrb[171].mxu0  ;;  %v5573_v19 = vpop.permute.xlu0 %5572  ;;  %v5380_v46 = vld [vmem:[#allocation3 + $0x16a] sm:$0xff]  ;;  %v15103_v59 = vld [vmem:[#allocation8_spill] sm:$0xff] }
 0x499   : > { %v5709_v24 = vpop.permute.xlu1 %5708  ;;  %v5284_v5 = vld [vmem:[#allocation3 + $0x168] sm:$0xff]  ;;  %v5285_v60 = vld [vmem:[#allocation3 + $0x170] sm:$0xff]  ;;  %v12873_v23 = vadd.f32 %v9244_v16, %v4391_v10  ;;  %v9247_v45 = vadd.f32 %v9246_v52, %v9245_v2  ;;  %v9142_v48 = vpop.f32.mrb[144].mxu1  ;;  %v5762_v51 = vsel %vm442_vm2, %v12870_v63, %v5573_v19  ;;  %v5398_v29 = vpack.c.bf16 %v5381_v33, %v5380_v46 }
 0x49a   : > { %v9143_v15 = vpop.f32.mrb[145].mxu1  ;;  %6416 = vmatmul.mubr.bf16.gmra.mrb[248].mxu0 %v5762_v51  ;;  %v5302_v61 = vpack.c.bf16 %v5285_v60, %v5284_v5  ;;  %v5938_v41 = vsel %vm442_vm2, %v12799_v22, %v5709_v24  ;;  %v614_v10 = vsub.s32 1, %v15103_v59  ;;  %v12890_v2 = vpack.c.bf16 %v5189_v44, %v5188_v38  ;;  %v5126_v46 = vld [vmem:[#allocation3 + $0xa8] sm:$0xff]  ;;  %v5127_v5 = vld [vmem:[#allocation3 + $0xb0] sm:$0xff] }
 0x49b   : > { %v12878_v47 = vadd.f32 %v9247_v45, %v4394_v17  ;;  %v12880_v20 = vadd.f32 %v9143_v15, %v9142_v48  ;;  %5684 = vrot.lane.b32.xlu1 %v5398_v29, %s10090_s15  ;;  %v9145_v57 = vpop.f32.mrb[146].mxu1  ;;  %6537 = vmatmul.mubr.bf16.gmra.mrb[228].mxu1 %v5870_v12  ;;  %v4399_v22 = vadd.f32 %v12858_v40, %v12650_v39  ;;  %v10020_v40 = vld [vmem:[%s14897_s2] sm:$0x3] }
 0x49c   : > { %5636 = vrot.lane.b32.xlu0 %v5302_v61, %s10090_s15  ;;  %v5045_v0 = vpop.permute.xlu0 %5044  ;;  %v9146_v34 = vpop.f32.mrb[147].mxu1  ;;  %6544 = vmatprep.mubr.bf16.mxu1 %v5938_v41  ;;  %15104 = vst [vmem:[#allocation23_spill] sm:$0xff] %v12890_v2  ;;  %v5338_v19 = vpack.c.bf16 %v5309_v1, %v5308_v27  ;;  %v4402_v60 = vadd.f32 %v9141_v30, %v12650_v39 }
 0x49d   : > { %v5661_v9 = vpop.permute.xlu1 %5660  ;;  %5110 = vst.msk [vmem:[#allocation3 + $0x181] sm:$0xff] %vm442_vm2, %v5045_v0  ;;  %v12887_v62 = vadd.f32 %v9146_v34, %v9145_v57  ;;  %v9248_v35 = vpop.f32.mrb[172].mxu0  ;;  %v12904_v51 = vrot.slane %v10020_v40, %v614_v10  ;;  %v12911_v12 = vpack.c.bf16 %v5127_v5, %v5126_v46  ;;  %v5383_v57 = vld [vmem:[#allocation3 + $0x18a] sm:$0xff]  ;;  %v15106_v40 = vld [vmem:[#allocation12_spill] sm:$0xff] }
 0x49e   : > { %v9249_v16 = vpop.f32.mrb[173].mxu0  ;;  %v5874_v29 = vsel %vm442_vm2, %v5338_v19, %v5661_v9 }
 0x49f   : > { %v9250_v24 = vadd.f32 %v9249_v16, %v9248_v35  ;;  %v9251_v33 = vpop.f32.mrb[174].mxu0  ;;  %v5190_v16 = vld [vmem:[#allocation3 + $0x169] sm:$0xff] }
 0x4a0   : > { %5588 = vrot.lane.b32.xlu0 %v12890_v2, %s10090_s15  ;;  %v9252_v17 = vpop.f32.mrb[175].mxu0  ;;  %v5623_v52 = vpop.permute.xlu0 %5622 }
 0x4a1   : > { %v5711_v14 = vpop.permute.xlu1 %5710  ;;  %v12897_v11 = vadd.f32 %v9250_v24, %v4399_v22  ;;  %v9253_v45 = vadd.f32 %v9252_v17, %v9251_v33  ;;  %v5830_v48 = vsel %vm442_vm2, %v12680_v7, %v5623_v52  ;;  %v15105_v7 = vld [vmem:[#allocation10_spill] sm:$0xff]  ;;  %v5310_v22 = vld [vmem:[#allocation3 + $0x61] sm:$0xff] }
 0x4a2   : > { %6423 = vmatprep.mubr.bf16.mxu0 %v5830_v48  ;;  %v5942_v30 = vsel %vm442_vm2, %v12837_v3, %v5711_v14  ;;  %v727_v41 = vadd.f32 %v15105_v7, %v12904_v51  ;;  %v5311_v14 = vld [vmem:[#allocation3 + $0x69] sm:$0xff]  ;;  %v5128_v17 = vld [vmem:[#allocation3 + $0xc0] sm:$0xff]  ;;  %v10019_v48 = vld [vmem:[%s14904_s9 + $0x8] sm:$0xff]  }
 0x4a3   : > { %v12907_v15 = vadd.f32 %v9253_v45, %v4402_v60  ;;  %6545 = vmatmul.mubr.bf16.gmra.mrb[232].mxu1 %v5874_v29  ;;  %v5191_v60 = vld [vmem:[#allocation3 + $0x171] sm:$0xff]  ;;  %v5129_v45 = vld [vmem:[#allocation3 + $0xc8] sm:$0xff]  ;;  %v737_v29 = vadd.f32 %v15106_v40, %v12904_v51  ;;  %9835 = vmatprep.subr.bf16.mxu1 %v10019_v48 }
 0x4a4   : > { %v5575_v38 = vpop.permute.xlu0 %5574  ;;  %6552 = vmatprep.mubr.bf16.mxu1 %v5942_v30  ;;  %v9148_v0 = vpop.f32.mrb[148].mxu1  ;;  %v5382_v34 = vld [vmem:[#allocation3 + $0x182] sm:$0xff]  ;;  %v882_v52 = vmax.f32 %v727_v41, 0.0  ;;  %v12930_v7 = vpack.c.bf16 %v5191_v60, %v5190_v16  ;;  %v5339_v41 = vpack.c.bf16 %v5311_v14, %v5310_v22  ;;  %v5226_v22 = vld [vmem:[#allocation3 + $0xda] sm:$0xff]  ;;  %9837 = vmatpush3.bf16.msra.mxu1 %v10019_v48 }
 0x4a5   : > { %v5663_v61 = vpop.permute.xlu1 %5662  ;;  %v5286_v35 = vld [vmem:[#allocation3 + $0x180] sm:$0xff]  ;;  %v5287_v44 = vld [vmem:[#allocation3 + $0x188] sm:$0xff]  ;;  %v9149_v9 = vpop.f32.mrb[149].mxu1  ;;  %v5766_v27 = vsel %vm442_vm2, %v12911_v12, %v5575_v38  ;;  %v5399_v1 = vpack.c.bf16 %v5383_v57, %v5382_v34  ;;  %v4407_v38 = vadd.f32 %v12880_v20, %v12650_v39  ;;  %v886_v14 = vmax.f32 %v737_v29, 0.0 }
 0x4a6   : > { %v5303_v59 = vpack.c.bf16 %v5287_v44, %v5286_v35  ;;  %v12917_v10 = vadd.f32 %v9149_v9, %v9148_v0  ;;  %6424 = vmatmul.mubr.bf16.gmra.mrb[252].mxu0 %v5766_v27  ;;  %v9151_v3 = vpop.f32.mrb[150].mxu1  ;;  %15107 = vst [vmem:[#allocation21_spill] sm:$0xff] %v12930_v7  ;;  %v5878_v35 = vsel %vm442_vm2, %v5339_v41, %v5663_v61  ;;  %v15108_v61 = vld [vmem:[#allocation14_spill] sm:$0xff]  ;;  %v5131_v41 = vld [vmem:[#allocation3 + $0xe0] sm:$0xff] }
 0x4a7   : > { %5686 = vrot.lane.b32.xlu1 %v5399_v1, %s10090_s15  ;;  %v9152_v33 = vpop.f32.mrb[151].mxu1  ;;  %v4410_v27 = vadd.f32 %v12887_v62, %v12650_v39 }
 0x4a8   : > { %5638 = vrot.lane.b32.xlu0 %v5303_v59, %s10090_s15  ;;  %v5625_v19 = vpop.permute.xlu0 %5624  ;;  %v12921_v46 = vadd.f32 %v9152_v33, %v9151_v3  ;;  %v5227_v33 = vld [vmem:[#allocation3 + $0xe2] sm:$0xff] }
 0x4a9   : > { %v5713_v24 = vpop.permute.xlu1 %5712  ;;  %v9254_v5 = vpop.f32.mrb[176].mxu0  ;;  %v5834_v57 = vsel %vm442_vm2, %v12695_v56, %v5625_v19  ;;  %v12938_v56 = vpack.c.bf16 %v5129_v45, %v5128_v17  ;;  %v5249_v40 = vpack.c.bf16 %v5227_v33, %v5226_v22 }
 0x4aa   : > { %v9255_v30 = vpop.f32.mrb[177].mxu0  ;;  %6431 = vmatprep.mubr.bf16.mxu0 %v5834_v57  ;;  %v5946_v3 = vsel %vm442_vm2, %v12870_v63, %v5713_v24  ;;  %v5312_v63 = vld [vmem:[#allocation3 + $0x79] sm:$0xff]  ;;  %v5313_v24 = vld [vmem:[#allocation3 + $0x81] sm:$0xff] }
 0x4ab   : > { %v9256_v0 = vadd.f32 %v9255_v30, %v9254_v5  ;;  %v9257_v34 = vpop.f32.mrb[178].mxu0  ;;  %7902 = vrot.lane.b32.xlu1 %v882_v52, %s10090_s15  ;;  %6553 = vmatmul.mubr.bf16.gmra.mrb[236].mxu1 %v5878_v35  ;;  %v747_v52 = vadd.f32 %v15108_v61, %v12904_v51  ;;  %v5130_v57 = vld [vmem:[#allocation3 + $0xd8] sm:$0xff] }
 0x4ac   : > { %5590 = vrot.lane.b32.xlu0 %v12930_v7, %s10090_s15  ;;  %v9258_v44 = vpop.f32.mrb[179].mxu0  ;;  %v5577_v59 = vpop.permute.xlu0 %5576  ;;  %6560 = vmatprep.mubr.bf16.mxu1 %v5946_v3  ;;  %v12973_v61 = vpack.c.bf16 %v5131_v41, %v5130_v57  ;;  %v5476_v41 = vld [vmem:[#allocation3 + $0x181] sm:$0xff] }
 0x4ad   : > { %v5665_v9 = vpop.permute.xlu1 %5664  ;;  %v12942_v1 = vadd.f32 %v9256_v0, %v4407_v38  ;;  %v9259_v20 = vadd.f32 %v9258_v44, %v9257_v34  ;;  %v9154_v16 = vpop.f32.mrb[152].mxu1  ;;  %v5770_v17 = vsel %vm442_vm2, %v12938_v56, %v5577_v59  ;;  %v890_v38 = vmax.f32 %v747_v52, 0.0  ;;  %v15109_v0 = vld [vmem:[#allocation16_spill] sm:$0xff] }
 0x4ae   : > { %v9155_v39 = vpop.f32.mrb[153].mxu1  ;;  %6432 = vmatmul.mubr.bf16.gmra.mrb[0].mxu0 %v5770_v17  ;;  %v757_v34 = vadd.f32 %v15109_v0, %v12904_v51  ;;  %v5315_v0 = vld [vmem:[#allocation3 + $0x99] sm:$0xff] }
 0x4af   : > { %v12950_v62 = vadd.f32 %v9259_v20, %v4410_v27  ;;  %v12952_v19 = vadd.f32 %v9155_v39, %v9154_v16  ;;  %v9157_v5 = vpop.f32.mrb[154].mxu1  ;;  %7906 = vrot.lane.b32.xlu1 %v886_v14, %s10090_s15  ;;  %v5340_v27 = vpack.c.bf16 %v5313_v24, %v5312_v63  ;;  %v12965_v20 = vld [vmem:[%s14901_s6] ss:$0 sm:$0xff] }
 0x4b0   : > { %5726 = vrot.lane.b32.xlu0 %v12854_v37, %s10090_s15  ;;  %v9158_v45 = vpop.f32.mrb[155].mxu1  ;;  %v5627_v29 = vpop.permute.xlu0 %5626  ;;  %v4415_v59 = vadd.f32 %v12965_v20, %v12917_v10  ;;  %v4418_v52 = vadd.f32 %v12965_v20, %v12921_v46  ;;  %v894_v24 = vmax.f32 %v757_v34, 0.0 }
 0x4b1   : > { %v5715_v60 = vpop.permute.xlu1 %5714  ;;  %v12957_v30 = vadd.f32 %v9158_v45, %v9157_v5  ;;  %v9260_v48 = vpop.f32.mrb[180].mxu0  ;;  %v5838_v44 = vsel %vm442_vm2, %v5249_v40, %v5627_v29  ;;  %v5882_v22 = vsel %vm442_vm2, %v5340_v27, %v5665_v9  ;;  %v15111_v45 = vld [vmem:[#allocation18_spill] sm:$0xff]  ;;  %v5479_v27 = vld [vmem:[#allocation3 + $0x1a1] sm:$0xff] }
 0x4b2   : > { %v9261_v35 = vpop.f32.mrb[181].mxu0  ;;  %6439 = vmatprep.mubr.bf16.mxu0 %v5838_v44  ;;  %v5950_v5 = vsel %vm442_vm2, %v12911_v12, %v5715_v60  ;;  %v767_v9 = vadd.f32 %v15111_v45, %v12904_v51  ;;  %v5478_v44 = vld [vmem:[#allocation3 + $0x199] sm:$0xff] }
 0x4b3   : > { %v9262_v3 = vadd.f32 %v9261_v35, %v9260_v48  ;;  %v9263_v16 = vpop.f32.mrb[182].mxu0  ;;  %7910 = vrot.lane.b32.xlu1 %v890_v38, %s10090_s15  ;;  %6561 = vmatmul.mubr.bf16.gmra.mrb[240].mxu1 %v5882_v22  ;;  %v5314_v38 = vld [vmem:[#allocation3 + $0x91] sm:$0xff]  ;;  %v5477_v35 = vld [vmem:[#allocation3 + $0x189] sm:$0xff] }
 0x4b4   : > { %5728 = vrot.lane.b32.xlu0 %v12890_v2, %s10090_s15  ;;  %v9264_v33 = vpop.f32.mrb[183].mxu0  ;;  %v5579_v39 = vpop.permute.xlu0 %5578  ;;  %6568 = vmatprep.mubr.bf16.mxu1 %v5950_v5  ;;  %v12996_v22 = vpack.c.bf16 %v5477_v35, %v5476_v41  ;;  %v15115_v5 = vld [vmem:[#allocation9_spill] sm:$0xff] }
 0x4b5   : > { %v5667_v14 = vpop.permute.xlu1 %5666  ;;  %v12977_v17 = vadd.f32 %v9262_v3, %v4415_v59  ;;  %v9265_v10 = vadd.f32 %v9264_v33, %v9263_v16  ;;  %v9160_v63 = vpop.f32.mrb[156].mxu1  ;;  %v5774_v40 = vsel %vm442_vm2, %v12973_v61, %v5579_v39  ;;  %v898_v59 = vmax.f32 %v767_v9, 0.0  ;;  %v15113_v3 = vld [vmem:[#allocation20_spill] sm:$0xff]  ;;  %v5316_v41 = vld [vmem:[#allocation3 + $0xa9] sm:$0xff] }
 0x4b6   : > { %v9161_v29 = vpop.f32.mrb[157].mxu1  ;;  %6440 = vmatmul.mubr.bf16.gmra.mrb[4].mxu0 %v5774_v40  ;;  %v777_v16 = vadd.f32 %v15113_v3, %v12904_v51  ;;  %15114 = vst [vmem:[#allocation31_spill] sm:$0xff] %v12996_v22  ;;  %v5341_v33 = vpack.c.bf16 %v5315_v0, %v5314_v38  ;;  %v5495_v39 = vpack.c.bf16 %v5479_v27, %v5478_v44  ;;  %v5317_v38 = vld [vmem:[#allocation3 + $0xb1] sm:$0xff] }
 0x4b7   : > { %15110 = vst [vmem:[#allocation27_spill] sm:$0xff] %v12977_v17  ;;  %v12985_v48 = vadd.f32 %v9265_v10, %v4418_v52  ;;  %v12987_v46 = vadd.f32 %v9161_v29, %v9160_v63  ;;  %v9163_v57 = vpop.f32.mrb[158].mxu1  ;;  %7914 = vrot.lane.b32.xlu1 %v894_v24, %s10090_s15  ;;  %v723_v63 = vadd.f32 %v15115_v5, %v12904_v51  ;;  %v15116_v24 = vld [vmem:[#allocation24_spill] sm:$0xff]  ;;  %v15117_v44 = vld [vmem:[#allocation11_spill] sm:$0xff] }
 0x4b8   : > { %5730 = vrot.lane.b32.xlu0 %v12930_v7, %s10090_s15  ;;  %v9164_v60 = vpop.f32.mrb[159].mxu1  ;;  %v5886_v52 = vsel %vm442_vm2, %v5341_v33, %v5667_v14  ;;  %v787_v45 = vadd.f32 %v15116_v24, %v12904_v51  ;;  %v902_v40 = vmax.f32 %v777_v16, 0.0  ;;  %v733_v27 = vadd.f32 %v15117_v44, %v12904_v51  ;;  %v15119_v24 = vld [vmem:[#allocation13_spill] sm:$0xff]  ;;  %v5416_v44 = vld [vmem:[#allocation3 + $0xf0] sm:$0xff] }
 0x4b9   : > { %15112 = vst [vmem:[#allocation25_spill] sm:$0xff] %v12985_v48  ;;  %v5717_v12 = vpop.permute.xlu1 %5716  ;;  %v12992_v34 = vadd.f32 %v9164_v60, %v9163_v57  ;;  %v880_v35 = vmax.f32 %v723_v63, 0.0  ;;  %v5342_v33 = vpack.c.bf16 %v5317_v38, %v5316_v41 }
 0x4ba   : > { %v5954_v9 = vsel %vm442_vm2, %v12938_v56, %v5717_v12  ;;  %v15118_v56 = vld [vmem:[#allocation28_spill] sm:$0xff] }
 0x4bb   : > { %7918 = vrot.lane.b32.xlu1 %v898_v59, %s10090_s15  ;;  %6569 = vmatmul.mubr.bf16.gmra.mrb[244].mxu1 %v5886_v52  ;;  %v906_v59 = vmax.f32 %v787_v45, 0.0  ;;  %v797_v12 = vadd.f32 %v15118_v56, %v12904_v51  ;;  %v743_v45 = vadd.f32 %v15119_v24, %v12904_v51  ;;  %v15121_v56 = vld [vmem:[#allocation15_spill] sm:$0xff] }
 0x4bc   : > { %5732 = vrot.lane.b32.xlu0 %v12996_v22, %s10090_s15  ;;  %6576 = vmatprep.mubr.bf16.mxu1 %v5954_v9  ;;  %v9294_v29 = vpop.f32.mrb[160].mxu1  ;;  %v15120_v9 = vld [vmem:[#allocation32_spill] sm:$0xff] }
 0x4bd   : > { %v5669_v10 = vpop.permute.xlu1 %5668  ;;  %v9295_v57 = vpop.f32.mrb[161].mxu1  ;;  %v6937_v22 = vld [vmem:[#allocation2 + $0x109] sm:$0xff] }
 0x4be   : > { %v9296_v0 = vadd.f32 %v9295_v57, %v9294_v29  ;;  %v9297_v14 = vpop.f32.mrb[162].mxu1  ;;  %v884_v29 = vmax.f32 %v733_v27, 0.0  ;;  %v910_v57 = vmax.f32 %v797_v12, 0.0 }
 0x4bf   : > { %7922 = vrot.lane.b32.xlu1 %v902_v40, %s10090_s15  ;;  %v9298_v3 = vpop.f32.mrb[163].mxu1  ;;  %v807_v40 = vadd.f32 %v15120_v9, %v12904_v51 }
 0x4c0   : > { %5734 = vrot.lane.b32.xlu0 %v5495_v39, %s10090_s15  ;;  %v9299_v16 = vadd.f32 %v9298_v3, %v9297_v14  ;;  %v13015_v52 = vadd.f32 %v9296_v0, %v12665_v13  ;;  %v5890_v39 = vsel %vm442_vm2, %v5342_v33, %v5669_v10  ;;  %v5318_v10 = vld [vmem:[#allocation3 + $0xc1] sm:$0xff]  ;;  %v5319_v0 = vld [vmem:[#allocation3 + $0xc9] sm:$0xff]  ;;  %v888_v3 = vmax.f32 %v743_v45, 0.0 }
 0x4c1   : > { %v5719_v60 = vpop.permute.xlu1 %5718  ;;  %v5343_v9 = vpack.c.bf16 %v5319_v0, %v5318_v10  ;;  %v4423_v45 = vadd.f32 %v12965_v20, %v12952_v19  ;;  %v4426_v19 = vadd.f32 %v12965_v20, %v12957_v30 }
 0x4c2   : > { %v13021_v63 = vadd.f32 %v9299_v16, %v12675_v50  ;;  %v5958_v13 = vsel %vm442_vm2, %v12973_v61, %v5719_v60  ;;  %v753_v61 = vadd.f32 %v15121_v56, %v12904_v51  ;;  %v914_v60 = vmax.f32 %v807_v40, 0.0  ;;  %v15122_v16 = vld [vmem:[#allocation36_spill] sm:$0xff] }
 0x4c3   : > { %7926 = vrot.lane.b32.xlu1 %v906_v59, %s10090_s15  ;;  %6577 = vmatmul.mubr.bf16.gmra.mrb[248].mxu1 %v5890_v39  ;;  %v5417_v59 = vld [vmem:[#allocation3 + $0xf8] sm:$0xff]  ;;  %v817_v33 = vadd.f32 %v15122_v16, %v12904_v51  ;;  %v15124_v56 = vld [vmem:[#allocation40_spill] sm:$0xff] }
 0x4c4   : > { %7900 = vrot.lane.b32.xlu0 %v880_v35, %s10090_s15  ;;  %6584 = vmatprep.mubr.bf16.mxu1 %v5958_v13  ;;  %v9300_v41 = vpop.f32.mrb[164].mxu1  ;;  %v13042_v40 = vpack.c.bf16 %v5417_v59, %v5416_v44  ;;  %v827_v48 = vadd.f32 %v15124_v56, %v12904_v51  ;;  %v5320_v59 = vld [vmem:[#allocation3 + $0xd9] sm:$0xff] }
 0x4c5   : > { %v5671_v5 = vpop.permute.xlu1 %5670  ;;  %v9301_v38 = vpop.f32.mrb[165].mxu1  ;;  %v918_v44 = vmax.f32 %v817_v33, 0.0 }
 0x4c6   : > { %v9302_v14 = vadd.f32 %v9301_v38, %v9300_v41  ;;  %v9303_v50 = vpop.f32.mrb[166].mxu1  ;;  %v922_v33 = vmax.f32 %v827_v48, 0.0 }
 0x4c7   : > { %7930 = vrot.lane.b32.xlu1 %v910_v57, %s10090_s15  ;;  %v9266_v35 = vpop.f32.mrb[184].mxu0  ;;  %v9304_v12 = vpop.f32.mrb[167].mxu1 }
 0x4c8   : > { %7904 = vrot.lane.b32.xlu0 %v884_v29, %s10090_s15  ;;  %v9305_v39 = vadd.f32 %v9304_v12, %v9303_v50  ;;  %v9267_v24 = vpop.f32.mrb[185].mxu0  ;;  %v13036_v13 = vadd.f32 %v9302_v14, %v12688_v4  ;;  %v15123_v29 = vld [vmem:[#allocation17_spill] sm:$0xff]  ;;  %v5894_v4 = vsel %vm442_vm2, %v5343_v9, %v5671_v5 }
 0x4c9   : > { %v5721_v27 = vpop.permute.xlu1 %5720  ;;  %v763_v57 = vadd.f32 %v15123_v29, %v12904_v51  ;;  %v9268_v41 = vadd.f32 %v9267_v24, %v9266_v35  ;;  %v9269_v38 = vpop.f32.mrb[186].mxu0  ;;  %v892_v35 = vmax.f32 %v753_v61, 0.0  ;;  %v15128_v29 = vld [vmem:[#allocation44_spill] sm:$0xff] }
 0x4ca   : > { %v9270_v16 = vpop.f32.mrb[187].mxu0  ;;  %v13050_v10 = vadd.f32 %v9305_v39, %v12692_v26  ;;  %v5962_v50 = vsel %vm442_vm2, %v13042_v40, %v5721_v27  ;;  %v15127_v27 = vld [vmem:[#allocation19_spill] sm:$0xff] }
 0x4cb   : > { %7934 = vrot.lane.b32.xlu1 %v914_v60, %s10090_s15  ;;  %v13054_v0 = vadd.f32 %v9268_v41, %v4423_v45  ;;  %v9271_v14 = vadd.f32 %v9270_v16, %v9269_v38  ;;  %6585 = vmatmul.mubr.bf16.gmra.mrb[252].mxu1 %v5894_v4  ;;  %v5321_v60 = vld [vmem:[#allocation3 + $0xe1] sm:$0xff]  ;;  %v896_v39 = vmax.f32 %v763_v57, 0.0  ;;  %v773_v61 = vadd.f32 %v15127_v27, %v12904_v51 }
 0x4cc   : > { %7908 = vrot.lane.b32.xlu0 %v888_v3, %s10090_s15  ;;  %6592 = vmatprep.mubr.bf16.mxu1 %v5962_v50  ;;  %v9306_v3 = vpop.f32.mrb[168].mxu1  ;;  %v837_v45 = vadd.f32 %v15128_v29, %v12904_v51  ;;  %v5344_v41 = vpack.c.bf16 %v5321_v60, %v5320_v59  ;;  %v4431_v57 = vadd.f32 %v12965_v20, %v12987_v46  ;;  %v15130_v60 = vld [vmem:[#allocation22_spill] sm:$0xff] }
 0x4cd   : > { %15125 = vst [vmem:[#allocation29_spill] sm:$0xff] %v13054_v0  ;;  %v13058_v5 = vadd.f32 %v9271_v14, %v4426_v19  ;;  %v5673_v26 = vpop.permute.xlu1 %5672  ;;  %v9307_v12 = vpop.f32.mrb[169].mxu1  ;;  %v4434_v50 = vadd.f32 %v12965_v20, %v12992_v34  ;;  %v900_v20 = vmax.f32 %v773_v61, 0.0 }
 0x4ce   : > { %v9308_v24 = vadd.f32 %v9307_v12, %v9306_v3  ;;  %v9309_v30 = vpop.f32.mrb[170].mxu1  ;;  %v5898_v48 = vsel %vm442_vm2, %v5344_v41, %v5673_v26  ;;  %v15131_v3 = vld [vmem:[#allocation48_spill] sm:$0xff]  ;;  %v926_v34 = vmax.f32 %v837_v45, 0.0 }
 0x4cf   : > { %15126 = vst [vmem:[#allocation35_spill] sm:$0xff] %v13058_v5  ;;  %7938 = vrot.lane.b32.xlu1 %v918_v44, %s10090_s15  ;;  %v9272_v9 = vpop.f32.mrb[188].mxu0  ;;  %v9310_v38 = vpop.f32.mrb[171].mxu1  ;;  %v847_v12 = vadd.f32 %v15131_v3, %v12904_v51 }
 0x4d0   : > { %7912 = vrot.lane.b32.xlu0 %v892_v35, %s10090_s15  ;;  %v9273_v56 = vpop.f32.mrb[189].mxu0  ;;  %v9311_v16 = vadd.f32 %v9310_v38, %v9309_v30  ;;  %v13069_v14 = vadd.f32 %v9308_v24, %v12703_v58  ;;  %v783_v58 = vadd.f32 %v15130_v60, %v12904_v51 }
 0x4d1   : > { %v9274_v4 = vadd.f32 %v9273_v56, %v9272_v9  ;;  %v9275_v19 = vpop.f32.mrb[190].mxu0  ;;  %v930_v41 = vmax.f32 %v847_v12, 0.0  ;;  %v5228_v56 = vld [vmem:[#allocation3 + $0xf2] sm:$0xff] }
 0x4d2   : > { %v9276_v35 = vpop.f32.mrb[191].mxu0  ;;  %v13079_v46 = vadd.f32 %v9311_v16, %v12707_v28  ;;  %v904_v27 = vmax.f32 %v783_v58, 0.0  ;;  %v15139_v12 = vld [vmem:[#allocation30_spill] sm:$0xff] }
 0x4d3   : > { %v13074_v44 = vadd.f32 %v9274_v4, %v4431_v57  ;;  %v9277_v59 = vadd.f32 %v9276_v35, %v9275_v19  ;;  %7942 = vrot.lane.b32.xlu1 %v922_v33, %s10090_s15  ;;  %6593 = vmatmul.mubr.bf16.gmra.mrb[0].mxu1 %v5898_v48  ;;  %v15133_v33 = vld [vmem:[#allocation26_spill] sm:$0xff]  ;;  %v15135_v57 = vld [vmem:[#allocation52_spill] sm:$0xff]  ;;  %v5418_v35 = vld [vmem:[#allocation3 + $0x108] sm:$0xff] }
 0x4d4   : > { %7916 = vrot.lane.b32.xlu0 %v896_v39, %s10090_s15  ;;  %v9312_v24 = vpop.f32.mrb[172].mxu1  ;;  %v793_v29 = vadd.f32 %v15133_v33, %v12904_v51  ;;  %v857_v16 = vadd.f32 %v15135_v57, %v12904_v51  ;;  %v5229_v48 = vld [vmem:[#allocation3 + $0xfa] sm:$0xff] }
 0x4d5   : > { %15129 = vst [vmem:[#allocation33_spill] sm:$0xff] %v13074_v44  ;;  %v13085_v26 = vadd.f32 %v9277_v59, %v4434_v50  ;;  %v9313_v30 = vpop.f32.mrb[173].mxu1  ;;  %v5419_v59 = vld [vmem:[#allocation3 + $0x110] sm:$0xff]  ;;  %v5323_v33 = vld [vmem:[#allocation3 + $0xf9] sm:$0xff] }
 0x4d6   : > { %v9314_v9 = vadd.f32 %v9313_v30, %v9312_v24  ;;  %v9315_v28 = vpop.f32.mrb[174].mxu1  ;;  %v13113_v24 = vpack.c.bf16 %v5419_v59, %v5418_v35  ;;  %v15141_v30 = vld [vmem:[#allocation56_spill] sm:$0xff] }
 0x4d7   : > { %15132 = vst [vmem:[#allocation39_spill] sm:$0xff] %v13085_v26  ;;  %7946 = vrot.lane.b32.xlu1 %v926_v34, %s10090_s15  ;;  %v9728_v39 = vpop.f32.mrb[192].mxu0  ;;  %v9316_v38 = vpop.f32.mrb[175].mxu1  ;;  %v13111_v34 = vpack.c.bf16 %v5229_v48, %v5228_v56  ;;  %v15143_v48 = vld [vmem:[#allocation34_spill] sm:$0xff]  ;;  %v13282_v26 = vld [vmem:[#allocation2 + $0x30] sm:$0xff] }
 0x4d8   : > { %7920 = vrot.lane.b32.xlu0 %v900_v20, %s10090_s15  ;;  %v13092_v61 = vadd.f32 %v9728_v39, %v13036_v13  ;;  %v4793_v45 = vpop.f32.mrb[193].mxu0  ;;  %v9317_v4 = vadd.f32 %v9316_v38, %v9315_v28  ;;  %v4657_v60 = vadd.f32 %v9314_v9, %v12712_v8  ;;  %v803_v20 = vadd.f32 %v15139_v12, %v12904_v51  ;;  %v5322_v39 = vld [vmem:[#allocation3 + $0xf1] sm:$0xff] }
 0x4d9   : > { %v13097_v19 = vadd.f32 %v4793_v45, %v13015_v52  ;;  %v9729_v50 = vpop.f32.mrb[194].mxu0  ;;  %15140 = vst [vmem:[#allocation45_spill] sm:$0xff] %v13111_v34  ;;  %v908_v8 = vmax.f32 %v793_v29, 0.0  ;;  %v867_v9 = vadd.f32 %v15141_v30, %v12904_v51  ;;  %v813_v35 = vadd.f32 %v15143_v48, %v12904_v51  ;;  %v5420_v30 = vld [vmem:[#allocation3 + $0x120] sm:$0xff] }
 0x4da   : > { %15134 = vst [vmem:[#allocation37_spill] sm:$0xff] %v13092_v61  ;;  %v13101_v58 = vadd.f32 %v9729_v50, %v13050_v10  ;;  %v4796_v13 = vpop.f32.mrb[195].mxu0  ;;  %v4660_v52 = vadd.f32 %v9317_v4, %v12718_v6  ;;  %v934_v10 = vmax.f32 %v857_v16, 0.0  ;;  %v912_v45 = vmax.f32 %v803_v20, 0.0  ;;  %v7178_v61 = vld [vmem:[#allocation2 + $0x6a] sm:$0xff] }
 0x4db   : > { %15136 = vst [vmem:[#allocation43_spill] sm:$0xff] %v13097_v19  ;;  %v13104_v3 = vadd.f32 %v4796_v13, %v13021_v63  ;;  %7950 = vrot.lane.b32.xlu1 %v930_v41, %s10090_s15  ;;  %v5345_v50 = vpack.c.bf16 %v5323_v33, %v5322_v39  ;;  %v938_v59 = vmax.f32 %v867_v9, 0.0  ;;  %v15144_v13 = vld [vmem:[#allocation60_spill] sm:$0xff]  ;;  %v5230_v39 = vld [vmem:[#allocation3 + $0x10a] sm:$0xff] }
 0x4dc   : > { %15137 = vst [vmem:[#allocation41_spill] sm:$0xff] %v13101_v58  ;;  %7924 = vrot.lane.b32.xlu0 %v904_v27, %s10090_s15  ;;  %v9318_v41 = vpop.f32.mrb[176].mxu1  ;;  %v877_v12 = vadd.f32 %v15144_v13, %v12904_v51  ;;  %v15146_v9 = vld [vmem:[#allocation38_spill] sm:$0xff]  ;;  %v5237_v58 = vld [vmem:[#allocation3 + $0x15a] sm:$0xff] }
 0x4dd   : > { %15138 = vst [vmem:[#allocation47_spill] sm:$0xff] %v13104_v3  ;;  %v5723_v63 = vpop.permute.xlu1 %5722  ;;  %v9319_v38 = vpop.f32.mrb[177].mxu1  ;;  %v6929_v3 = vld [vmem:[#allocation2 + $0xa9] sm:$0xff] }
 0x4de   : > { %v5629_v28 = vpop.permute.xlu0 %5628  ;;  %v5966_v27 = vsel %vm442_vm2, %v13113_v24, %v5723_v63  ;;  %v9320_v56 = vadd.f32 %v9319_v38, %v9318_v41  ;;  %v9321_v57 = vpop.f32.mrb[178].mxu1  ;;  %v5421_v63 = vld [vmem:[#allocation3 + $0x128] sm:$0xff]  ;;  %v942_v48 = vmax.f32 %v877_v12, 0.0  ;;  %v5325_v12 = vld [vmem:[#allocation3 + $0x111] sm:$0xff] }
 0x4df   : > { %v5842_v6 = vsel %vm442_vm2, %v13111_v34, %v5629_v28  ;;  %7954 = vrot.lane.b32.xlu1 %v934_v10, %s10090_s15  ;;  %v9732_v29 = vpop.f32.mrb[196].mxu0  ;;  %6600 = vmatprep.mubr.bf16.mxu1 %v5966_v27  ;;  %v9322_v10 = vpop.f32.mrb[179].mxu1  ;;  %v823_v27 = vadd.f32 %v15146_v9, %v12904_v51 }
 0x4e0   : > { %7928 = vrot.lane.b32.xlu0 %v908_v8, %s10090_s15  ;;  %6447 = vmatprep.mubr.bf16.mxu0 %v5842_v6  ;;  %v13123_v16 = vadd.f32 %v9732_v29, %v4657_v60  ;;  %v4809_v4 = vpop.f32.mrb[197].mxu0  ;;  %v9323_v28 = vadd.f32 %v9322_v10, %v9321_v57  ;;  %v4665_v33 = vadd.f32 %v9320_v56, %v12741_v18  ;;  %v5324_v10 = vld [vmem:[#allocation3 + $0x109] sm:$0xff] }
 0x4e1   : > { %v13130_v8 = vadd.f32 %v4809_v4, %v13069_v14  ;;  %v5675_v20 = vpop.permute.xlu1 %5674  ;;  %v9733_v6 = vpop.f32.mrb[198].mxu0  ;;  %v5231_v4 = vld [vmem:[#allocation3 + $0x112] sm:$0xff]  ;;  %v13145_v18 = vpack.c.bf16 %v5421_v63, %v5420_v30  ;;  %v920_v63 = vmax.f32 %v823_v27, 0.0 }
 0x4e2   : > { %15142 = vst [vmem:[#allocation51_spill] sm:$0xff] %v13123_v16  ;;  %v5902_v60 = vsel %vm442_vm2, %v5345_v50, %v5675_v20  ;;  %v5581_v41 = vpop.permute.xlu0 %5580  ;;  %v13138_v29 = vadd.f32 %v9733_v6, %v4660_v52  ;;  %v4812_v14 = vpop.f32.mrb[199].mxu0  ;;  %v4668_v56 = vadd.f32 %v9323_v28, %v12746_v42  ;;  %v916_v50 = vmax.f32 %v813_v35, 0.0  ;;  %v15150_v6 = vld [vmem:[#allocation42_spill] sm:$0xff] }
 0x4e3   : > { %15145 = vst [vmem:[#allocation49_spill] sm:$0xff] %v13130_v8  ;;  %v5778_v38 = vsel %vm442_vm2, %v13042_v40, %v5581_v41  ;;  %7958 = vrot.lane.b32.xlu1 %v938_v59, %s10090_s15  ;;  %v13143_v57 = vadd.f32 %v4812_v14, %v13079_v46  ;;  %6601 = vmatmul.mubr.bf16.gmra.mrb[4].mxu1 %v5902_v60  ;;  %v7113_v8 = vld [vmem:[#allocation2 + $0x61] sm:$0xff] }
 0x4e4   : > { %15147 = vst [vmem:[#allocation55_spill] sm:$0xff] %v13138_v29  ;;  %7932 = vrot.lane.b32.xlu0 %v912_v45, %s10090_s15  ;;  %6448 = vmatmul.mubr.bf16.gmra.mrb[8].mxu0 %v5778_v38  ;;  %v9324_v52 = vpop.f32.mrb[180].mxu1  ;;  %v13148_v13 = vpack.c.bf16 %v5231_v4, %v5230_v39  ;;  %v5346_v41 = vpack.c.bf16 %v5325_v12, %v5324_v10 }
 0x4e5   : > { %15148 = vst [vmem:[#allocation53_spill] sm:$0xff] %v13143_v57  ;;  %v5725_v40 = vpop.permute.xlu1 %5724  ;;  %v9325_v20 = vpop.f32.mrb[181].mxu1  ;;  %v833_v39 = vadd.f32 %v15150_v6, %v12904_v51  ;;  %v15157_v6 = vld [vmem:[#allocation50_spill] sm:$0xff] }
 0x4e6   : > { %15149 = vst [vmem:[#allocation59_spill] sm:$0xff] %v13148_v13  ;;  %v5631_v59 = vpop.permute.xlu0 %5630  ;;  %v5970_v46 = vsel %vm442_vm2, %v13145_v18, %v5725_v40  ;;  %v9326_v45 = vadd.f32 %v9325_v20, %v9324_v52  ;;  %v9327_v30 = vpop.f32.mrb[182].mxu1 }
 0x4e7   : > { %7962 = vrot.lane.b32.xlu1 %v942_v48, %s10090_s15  ;;  %v5846_v42 = vsel %vm442_vm2, %v13148_v13, %v5631_v59  ;;  %v9736_v35 = vpop.f32.mrb[200].mxu0  ;;  %6608 = vmatprep.mubr.bf16.mxu1 %v5970_v46  ;;  %v9328_v28 = vpop.f32.mrb[183].mxu1 }
 0x4e8   : > { %7936 = vrot.lane.b32.xlu0 %v916_v50, %s10090_s15  ;;  %6455 = vmatprep.mubr.bf16.mxu0 %v5846_v42  ;;  %v4825_v60 = vpop.f32.mrb[201].mxu0  ;;  %v9329_v9 = vadd.f32 %v9328_v28, %v9327_v30  ;;  %v4673_v38 = vadd.f32 %v9326_v45, %v12763_v36  ;;  %v924_v36 = vmax.f32 %v833_v39, 0.0  ;;  %v5232_v42 = vld [vmem:[#allocation3 + $0x122] sm:$0xff]  ;;  %v5233_v28 = vld [vmem:[#allocation3 + $0x12a] sm:$0xff]  ;;  %v853_v39 = vadd.f32 %v15157_v6, %v12904_v51 }
 0x4e9   : > { %v13159_v14 = vadd.f32 %v4825_v60, %v4665_v33  ;;  %v5677_v4 = vpop.permute.xlu1 %5676  ;;  %v9737_v50 = vpop.f32.mrb[202].mxu0  ;;  %v15154_v33 = vld [vmem:[#allocation46_spill] sm:$0xff]  ;;  %v13175_v60 = vpack.c.bf16 %v5233_v28, %v5232_v42 }
 0x4ea   : > { %v5906_v48 = vsel %vm442_vm2, %v5346_v41, %v5677_v4  ;;  %v5583_v40 = vpop.permute.xlu0 %5582  ;;  %v4828_v52 = vpop.f32.mrb[203].mxu0  ;;  %v13162_v27 = vadd.f32 %v9736_v35, %v4673_v38  ;;  %v4676_v10 = vadd.f32 %v9329_v9, %v12771_v43  ;;  %v843_v46 = vadd.f32 %v15154_v33, %v12904_v51 }
 0x4eb   : > { %15151 = vst [vmem:[#allocation57_spill] sm:$0xff] %v13159_v14  ;;  %v5782_v59 = vsel %vm442_vm2, %v13113_v24, %v5583_v40  ;;  %v13168_v20 = vadd.f32 %v4828_v52, %v4668_v56  ;;  %6609 = vmatmul.mubr.bf16.gmra.mrb[8].mxu1 %v5906_v48  ;;  %15156 = vst [vmem:[#allocation14_spill] sm:$0xff] %v13175_v60 }
 0x4ec   : > { %15152 = vst [vmem:[#allocation8_spill] sm:$0xff] %v13162_v27  ;;  %7940 = vrot.lane.b32.xlu0 %v920_v63, %s10090_s15  ;;  %6456 = vmatmul.mubr.bf16.gmra.mrb[12].mxu0 %v5782_v59  ;;  %v13172_v45 = vadd.f32 %v9737_v50, %v4676_v10  ;;  %v9330_v30 = vpop.f32.mrb[184].mxu1  ;;  %v928_v41 = vmax.f32 %v843_v46, 0.0  ;;  %v932_v10 = vmax.f32 %v853_v39, 0.0  ;;  %v15161_v39 = vld [vmem:[#allocation58_spill] sm:$0xff]  ;;  %v5139_v27 = vld [vmem:[#allocation3 + $0x140] sm:$0xff] }
 0x4ed   : > { %15153 = vst [vmem:[#allocation10_spill] sm:$0xff] %v13168_v20  ;;  %v9331_v35 = vpop.f32.mrb[185].mxu1  ;;  %v7046_v20 = vld [vmem:[#allocation2 + $0x38] sm:$0xff] }
 0x4ee   : > { %15155 = vst [vmem:[#allocation12_spill] sm:$0xff] %v13172_v45  ;;  %v9332_v12 = vadd.f32 %v9331_v35, %v9330_v30  ;;  %v9333_v24 = vpop.f32.mrb[186].mxu1  ;;  %v5138_v45 = vld [vmem:[#allocation3 + $0x138] sm:$0xff] }
 0x4ef   : > { %v9740_v43 = vpop.f32.mrb[204].mxu0  ;;  %v9334_v63 = vpop.f32.mrb[187].mxu1 }
 0x4f0   : > { %7944 = vrot.lane.b32.xlu0 %v924_v36, %s10090_s15  ;;  %v4841_v56 = vpop.f32.mrb[205].mxu0  ;;  %v9335_v9 = vadd.f32 %v9334_v63, %v9333_v24  ;;  %v4681_v38 = vadd.f32 %v9332_v12, %v12782_v49  ;;  %v15159_v36 = vld [vmem:[#allocation54_spill] sm:$0xff] }
 0x4f1   : > { %v9741_v50 = vpop.f32.mrb[206].mxu0  ;;  %v863_v33 = vadd.f32 %v15159_v36, %v12904_v51 }
 0x4f2   : > { %v5633_v4 = vpop.permute.xlu0 %5632  ;;  %v13182_v40 = vadd.f32 %v4841_v56, %v4681_v38  ;;  %v4684_v52 = vadd.f32 %v9335_v9, %v12787_v55  ;;  %v4844_v59 = vpop.f32.mrb[207].mxu0  ;;  %v6885_v56 = vld [vmem:[#allocation2 + $0x18] sm:$0xff]  ;;  %v873_v9 = vadd.f32 %v15161_v39, %v12904_v51  ;;  %v5234_v39 = vld [vmem:[#allocation3 + $0x13a] sm:$0xff] }
 0x4f3   : > { %v5850_v48 = vsel %vm442_vm2, %v13175_v60, %v5633_v4  ;;  %v936_v6 = vmax.f32 %v863_v33, 0.0  ;;  %v13206_v33 = vld [vmem:[#allocation2 + $0x49] sm:$0xff]  ;;  %v6981_v51 = vld [vmem:[#allocation2 + $0x1a] sm:$0xff] }
 0x4f4   : > { %15158 = vst [vmem:[#allocation16_spill] sm:$0xff] %v13182_v40  ;;  %7948 = vrot.lane.b32.xlu0 %v928_v41, %s10090_s15  ;;  %6463 = vmatprep.mubr.bf16.mxu0 %v5850_v48  ;;  %v13188_v46 = vadd.f32 %v4844_v59, %v4684_v52  ;;  %v9336_v30 = vpop.f32.mrb[188].mxu1  ;;  %v6917_v41 = vld [vmem:[#allocation2 + $0x19] sm:$0xff]  ;;  %v6918_v59 = vld [vmem:[#allocation2 + $0x21] sm:$0xff] }
 0x4f5   : > { %v9337_v35 = vpop.f32.mrb[189].mxu1  ;;  %v6886_v52 = vld [vmem:[#allocation2 + $0x20] sm:$0xff] }
 0x4f6   : > { %15160 = vst [vmem:[#allocation18_spill] sm:$0xff] %v13188_v46  ;;  %v5585_v49 = vpop.permute.xlu0 %5584  ;;  %v9338_v12 = vadd.f32 %v9337_v35, %v9336_v30  ;;  %v9339_v55 = vpop.f32.mrb[190].mxu1  ;;  %v13204_v30 = vld [vmem:[#allocation2 + $0x48] sm:$0xff]  ;;  %v940_v35 = vmax.f32 %v873_v9, 0.0  ;;  %v5143_v60 = vld [vmem:[#allocation3 + $0x170] sm:$0xff] }
 0x4f7   : > { %v5786_v42 = vsel %vm442_vm2, %v13145_v18, %v5585_v49  ;;  %v13193_v24 = vpop.f32.mrb[208].mxu0  ;;  %v9340_v28 = vpop.f32.mrb[191].mxu1  ;;  %v6949_v49 = vadd.f32 %v6917_v41, %v6885_v56  ;;  %v6953_v56 = vadd.f32 %v13206_v33, %v13204_v30 }
 0x4f8   : > { %7952 = vrot.lane.b32.xlu0 %v932_v10, %s10090_s15  ;;  %6464 = vmatmul.mubr.bf16.gmra.mrb[16].mxu0 %v5786_v42  ;;  %v4857_v63 = vpop.f32.mrb[209].mxu0  ;;  %v4689_v38 = vadd.f32 %v9338_v12, %v12802_v53  ;;  %v9341_v4 = vadd.f32 %v9340_v28, %v9339_v55  ;;  %v13208_v42 = vld [vmem:[#allocation2 + $0x50] sm:$0xff] }
 0x4f9   : > { %v13198_v18 = vpop.f32.mrb[210].mxu0  ;;  %v13210_v53 = vld [vmem:[#allocation2 + $0x51] sm:$0xff] }
 0x4fa   : > { %v4860_v48 = vpop.f32.mrb[211].mxu0  ;;  %v13200_v10 = vadd.f32 %v9740_v43, %v4689_v38  ;;  %v4692_v36 = vadd.f32 %v9341_v4, %v12811_v31  ;;  %v6950_v43 = vadd.f32 %v6918_v59, %v6886_v52  ;;  %v6982_v31 = vld [vmem:[#allocation2 + $0x22] sm:$0xff]  ;;  %v7013_v4 = vadd.f32 %v6981_v51, %v6949_v49  ;;  %v5235_v59 = vld [vmem:[#allocation3 + $0x142] sm:$0xff] }
 0x4fb   : > { %v6954_v9 = vadd.f32 %v13210_v53, %v13208_v42  ;;  %v13230_v46 = vpack.c.bf16 %v5235_v59, %v5234_v39  ;;  %v13243_v59 = vpack.c.bf16 %v5139_v27, %v5138_v45  ;;  %v7173_v45 = vld [vmem:[#allocation2 + $0x32] sm:$0xff] }
 0x4fc   : > { %15162 = vst [vmem:[#allocation20_spill] sm:$0xff] %v13200_v10  ;;  %7956 = vrot.lane.b32.xlu0 %v936_v6, %s10090_s15  ;;  %v13212_v12 = vadd.f32 %v9741_v50, %v4692_v36  ;;  %v9342_v55 = vpop.f32.mrb[192].mxu1  ;;  %v13221_v50 = vld [vmem:[#allocation2 + $0x4a] sm:$0xff]  ;;  %v13225_v10 = vld [vmem:[#allocation2 + $0x52] sm:$0xff]  ;;  %v7014_v49 = vadd.f32 %v6982_v31, %v6950_v43 }
 0x4fd   : > { %v9343_v28 = vpop.f32.mrb[193].mxu1  ;;  %15164 = vst [vmem:[#allocation24_spill] sm:$0xff] %v13230_v46  ;;  %v7017_v14 = vadd.f32 %v13221_v50, %v6953_v56  ;;  %v7018_v39 = vadd.f32 %v13225_v10, %v6954_v9  ;;  %v7109_v43 = vld [vmem:[#allocation2 + $0x31] sm:$0xff]  ;;  %v7050_v31 = vld [vmem:[#allocation2 + $0x68] sm:$0xff] }
 0x4fe   : > { %15163 = vst [vmem:[#allocation9_spill] sm:$0xff] %v13212_v12  ;;  %v9344_v41 = vadd.f32 %v9343_v28, %v9342_v55  ;;  %v9345_v6 = vpop.f32.mrb[194].mxu1  ;;  %v7045_v12 = vld [vmem:[#allocation2 + $0x30] sm:$0xff]  ;;  %v7078_v56 = vadd.f32 %v7046_v20, %v7014_v49 }
 0x4ff   : > { %v13217_v38 = vpop.f32.mrb[212].mxu0  ;;  %v9346_v36 = vpop.f32.mrb[195].mxu1  ;;  %v7114_v20 = vld [vmem:[#allocation2 + $0x69] sm:$0xff] }
 0x500   : > { %7960 = vrot.lane.b32.xlu0 %v940_v35, %s10090_s15  ;;  %v13223_v52 = vpop.f32.mrb[213].mxu0  ;;  %v4697_v55 = vadd.f32 %v9344_v41, %v12824_v25  ;;  %v9347_v28 = vadd.f32 %v9346_v36, %v9345_v6  ;;  %v7077_v41 = vadd.f32 %v7045_v12, %v7013_v4  ;;  %v7049_v6 = vld [vmem:[#allocation2 + $0x60] sm:$0xff] }
 0x501   : > { %v13228_v35 = vpop.f32.mrb[214].mxu0 }
 0x502   : > { %v5635_v51 = vpop.permute.xlu0 %5634  ;;  %v13232_v40 = vpop.f32.mrb[215].mxu0  ;;  %v13235_v29 = vadd.f32 %v4857_v63, %v4697_v55  ;;  %v4700_v16 = vadd.f32 %v9347_v28, %v12831_v32  ;;  %v7081_v32 = vadd.f32 %v7049_v6, %v7017_v14 }
 0x503   : > { %v5854_v25 = vsel %vm442_vm2, %v13230_v46, %v5635_v51  ;;  %v7141_v51 = vadd.f32 %v7109_v43, %v7077_v41  ;;  %v5142_v46 = vld [vmem:[#allocation3 + $0x168] sm:$0xff] }
 0x504   : > { %15165 = vst [vmem:[#allocation11_spill] sm:$0xff] %v13235_v29  ;;  %6471 = vmatprep.mubr.bf16.mxu0 %v5854_v25  ;;  %v13241_v36 = vadd.f32 %v4860_v48, %v4700_v16  ;;  %v9348_v57 = vpop.f32.mrb[196].mxu1  ;;  %v7110_v29 = vld [vmem:[#allocation2 + $0x39] sm:$0xff]  ;;  %v7082_v25 = vadd.f32 %v7050_v31, %v7018_v39 }
 0x505   : > { %v9349_v55 = vpop.f32.mrb[197].mxu1  ;;  %v7142_v6 = vadd.f32 %v7110_v29, %v7078_v56  ;;  %v7205_v43 = vadd.f32 %v7173_v45, %v7141_v51 }
 0x506   : > { %15166 = vst [vmem:[#allocation28_spill] sm:$0xff] %v13241_v36  ;;  %v5587_v63 = vpop.permute.xlu0 %5586  ;;  %v9350_v12 = vadd.f32 %v9349_v55, %v9348_v57  ;;  %v9351_v4 = vpop.f32.mrb[198].mxu1  ;;  %v5236_v57 = vld [vmem:[#allocation3 + $0x152] sm:$0xff]  ;;  %v7174_v55 = vld [vmem:[#allocation2 + $0x3a] sm:$0xff]  ;;  %v7145_v36 = vadd.f32 %v7113_v8, %v7081_v32  ;;  %v7146_v31 = vadd.f32 %v7114_v20, %v7082_v25 }
 0x507   : > { %v5790_v28 = vsel %vm442_vm2, %v13243_v59, %v5587_v63  ;;  %v13247_v9 = vpop.f32.mrb[216].mxu0  ;;  %v9352_v16 = vpop.f32.mrb[199].mxu1  ;;  %v13263_v29 = vpack.c.bf16 %v5237_v58, %v5236_v57  ;;  %v7206_v56 = vadd.f32 %v7174_v55, %v7142_v6  ;;  %v5140_v8 = vld [vmem:[#allocation3 + $0x150] sm:$0xff]  ;;  %v5141_v32 = vld [vmem:[#allocation3 + $0x158] sm:$0xff]  ;;  %v6893_v58 = vld [vmem:[#allocation2 + $0x78] sm:$0xff] }
 0x508   : > { %15167 = vst [vmem:[#allocation13_spill] sm:$0xff] %v13247_v9  ;;  %6472 = vmatmul.mubr.bf16.gmra.mrb[20].mxu0 %v5790_v28  ;;  %v13249_v27 = vpop.f32.mrb[217].mxu0  ;;  %v4705_v48 = vadd.f32 %v9350_v12, %v12848_v21  ;;  %v9353_v49 = vadd.f32 %v9352_v16, %v9351_v4  ;;  %v7177_v28 = vld [vmem:[#allocation2 + $0x62] sm:$0xff]  ;;  %v7210_v20 = vadd.f32 %v7178_v61, %v7146_v31  ;;  %v13278_v61 = vld [vmem:[#allocation2 + $0x7a] sm:$0xff]  ;;  %v6930_v31 = vld [vmem:[#allocation2 + $0xb1] sm:$0xff] }
 0x509   : > { %v13252_v14 = vpop.f32.mrb[218].mxu0  ;;  %15171 = vst [vmem:[#allocation17_spill] sm:$0xff] %v13263_v29  ;;  %v6894_v55 = vld [vmem:[#allocation2 + $0x80] sm:$0xff]  ;;  %v7271_v19 = vadd.f32 %v7206_v56, %v13208_v42  ;;  %v13290_v56 = vld [vmem:[#allocation2 + $0x38] sm:$0xff] }
 0x50a   : > { %15168 = vst [vmem:[#allocation32_spill] sm:$0xff] %v13252_v14  ;;  %v13254_v63 = vpop.f32.mrb[219].mxu0  ;;  %v13257_v41 = vadd.f32 %v13193_v24, %v4705_v48  ;;  %v4708_v39 = vadd.f32 %v9353_v49, %v12856_v54  ;;  %v7209_v24 = vadd.f32 %v7177_v28, %v7145_v36  ;;  %v6897_v48 = vld [vmem:[#allocation2 + $0xa8] sm:$0xff]  ;;  %v6925_v49 = vld [vmem:[#allocation2 + $0x79] sm:$0xff] }
 0x50b   : > { %v6926_v36 = vld [vmem:[#allocation2 + $0x81] sm:$0xff]  ;;  %v6994_v14 = vld [vmem:[#allocation2 + $0xb2] sm:$0xff] }
 0x50c   : > { %15169 = vst [vmem:[#allocation15_spill] sm:$0xff] %v13257_v41  ;;  %v13261_v21 = vadd.f32 %v13198_v18, %v4708_v39  ;;  %v9354_v12 = vpop.f32.mrb[200].mxu1  ;;  %v7270_v18 = vadd.f32 %v7205_v43, %v13204_v30  ;;  %v6957_v39 = vadd.f32 %v6925_v49, %v6893_v58  ;;  %v6958_v30 = vadd.f32 %v6926_v36, %v6894_v55  ;;  %v6898_v43 = vld [vmem:[#allocation2 + $0xb0] sm:$0xff]  ;;  %v6997_v9 = vld [vmem:[#allocation2 + $0xda] sm:$0xff] }
 0x50d   : > { %v9355_v16 = vpop.f32.mrb[201].mxu1 }
 0x50e   : > { %15170 = vst [vmem:[#allocation36_spill] sm:$0xff] %v13261_v21  ;;  %v5637_v4 = vpop.permute.xlu0 %5636  ;;  %v9356_v54 = vadd.f32 %v9355_v16, %v9354_v12  ;;  %v9357_v51 = vpop.f32.mrb[202].mxu1  ;;  %v13273_v16 = vpack.c.bf16 %v5141_v32, %v5140_v8  ;;  %v13292_v32 = vld [vmem:[#allocation2 + $0x31] sm:$0xff] }
 0x50f   : > { %v5858_v25 = vsel %vm442_vm2, %v13263_v29, %v5637_v4  ;;  %v13267_v45 = vpop.f32.mrb[220].mxu0  ;;  %v9358_v6 = vpop.f32.mrb[203].mxu1 }
 0x510   : > { %15172 = vst [vmem:[#allocation40_spill] sm:$0xff] %v13267_v45  ;;  %6479 = vmatprep.mubr.bf16.mxu0 %v5858_v25  ;;  %v13270_v57 = vpop.f32.mrb[221].mxu0  ;;  %v4713_v28 = vadd.f32 %v9356_v54, %v12873_v23  ;;  %v9359_v12 = vadd.f32 %v9358_v6, %v9357_v51  ;;  %v6961_v25 = vadd.f32 %v6929_v3, %v6897_v48  ;;  %v13294_v54 = vld [vmem:[#allocation2 + $0x39] sm:$0xff]  ;;  %v13297_v48 = vld [vmem:[#allocation2 + $0x82] sm:$0xff] }
 0x511   : > { %15173 = vst [vmem:[#allocation19_spill] sm:$0xff] %v13270_v57  ;;  %v13275_v4 = vpop.f32.mrb[222].mxu0  ;;  %v7274_v45 = vadd.f32 %v7209_v24, %v6893_v58  ;;  %15177 = vst [vmem:[#allocation26_spill] sm:$0xff] %v13294_v54  ;;  %v7334_v3 = vadd.f32 %v7270_v18, %v13206_v33  ;;  %v7275_v51 = vadd.f32 %v7210_v20, %v6894_v55  ;;  %v6993_v24 = vld [vmem:[#allocation2 + $0xaa] sm:$0xff]  ;;  %v6901_v58 = vld [vmem:[#allocation2 + $0xd8] sm:$0xff] }
 0x512   : > { %15174 = vst [vmem:[#allocation44_spill] sm:$0xff] %v13275_v4  ;;  %v5589_v21 = vpop.permute.xlu0 %5588  ;;  %v13280_v41 = vpop.f32.mrb[223].mxu0  ;;  %v13285_v23 = vadd.f32 %v13223_v52, %v4713_v28  ;;  %v4716_v8 = vadd.f32 %v9359_v12, %v12878_v47  ;;  %v13300_v52 = vadd.f32 %v13278_v61, %v6957_v39  ;;  %v5238_v6 = vld [vmem:[#allocation3 + $0x16a] sm:$0xff]  ;;  %v6962_v33 = vadd.f32 %v6930_v31, %v6898_v43  ;;  %v13315_v43 = vld [vmem:[#allocation2 + $0x32] sm:$0xff] }
 0x513   : > { %15175 = vst [vmem:[#allocation22_spill] sm:$0xff] %v13280_v41  ;;  %v5794_v42 = vsel %vm442_vm2, %v13273_v16, %v5589_v21  ;;  %v6883_v28 = vld [vmem:[#allocation2] sm:$0xff]  ;;  %v6952_v39 = vadd.f32 %v13294_v54, %v13290_v56  ;;  %15180 = vst [vmem:[#allocation56_spill] sm:$0xff] %v13315_v43  ;;  %v13320_v57 = vadd.f32 %v7334_v3, %v13221_v50  ;;  %v7009_v54 = vld [vmem:[#allocation2 + $0x16a] sm:$0xff] }
 0x514   : > { %15176 = vst [vmem:[#allocation48_spill] sm:$0xff] %v13285_v23  ;;  %6480 = vmatmul.mubr.bf16.gmra.mrb[24].mxu0 %v5794_v42  ;;  %v13303_v47 = vadd.f32 %v13232_v40, %v4716_v8  ;;  %v9360_v21 = vpop.f32.mrb[204].mxu1  ;;  %v6915_v12 = vld [vmem:[#allocation2 + $0x1] sm:$0xff]  ;;  %v13306_v23 = vadd.f32 %v13297_v48, %v6958_v30  ;;  %v6933_v4 = vld [vmem:[#allocation2 + $0xd9] sm:$0xff]  ;;  %v6951_v42 = vadd.f32 %v13292_v32, %v13282_v26 }
 0x515   : > { %v6902_v18 = vld [vmem:[#allocation2 + $0xe0] sm:$0xff]  ;;  %v9361_v55 = vpop.f32.mrb[205].mxu1  ;;  %v7335_v40 = vadd.f32 %v7271_v19, %v13210_v53  ;;  %v7338_v8 = vadd.f32 %v7274_v45, %v6925_v49  ;;  %v7339_v0 = vadd.f32 %v7275_v51, %v6926_v36  ;;  %v6884_v53 = vld [vmem:[#allocation2 + $0x8] sm:$0xff]  ;;  %v6947_v49 = vadd.f32 %v6915_v12, %v6883_v28 }
 0x516   : > { %15178 = vst [vmem:[#allocation52_spill] sm:$0xff] %v13303_v47  ;;  %v6934_v20 = vld [vmem:[#allocation2 + $0xe1] sm:$0xff]  ;;  %v13313_v47 = vadd.f32 %v6993_v24, %v6961_v25  ;;  %v9362_v44 = vadd.f32 %v9361_v55, %v9360_v21  ;;  %v9363_v41 = vpop.f32.mrb[206].mxu1  ;;  %v6916_v45 = vld [vmem:[#allocation2 + $0x9] sm:$0xff]  ;;  %v6965_v25 = vadd.f32 %v6933_v4, %v6901_v58  ;;  %v7015_v28 = vadd.f32 %v13315_v43, %v6951_v42  ;;  %v6909_v42 = vld [vmem:[#allocation2 + $0x138] sm:$0xff] }
 0x517   : > { %v5239_v30 = vld [vmem:[#allocation3 + $0x172] sm:$0xff]  ;;  %v9428_v5 = vpop.f32.mrb[224].mxu0  ;;  %v13317_v31 = vld [vmem:[#allocation2 + $0x3a] sm:$0xff]  ;;  %v9364_v17 = vpop.f32.mrb[207].mxu1  ;;  %v6966_v36 = vadd.f32 %v6934_v20, %v6902_v18  ;;  %v7048_v18 = vld [vmem:[#allocation2 + $0x50] sm:$0xff]  ;;  %v6948_v20 = vadd.f32 %v6916_v45, %v6884_v53 }
 0x518   : > { %15179 = vst [vmem:[#allocation30_spill] sm:$0xff] %v13313_v47  ;;  %15181 = vst [vmem:[#allocation34_spill] sm:$0xff] %v13317_v31  ;;  %v13322_v29 = vpack.c.bf16 %v5239_v30, %v5238_v6  ;;  %v9429_v19 = vpop.f32.mrb[225].mxu0  ;;  %v4721_v24 = vadd.f32 %v9362_v44, %v12897_v11  ;;  %v9365_v21 = vadd.f32 %v9364_v17, %v9363_v41  ;;  %v6979_v50 = vld [vmem:[#allocation2 + $0x2] sm:$0xff]  ;;  %v6906_v17 = vld [vmem:[#allocation2 + $0x110] sm:$0xff] }
 0x519   : > { %v13325_v13 = vadd.f32 %v9429_v19, %v9428_v5  ;;  %v6998_v3 = vld [vmem:[#allocation2 + $0xe2] sm:$0xff]  ;;  %v9431_v30 = vpop.f32.mrb[226].mxu0  ;;  %v7016_v4 = vadd.f32 %v13317_v31, %v6952_v39  ;;  %v7402_v11 = vadd.f32 %v7338_v8, %v13278_v61  ;;  %v7403_v19 = vadd.f32 %v7339_v0, %v13297_v48  ;;  %v6980_v61 = vld [vmem:[#allocation2 + $0xa] sm:$0xff]  ;;  %v7043_v45 = vld [vmem:[#allocation2 + $0x18] sm:$0xff] }
 0x51a   : > { %15182 = vst [vmem:[#allocation60_spill] sm:$0xff] %v13322_v29  ;;  %v5639_v55 = vpop.permute.xlu0 %5638  ;;  %v6905_v51 = vld [vmem:[#allocation2 + $0x108] sm:$0xff]  ;;  %v13333_v44 = vadd.f32 %v13217_v38, %v4721_v24  ;;  %v4724_v5 = vadd.f32 %v9365_v21, %v12907_v15  ;;  %v9432_v58 = vpop.f32.mrb[227].mxu0  ;;  %v7011_v8 = vadd.f32 %v6979_v50, %v6947_v49  ;;  %v13342_v38 = vadd.f32 %v7335_v40, %v13225_v10  ;;  %v6941_v21 = vld [vmem:[#allocation2 + $0x139] sm:$0xff]  ;;  %v5326_v49 = vld [vmem:[#allocation3 + $0x121] sm:$0xff] }
 0x51b   : > { %15183 = vst [vmem:[#allocation38_spill] sm:$0xff] %v13325_v13  ;;  %v5862_v6 = vsel %vm442_vm2, %v13322_v29, %v5639_v55  ;;  %v5496_v41 = vld [vmem:[#allocation3 + $0x32] sm:$0xff]  ;;  %v6938_v55 = vld [vmem:[#allocation2 + $0x111] sm:$0xff]  ;;  %v13337_v13 = vpack.c.bf16 %v5143_v60, %v5142_v46  ;;  %v13339_v39 = vadd.f32 %v9432_v58, %v9431_v30  ;;  %v13344_v15 = vadd.f32 %v6994_v14, %v6962_v33  ;;  %v5327_v58 = vld [vmem:[#allocation3 + $0x129] sm:$0xff] }
 0x51c   : > { %15184 = vst [vmem:[#allocation42_spill] sm:$0xff] %v13333_v44  ;;  %6487 = vmatprep.mubr.bf16.mxu0 %v5862_v6  ;;  %v7047_v12 = vld [vmem:[#allocation2 + $0x48] sm:$0xff]  ;;  %v13346_v24 = vadd.f32 %v6997_v9, %v6965_v25  ;;  %v13349_v53 = vadd.f32 %v13228_v35, %v4724_v5  ;;  %v6910_v60 = vld [vmem:[#allocation2 + $0x140] sm:$0xff]  ;;  %v9366_v14 = vpop.f32.mrb[208].mxu1  ;;  %v7080_v40 = vadd.f32 %v7048_v18, %v7016_v4  ;;  %v13353_v50 = vmul.f32 0.11111111, %v7402_v11  ;;  %v5679_v18 = vpop.permute.xlu1 %5678 }
 0x51d   : > { %15185 = vst [vmem:[#allocation46_spill] sm:$0xff] %v13339_v39  ;;  %15186 = vst [vmem:[#allocation50_spill] sm:$0xff] %v13344_v15  ;;  %v5497_v48 = vld [vmem:[#allocation3 + $0x3a] sm:$0xff]  ;;  %v6942_v46 = vld [vmem:[#allocation2 + $0x141] sm:$0xff]  ;;  %v7079_v9 = vadd.f32 %v7047_v12, %v7015_v28  ;;  %v13355_v35 = vadd.f32 %v6998_v3, %v6966_v36  ;;  %v13357_v5 = vadd.f32 %v6937_v22, %v6905_v51 }
 0x51e   : > { %15187 = vst [vmem:[#allocation54_spill] sm:$0xff] %v13346_v24  ;;  %15188 = vst [vmem:[#allocation58_spill] sm:$0xff] %v13349_v53  ;;  %v5591_v0 = vpop.permute.xlu0 %5590  ;;  %v6913_v6 = vld [vmem:[#allocation2 + $0x168] sm:$0xff]  ;;  %v5528_v33 = vpack.c.bf16 %v5497_v48, %v5496_v41  ;;  %v9367_v53 = vpop.f32.mrb[209].mxu1  ;;  %v7112_v44 = vld [vmem:[#allocation2 + $0x51] sm:$0xff]  ;;  %v7012_v34 = vadd.f32 %v6980_v61, %v6948_v20  ;;  %v13365_v41 = vadd.f32 %v6938_v55, %v6906_v17 }
 0x51f   : > { %v6945_v30 = vld [vmem:[#allocation2 + $0x169] sm:$0xff]  ;;  %v5798_v10 = vsel %vm442_vm2, %v13337_v13, %v5591_v0  ;;  %15189 = vst [vmem:[#allocation61_spill] sm:$0xff] %v13355_v35  ;;  %v13359_v39 = vld [vmem:[#allocation2 + $0x60] sm:$0xff]  ;;  %v13363_v0 = vmul.f32 0.11111111, %v7403_v19  ;;  %v9368_v28 = vadd.f32 %v9367_v53, %v9366_v14  ;;  %v9369_v4 = vpop.f32.mrb[210].mxu1  ;;  %v7075_v51 = vadd.f32 %v7043_v45, %v7011_v8 }
 0x520   : > { %v7111_v25 = vld [vmem:[#allocation2 + $0x49] sm:$0xff]  ;;  %6488 = vmatmul.mubr.bf16.gmra.mrb[28].mxu0 %v5798_v10  ;;  %v13368_v36 = vld [vmem:[#allocation2 + $0x61] sm:$0xff]  ;;  %v13372_v11 = vadd.f32 %v6941_v21, %v6909_v42  ;;  %v5347_v48 = vpack.c.bf16 %v5327_v58, %v5326_v49  ;;  %v9370_v20 = vpop.f32.mrb[211].mxu1  ;;  %v7107_v19 = vld [vmem:[#allocation2 + $0x19] sm:$0xff]  ;;  %v7144_v35 = vadd.f32 %v7112_v44, %v7080_v40  ;;  %v6974_v58 = vadd.f32 %v6942_v46, %v6910_v60 }
 0x521   : > { %v13361_v29 = vld [vmem:[#allocation2 + $0x68] sm:$0xff]  ;;  %9766 = vmatprep.mubr.msk.bf16.mxu0 %vm442_vm2, %v5528_v33  ;;  %v7044_v3 = vld [vmem:[#allocation2 + $0x20] sm:$0xff]  ;;  %v6914_v12 = vld [vmem:[#allocation2 + $0x170] sm:$0xff]  ;;  %v6955_v17 = vadd.f32 %v13368_v36, %v13359_v39  ;;  %v4729_v14 = vadd.f32 %v9368_v28, %v12942_v1  ;;  %v9371_v33 = vadd.f32 %v9370_v20, %v9369_v4  ;;  %v7143_v45 = vadd.f32 %v7111_v25, %v7079_v9 }
 0x522   : > { %v13370_v22 = vld [vmem:[#allocation2 + $0x69] sm:$0xff]  ;;  %v7002_v53 = vld [vmem:[#allocation2 + $0x112] sm:$0xff]  ;;  %v5727_v8 = vpop.permute.xlu0 %5726  ;;  %v5498_v42 = vld [vmem:[#allocation3 + $0x4a] sm:$0xff]  ;;  %v6977_v24 = vadd.f32 %v6945_v30, %v6913_v6  ;;  %v7076_v2 = vadd.f32 %v7044_v3, %v7012_v34  ;;  %v5910_v1 = vsel %vm442_vm2, %v5347_v48, %v5679_v18 }
 0x523   : > { %v6956_v55 = vadd.f32 %v13370_v22, %v13361_v29  ;;  %v7001_v61 = vld [vmem:[#allocation2 + $0x10a] sm:$0xff]  ;;  %v5499_v21 = vld [vmem:[#allocation3 + $0x52] sm:$0xff]  ;;  %v7005_v49 = vld [vmem:[#allocation2 + $0x13a] sm:$0xff]  ;;  %v5974_v7 = vsel %vm442_vm2, %v13243_v59, %v5727_v8  ;;  %v13383_v28 = vadd.f32 %v13249_v27, %v4729_v14  ;;  %v4732_v9 = vadd.f32 %v9371_v33, %v12950_v62 }
 0x524   : > { %v6946_v10 = vld [vmem:[#allocation2 + $0x171] sm:$0xff]  ;;  %v7006_v47 = vld [vmem:[#allocation2 + $0x142] sm:$0xff]  ;;  %6616 = vmatprep.mubr.bf16.mxu1 %v5974_v7  ;;  %v7139_v59 = vadd.f32 %v7107_v19, %v7075_v51  ;;  %v5529_v34 = vpack.c.bf16 %v5499_v21, %v5498_v42  ;;  %v5501_v40 = vld [vmem:[#allocation3 + $0x6a] sm:$0xff]  ;;  %v13402_v14 = vadd.f32 %v7001_v61, %v13357_v5  ;;  %v13422_v5 = vadd.f32 %v7005_v49, %v13372_v11  ;;  %v5681_v42 = vpop.permute.xlu1 %5680 }
 0x525   : > { %v5500_v31 = vld [vmem:[#allocation3 + $0x62] sm:$0xff]  ;;  %v7175_v15 = vld [vmem:[#allocation2 + $0x4a] sm:$0xff]  ;;  %15190 = vst [vmem:[#allocation62_spill] sm:$0xff] %v13383_v28  ;;  %v13386_v44 = vld [vmem:[#allocation2 + $0x62] sm:$0xff]  ;;  %v6978_v6 = vadd.f32 %v6946_v10, %v6914_v12  ;;  %6617 = vmatmul.mubr.bf16.gmra.mrb[12].mxu1 %v5910_v1  ;;  %v13393_v3 = vadd.f32 %v13254_v63, %v4732_v9 }
 0x526   : > { %v7176_v43 = vld [vmem:[#allocation2 + $0x52] sm:$0xff]  ;;  %v13388_v60 = vld [vmem:[#allocation2 + $0x6a] sm:$0xff]  ;;  %v7108_v46 = vld [vmem:[#allocation2 + $0x21] sm:$0xff]  ;;  %v7019_v4 = vadd.f32 %v13386_v44, %v6955_v17  ;;  %v5729_v7 = vpop.permute.xlu0 %5728  ;;  %v5530_v62 = vpack.c.bf16 %v5501_v40, %v5500_v31  ;;  %v7207_v12 = vadd.f32 %v7175_v15, %v7143_v45  ;;  %v13405_v17 = vadd.f32 %v7002_v53, %v13365_v41 }
 0x527   : > { %v7010_v30 = vld [vmem:[#allocation2 + $0x172] sm:$0xff]  ;;  %v7171_v25 = vld [vmem:[#allocation2 + $0x1a] sm:$0xff]  ;;  %v7020_v27 = vadd.f32 %v13388_v60, %v6956_v55  ;;  %15191 = vst [vmem:[#allocation63_spill] sm:$0xff] %v13393_v3  ;;  %v13395_v18 = vld [vmem:[#allocation3 + $0x7a] sm:$0xff]  ;;  %v7208_v20 = vadd.f32 %v7176_v43, %v7144_v35  ;;  %v5978_v63 = vsel %vm442_vm2, %v13273_v16, %v5729_v7  ;;  %v7140_v43 = vadd.f32 %v7108_v46, %v7076_v2 }
 0x528   : > { %v13397_v48 = vld [vmem:[#allocation3 + $0x82] sm:$0xff]  ;;  %v13399_v51 = vld [vmem:[#allocation3 + $0x92] sm:$0xff]  ;;  %9767 = vmatmul.mubr.msk.bf16.vlgmr.msra.gmra.mrb[32].mxu0 %vm442_vm2, %v5529_v34  ;;  %v13410_v31 = vld [vmem:[#allocation3 + $0x9a] sm:$0xff]  ;;  %v13417_v15 = vmul.f32 0.11111111, %v13320_v57  ;;  %6624 = vmatprep.mubr.bf16.mxu1 %v5978_v63  ;;  %v7203_v53 = vadd.f32 %v7171_v25, %v7139_v59  ;;  %v13429_v2 = vadd.f32 %v7006_v47, %v6974_v58  ;;  %v13431_v57 = vadd.f32 %v7009_v54, %v6977_v24 }
 0x529   : > { %v7051_v19 = vld [vmem:[#allocation2 + $0x78] sm:$0xff]  ;;  %v7052_v10 = vld [vmem:[#allocation2 + $0x80] sm:$0xff]  ;;  %9770 = vmatprep.mubr.msk.bf16.mxu0 %vm442_vm2, %v5530_v62  ;;  %v7053_v8 = vld [vmem:[#allocation2 + $0x90] sm:$0xff]  ;;  %v13440_v59 = vadd.f32 %v7010_v30, %v6978_v6  ;;  %v7272_v34 = vadd.f32 %v13359_v39, %v7207_v12  ;;  %v7273_v40 = vadd.f32 %v13361_v29, %v7208_v20  ;;  %v5531_v30 = vpack.c.bf16 %v13397_v48, %v13395_v18 }
 0x52a   : > { %v13412_v55 = vld [vmem:[#allocation3 + $0xaa] sm:$0xff]  ;;  %v13414_v33 = vld [vmem:[#allocation3 + $0xb2] sm:$0xff]  ;;  %15192 = vst [vmem:[#allocation64_spill] sm:$0xff] %v13417_v15  ;;  %v13425_v16 = vld [vmem:[#allocation3 + $0xc2] sm:$0xff]  ;;  %v7083_v21 = vadd.f32 %v7051_v19, %v7019_v4  ;;  %v7084_v45 = vadd.f32 %v7052_v10, %v7020_v27  ;;  %v5731_v47 = vpop.permute.xlu0 %5730  ;;  %v5532_v7 = vpack.c.bf16 %v13410_v31, %v13399_v51  ;;  %v5914_v20 = vsel %vm442_vm2, %v12854_v37, %v5681_v42 }
 0x52b   : > { %v13427_v41 = vld [vmem:[#allocation3 + $0xca] sm:$0xff]  ;;  %v7172_v61 = vld [vmem:[#allocation2 + $0x22] sm:$0xff]  ;;  %15193 = vst [vmem:[#allocation65_spill] sm:$0xff] %v13431_v57  ;;  %v13436_v1 = vld [vmem:[#allocation2 + $0x90] sm:$0xff]  ;;  %v7268_v63 = vadd.f32 %v7203_v53, %v13282_v26  ;;  %v5982_v37 = vsel %vm442_vm2, %v13337_v13, %v5731_v47  ;;  %v7336_v26 = vadd.f32 %v13368_v36, %v7272_v34  ;;  %v7337_v53 = vadd.f32 %v13370_v22, %v7273_v40 }
 0x52c   : > { %v10022_v11 = vld [vmem:[%s14904_s9] sm:$0xff]   ;;  %v13438_v9 = vld [vmem:[#allocation2 + $0x91] sm:$0xff]  ;;  %15194 = vst [vmem:[#allocation66_spill] sm:$0xff] %v13440_v59  ;;  %v10023_v24 = vld [vmem:[%s14904_s9 + $0x8] sm:$0xff]   ;;  %v7204_v29 = vadd.f32 %v7172_v61, %v7140_v43  ;;  %v13485_v61 = vmul.f32 0.11111111, %v13342_v38  ;;  %v7085_v13 = vadd.f32 %v7053_v8, %v13300_v52 }
 0x52d   : > { %9799 = vmatpush3.bf16.msra.mxu0 %v10022_v11  ;;  %v7115_v49 = vld [vmem:[#allocation2 + $0x79] sm:$0xff]  ;;  %v13442_v58 = vld [vmem:[#allocation3 + $0xda] sm:$0xff]  ;;  %v7116_v25 = vld [vmem:[#allocation2 + $0x81] sm:$0xff]  ;;  %v6959_v6 = vadd.f32 %v13438_v9, %v13436_v1  ;;  %6625 = vmatmul.mubr.bf16.gmra.mrb[16].mxu1 %v5914_v20 }
 0x52e   : > { %v7054_v46 = vld [vmem:[#allocation2 + $0x98] sm:$0xff]  ;;  %9800 = vmatprep.subr.bf16.mxu0 %v10023_v24  ;;  %v13461_v62 = vld [vmem:[#allocation3 + $0x180] sm:$0xff]  ;;  %v13475_v48 = vld [vmem:[#allocation3 + $0x198] sm:$0xff]  ;;  %15196 = vst [vmem:[#allocation68_spill] sm:$0xff] %v13485_v61  ;;  %v7147_v42 = vadd.f32 %v7115_v49, %v7083_v21  ;;  %v7148_v11 = vadd.f32 %v7116_v25, %v7084_v45  ;;  %6632 = vmatprep.mubr.bf16.mxu1 %v5982_v37 }
 0x52f   : > { %v13444_v54 = vld [vmem:[#allocation3 + $0xe2] sm:$0xff]  ;;  %v13482_v43 = vld [vmem:[#allocation2 + $0xc1] sm:$0xff]  ;;  %v13493_v10 = vld [vmem:[#allocation2 + $0xc9] sm:$0xff]  ;;  %v7269_v47 = vadd.f32 %v7204_v29, %v13290_v56  ;;  %v7086_v36 = vadd.f32 %v7054_v46, %v13306_v23  ;;  %v5683_v56 = vpop.permute.xlu1 %5682  ;;  %v7332_v46 = vadd.f32 %v7268_v63, %v13292_v32  ;;  %v7401_v37 = vadd.f32 %v13388_v60, %v7337_v53 }
 0x530   : > { %v13451_v4 = vld [vmem:[#allocation2 + $0x98] sm:$0xff]  ;;  %v13477_v51 = vld [vmem:[#allocation3 + $0x1a0] sm:$0xff]  ;;  %v13489_v35 = vld [vmem:[#allocation2 + $0xc0] sm:$0xff]  ;;  %9771 = vmatmul.mubr.msk.bf16.gmra.mrb[36].mxu0 %vm442_vm2, %v5531_v30  ;;  %v7149_v8 = vadd.f32 %v13438_v9, %v7085_v13 }
 0x531   : > { %v13453_v27 = vld [vmem:[#allocation2 + $0x99] sm:$0xff]  ;;  %9801 = vmatpush3.bf16.msra.mxu0 %v10023_v24  ;;  %v13491_v18 = vld [vmem:[#allocation2 + $0xc8] sm:$0xff]  ;;  %9774 = vmatprep.mubr.msk.bf16.mxu0 %vm442_vm2, %v5532_v7  ;;  %v6963_v34 = vadd.f32 %v13482_v43, %v13489_v35  ;;  %v13528_v45 = vld [vmem:[#allocation2 + $0xb0] sm:$0xff] }
 0x532   : > { %v13463_v19 = vld [vmem:[#allocation3 + $0x188] sm:$0xff]  ;;  %v6960_v12 = vadd.f32 %v13453_v27, %v13451_v4  ;;  %v7180_v3 = vld [vmem:[#allocation2 + $0x82] sm:$0xff]  ;;  %v6964_v40 = vadd.f32 %v13493_v10, %v13491_v18  ;;  %v9434_v29 = vpop.f32.mrb[228].mxu0  ;;  %v13538_v53 = vld [vmem:[#allocation3 + $0x19a] sm:$0xff] }
 0x533   : > { %v13465_v39 = vld [vmem:[#allocation3 + $0x182] sm:$0xff]  ;;  %v7179_v38 = vld [vmem:[#allocation2 + $0x7a] sm:$0xff]  ;;  %v5446_v52 = vpack.c.bf16 %v13463_v19, %v13461_v62  ;;  %v7246_v30 = vld [vmem:[#allocation2 + $0xa8] sm:$0xff]  ;;  %v5733_v19 = vpop.permute.xlu0 %5732  ;;  %v9435_v32 = vpop.f32.mrb[229].mxu0 }
 0x534   : > { %15195 = vst [vmem:[#allocation67_spill] sm:$0xff] %v13465_v39  ;;  %v13480_v31 = vld [vmem:[#allocation2 + $0x92] sm:$0xff]  ;;  %v13497_v20 = vld [vmem:[#allocation2 + $0x9a] sm:$0xff]  ;;  %v7211_v25 = vadd.f32 %v7179_v38, %v7147_v42  ;;  %v13521_v7 = vld [vmem:[#allocation2 + $0xc2] sm:$0xff]  ;;  %v7150_v42 = vadd.f32 %v13453_v27, %v7086_v36  ;;  %v9437_v60 = vpop.f32.mrb[230].mxu0 }
 0x535   : > { %v7023_v21 = vadd.f32 %v13480_v31, %v6959_v6  ;;  %v13504_v49 = vld [vmem:[#allocation3 + $0x18a] sm:$0xff]  ;;  %v7024_v22 = vadd.f32 %v13497_v20, %v6960_v12  ;;  %v7212_v6 = vadd.f32 %v7180_v3, %v7148_v11  ;;  %v13523_v62 = vld [vmem:[#allocation2 + $0xca] sm:$0xff]  ;;  %v7400_v12 = vadd.f32 %v13386_v44, %v7336_v26  ;;  %v13540_v13 = vld [vmem:[#allocation3 + $0x1a2] sm:$0xff]  ;;  %v9438_v36 = vpop.f32.mrb[231].mxu0 }
 0x536   : > { %v7057_v24 = vld [vmem:[#allocation2 + $0xc0] sm:$0xff]  ;;  %v7058_v28 = vld [vmem:[#allocation2 + $0xc8] sm:$0xff]  ;;  %v13536_v26 = vadd.f32 %v9435_v32, %v9434_v29  ;;  %v13548_v29 = vld [vmem:[#allocation2 + $0xd8] sm:$0xff] }
 0x537   : > { %v7087_v23 = vadd.f32 %v7246_v30, %v7023_v21  ;;  %v15197_v63 = vld [vmem:[#allocation26_spill] sm:$0xff]  ;;  %v7088_v11 = vadd.f32 %v13528_v45, %v7024_v22  ;;  %v15199_v15 = vld [vmem:[#allocation23_spill] sm:$0xff]  ;;  %v7027_v21 = vadd.f32 %v13521_v7, %v6963_v34  ;;  %v5986_v22 = vsel %vm442_vm2, %v5446_v52, %v5733_v19  ;;  %v13556_v19 = vld [vmem:[#allocation2 + $0xf0] sm:$0xff] }
 0x538   : > { %v7333_v3 = vadd.f32 %v7269_v47, %v15197_v63  ;;  %v15198_v38 = vld [vmem:[#allocation30_spill] sm:$0xff]  ;;  %v5918_v44 = vsel %vm442_vm2, %v15199_v15, %v5683_v56  ;;  %15200 = vst [vmem:[#allocation26_spill] sm:$0xff] %v13536_v26  ;;  %15202 = vst [vmem:[#allocation23_spill] sm:$0xff] %v13540_v13  ;;  %v7028_v47 = vadd.f32 %v13523_v62, %v6964_v40  ;;  %v15203_v63 = vld [vmem:[#allocation56_spill] sm:$0xff] }
 0x539   : > { %v7089_v61 = vadd.f32 %v7057_v24, %v15198_v38  ;;  %15201 = vst [vmem:[#allocation30_spill] sm:$0xff] %v13538_v53  ;;  %6633 = vmatmul.mubr.bf16.gmra.mrb[20].mxu1 %v5918_v44  ;;  %v7396_v24 = vadd.f32 %v7332_v46, %v15203_v63  ;;  %v7276_v38 = vadd.f32 %v13436_v1, %v7211_v25  ;;  %v7310_v56 = vld [vmem:[#allocation2 + $0xa9] sm:$0xff]  ;;  %v13550_v32 = vld [vmem:[#allocation2 + $0xe0] sm:$0xff]  ;;  %v7311_v40 = vld [vmem:[#allocation2 + $0xb1] sm:$0xff]  ;;  %v5735_v63 = vpop.permute.xlu0 %5734 }
 0x53a   : > { %v7277_v15 = vadd.f32 %v13451_v4, %v7212_v6  ;;  %v13552_v26 = vadd.f32 %v9438_v36, %v9437_v60  ;;  %6640 = vmatprep.mubr.bf16.mxu1 %v5986_v22  ;;  %v7213_v34 = vadd.f32 %v13480_v31, %v7149_v8  ;;  %v7151_v44 = vadd.f32 %v7310_v56, %v7087_v23  ;;  %v15205_v59 = vld [vmem:[#allocation50_spill] sm:$0xff]  ;;  %v13558_v46 = vld [vmem:[#allocation2 + $0xf1] sm:$0xff] }
 0x53b   : > { %v7090_v52 = vadd.f32 %v7058_v28, %v15205_v59  ;;  %v15206_v1 = vpack.c.bf16 %v13414_v33, %v13412_v55  ;;  %v13564_v4 = vmul.f32 0.11111111, %v7400_v12  ;;  %v7214_v25 = vadd.f32 %v13497_v20, %v7150_v42  ;;  %v13576_v55 = vld [vmem:[#allocation2 + $0xaa] sm:$0xff]  ;;  %v5685_v42 = vpop.permute.xlu1 %5684  ;;  %v13585_v36 = vld [vmem:[#allocation2 + $0xd9] sm:$0xff]  ;;  %v13587_v22 = vld [vmem:[#allocation2 + $0xe1] sm:$0xff] }
 0x53c   : > { %15204 = vst [vmem:[#allocation56_spill] sm:$0xff] %v13552_v26  ;;  %v7152_v6 = vadd.f32 %v7311_v40, %v7088_v11  ;;  %v7153_v8 = vadd.f32 %v13482_v43, %v7089_v61  ;;  %v15207_v23 = vpack.c.bf16 %v13427_v41, %v13425_v16  ;;  %v13574_v59 = vmul.f32 0.11111111, %v7401_v37  ;;  %v15208_v11 = vld [vmem:[#allocation34_spill] sm:$0xff]  ;;  %v13583_v41 = vld [vmem:[#allocation2 + $0xb2] sm:$0xff] }
 0x53d   : > { %9775 = vmatmul.mubr.msk.bf16.gmra.mrb[40].mxu0 %vm442_vm2, %v15206_v1  ;;  %v7091_v33 = vadd.f32 %v13548_v29, %v7027_v21  ;;  %v7092_v12 = vadd.f32 %v13550_v32, %v7028_v47  ;;  %v7397_v60 = vadd.f32 %v7333_v3, %v15208_v11  ;;  %v7340_v61 = vadd.f32 %v13438_v9, %v7276_v38  ;;  %v9440_v21 = vpop.f32.mrb[232].mxu0  ;;  %v7253_v38 = vld [vmem:[#allocation2 + $0xf8] sm:$0xff] }
 0x53e   : > { %9778 = vmatprep.mubr.msk.bf16.mxu0 %vm442_vm2, %v15207_v23  ;;  %v7341_v16 = vadd.f32 %v13453_v27, %v7277_v15  ;;  %v6967_v37 = vadd.f32 %v13558_v46, %v13556_v19  ;;  %v13591_v1 = vmul.f32 0.11111111, %v7396_v24  ;;  %v7278_v47 = vadd.f32 %v7246_v30, %v7213_v34  ;;  %v13595_v27 = vld [vmem:[#allocation2 + $0xf9] sm:$0xff]  ;;  %v9441_v23 = vpop.f32.mrb[233].mxu0  ;;  %v7061_v34 = vld [vmem:[#allocation2 + $0xf0] sm:$0xff] }
 0x53f   : > { %v7215_v3 = vadd.f32 %v13576_v55, %v7151_v44  ;;  %v7154_v9 = vadd.f32 %v13493_v10, %v7090_v52  ;;  %v13597_v15 = vld [vmem:[#allocation2 + $0xf2] sm:$0xff]  ;;  %v15209_v11 = vpack.c.bf16 %v13477_v51, %v13475_v48  ;;  %v7279_v26 = vadd.f32 %v13528_v45, %v7214_v25  ;;  %v9443_v13 = vpop.f32.mrb[234].mxu0 }
 0x540   : > { %v7216_v24 = vadd.f32 %v13583_v41, %v7152_v6  ;;  %v7217_v30 = vadd.f32 %v13521_v7, %v7153_v8  ;;  %v15210_v44 = vld [vmem:[#allocation21_spill] sm:$0xff]  ;;  %v13608_v53 = vadd.f32 %v9441_v23, %v9440_v21  ;;  %v7155_v57 = vadd.f32 %v13585_v36, %v7091_v33  ;;  %v9444_v51 = vpop.f32.mrb[235].mxu0  ;;  %v13616_v8 = vld [vmem:[#allocation2 + $0xe2] sm:$0xff] }
 0x541   : > { %v5990_v28 = vsel %vm442_vm2, %v15209_v11, %v5735_v63  ;;  %v5922_v52 = vsel %vm442_vm2, %v15210_v44, %v5685_v42  ;;  %v7156_v39 = vadd.f32 %v13587_v22, %v7092_v12  ;;  %v7062_v48 = vld [vmem:[#allocation2 + $0xf8] sm:$0xff]  ;;  %v7404_v45 = vadd.f32 %v13480_v31, %v7340_v61  ;;  %v13626_v31 = vld [vmem:[#allocation2 + $0x108] sm:$0xff] }
 0x542   : > { %6641 = vmatmul.mubr.bf16.gmra.mrb[24].mxu1 %v5922_v52  ;;  %v7405_v25 = vadd.f32 %v13497_v20, %v7341_v16  ;;  %v13614_v6 = vld [vmem:[#allocation2 + $0xda] sm:$0xff]  ;;  %v6968_v42 = vadd.f32 %v13595_v27, %v7253_v38  ;;  %v7031_v63 = vadd.f32 %v13597_v15, %v6967_v37  ;;  %v13620_v21 = vadd.f32 %v9444_v51, %v9443_v13  ;;  %v13661_v44 = vld [vmem:[#allocation2 + $0x128] sm:$0xff] }
 0x543   : > { %6648 = vmatprep.mubr.bf16.mxu1 %v5990_v28  ;;  %v7342_v33 = vadd.f32 %v7310_v56, %v7278_v47  ;;  %v7280_v12 = vadd.f32 %v13489_v35, %v7215_v3  ;;  %v7218_v23 = vadd.f32 %v13523_v62, %v7154_v9  ;;  %v13624_v11 = vld [vmem:[#allocation2 + $0xfa] sm:$0xff]  ;;  %v15211_v20 = vpack.c.bf16 %v13444_v54, %v13442_v58  ;;  %v5687_v54 = vpop.permute.xlu1 %5686  ;;  %v13663_v52 = vld [vmem:[#allocation2 + $0x129] sm:$0xff] }
 0x544   : > { %v7343_v61 = vadd.f32 %v7311_v40, %v7279_v26  ;;  %v7281_v16 = vadd.f32 %v13491_v18, %v7216_v24  ;;  %v7282_v13 = vadd.f32 %v13548_v29, %v7217_v30  ;;  %v15212_v28 = vld [vmem:[#allocation54_spill] sm:$0xff]  ;;  %v15213_v37 = vld [vmem:[#allocation45_spill] sm:$0xff]  ;;  %v13637_v35 = vmul.f32 0.11111111, %v7397_v60  ;;  %v13646_v29 = vld [vmem:[#allocation2 + $0x110] sm:$0xff] }
 0x545   : > { %9779 = vmatmul.mubr.msk.bf16.gmra.mrb[44].mxu0 %vm442_vm2, %v15211_v20  ;;  %v7093_v56 = vadd.f32 %v7061_v34, %v15212_v28  ;;  %v7219_v47 = vadd.f32 %v13614_v6, %v7155_v57  ;;  %v7220_v3 = vadd.f32 %v13616_v8, %v7156_v39  ;;  %v15214_v9 = vld [vmem:[#allocation61_spill] sm:$0xff]  ;;  %v7462_v26 = vpack.c.bf16 %v13574_v59, %v13564_v4  ;;  %v13648_v40 = vld [vmem:[#allocation2 + $0x109] sm:$0xff]  ;;  %v13652_v30 = vld [vmem:[#allocation2 + $0x121] sm:$0xff] }
 0x546   : > { %9782 = vmatprep.mubr.msk.bf16.mxu0 %vm442_vm2, %v15213_v37  ;;  %v7094_v58 = vadd.f32 %v7062_v48, %v15214_v9  ;;  %v13644_v18 = vmul.f32 0.11111111, %v7404_v45  ;;  %v7032_v24 = vadd.f32 %v13624_v11, %v6968_v42  ;;  %v7095_v60 = vadd.f32 %v13626_v31, %v7031_v63  ;;  %v13659_v59 = vld [vmem:[#allocation2 + $0x120] sm:$0xff]  ;;  %v15215_v42 = vld [vmem:[#allocation31_spill] sm:$0xff] }
 0x547   : > { %v13654_v57 = vmul.f32 0.11111111, %v7405_v25  ;;  %v7406_v39 = vadd.f32 %v13576_v55, %v7342_v33  ;;  %v7344_v34 = vadd.f32 %v13482_v43, %v7280_v12  ;;  %v7283_v4 = vadd.f32 %v13550_v32, %v7218_v23  ;;  %v13673_v33 = vld [vmem:[#allocation2 + $0x111] sm:$0xff]  ;;  %v9446_v23 = vpop.f32.mrb[236].mxu0  ;;  %v15216_v37 = vld [vmem:[#allocation59_spill] sm:$0xff] }
 0x548   : > { %v7407_v48 = vadd.f32 %v13583_v41, %v7343_v61  ;;  %v7345_v51 = vadd.f32 %v13493_v10, %v7281_v16  ;;  %v7346_v45 = vadd.f32 %v13585_v36, %v7282_v13  ;;  %v7157_v25 = vadd.f32 %v13558_v46, %v7093_v56  ;;  %v13688_v16 = vld [vmem:[#allocation2 + $0x10a] sm:$0xff]  ;;  %v13690_v13 = vld [vmem:[#allocation2 + $0x122] sm:$0xff]  ;;  %v9447_v56 = vpop.f32.mrb[237].mxu0 }
 0x549   : > { %v5926_v55 = vsel %vm442_vm2, %v15215_v42, %v5687_v54  ;;  %v7284_v43 = vadd.f32 %v13556_v19, %v7219_v47  ;;  %v7285_v32 = vadd.f32 %v7253_v38, %v7220_v3  ;;  %v7158_v63 = vadd.f32 %v13595_v27, %v7094_v58  ;;  %v13692_v28 = vld [vmem:[#allocation2 + $0x12a] sm:$0xff]  ;;  %v7065_v58 = vld [vmem:[#allocation2 + $0x120] sm:$0xff] }
 0x54a   : > { %6649 = vmatmul.mubr.bf16.gmra.mrb[28].mxu1 %v5926_v55  ;;  %v7096_v12 = vadd.f32 %v13646_v29, %v7032_v24  ;;  %v7159_v41 = vadd.f32 %v13648_v40, %v7095_v60  ;;  %v6971_v10 = vadd.f32 %v13652_v30, %v13659_v59  ;;  %v6972_v36 = vadd.f32 %v13663_v52, %v13661_v44  ;;  %v15217_v24 = vld [vmem:[#allocation14_spill] sm:$0xff]  ;;  %v13721_v55 = vld [vmem:[#allocation2 + $0x138] sm:$0xff] }
 0x54b   : > { %9806 = vmatprep.mubr.msk.bf16.mxu1 %vm386_vm0, %v7462_v26  ;;  %v7460_v19 = vpack.c.bf16 %v13637_v35, %v13591_v1  ;;  %v13684_v38 = vmul.f32 0.11111111, %v7406_v39  ;;  %v7408_v20 = vadd.f32 %v13521_v7, %v7344_v34  ;;  %v7347_v61 = vadd.f32 %v13587_v22, %v7283_v4  ;;  %v7066_v22 = vld [vmem:[#allocation2 + $0x128] sm:$0xff]  ;;  %v9449_v26 = vpop.f32.mrb[238].mxu0 }
 0x54c   : > { %v13696_v47 = vmul.f32 0.11111111, %v7407_v48  ;;  %v7409_v3 = vadd.f32 %v13523_v62, %v7345_v51  ;;  %v7410_v9 = vadd.f32 %v13614_v6, %v7346_v45  ;;  %v7221_v7 = vadd.f32 %v13597_v15, %v7157_v25  ;;  %v9450_v4 = vpop.f32.mrb[239].mxu0  ;;  %v13708_v62 = vld [vmem:[#allocation2 + $0x112] sm:$0xff] }
 0x54d   : > { %9783 = vmatmul.mubr.msk.bf16.gmra.mrb[48].mxu0 %vm442_vm2, %v15216_v37  ;;  %v13701_v54 = vadd.f32 %v9447_v56, %v9446_v23  ;;  %v7348_v60 = vadd.f32 %v13558_v46, %v7284_v43  ;;  %v7349_v39 = vadd.f32 %v13595_v27, %v7285_v32  ;;  %v7222_v34 = vadd.f32 %v13624_v11, %v7158_v63  ;;  %v13723_v43 = vld [vmem:[#allocation2 + $0x140] sm:$0xff]  ;;  %v13725_v32 = vld [vmem:[#allocation2 + $0x151] sm:$0xff] }
 0x54e   : > { %9786 = vmatprep.mubr.msk.bf16.mxu0 %vm442_vm2, %v15217_v24  ;;  %v7160_v6 = vadd.f32 %v13673_v33, %v7096_v12  ;;  %v7223_v48 = vadd.f32 %v13688_v16, %v7159_v41  ;;  %v7035_v51 = vadd.f32 %v13690_v13, %v6971_v10  ;;  %v7036_v45 = vadd.f32 %v13692_v28, %v6972_v36  ;;  %v13732_v36 = vld [vmem:[#allocation2 + $0x150] sm:$0xff]  ;;  %v13773_v24 = vld [vmem:[#allocation2 + $0x15a] sm:$0xff] }
 0x54f   : > { %v13714_v25 = vadd.f32 %v9450_v4, %v9449_v26  ;;  %v7464_v46 = vpack.c.bf16 %v13654_v57, %v13644_v18  ;;  %v13718_v42 = vmul.f32 0.11111111, %v7408_v20  ;;  %v7411_v27 = vadd.f32 %v13616_v8, %v7347_v61  ;;  %v13734_v18 = vld [vmem:[#allocation2 + $0x158] sm:$0xff] }
 0x550   : > { %v13727_v63 = vmul.f32 0.11111111, %v7409_v3  ;;  %v7286_v12 = vadd.f32 %v13626_v31, %v7221_v7  ;;  %v7097_v41 = vadd.f32 %v7065_v58, %v13402_v14  ;;  %v7098_v10 = vadd.f32 %v7066_v22, %v13405_v17  ;;  %v13736_v57 = vld [vmem:[#allocation2 + $0x159] sm:$0xff]  ;;  %v9372_v3 = vpop.f32.mrb[212].mxu1  ;;  %v15219_v7 = vld [vmem:[#allocation24_spill] sm:$0xff] }
 0x551   : > { %v13738_v8 = vmul.f32 0.11111111, %v7410_v9  ;;  %v7412_v23 = vadd.f32 %v13597_v15, %v7348_v60  ;;  %v7413_v20 = vadd.f32 %v13624_v11, %v7349_v39  ;;  %v7287_v61 = vadd.f32 %v13646_v29, %v7222_v34  ;;  %v13756_v29 = vld [vmem:[#allocation2 + $0x139] sm:$0xff]  ;;  %v9373_v9 = vpop.f32.mrb[213].mxu1  ;;  %v7069_v60 = vld [vmem:[#allocation2 + $0x150] sm:$0xff] }
 0x552   : > { %v15218_v31 = vpack.c.bf16 %v13363_v0, %v13353_v50  ;;  %v7224_v14 = vadd.f32 %v13708_v62, %v7160_v6  ;;  %v7288_v17 = vadd.f32 %v13659_v59, %v7223_v48  ;;  %v7099_v56 = vadd.f32 %v13721_v55, %v7035_v51  ;;  %v13758_v50 = vld [vmem:[#allocation2 + $0x141] sm:$0xff]  ;;  %v13771_v26 = vld [vmem:[#allocation2 + $0x152] sm:$0xff]  ;;  %v9375_v34 = vpop.f32.mrb[214].mxu1 }
 0x553   : > { %v7100_v37 = vadd.f32 %v13723_v43, %v7036_v45  ;;  %v7465_v15 = vpack.c.bf16 %v13696_v47, %v13684_v38  ;;  %v13754_v11 = vmul.f32 0.11111111, %v7411_v27  ;;  %v6975_v0 = vadd.f32 %v13725_v32, %v13732_v36  ;;  %v15220_v4 = vld [vmem:[#allocation17_spill] sm:$0xff]  ;;  %v9376_v45 = vpop.f32.mrb[215].mxu1 }
 0x554   : > { %9807 = vmatmul.mubr.msk.bf16.vlgmr.msra.gmra.mrb[32].mxu1 %vm386_vm0, %v15218_v31  ;;  %v6976_v59 = vadd.f32 %v13736_v57, %v13734_v18  ;;  %v7466_v58 = vpack.c.bf16 %v13727_v63, %v13718_v42  ;;  %v7350_v38 = vadd.f32 %v13648_v40, %v7286_v12  ;;  %v7161_v47 = vadd.f32 %v13652_v30, %v7097_v41  ;;  %v7070_v51 = vld [vmem:[#allocation2 + $0x158] sm:$0xff]  ;;  %v15221_v12 = vld [vmem:[#allocation27_spill] sm:$0xff] }
 0x555   : > { %9810 = vmatprep.mubr.msk.bf16.mxu1 %vm386_vm0, %v7464_v46  ;;  %9787 = vmatmul.mubr.msk.bf16.gmra.mrb[52].mxu0 %vm442_vm2, %v15219_v7  ;;  %v7162_v22 = vadd.f32 %v13663_v52, %v7098_v10  ;;  %v9374_v39 = vadd.f32 %v9373_v9, %v9372_v3  ;;  %v13777_v6 = vmul.f32 0.11111111, %v7412_v23  ;;  %v13779_v48 = vmul.f32 0.11111111, %v7413_v20  ;;  %v13787_v31 = vld [vmem:[#allocation2 + $0x13a] sm:$0xff]  ;;  %v13789_v23 = vld [vmem:[#allocation2 + $0x142] sm:$0xff] }
 0x556   : > { %9790 = vmatprep.mubr.msk.bf16.mxu0 %vm442_vm2, %v15220_v4  ;;  %v7351_v40 = vadd.f32 %v13673_v33, %v7287_v61  ;;  %v7289_v46 = vadd.f32 %v13661_v44, %v7224_v14  ;;  %v7352_v42 = vadd.f32 %v13652_v30, %v7288_v17  ;;  %v7163_v27 = vadd.f32 %v13756_v29, %v7099_v56  ;;  %v13797_v17 = vld [vmem:[#allocation2 + $0x168] sm:$0xff]  ;;  %v13799_v56 = vld [vmem:[#allocation2 + $0x170] sm:$0xff]  ;;  %v15223_v9 = vld [vmem:[#allocation25_spill] sm:$0xff] }
 0x557   : > { %v7164_v63 = vadd.f32 %v13758_v50, %v7100_v37  ;;  %v4737_v41 = vadd.f32 %v9374_v39, %v15221_v12  ;;  %v9377_v10 = vadd.f32 %v9376_v45, %v9375_v34  ;;  %v7039_v20 = vadd.f32 %v13771_v26, %v6975_v0  ;;  %v15222_v37 = vld [vmem:[#allocation13_spill] sm:$0xff]  ;;  %v9378_v39 = vpop.f32.mrb[216].mxu1  ;;  %v9452_v34 = vpop.f32.mrb[240].mxu0 }
 0x558   : > { %v7040_v33 = vadd.f32 %v13773_v24, %v6976_v59  ;;  %v7414_v61 = vadd.f32 %v13688_v16, %v7350_v38  ;;  %v7225_v44 = vadd.f32 %v13690_v13, %v7161_v47  ;;  %v7226_v30 = vadd.f32 %v13692_v28, %v7162_v22  ;;  %v15224_v22 = vld [vmem:[#allocation32_spill] sm:$0xff] }
 0x559   : > { %v7101_v14 = vadd.f32 %v7069_v60, %v13422_v5  ;;  %v13802_v3 = vadd.f32 %v15222_v37, %v4737_v41  ;;  %v4740_v7 = vadd.f32 %v9377_v10, %v15223_v9  ;;  %v7415_v0 = vadd.f32 %v13708_v62, %v7351_v40 }
 0x55a   : > { %v7102_v59 = vadd.f32 %v7070_v51, %v13429_v2  ;;  %v7467_v16 = vpack.c.bf16 %v13754_v11, %v13738_v8  ;;  %v7353_v5 = vadd.f32 %v13663_v52, %v7289_v46  ;;  %v7227_v38 = vadd.f32 %v13787_v31, %v7163_v27  ;;  %v9379_v8 = vpop.f32.mrb[217].mxu1  ;;  %v15225_v11 = vld [vmem:[#allocation60_spill] sm:$0xff]  ;;  %v9453_v46 = vpop.f32.mrb[241].mxu0  ;;  %v15226_v27 = vld [vmem:[#allocation67_spill] sm:$0xff] }
 0x55b   : > { %v7228_v47 = vadd.f32 %v13789_v23, %v7164_v63  ;;  %v13814_v60 = vadd.f32 %v15224_v22, %v4740_v7  ;;  %v7416_v62 = vadd.f32 %v13690_v13, %v7352_v42  ;;  %v7103_v2 = vadd.f32 %v13797_v17, %v7039_v20  ;;  %v13827_v51 = vld [vmem:[#allocation2 + $0x169] sm:$0xff]  ;;  %v13829_v13 = vld [vmem:[#allocation2 + $0x171] sm:$0xff]  ;;  %v9381_v42 = vpop.f32.mrb[218].mxu1  ;;  %v9455_v41 = vpop.f32.mrb[242].mxu0 }
 0x55c   : > { %9811 = vmatmul.mubr.msk.bf16.gmra.mrb[36].mxu1 %vm386_vm0, %v7465_v15  ;;  %v7104_v15 = vadd.f32 %v13799_v56, %v7040_v33  ;;  %v7468_v52 = vpack.c.bf16 %v13779_v48, %v13777_v6  ;;  %v7290_v4 = vadd.f32 %v13721_v55, %v7225_v44  ;;  %v7291_v40 = vadd.f32 %v13723_v43, %v7226_v30  ;;  %v7073_v43 = vld [vmem:[#allocation2 + $0x180] sm:$0xff]  ;;  %v7074_v44 = vld [vmem:[#allocation2 + $0x188] sm:$0xff] }
 0x55d   : > { %9814 = vmatprep.mubr.msk.bf16.mxu1 %vm386_vm0, %v7466_v58  ;;  %9791 = vmatmul.mubr.msk.bf16.gmra.mrb[56].mxu0 %vm442_vm2, %v15225_v11  ;;  %v7165_v58 = vadd.f32 %v13725_v32, %v7101_v14  ;;  %v9380_v45 = vadd.f32 %v9379_v8, %v9378_v39  ;;  %v15227_v63 = vpack.c.bf16 %v13504_v49, %v15226_v27  ;;  %v13835_v12 = vmul.f32 0.11111111, %v7414_v61  ;;  %v15228_v49 = vld [vmem:[#allocation29_spill] sm:$0xff]  ;;  %v9456_v14 = vpop.f32.mrb[243].mxu0  ;;  %v15231_v8 = vld [vmem:[#allocation66_spill] sm:$0xff] }
 0x55e   : > { %v13837_v6 = vmul.f32 0.11111111, %v7415_v0  ;;  %v7166_v55 = vadd.f32 %v13736_v57, %v7102_v59  ;;  %v13840_v48 = vadd.f32 %v9453_v46, %v9452_v34  ;;  %v7417_v10 = vadd.f32 %v13692_v28, %v7353_v5  ;;  %v9382_v0 = vpop.f32.mrb[219].mxu1  ;;  %v13857_v5 = vld [vmem:[#allocation2 + $0x172] sm:$0xff]  ;;  %v7328_v34 = vld [vmem:[#allocation2 + $0x181] sm:$0xff] }
 0x55f   : > { %9794 = vmatprep.mubr.msk.bf16.mxu0 %vm442_vm2, %v15227_v63  ;;  %v7292_v20 = vadd.f32 %v13732_v36, %v7227_v38  ;;  %v7293_v33 = vadd.f32 %v13734_v18, %v7228_v47  ;;  %v4745_v30 = vadd.f32 %v9380_v45, %v15228_v49  ;;  %v13846_v61 = vmul.f32 0.11111111, %v7416_v62  ;;  %v13855_v18 = vld [vmem:[#allocation2 + $0x16a] sm:$0xff]  ;;  %v15230_v62 = vld [vmem:[#allocation65_spill] sm:$0xff]  ;;  %v15238_v49 = vld [vmem:[#allocation22_spill] sm:$0xff] }
 0x560   : > { %v7167_v37 = vadd.f32 %v13827_v51, %v7103_v2  ;;  %v7168_v9 = vadd.f32 %v13829_v13, %v7104_v15  ;;  %v13850_v7 = vadd.f32 %v9456_v14, %v9455_v41  ;;  %v7354_v59 = vadd.f32 %v13756_v29, %v7290_v4  ;;  %v15229_v38 = vld [vmem:[#allocation19_spill] sm:$0xff]  ;;  %v15232_v4 = vld [vmem:[#allocation64_spill] sm:$0xff] }
 0x561   : > { %v7355_v28 = vadd.f32 %v13758_v50, %v7291_v40  ;;  %v7229_v36 = vadd.f32 %v13771_v26, %v7165_v58  ;;  %v13860_v47 = vadd.f32 %v15229_v38, %v4745_v30  ;;  %v9383_v22 = vadd.f32 %v9382_v0, %v9381_v42  ;;  %v15233_v40 = vld [vmem:[#allocation68_spill] sm:$0xff]  ;;  %v15234_v45 = vld [vmem:[#allocation35_spill] sm:$0xff]  ;;  %v9384_v42 = vpop.f32.mrb[220].mxu1 }
 0x562   : > { %v7230_v39 = vadd.f32 %v13773_v24, %v7166_v55  ;;  %v7105_v2 = vadd.f32 %v7073_v43, %v15230_v62  ;;  %v7449_v15 = vmul.f32 0.11111111, %v7417_v10  ;;  %v7356_v29 = vadd.f32 %v13725_v32, %v7292_v20  ;;  %v7329_v63 = vld [vmem:[#allocation2 + $0x189] sm:$0xff]  ;;  %v9385_v55 = vpop.f32.mrb[221].mxu1  ;;  %v15236_v43 = vld [vmem:[#allocation30_spill] sm:$0xff] }
 0x563   : > { %v7357_v50 = vadd.f32 %v13736_v57, %v7293_v33  ;;  %v7106_v11 = vadd.f32 %v7074_v44, %v15231_v8  ;;  %v7461_v58 = vpack.c.bf16 %v15233_v40, %v15232_v4  ;;  %v4748_v46 = vadd.f32 %v9383_v22, %v15234_v45  ;;  %v15235_v32 = vld [vmem:[#allocation23_spill] sm:$0xff]  ;;  %v7264_v33 = vld [vmem:[#allocation2 + $0x180] sm:$0xff] }
 0x564   : > { %9815 = vmatmul.mubr.msk.bf16.gmra.mrb[40].mxu1 %vm386_vm0, %v7467_v16  ;;  %v7231_v27 = vadd.f32 %v13855_v18, %v7167_v37  ;;  %v7232_v16 = vadd.f32 %v13857_v5, %v7168_v9  ;;  %v15237_v57 = vpack.c.bf16 %v15235_v32, %v15236_v43  ;;  %v7469_v41 = vpack.c.bf16 %v13837_v6, %v13835_v12  ;;  %v7265_v44 = vld [vmem:[#allocation2 + $0x188] sm:$0xff]  ;;  %v9387_v37 = vpop.f32.mrb[222].mxu1 }
 0x565   : > { %9818 = vmatprep.mubr.msk.bf16.mxu1 %vm386_vm0, %v7468_v52  ;;  %v7418_v10 = vadd.f32 %v13787_v31, %v7354_v59  ;;  %v7419_v20 = vadd.f32 %v13789_v23, %v7355_v28  ;;  %v7294_v52 = vadd.f32 %v13797_v17, %v7229_v36  ;;  %v13884_v30 = vadd.f32 %v15238_v49, %v4748_v46  ;;  %v9458_v31 = vpop.f32.mrb[244].mxu0  ;;  %v9388_v9 = vpop.f32.mrb[223].mxu1  ;;  %v7392_v59 = vld [vmem:[#allocation2 + $0x182] sm:$0xff]  ;;  %v15239_v36 = vld [vmem:[#allocation33_spill] sm:$0xff] }
 0x566   : > { %9795 = vmatmul.mubr.msk.bf16.gmra.mrb[60].mxu0 %vm442_vm2, %v15237_v57  ;;  %v9386_v14 = vadd.f32 %v9385_v55, %v9384_v42  ;;  %v7295_v12 = vadd.f32 %v13799_v56, %v7230_v39  ;;  %v7169_v6 = vadd.f32 %v7328_v34, %v7105_v2  ;;  %v7470_v23 = vpack.c.bf16 %v7449_v15, %v13846_v61  ;;  %v9459_v62 = vpop.f32.mrb[245].mxu0  ;;  %v9540_v32 = vpop.f32.mrb[224].mxu1 }
 0x567   : > { %9802 = vmatprep.mubr.msk.bf16.mxu0 %vm386_vm0, %v7460_v19  ;;  %v7420_v17 = vadd.f32 %v13771_v26, %v7356_v29  ;;  %v7421_v0 = vadd.f32 %v13773_v24, %v7357_v50  ;;  %v7170_v28 = vadd.f32 %v7329_v63, %v7106_v11  ;;  %v9389_v22 = vadd.f32 %v9388_v9, %v9387_v37  ;;  %v7393_v19 = vld [vmem:[#allocation2 + $0x18a] sm:$0xff]  ;;  %v9461_v56 = vpop.f32.mrb[246].mxu0  ;;  %v13901_v26 = vld [vmem:[%s14903_s8] ss:$0 sm:$0xff] }
 0x568   : > { %v4753_v38 = vadd.f32 %v9386_v14, %v15239_v36  ;;  %v7296_v1 = vadd.f32 %v7264_v33, %v7231_v27  ;;  %v7297_v35 = vadd.f32 %v7265_v44, %v7232_v16  ;;  %v13895_v8 = vadd.f32 %v9459_v62, %v9458_v31  ;;  %v15240_v24 = vld [vmem:[#allocation40_spill] sm:$0xff]  ;;  %v15241_v29 = vld [vmem:[#allocation39_spill] sm:$0xff]  ;;  %v9462_v11 = vpop.f32.mrb[247].mxu0  ;;  %v7266_v27 = vld [vmem:[#allocation2 + $0x198] sm:$0xff] }
 0x569   : > { %v7450_v39 = vmul.f32 0.11111111, %v7418_v10  ;;  %v7451_v2 = vmul.f32 0.11111111, %v7419_v20  ;;  %v7358_v61 = vadd.f32 %v13827_v51, %v7294_v52  ;;  %v4756_v50 = vadd.f32 %v9389_v22, %v15241_v29  ;;  %v15242_v16 = vld [vmem:[#allocation44_spill] sm:$0xff]  ;;  %v7267_v10 = vld [vmem:[#allocation2 + $0x1a0] sm:$0xff] }
 0x56a   : > { %v13904_v15 = vadd.f32 %v15240_v24, %v4753_v38  ;;  %v7359_v4 = vadd.f32 %v13829_v13, %v7295_v12  ;;  %v7233_v40 = vadd.f32 %v7392_v59, %v7169_v6  ;;  %v13908_v45 = vadd.f32 %v9462_v11, %v9461_v56  ;;  %v15243_v13 = vld [vmem:[#allocation38_spill] sm:$0xff]  ;;  %v9541_v52 = vpop.f32.mrb[225].mxu1 }
 0x56b   : > { %v7452_v46 = vmul.f32 0.11111111, %v7420_v17  ;;  %v7453_v51 = vmul.f32 0.11111111, %v7421_v0  ;;  %v7234_v42 = vadd.f32 %v7393_v19, %v7170_v28  ;;  %v13912_v55 = vadd.f32 %v15242_v16, %v4756_v50  ;;  %v9543_v33 = vpop.f32.mrb[226].mxu1  ;;  %v15244_v37 = vld [vmem:[#allocation46_spill] sm:$0xff] }
 0x56c   : > { %9819 = vmatmul.mubr.msk.bf16.gmra.mrb[44].mxu1 %vm386_vm0, %v7469_v41  ;;  %v7360_v43 = vadd.f32 %v7328_v34, %v7296_v1  ;;  %v7361_v57 = vadd.f32 %v7329_v63, %v7297_v35  ;;  %v6370_v20 = vadd.f32 %v15243_v13, %v13901_v26  ;;  %v9542_v41 = vadd.f32 %v9541_v52, %v9540_v32  ;;  %v9544_v6 = vpop.f32.mrb[227].mxu1  ;;  %v7330_v9 = vld [vmem:[#allocation2 + $0x199] sm:$0xff]  ;;  %v7331_v28 = vld [vmem:[#allocation2 + $0x1a1] sm:$0xff] }
 0x56d   : > { %9822 = vmatprep.mubr.msk.bf16.mxu1 %vm386_vm0, %v7470_v23  ;;  %v7422_v44 = vadd.f32 %v13855_v18, %v7358_v61  ;;  %v7423_v49 = vadd.f32 %v13857_v5, %v7359_v4  ;;  %v7298_v14 = vadd.f32 %v7266_v27, %v7233_v40  ;;  %v6373_v12 = vadd.f32 %v15244_v37, %v13901_v26  ;;  %v9464_v5 = vpop.f32.mrb[248].mxu0  ;;  %v7394_v1 = vld [vmem:[#allocation2 + $0x19a] sm:$0xff] }
 0x56e   : > { %9803 = vmatmul.mubr.msk.bf16.vlgmr.msra.gmra.mrb[64].mxu0 %vm386_vm0, %v7461_v58  ;;  %v7471_v34 = vpack.c.bf16 %v7451_v2, %v7450_v39  ;;  %v7472_v63 = vpack.c.bf16 %v7453_v51, %v7452_v46  ;;  %v7299_v31 = vadd.f32 %v7267_v10, %v7234_v42  ;;  %v9545_v23 = vadd.f32 %v9544_v6, %v9543_v33  ;;  %v9465_v35 = vpop.f32.mrb[249].mxu0  ;;  %v9546_v2 = vpop.f32.mrb[228].mxu1  ;;  %v15245_v4 = vld [vmem:[#allocation26_spill] sm:$0xff] }
 0x56f   : > { %v7424_v17 = vadd.f32 %v7392_v59, %v7360_v43  ;;  %v7425_v0 = vadd.f32 %v7393_v19, %v7361_v57  ;;  %v13922_v58 = vadd.f32 %v9542_v41, %v6370_v20  ;;  %v7454_v36 = vmul.f32 0.11111111, %v7422_v44  ;;  %v7395_v59 = vld [vmem:[#allocation2 + $0x1a2] sm:$0xff]  ;;  %v9467_v61 = vpop.f32.mrb[250].mxu0  ;;  %v9547_v24 = vpop.f32.mrb[229].mxu1  ;;  %v15246_v43 = vld [vmem:[#allocation56_spill] sm:$0xff] }
 0x570   : > { %v7455_v38 = vmul.f32 0.11111111, %v7423_v49  ;;  %v7362_v18 = vadd.f32 %v7330_v9, %v7298_v14  ;;  %v13924_v22 = vadd.f32 %v9545_v23, %v6373_v12  ;;  %v7363_v62 = vadd.f32 %v7331_v28, %v7299_v31  ;;  %v9468_v29 = vpop.f32.mrb[251].mxu0  ;;  %v9549_v42 = vpop.f32.mrb[230].mxu1 }
 0x571   : > { %v7456_v56 = vmul.f32 0.11111111, %v7424_v17  ;;  %v7457_v39 = vmul.f32 0.11111111, %v7425_v0  ;;  %v13928_v19 = vadd.f32 %v9465_v35, %v9464_v5  ;;  %v6378_v40 = vadd.f32 %v15245_v4, %v13901_v26  ;;  %v9550_v16 = vpop.f32.mrb[231].mxu1 }
 0x572   : > { %v7473_v50 = vpack.c.bf16 %v7455_v38, %v7454_v36  ;;  %v7426_v11 = vadd.f32 %v7394_v1, %v7362_v18  ;;  %v9548_v46 = vadd.f32 %v9547_v24, %v9546_v2  ;;  %v13932_v51 = vadd.f32 %v9468_v29, %v9467_v61 }
 0x573   : > { %v7427_v27 = vadd.f32 %v7395_v59, %v7363_v62  ;;  %v7474_v32 = vpack.c.bf16 %v7457_v39, %v7456_v56  ;;  %v6381_v57 = vadd.f32 %v15246_v43, %v13901_v26  ;;  %v9551_v10 = vadd.f32 %v9550_v16, %v9549_v42 }
 0x574   : > { %9823 = vmatmul.mubr.msk.bf16.gmra.mrb[48].mxu1 %vm386_vm0, %v7471_v34  ;;  %v13936_v13 = vadd.f32 %v9548_v46, %v6378_v40  ;;  %v7458_v20 = vmul.f32 0.11111111, %v7426_v11  ;;  %v6386_v49 = vadd.f32 %v13608_v53, %v13901_v26  ;;  %v6394_v5 = vadd.f32 %v13701_v54, %v13901_v26 }
 0x575   : > { %9826 = vmatprep.mubr.msk.bf16.mxu1 %vm386_vm0, %v7472_v63  ;;  %v7459_v52 = vmul.f32 0.11111111, %v7427_v27  ;;  %v13939_v41 = vadd.f32 %v9551_v10, %v6381_v57  ;;  %v6389_v63 = vadd.f32 %v13620_v21, %v13901_v26  ;;  %v6397_v39 = vadd.f32 %v13714_v25, %v13901_v26 }
 0x576   : > { %v9552_v33 = vpop.f32.mrb[232].mxu1  ;;  %v6402_v54 = vadd.f32 %v13840_v48, %v13901_v26  ;;  %v6405_v25 = vadd.f32 %v13850_v7, %v13901_v26  ;;  %v6410_v48 = vadd.f32 %v13895_v8, %v13901_v26  ;;  %v6413_v7 = vadd.f32 %v13908_v45, %v13901_v26 }
 0x577   : > { %v9553_v44 = vpop.f32.mrb[233].mxu1  ;;  %v7475_v34 = vpack.c.bf16 %v7459_v52, %v7458_v20  ;;  %v6421_v8 = vadd.f32 %v13932_v51, %v13901_v26 }
 0x578   : > { %v9554_v14 = vadd.f32 %v9553_v44, %v9552_v33  ;;  %v9555_v37 = vpop.f32.mrb[234].mxu1 }
 0x579   : > { %v9470_v12 = vpop.f32.mrb[252].mxu0  ;;  %v9556_v6 = vpop.f32.mrb[235].mxu1 }
 0x57a   : > { %v9557_v31 = vadd.f32 %v9556_v6, %v9555_v37  ;;  %v9471_v9 = vpop.f32.mrb[253].mxu0  ;;  %v13946_v23 = vadd.f32 %v9554_v14, %v6386_v49 }
 0x57b   : > { %v9472_v17 = vadd.f32 %v9471_v9, %v9470_v12  ;;  %v9473_v0 = vpop.f32.mrb[254].mxu0 }
 0x57c   : > { %9827 = vmatmul.mubr.msk.bf16.gmra.mrb[52].mxu1 %vm386_vm0, %v7473_v50  ;;  %v9474_v28 = vpop.f32.mrb[255].mxu0  ;;  %v13948_v36 = vadd.f32 %v9557_v31, %v6389_v63 }
 0x57d   : > { %9830 = vmatprep.mubr.msk.bf16.mxu1 %vm386_vm0, %v7474_v32  ;;  %v9475_v38 = vadd.f32 %v9474_v28, %v9473_v0  ;;  %v6418_v28 = vadd.f32 %v13928_v19, %v13901_v26 }
 0x57e   : > { %v9558_v53 = vpop.f32.mrb[236].mxu1 }
 0x57f   : > { %v9559_v18 = vpop.f32.mrb[237].mxu1  ;;  %v6429_v19 = vadd.f32 %v9475_v38, %v13901_v26 }
 0x580   : > { %v9560_v62 = vadd.f32 %v9559_v18, %v9558_v53  ;;  %v9561_v1 = vpop.f32.mrb[238].mxu1 }
 0x581   : > { %v9476_v21 = vpop.f32.mrb[0].mxu0  ;;  %v9562_v35 = vpop.f32.mrb[239].mxu1 }
 0x582   : > { %v9477_v56 = vpop.f32.mrb[1].mxu0  ;;  %v9563_v59 = vadd.f32 %v9562_v35, %v9561_v1  ;;  %v13955_v24 = vadd.f32 %v9560_v62, %v6394_v5 }
 0x583   : > { %v9478_v2 = vadd.f32 %v9477_v56, %v9476_v21  ;;  %v9479_v61 = vpop.f32.mrb[2].mxu0  ;;  %v6426_v56 = vadd.f32 %v9472_v17, %v13901_v26 }
 0x584   : > { %9831 = vmatmul.mubr.msk.bf16.gmra.mrb[56].mxu1 %vm386_vm0, %v7475_v34  ;;  %v9480_v29 = vpop.f32.mrb[3].mxu0  ;;  %v13957_v11 = vadd.f32 %v9563_v59, %v6397_v39 }
 0x585   : > { %v9481_v50 = vadd.f32 %v9480_v29, %v9479_v61 }
 0x586   : > { %v9564_v4 = vpop.f32.mrb[240].mxu1 }
 0x587   : > { %v9565_v40 = vpop.f32.mrb[241].mxu1 }
 0x588   : > { %v9566_v46 = vadd.f32 %v9565_v40, %v9564_v4  ;;  %v9567_v42 = vpop.f32.mrb[242].mxu1 }
 0x589   : > { %v9482_v27 = vpop.f32.mrb[4].mxu0  ;;  %v9568_v16 = vpop.f32.mrb[243].mxu1 }
 0x58a   : > { %v9483_v32 = vpop.f32.mrb[5].mxu0  ;;  %v9569_v43 = vadd.f32 %v9568_v16, %v9567_v42  ;;  %v13963_v20 = vadd.f32 %v9566_v46, %v6402_v54  ;;  %v6434_v46 = vadd.f32 %v9478_v2, %v13901_v26 }
 0x58b   : > { %v9484_v57 = vadd.f32 %v9483_v32, %v9482_v27  ;;  %v9485_v10 = vpop.f32.mrb[6].mxu0  ;;  %v6437_v32 = vadd.f32 %v9481_v50, %v13901_v26 }
 0x58c   : > { %v9486_v52 = vpop.f32.mrb[7].mxu0  ;;  %v13965_v44 = vadd.f32 %v9569_v43, %v6405_v25 }
 0x58d   : > { %v9487_v33 = vadd.f32 %v9486_v52, %v9485_v10 }
 0x58e   : > { %v9570_v49 = vpop.f32.mrb[244].mxu1 }
 0x58f   : > { %v9571_v14 = vpop.f32.mrb[245].mxu1 }
 0x590   : > { %v9572_v37 = vadd.f32 %v9571_v14, %v9570_v49  ;;  %v9573_v12 = vpop.f32.mrb[246].mxu1  ;;  %v6442_v14 = vadd.f32 %v9484_v57, %v13901_v26 }
 0x591   : > { %v9574_v6 = vpop.f32.mrb[247].mxu1 }
 0x592   : > { %v9575_v34 = vadd.f32 %v9574_v6, %v9573_v12  ;;  %v13971_v63 = vadd.f32 %v9572_v37, %v6410_v48 }
 0x594   : > { %v13973_v31 = vadd.f32 %v9575_v34, %v6413_v7  ;;  %v6445_v34 = vadd.f32 %v9487_v33, %v13901_v26 }
 0x596   : > { %v9576_v9 = vpop.f32.mrb[248].mxu1 }
 0x597   : > { %v9577_v0 = vpop.f32.mrb[249].mxu1 }
 0x598   : > { %v9578_v53 = vadd.f32 %v9577_v0, %v9576_v9  ;;  %v9579_v18 = vpop.f32.mrb[250].mxu1 }
 0x599   : > { %v9580_v5 = vpop.f32.mrb[251].mxu1 }
 0x59a   : > { %v9581_v62 = vadd.f32 %v9580_v5, %v9579_v18  ;;  %v13979_v1 = vadd.f32 %v9578_v53, %v6418_v28 }
 0x59c   : > { %v13981_v45 = vadd.f32 %v9581_v62, %v6421_v8 }
 0x59e   : > { %v9582_v21 = vpop.f32.mrb[252].mxu1 }
 0x59f   : > { %v9583_v35 = vpop.f32.mrb[253].mxu1 }
 0x5a0   : > { %v9584_v39 = vadd.f32 %v9583_v35, %v9582_v21  ;;  %v9585_v59 = vpop.f32.mrb[254].mxu1 }
 0x5a1   : > { %v9586_v61 = vpop.f32.mrb[255].mxu1 }
 0x5a2   : > { %v9587_v29 = vadd.f32 %v9586_v61, %v9585_v59  ;;  %v13985_v4 = vadd.f32 %v9584_v39, %v6426_v56 }
 0x5a4   : > { %v13987_v40 = vadd.f32 %v9587_v29, %v6429_v19 }
 0x5a6   : > { %v9588_v51 = vpop.f32.mrb[0].mxu1 }
 0x5a7   : > { %v9589_v54 = vpop.f32.mrb[1].mxu1 }
 0x5a8   : > { %v9590_v42 = vadd.f32 %v9589_v54, %v9588_v51  ;;  %v9591_v27 = vpop.f32.mrb[2].mxu1 }
 0x5a9   : > { %v9592_v16 = vpop.f32.mrb[3].mxu1 }
 0x5aa   : > { %v9593_v17 = vadd.f32 %v9592_v16, %v9591_v27  ;;  %v13991_v25 = vadd.f32 %v9590_v42, %v6434_v46 }
 0x5ac   : > { %v13993_v43 = vadd.f32 %v9593_v17, %v6437_v32 }
 0x5b6   : > { %v9594_v10 = vpop.f32.mrb[4].mxu1 }
 0x5b7   : > { %v9488_v38 = vpop.f32.mrb[8].mxu0  ;;  %v9595_v49 = vpop.f32.mrb[5].mxu1 }
 0x5b8   : > { %v9489_v52 = vpop.f32.mrb[9].mxu0  ;;  %v9596_v37 = vadd.f32 %v9595_v49, %v9594_v10  ;;  %v9597_v2 = vpop.f32.mrb[6].mxu1 }
 0x5b9   : > { %v9490_v48 = vadd.f32 %v9489_v52, %v9488_v38  ;;  %v9491_v12 = vpop.f32.mrb[10].mxu0  ;;  %v9598_v7 = vpop.f32.mrb[7].mxu1 }
 0x5ba   : > { %v9492_v6 = vpop.f32.mrb[11].mxu0  ;;  %v9599_v9 = vadd.f32 %v9598_v7, %v9597_v2  ;;  %v13997_v0 = vadd.f32 %v9596_v37, %v6442_v14 }
 0x5bb   : > { %v9493_v50 = vadd.f32 %v9492_v6, %v9491_v12  ;;  %v6450_v57 = vadd.f32 %v9490_v48, %v13901_v26 }
 0x5bc   : > { %v13999_v28 = vadd.f32 %v9599_v9, %v6445_v34 }
 0x5bd   : > { %v6453_v33 = vadd.f32 %v9493_v50, %v13901_v26 }
 0x5be   : > { %v9600_v18 = vpop.f32.mrb[8].mxu1 }
 0x5bf   : > { %v9494_v53 = vpop.f32.mrb[12].mxu0  ;;  %v9601_v8 = vpop.f32.mrb[9].mxu1 }
 0x5c0   : > { %v9495_v5 = vpop.f32.mrb[13].mxu0  ;;  %v9602_v21 = vadd.f32 %v9601_v8, %v9600_v18  ;;  %v9603_v56 = vpop.f32.mrb[10].mxu1 }
 0x5c1   : > { %v9496_v62 = vadd.f32 %v9495_v5, %v9494_v53  ;;  %v9497_v35 = vpop.f32.mrb[14].mxu0  ;;  %v9604_v59 = vpop.f32.mrb[11].mxu1 }
 0x5c2   : > { %v9498_v39 = vpop.f32.mrb[15].mxu0  ;;  %v9605_v19 = vadd.f32 %v9604_v59, %v9603_v56  ;;  %v14003_v29 = vadd.f32 %v9602_v21, %v6450_v57 }
 0x5c3   : > { %v9499_v61 = vadd.f32 %v9498_v39, %v9497_v35  ;;  %v6458_v21 = vadd.f32 %v9496_v62, %v13901_v26 }
 0x5c4   : > { %v14005_v51 = vadd.f32 %v9605_v19, %v6453_v33 }
 0x5cb   : > { %v9500_v54 = vpop.f32.mrb[16].mxu0 }
 0x5cc   : > { %v9501_v46 = vpop.f32.mrb[17].mxu0 }
 0x5cd   : > { %v9502_v42 = vadd.f32 %v9501_v46, %v9500_v54  ;;  %v9503_v27 = vpop.f32.mrb[18].mxu0  ;;  %v6461_v54 = vadd.f32 %v9499_v61, %v13901_v26 }
 0x5ce   : > { %v9504_v16 = vpop.f32.mrb[19].mxu0 }
 0x5cf   : > { %v9505_v32 = vadd.f32 %v9504_v16, %v9503_v27 }
 0x5db   : > { %v9506_v17 = vpop.f32.mrb[20].mxu0 }
 0x5dc   : > { %v9507_v38 = vpop.f32.mrb[21].mxu0 }
 0x5dd   : > { %v14007_v10 = vadd.f32 %v9507_v38, %v9506_v17  ;;  %v9509_v52 = vpop.f32.mrb[22].mxu0 }
 0x5de   : > { %v9510_v49 = vpop.f32.mrb[23].mxu0 }
 0x5df   : > { %v14009_v14 = vadd.f32 %v9510_v49, %v9509_v52 }
 0x5e7   : > { %v9512_v48 = vpop.f32.mrb[24].mxu0 }
 0x5e8   : > { %v9513_v37 = vpop.f32.mrb[25].mxu0 }
 0x5e9   : > { %v14011_v12 = vadd.f32 %v9513_v37, %v9512_v48  ;;  %v9515_v2 = vpop.f32.mrb[26].mxu0 }
 0x5ea   : > { %v9516_v6 = vpop.f32.mrb[27].mxu0 }
 0x5eb   : > { %v14013_v7 = vadd.f32 %v9516_v6, %v9515_v2 }
 0x5f3   : > { %v9518_v34 = vpop.f32.mrb[28].mxu0 }
 0x5f4   : > { %v9519_v50 = vpop.f32.mrb[29].mxu0 }
 0x5f5   : > { %v14015_v9 = vadd.f32 %v9519_v50, %v9518_v34  ;;  %v9521_v53 = vpop.f32.mrb[30].mxu0 }
 0x5f6   : > { %v9522_v18 = vpop.f32.mrb[31].mxu0 }
 0x5f7   : > { %v14017_v5 = vadd.f32 %v9522_v18, %v9521_v53 }
 0x5f8   : > { %v9606_v8 = vpop.f32.mrb[12].mxu1 }
 0x5f9   : > { %v9607_v57 = vpop.f32.mrb[13].mxu1 }
 0x5fa   : > { %v9608_v35 = vadd.f32 %v9607_v57, %v9606_v8  ;;  %v9609_v56 = vpop.f32.mrb[14].mxu1  ;;  %v6469_v8 = vadd.f32 %v9505_v32, %v13901_v26  ;;  %v14044_v32 = vpop.permute.xlu1 %7902 }
 0x5fb   : > { %v9768_v39 = vpop.f32.mrb[32].mxu0  ;;  %v9610_v59 = vpop.f32.mrb[15].mxu1 }
 0x5fc   : > { %v6700_v33 = vadd.f32 %v9768_v39, %v13936_v13  ;;  %v6691_v19 = vpop.f32.mrb[33].mxu0  ;;  %v9611_v46 = vadd.f32 %v9610_v59, %v9609_v56  ;;  %v14023_v17 = vadd.f32 %v9608_v35, %v6458_v21 }
 0x5fd   : > { %v6692_v27 = vadd.f32 %v6691_v19, %v13922_v58  ;;  %v9769_v16 = vpop.f32.mrb[34].mxu0  ;;  %v6466_v58 = vadd.f32 %v9502_v42, %v13901_v26 }
 0x5fe   : > { %v6820_v38 = vmax.f32 %v6700_v33, 0.0  ;;  %v6703_v52 = vadd.f32 %v9769_v16, %v13939_v41  ;;  %v6694_v49 = vpop.f32.mrb[35].mxu0  ;;  %v14027_v48 = vadd.f32 %v9611_v46, %v6461_v54 }
 0x5ff   : > { %v6695_v62 = vadd.f32 %v6694_v49, %v13924_v22  ;;  %v6818_v2 = vmax.f32 %v6692_v27, 0.0 }
 0x600   : > { %v6821_v37 = vmax.f32 %v6703_v52, 0.0  ;;  %7776 = vrot.lane.b32.xlu0 %v6820_v38, %s10091_s30  ;;  %v9612_v13 = vpop.f32.mrb[16].mxu1 }
 0x601   : > { %v9613_v61 = vpop.f32.mrb[17].mxu1  ;;  %v6819_v53 = vmax.f32 %v6695_v62, 0.0 }
 0x602   : > { %7778 = vrot.lane.b32.xlu1 %v6821_v37, %s10091_s30  ;;  %v9614_v6 = vadd.f32 %v9613_v61, %v9612_v13  ;;  %v9615_v34 = vpop.f32.mrb[18].mxu1  ;;  %v6477_v13 = vadd.f32 %v14009_v14, %v13901_v26  ;;  %v14064_v14 = vpop.permute.xlu1 %7906 }
 0x603   : > { %v9772_v50 = vpop.f32.mrb[36].mxu0  ;;  %v9616_v41 = vpop.f32.mrb[19].mxu1 }
 0x604   : > { %v6716_v18 = vadd.f32 %v9772_v50, %v13955_v24  ;;  %v6707_v22 = vpop.f32.mrb[37].mxu0  ;;  %7772 = vrot.lane.b32.xlu0 %v6818_v2, %s10091_s30  ;;  %v9617_v57 = vadd.f32 %v9616_v41, %v9615_v34  ;;  %v14036_v56 = vadd.f32 %v9614_v6, %v6466_v58 }
 0x605   : > { %v6708_v21 = vadd.f32 %v6707_v22, %v13946_v23  ;;  %v9773_v35 = vpop.f32.mrb[38].mxu0  ;;  %v14046_v23 = vpop.permute.xlu0 %7900 }
 0x606   : > { %v6824_v39 = vmax.f32 %v6716_v18, 0.0  ;;  %v6719_v42 = vadd.f32 %v9773_v35, %v13957_v11  ;;  %v6710_v59 = vpop.f32.mrb[39].mxu0  ;;  %7774 = vrot.lane.b32.xlu1 %v6819_v53, %s10091_s30  ;;  %v14041_v24 = vadd.f32 %v9617_v57, %v6469_v8  ;;  %v6474_v11 = vadd.f32 %v14007_v10, %v13901_v26 }
 0x607   : > { %v6711_v33 = vadd.f32 %v6710_v59, %v13948_v36  ;;  %v6822_v46 = vmax.f32 %v6708_v21, 0.0 }
 0x608   : > { %v6825_v19 = vmax.f32 %v6719_v42, 0.0  ;;  %7784 = vrot.lane.b32.xlu0 %v6824_v39, %s10091_s30 }
 0x609   : > { %v6823_v52 = vmax.f32 %v6711_v33, 0.0  ;;  %v6485_v33 = vadd.f32 %v14013_v7, %v13901_v26  ;;  %v14084_v7 = vpop.permute.xlu1 %7910 }
 0x60a   : > { %7786 = vrot.lane.b32.xlu1 %v6825_v19, %s10091_s30 }
 0x60c   : > { %v9618_v54 = vpop.f32.mrb[20].mxu1  ;;  %7780 = vrot.lane.b32.xlu0 %v6822_v46, %s10091_s30 }
 0x60d   : > { %v9619_v27 = vpop.f32.mrb[21].mxu1 }
 0x60e   : > { %v9620_v16 = vadd.f32 %v9619_v27, %v9618_v54  ;;  %v9621_v38 = vpop.f32.mrb[22].mxu1  ;;  %7782 = vrot.lane.b32.xlu1 %v6823_v52, %s10091_s30 }
 0x60f   : > { %v9622_v49 = vpop.f32.mrb[23].mxu1 }
 0x610   : > { %v9776_v36 = vpop.f32.mrb[40].mxu0  ;;  %v9623_v2 = vadd.f32 %v9622_v49, %v9621_v38  ;;  %v14056_v6 = vadd.f32 %v9620_v16, %v6474_v11 }
 0x611   : > { %v6732_v62 = vadd.f32 %v9776_v36, %v13971_v63  ;;  %v6723_v37 = vpop.f32.mrb[41].mxu0 }
 0x612   : > { %v6724_v61 = vadd.f32 %v6723_v37, %v13963_v20  ;;  %v9777_v58 = vpop.f32.mrb[42].mxu0  ;;  %v14061_v53 = vadd.f32 %v9623_v2, %v6477_v13  ;;  %v14066_v20 = vpop.permute.xlu0 %7904 }
 0x613   : > { %v6828_v10 = vmax.f32 %v6732_v62, 0.0  ;;  %v6735_v34 = vadd.f32 %v9777_v58, %v13973_v31  ;;  %v6726_v50 = vpop.f32.mrb[43].mxu0  ;;  %v6482_v31 = vadd.f32 %v14011_v12, %v13901_v26 }
 0x614   : > { %v6727_v63 = vadd.f32 %v6726_v50, %v13965_v44  ;;  %v6826_v22 = vmax.f32 %v6724_v61, 0.0 }
 0x615   : > { %v6829_v41 = vmax.f32 %v6735_v34, 0.0  ;;  %7792 = vrot.lane.b32.xlu0 %v6828_v10, %s10091_s30  ;;  %v9624_v18 = vpop.f32.mrb[24].mxu1  ;;  %v6493_v34 = vadd.f32 %v14017_v5, %v13901_v26 }
 0x616   : > { %v9625_v8 = vpop.f32.mrb[25].mxu1  ;;  %v6827_v35 = vmax.f32 %v6727_v63, 0.0 }
 0x617   : > { %7794 = vrot.lane.b32.xlu1 %v6829_v41, %s10091_s30  ;;  %v9626_v57 = vadd.f32 %v9625_v8, %v9624_v18  ;;  %v9627_v21 = vpop.f32.mrb[26].mxu1 }
 0x618   : > { %v9780_v44 = vpop.f32.mrb[44].mxu0  ;;  %v9628_v39 = vpop.f32.mrb[27].mxu1 }
 0x619   : > { %v6748_v42 = vadd.f32 %v9780_v44, %v13985_v4  ;;  %v6739_v59 = vpop.f32.mrb[45].mxu0  ;;  %7788 = vrot.lane.b32.xlu0 %v6826_v22, %s10091_s30  ;;  %v9629_v19 = vadd.f32 %v9628_v39, %v9627_v21  ;;  %v14076_v27 = vadd.f32 %v9626_v57, %v6482_v31 }
 0x61a   : > { %v6740_v54 = vadd.f32 %v6739_v59, %v13979_v1  ;;  %v9781_v46 = vpop.f32.mrb[46].mxu0  ;;  %v14086_v1 = vpop.permute.xlu0 %7908 }
 0x61b   : > { %v6832_v12 = vmax.f32 %v6748_v42, 0.0  ;;  %v6751_v11 = vadd.f32 %v9781_v46, %v13987_v40  ;;  %v6742_v16 = vpop.f32.mrb[47].mxu0  ;;  %7790 = vrot.lane.b32.xlu1 %v6827_v35, %s10091_s30  ;;  %v14081_v38 = vadd.f32 %v9629_v19, %v6485_v33  ;;  %v6490_v40 = vadd.f32 %v14015_v9, %v13901_v26  ;;  %v14104_v26 = vpop.permute.xlu1 %7914 }
 0x61c   : > { %v6743_v4 = vadd.f32 %v6742_v16, %v13981_v45  ;;  %v6830_v49 = vmax.f32 %v6740_v54, 0.0 }
 0x61d   : > { %v6833_v36 = vmax.f32 %v6751_v11, 0.0  ;;  %7800 = vrot.lane.b32.xlu0 %v6832_v12, %s10091_s30  ;;  %v9630_v52 = vpop.f32.mrb[28].mxu1 }
 0x61e   : > { %v9631_v62 = vpop.f32.mrb[29].mxu1  ;;  %v6831_v2 = vmax.f32 %v6743_v4, 0.0 }
 0x61f   : > { %7802 = vrot.lane.b32.xlu1 %v6833_v36, %s10091_s30  ;;  %v9632_v37 = vadd.f32 %v9631_v62, %v9630_v52  ;;  %v9633_v13 = vpop.f32.mrb[30].mxu1 }
 0x620   : > { %v9784_v45 = vpop.f32.mrb[48].mxu0  ;;  %v9634_v61 = vpop.f32.mrb[31].mxu1 }
 0x621   : > { %v6764_v58 = vadd.f32 %v9784_v45, %v13997_v0  ;;  %v6755_v10 = vpop.f32.mrb[49].mxu0  ;;  %7796 = vrot.lane.b32.xlu0 %v6830_v49, %s10091_s30  ;;  %v9635_v50 = vadd.f32 %v9634_v61, %v9633_v13  ;;  %v14096_v18 = vadd.f32 %v9632_v37, %v6490_v40 }
 0x622   : > { %v6756_v63 = vadd.f32 %v6755_v10, %v13991_v25  ;;  %v9785_v41 = vpop.f32.mrb[50].mxu0  ;;  %v14106_v25 = vpop.permute.xlu0 %7912 }
 0x623   : > { %v6836_v9 = vmax.f32 %v6764_v58, 0.0  ;;  %v6767_v22 = vadd.f32 %v9785_v41, %v13999_v28  ;;  %v6758_v8 = vpop.f32.mrb[51].mxu0  ;;  %7798 = vrot.lane.b32.xlu1 %v6831_v2, %s10091_s30  ;;  %v14101_v31 = vadd.f32 %v9635_v50, %v6493_v34  ;;  %v14145_v50 = vld [vmem:[%s14905_s10] ss:$0 sm:$0xff] }
 0x624   : > { %v6759_v0 = vadd.f32 %v6758_v8, %v13993_v43  ;;  %v6834_v21 = vmax.f32 %v6756_v63, 0.0 }
 0x625   : > { %v6837_v57 = vmax.f32 %v6767_v22, 0.0  ;;  %7808 = vrot.lane.b32.xlu0 %v6836_v9, %s10091_s30 }
 0x626   : > { %v6835_v39 = vmax.f32 %v6759_v0, 0.0  ;;  %v14124_v36 = vpop.permute.xlu0 %7916 }
 0x627   : > { %v9808_v5 = vpop.f32.mrb[32].mxu1  ;;  %7810 = vrot.lane.b32.xlu1 %v6837_v57, %s10091_s30 }
 0x628   : > { %v14109_v44 = vpop.f32.mrb[33].mxu1  ;;  %v9788_v28 = vpop.f32.mrb[52].mxu0  ;;  %v7606_v57 = vadd.f32 %v9808_v5, %v14145_v50 }
 0x629   : > { %v9809_v35 = vpop.f32.mrb[34].mxu1  ;;  %v6780_v43 = vadd.f32 %v9788_v28, %v14023_v17  ;;  %v6771_v42 = vpop.f32.mrb[53].mxu0  ;;  %7804 = vrot.lane.b32.xlu0 %v6834_v21, %s10091_s30 }
 0x62a   : > { %v14113_v59 = vpop.f32.mrb[35].mxu1  ;;  %v6772_v33 = vadd.f32 %v6771_v42, %v14003_v29  ;;  %v9789_v19 = vpop.f32.mrb[54].mxu0  ;;  %v7609_v5 = vadd.f32 %v9809_v35, %v14145_v50 }
 0x62b   : > { %v6840_v54 = vmax.f32 %v6780_v43, 0.0  ;;  %v6783_v46 = vadd.f32 %v9789_v19, %v14027_v48  ;;  %v6774_v12 = vpop.f32.mrb[55].mxu0  ;;  %7806 = vrot.lane.b32.xlu1 %v6835_v39, %s10091_s30  ;;  %v14120_v17 = vpop.permute.xlu1 %7918 }
 0x62c   : > { %v6775_v11 = vadd.f32 %v6774_v12, %v14005_v51  ;;  %v6838_v52 = vmax.f32 %v6772_v33, 0.0  ;;  %v14149_v63 = vpop.permute.xlu0 %7920 }
 0x62d   : > { %v6841_v16 = vmax.f32 %v6783_v46, 0.0  ;;  %7816 = vrot.lane.b32.xlu0 %v6840_v54, %s10091_s30 }
 0x62e   : > { %v6839_v62 = vmax.f32 %v6775_v11, 0.0 }
 0x62f   : > { %v14122_v4 = vpop.f32.mrb[36].mxu1  ;;  %7818 = vrot.lane.b32.xlu1 %v6841_v16, %s10091_s30 }
 0x630   : > { %v14127_v29 = vpop.f32.mrb[37].mxu1  ;;  %v9792_v48 = vpop.f32.mrb[56].mxu0 }
 0x631   : > { %v14129_v49 = vpop.f32.mrb[38].mxu1  ;;  %v6796_v51 = vadd.f32 %v9792_v48, %v14056_v6  ;;  %v6787_v40 = vpop.f32.mrb[57].mxu0  ;;  %7812 = vrot.lane.b32.xlu0 %v6838_v52, %s10091_s30 }
 0x632   : > { %v14133_v37 = vpop.f32.mrb[39].mxu1  ;;  %v6788_v13 = vadd.f32 %v6787_v40, %v14036_v56  ;;  %v9793_v45 = vpop.f32.mrb[58].mxu0  ;;  %v7598_v40 = vadd.f32 %v14145_v50, %v14109_v44 }
 0x633   : > { %v6844_v2 = vmax.f32 %v6796_v51, 0.0  ;;  %v6799_v61 = vadd.f32 %v9793_v45, %v14061_v53  ;;  %v6790_v58 = vpop.f32.mrb[59].mxu0  ;;  %7814 = vrot.lane.b32.xlu1 %v6839_v62, %s10091_s30  ;;  %v14140_v6 = vpop.permute.xlu1 %7922 }
 0x634   : > { %v6791_v10 = vadd.f32 %v6790_v58, %v14041_v24  ;;  %v6842_v53 = vmax.f32 %v6788_v13, 0.0  ;;  %v14165_v54 = vpop.permute.xlu0 %7924 }
 0x635   : > { %v6845_v34 = vmax.f32 %v6799_v61, 0.0  ;;  %7824 = vrot.lane.b32.xlu0 %v6844_v2, %s10091_s30  ;;  %v7601_v61 = vadd.f32 %v14145_v50, %v14113_v59  ;;  %v7622_v59 = vadd.f32 %v14122_v4, %v14145_v50 }
 0x636   : > { %v6843_v22 = vmax.f32 %v6791_v10, 0.0 }
 0x637   : > { %v14147_v56 = vpop.f32.mrb[40].mxu1  ;;  %7826 = vrot.lane.b32.xlu1 %v6845_v34, %s10091_s30  ;;  %v7712_v34 = vmax.f32 %v7598_v40, 0.0 }
 0x638   : > { %v14152_v41 = vpop.f32.mrb[41].mxu1  ;;  %v14181_v62 = vpop.permute.xlu0 %7928 }
 0x639   : > { %v9796_v24 = vpop.f32.mrb[60].mxu0  ;;  %v14154_v9 = vpop.f32.mrb[42].mxu1  ;;  %7820 = vrot.lane.b32.xlu0 %v6842_v53, %s10091_s30 }
 0x63a   : > { %v6812_v8 = vadd.f32 %v9796_v24, %v14096_v18  ;;  %v6803_v0 = vpop.f32.mrb[61].mxu0  ;;  %v14159_v21 = vpop.f32.mrb[43].mxu1  ;;  %v7714_v18 = vmax.f32 %v7606_v57, 0.0 }
 0x63b   : > { %v6804_v28 = vadd.f32 %v6803_v0, %v14076_v27  ;;  %v9797_v39 = vpop.f32.mrb[62].mxu0  ;;  %7822 = vrot.lane.b32.xlu1 %v6843_v22, %s10091_s30  ;;  %v14171_v27 = vpop.permute.xlu1 %7926  ;;  %v7713_v22 = vmax.f32 %v7601_v61, 0.0 }
 0x63c   : > { %v6848_v43 = vmax.f32 %v6812_v8, 0.0  ;;  %v6815_v42 = vadd.f32 %v9797_v39, %v14101_v31  ;;  %v6806_v33 = vpop.f32.mrb[63].mxu0  ;;  %v14199_v24 = vpop.permute.xlu0 %7932 }
 0x63d   : > { %v6807_v19 = vadd.f32 %v6806_v33, %v14081_v38  ;;  %v7715_v38 = vmax.f32 %v7609_v5, 0.0  ;;  %v6846_v51 = vmax.f32 %v6804_v28, 0.0 }
 0x63e   : > { %v6849_v46 = vmax.f32 %v6815_v42, 0.0  ;;  %7832 = vrot.lane.b32.xlu0 %v6848_v43, %s10091_s30  ;;  %v7718_v43 = vmax.f32 %v7622_v59, 0.0  ;;  %v7625_v42 = vadd.f32 %v14129_v49, %v14145_v50 }
 0x63f   : > { %v14169_v12 = vpop.f32.mrb[44].mxu1  ;;  %v14186_v45 = vpop.permute.xlu1 %7930  ;;  %v6847_v2 = vmax.f32 %v6807_v19, 0.0 }
 0x640   : > { %7834 = vrot.lane.b32.xlu1 %v6849_v46, %s10091_s30  ;;  %v14174_v31 = vpop.f32.mrb[45].mxu1  ;;  %v14215_v19 = vpop.permute.xlu0 %7936 }
 0x641   : > { %v9804_v11 = vpop.f32.mrb[64].mxu0  ;;  %v14176_v16 = vpop.f32.mrb[46].mxu1 }
 0x642   : > { %8040 = vrot.lane.b32.xlu0 %v7714_v18, %s10092_s14  ;;  %v7581_v52 = vpop.f32.mrb[65].mxu0  ;;  %v14179_v48 = vpop.f32.mrb[47].mxu1  ;;  %v7590_v58 = vadd.f32 %v9804_v11, %v14145_v50 }
 0x643   : > { %v9805_v35 = vpop.f32.mrb[66].mxu0  ;;  %v14207_v28 = vpop.permute.xlu1 %7934  ;;  %v7582_v4 = vadd.f32 %v14145_v50, %v7581_v52 }
 0x644   : > { %8042 = vrot.lane.b32.xlu1 %v7715_v38, %s10092_s14  ;;  %v7584_v13 = vpop.f32.mrb[67].mxu0  ;;  %v7710_v8 = vmax.f32 %v7590_v58, 0.0  ;;  %v7593_v0 = vadd.f32 %v9805_v35, %v14145_v50  ;;  %v7719_v38 = vmax.f32 %v7625_v42, 0.0  ;;  %v14232_v52 = vpop.permute.xlu0 %7940  ;;  %v7630_v42 = vadd.f32 %v14145_v50, %v14152_v41 }
 0x645   : > { %v7585_v11 = vadd.f32 %v14145_v50, %v7584_v13  ;;  %v7708_v35 = vmax.f32 %v7582_v4, 0.0  ;;  %15247 = vst [vmem:[#allocation50_spill] sm:$0xff] %v14232_v52  ;;  %v7638_v13 = vadd.f32 %v14147_v56, %v14145_v50  ;;  %v7641_v56 = vadd.f32 %v14154_v9, %v14145_v50 }
 0x646   : > { %7828 = vrot.lane.b32.xlu0 %v6846_v51, %s10091_s30  ;;  %v7711_v39 = vmax.f32 %v7593_v0, 0.0  ;;  %v7614_v51 = vadd.f32 %v14145_v50, %v14127_v29  ;;  %v7654_v9 = vadd.f32 %v14169_v12, %v14145_v50 }
 0x647   : > { %v14192_v10 = vpop.f32.mrb[48].mxu1  ;;  %v14223_v5 = vpop.permute.xlu1 %7938  ;;  %v7709_v40 = vmax.f32 %v7585_v11, 0.0  ;;  %v7723_v11 = vmax.f32 %v7641_v56, 0.0 }
 0x648   : > { %7830 = vrot.lane.b32.xlu1 %v6847_v2, %s10091_s30  ;;  %v14195_v53 = vpop.f32.mrb[49].mxu1  ;;  %v7617_v2 = vadd.f32 %v14145_v50, %v14133_v37  ;;  %v7722_v37 = vmax.f32 %v7638_v13, 0.0  ;;  %v7726_v41 = vmax.f32 %v7654_v9, 0.0  ;;  %s377_s30 = sand.u32 1, %s10078_s18  }
 0x649   : > { %v14197_v44 = vpop.f32.mrb[50].mxu1  ;;  %s14854_s12 = scalar_lea.sflag [#allocation6], %s377_s30 }
 0x64a   : > { %8036 = vrot.lane.b32.xlu0 %v7712_v34, %s10092_s14  ;;  %v14205_v57 = vpop.f32.mrb[51].mxu1  ;;  %v7716_v34 = vmax.f32 %v7614_v51, 0.0  ;;  %v7717_v0 = vmax.f32 %v7617_v2, 0.0  ;;  %v7657_v2 = vadd.f32 %v14176_v16, %v14145_v50 }
 0x64b   : > { %v14241_v58 = vpop.permute.xlu1 %7942 }
 0x64c   : > { %8038 = vrot.lane.b32.xlu1 %v7713_v22, %s10092_s14  ;;  %15248 = vst [vmem:[#allocation34_spill] sm:$0xff] %v14241_v58  ;;  %v7727_v12 = vmax.f32 %v7657_v2, 0.0 }
 0x64e   : > { %8032 = vrot.lane.b32.xlu0 %v7710_v8, %s10092_s14 }
 0x64f   : > { %v14213_v33 = vpop.f32.mrb[52].mxu1  ;;  %v14260_v4 = vpop.permute.xlu1 %7946 }
 0x650   : > { %8034 = vrot.lane.b32.xlu1 %v7711_v39, %s10092_s14  ;;  %v14219_v18 = vpop.f32.mrb[53].mxu1  ;;  %15250 = vst [vmem:[#allocation54_spill] sm:$0xff] %v14260_v4 }
 0x651   : > { %v14221_v46 = vpop.f32.mrb[54].mxu1 }
 0x652   : > { %8048 = vrot.lane.b32.xlu0 %v7718_v43, %s10092_s14  ;;  %v14227_v49 = vpop.f32.mrb[55].mxu1  ;;  %v14255_v43 = vpop.permute.xlu0 %7944 }
 0x653   : > { %15249 = vst [vmem:[#allocation21_spill] sm:$0xff] %v14255_v43  ;;  %v14273_v13 = vpop.permute.xlu1 %7950  ;;  %v15270_v43 = vld [vmem:[#allocation52_spill] sm:$0xff] }
 0x654   : > { %8050 = vrot.lane.b32.xlu1 %v7719_v38, %s10092_s14  ;;  %v7633_v38 = vadd.f32 %v14145_v50, %v14159_v21  ;;  %15252 = vst [vmem:[#allocation61_spill] sm:$0xff] %v14273_v13  ;;  %v7646_v21 = vadd.f32 %v14145_v50, %v14174_v31  ;;  %v4941_v58 = vmax.f32 %v15270_v43, 0.0 }
 0x656   : > { %8028 = vrot.lane.b32.xlu0 %v7708_v35, %s10092_s14  ;;  %v7720_v35 = vmax.f32 %v7630_v42, 0.0  ;;  %v14268_v51 = vpop.permute.xlu0 %7948  ;;  %v7724_v16 = vmax.f32 %v7646_v21, 0.0  ;;  %v7681_v21 = vadd.f32 %v14145_v50, %v14227_v49 }
 0x657   : > { %v14239_v61 = vpop.f32.mrb[56].mxu1  ;;  %15251 = vst [vmem:[#allocation45_spill] sm:$0xff] %v14268_v51 }
 0x658   : > { %8030 = vrot.lane.b32.xlu1 %v7709_v40, %s10092_s14  ;;  %v7693_v29 = vpop.f32.mrb[57].mxu1  ;;  %v7721_v40 = vmax.f32 %v7633_v38, 0.0  ;;  %v7686_v38 = vadd.f32 %v14213_v33, %v14145_v50 }
 0x659   : > { %v14245_v22 = vadd.f32 %v14145_v50, %v7693_v29  ;;  %v14247_v8 = vpop.f32.mrb[58].mxu1  ;;  %v7670_v29 = vadd.f32 %v14192_v10, %v14145_v50 }
 0x65a   : > { %8044 = vrot.lane.b32.xlu0 %v7716_v34, %s10092_s14  ;;  %v7696_v59 = vpop.f32.mrb[59].mxu1  ;;  %v7649_v34 = vadd.f32 %v14145_v50, %v14179_v48  ;;  %v7662_v48 = vadd.f32 %v14145_v50, %v14195_v53  ;;  %v7734_v53 = vmax.f32 %v7686_v38, 0.0 }
 0x65b   : > { %v14253_v39 = vadd.f32 %v14145_v50, %v7696_v59  ;;  %v7730_v31 = vmax.f32 %v7670_v29, 0.0  ;;  %v7673_v59 = vadd.f32 %v14197_v44, %v14145_v50  ;;  %v7733_v29 = vmax.f32 %v7681_v21, 0.0 }
 0x65c   : > { %8046 = vrot.lane.b32.xlu1 %v7717_v0, %s10092_s14  ;;  %v14283_v0 = vpop.permute.xlu0 %7952  ;;  %v7725_v56 = vmax.f32 %v7649_v34, 0.0  ;;  %v7728_v44 = vmax.f32 %v7662_v48, 0.0 }
 0x65d   : > { %15253 = vst [vmem:[#allocation31_spill] sm:$0xff] %v14283_v0  ;;  %v7731_v42 = vmax.f32 %v7673_v59, 0.0  ;;  %v7736_v59 = vmax.f32 %v14245_v22, 0.0  ;;  %v15265_v0 = vld [vmem:[#allocation58_spill] sm:$0xff] }
 0x65e   : > { %8056 = vrot.lane.b32.xlu0 %v7722_v37, %s10092_s14  ;;  %v14286_v37 = vpop.permute.xlu1 %7954  ;;  %v4943_v13 = vmax.f32 %v15265_v0, 0.0 }
 0x65f   : > { %15254 = vst [vmem:[#allocation59_spill] sm:$0xff] %v14286_v37 }
 0x660   : > { %8058 = vrot.lane.b32.xlu1 %v7723_v11, %s10092_s14  ;;  %v14294_v10 = vpop.permute.xlu0 %7956  ;;  %v7665_v11 = vadd.f32 %v14145_v50, %v14205_v57  ;;  %v7678_v57 = vadd.f32 %v14145_v50, %v14219_v18 }
 0x661   : > { %15255 = vst [vmem:[#allocation14_spill] sm:$0xff] %v14294_v10 }
 0x662   : > { %8052 = vrot.lane.b32.xlu0 %v7720_v35, %s10092_s14  ;;  %v14301_v9 = vpop.permute.xlu1 %7958  ;;  %v7729_v35 = vmax.f32 %v7665_v11, 0.0 }
 0x663   : > { %15256 = vst [vmem:[#allocation24_spill] sm:$0xff] %v14301_v9 }
 0x664   : > { %8054 = vrot.lane.b32.xlu1 %v7721_v40, %s10092_s14  ;;  %v7689_v40 = vadd.f32 %v14221_v46, %v14145_v50  ;;  %v7732_v46 = vmax.f32 %v7678_v57, 0.0 }
 0x666   : > { %8064 = vrot.lane.b32.xlu0 %v7726_v41, %s10092_s14  ;;  %v14307_v41 = vpop.permute.xlu0 %7960  ;;  %v14312_v33 = vpop.permute.xlu1 %7962  ;;  %v7735_v2 = vmax.f32 %v7689_v40, 0.0 }
 0x667   : > { %15257 = vst [vmem:[#allocation17_spill] sm:$0xff] %v14307_v41  ;;  %15258 = vst [vmem:[#allocation27_spill] sm:$0xff] %v14312_v33 }
 0x668   : > { %8066 = vrot.lane.b32.xlu1 %v7727_v12, %s10092_s14  ;;  %v7702_v12 = vadd.f32 %v14239_v61, %v14145_v50 }
 0x66a   : > { %8060 = vrot.lane.b32.xlu0 %v7724_v16, %s10092_s14  ;;  %v7738_v18 = vmax.f32 %v7702_v12, 0.0  ;;  %v7705_v16 = vadd.f32 %v14247_v8, %v14145_v50  ;;  %v7737_v50 = vmax.f32 %v14253_v39, 0.0 }
 0x66c   : > { %8062 = vrot.lane.b32.xlu1 %v7725_v56, %s10092_s14  ;;  %v7739_v61 = vmax.f32 %v7705_v16, 0.0 }
 0x66e   : > { %8072 = vrot.lane.b32.xlu0 %v7730_v31, %s10092_s14 }
 0x670   : > { %8074 = vrot.lane.b32.xlu1 %v7731_v42, %s10092_s14 }
 0x672   : > { %8068 = vrot.lane.b32.xlu0 %v7728_v44, %s10092_s14  ;;  %v14319_v34 = vpop.permute.xlu0 %7776 }
 0x674   : > { %8070 = vrot.lane.b32.xlu1 %v7729_v35, %s10092_s14  ;;  %v14324_v56 = vpop.permute.xlu1 %7778 }
 0x676   : > { %8080 = vrot.lane.b32.xlu0 %v7734_v53, %s10092_s14  ;;  %v7773_v49 = vpop.permute.xlu0 %7772 }
 0x678   : > { %8082 = vrot.lane.b32.xlu1 %v7735_v2, %s10092_s14  ;;  %v14328_v31 = vpop.permute.xlu1 %7774  ;;  %v15259_v2 = vld [vmem:[#allocation15_spill] sm:$0xff] }
 0x679   : > { %v4938_v21 = vmax.f32 %v15259_v2, 0.0  ;;  %v15262_v2 = vld [vmem:[#allocation42_spill] sm:$0xff] }
 0x67a   : > { %8076 = vrot.lane.b32.xlu0 %v7732_v46, %s10092_s14  ;;  %v14333_v48 = vpop.permute.xlu0 %7784  ;;  %v15260_v46 = vld [vmem:[#allocation36_spill] sm:$0xff]  ;;  %v4942_v9 = vmax.f32 %v15262_v2, 0.0 }
 0x67c   : > { %8078 = vrot.lane.b32.xlu1 %v7733_v29, %s10092_s14  ;;  %v14336_v8 = vpop.permute.xlu1 %7786  ;;  %v4939_v29 = vmax.f32 %v15260_v46, 0.0 }
 0x67e   : > { %8088 = vrot.lane.b32.xlu0 %v7738_v18, %s10092_s14  ;;  %v14340_v42 = vpop.permute.xlu0 %7780 }
 0x680   : > { %8090 = vrot.lane.b32.xlu1 %v7739_v61, %s10092_s14  ;;  %v14342_v11 = vpop.permute.xlu1 %7782 }
 0x682   : > { %8084 = vrot.lane.b32.xlu0 %v7736_v59, %s10092_s14 }
 0x684   : > { %8086 = vrot.lane.b32.xlu1 %v7737_v50, %s10092_s14  ;;  %v15261_v50 = vld [vmem:[#allocation43_spill] sm:$0xff]  ;;  %s9838_s14 = smul.u32 768, %s377_s30 }
 0x685   : > { %v4920_v33 = vmax.f32 %v15261_v50, 0.0  ;;  %v15267_v50 = vld [vmem:[#allocation48_spill] sm:$0xff] }
 0x686   : > { %v4940_v4 = vmax.f32 %v15267_v50, 0.0  ;;  %v4946_v50 = vmax.f32 %v13802_v3, 0.0  ;;  %v15275_v3 = vld [vmem:[#allocation62_spill] sm:$0xff]  ;;  %s14647_s15 = scalar_lea.vmem [#allocation5], %s9838_s14  ;;  %s10028_s14 = sshll.u32 %s10093_s21, 4  ;;  %s10029_s14 = int_to_ptr.vmem [resolvable:$false] %s10028_s14 }
 0x687   : > { %v14344_v38 = vpop.permute.xlu0 %7792  ;;  %v8124_v46 = vsel %vm498_vm4, %v4920_v33, %v7773_v49  ;;  %v4944_v52 = vmax.f32 %v15275_v3, 0.0  ;;  %s8522_s22 = sshll.u32 %s14647_s15, 4  ;;  %s10030_s16 = scalar_lea.vmem %s10029_s14, 24576  ;;  %s14849_s22 = int_to_ptr.vmem [resolvable:$true] %s8522_s22 }
 0x688   : > { %s10024_s13 = scalar_lea.vmem %s14849_s22, 12288  ;;  %p10031_p0 = scmp.lt.s32.totalorder %s14849_s22, %s10029_s14 }
 0x689   : > { %v14346_v44 = vpop.permute.xlu1 %7794  ;;  %p10025_p11 = scmp.ne.s32.totalorder %s14849_s22, %s10024_s13  ;;  %p10032_p1 = scmp.lt.s32.totalorder %s10030_s16, %s10024_s13 }
 0x68b   : > { %v14348_v22 = vpop.permute.xlu0 %7788  ;;  %p10026_p12 = pnand %p10025_p11, %p10194_p5  ;;  %p10033_p2 = por %p10032_p1, %p10031_p0 }
 0x68d   : > { %v14350_v35 = vpop.permute.xlu1 %7790  ;;  %p10027_p13 = pneg %p10026_p12 }
 0x68f   : > { %v14352_v53 = vpop.permute.xlu0 %7800  ;;  %p10034_p3 = pnand %p10033_p2, %p10027_p13 }
 0x691   : > { %v14354_v39 = vpop.permute.xlu1 %7802 }
 0x693   : > { %v14356_v40 = vpop.permute.xlu0 %7796 }
 0x695   : > { %v14358_v57 = vpop.permute.xlu1 %7798 }
 0x697   : > { %v14361_v12 = vpop.permute.xlu0 %7808 }
 0x698   : > { %v14366_v18 = vsel %vm498_vm4, %v4938_v21, %v14361_v12  ;;  %v15264_v21 = vld [vmem:[#allocation47_spill] sm:$0xff] }
 0x699   : > { %v14368_v16 = vpop.permute.xlu1 %7810  ;;  %v4921_v37 = vmax.f32 %v15264_v21, 0.0  ;;  %v15269_v21 = vld [vmem:[#allocation37_spill] sm:$0xff] }
 0x69a   : > { %v14372_v61 = vsel %vm498_vm4, %v4939_v29, %v14368_v16  ;;  %v4922_v0 = vmax.f32 %v15269_v21, 0.0  ;;  %v15273_v21 = vld [vmem:[#allocation41_spill] sm:$0xff] }
 0x69b   : > { %v14374_v59 = vpop.permute.xlu0 %7804  ;;  %v8125_v2 = vsel %vm498_vm4, %v4921_v37, %v14328_v31  ;;  %v4923_v43 = vmax.f32 %v15273_v21, 0.0  ;;  %v15276_v21 = vld [vmem:[#allocation49_spill] sm:$0xff] }
 0x69c   : > { %v8126_v37 = vsel %vm498_vm4, %v4922_v0, %v14319_v34 }
 0x69d   : > { %v14377_v41 = vpop.permute.xlu1 %7806  ;;  %v8127_v0 = vsel %vm498_vm4, %v4923_v43, %v14324_v56 }
 0x69f   : > { %v14381_v10 = vpop.permute.xlu0 %7816 }
 0x6a0   : > { %15263 = vst [vmem:[#allocation13_spill] sm:$0xff] %v14381_v10  ;;  %8220 = vxpose.xlu0.b32.start [1/16] %v8124_v46, 128  ;;  %v14387_v29 = vsel %vm498_vm4, %v4942_v9, %v14381_v10 }
 0x6a1   : > { %v14389_v51 = vpop.permute.xlu1 %7818 }
 0x6a2   : > { %15266 = vst [vmem:[#allocation25_spill] sm:$0xff] %v14389_v51  ;;  %v14396_v33 = vsel %vm498_vm4, %v4943_v13, %v14389_v51  ;;  %v4947_v51 = vmax.f32 %v13814_v60, 0.0  ;;  %v8156_v60 = vsel %vm442_vm2, %v7773_v49, %v14046_v23 }
 0x6a3   : > { %v14398_v46 = vpop.permute.xlu0 %7812 }
 0x6a4   : > { %15268 = vst [vmem:[#allocation32_spill] sm:$0xff] %v14398_v46  ;;  %8221 = vxpose.xlu0.b32.cont [2/16] %v8125_v2, 128  ;;  %v14404_v9 = vsel %vm498_vm4, %v4940_v4, %v14398_v46 }
 0x6a5   : > { %v14406_v10 = vpop.permute.xlu1 %7814 }
 0x6a6   : > { %15271 = vst [vmem:[#allocation60_spill] sm:$0xff] %v14406_v10  ;;  %v14413_v13 = vsel %vm498_vm4, %v4941_v58, %v14406_v10 }
 0x6a7   : > { %v14415_v2 = vpop.permute.xlu0 %7824 }
 0x6a8   : > { %15272 = vst [vmem:[#allocation67_spill] sm:$0xff] %v14415_v2  ;;  %8222 = vxpose.xlu0.b32.cont [3/16] %v8126_v37, 128  ;;  %v14421_v4 = vsel %vm498_vm4, %v4946_v50, %v14415_v2  ;;  %v4924_v50 = vmax.f32 %v15276_v21, 0.0  ;;  %v15277_v2 = vld [vmem:[#allocation63_spill] sm:$0xff]  ;;  %v4951_v21 = vmax.f32 %v13912_v55, 0.0  ;;  %v8158_v55 = vsel %vm442_vm2, %v14319_v34, %v14066_v20 }
 0x6a9   : > { %v14423_v46 = vpop.permute.xlu1 %7826  ;;  %v4945_v10 = vmax.f32 %v15277_v2, 0.0  ;;  %v8157_v2 = vsel %vm442_vm2, %v14328_v31, %v14044_v32  ;;  %v15282_v31 = vld [vmem:[#allocation51_spill] sm:$0xff]  ;;  %v4949_v34 = vmax.f32 %v13884_v30, 0.0  ;;  %v15284_v30 = vld [vmem:[#allocation57_spill] sm:$0xff] }
 0x6aa   : > { %15274 = vst [vmem:[#allocation29_spill] sm:$0xff] %v14423_v46  ;;  %v14430_v58 = vsel %vm498_vm4, %v4947_v51, %v14423_v46  ;;  %v4950_v51 = vmax.f32 %v13904_v15, 0.0  ;;  %v8128_v46 = vsel %vm498_vm4, %v4924_v50, %v14340_v42 }
 0x6ab   : > { %v14432_v37 = vpop.permute.xlu0 %7820 }
 0x6ac   : > { %8223 = vxpose.xlu0.b32.cont [4/16] %v8127_v0, 128  ;;  %v14440_v3 = vsel %vm498_vm4, %v4944_v52, %v14432_v37  ;;  %v15280_v52 = vld [vmem:[#allocation53_spill] sm:$0xff] }
 0x6ad   : > { %8252 = vxpose.xlu1.b32.start [1/16] %v8156_v60, 128  ;;  %v14442_v43 = vpop.permute.xlu1 %7822  ;;  %v4925_v60 = vmax.f32 %v15280_v52, 0.0  ;;  %v4948_v52 = vmax.f32 %v13860_v47, 0.0 }
 0x6ae   : > { %15278 = vst [vmem:[#allocation19_spill] sm:$0xff] %v14442_v43  ;;  %v14449_v0 = vsel %vm498_vm4, %v4945_v10, %v14442_v43 }
 0x6af   : > { %v8129_v10 = vsel %vm498_vm4, %v4925_v60, %v14342_v11 }
 0x6b0   : > { %v14451_v49 = vpop.permute.xlu0 %7832  ;;  %8224 = vxpose.xlu0.b32.cont [5/16] %v8128_v46, 128 }
 0x6b1   : > { %15279 = vst [vmem:[#allocation65_spill] sm:$0xff] %v14451_v49  ;;  %8253 = vxpose.xlu1.b32.cont [2/16] %v8157_v2, 128  ;;  %v14460_v15 = vsel %vm498_vm4, %v4950_v51, %v14451_v49  ;;  %v4926_v2 = vmax.f32 %v15282_v31, 0.0 }
 0x6b2   : > { %v14462_v50 = vpop.permute.xlu1 %7834 }
 0x6b3   : > { %15281 = vst [vmem:[#allocation66_spill] sm:$0xff] %v14462_v50  ;;  %v14468_v46 = vsel %vm498_vm4, %v4951_v21, %v14462_v50  ;;  %v8130_v60 = vsel %vm498_vm4, %v4926_v2, %v14333_v48  ;;  %v8159_v21 = vsel %vm442_vm2, %v14324_v56, %v14064_v14  ;;  %v8160_v56 = vsel %vm442_vm2, %v14340_v42, %v14086_v1 }
 0x6b4   : > { %v14470_v43 = vpop.permute.xlu0 %8040  ;;  %8225 = vxpose.xlu0.b32.cont [6/16] %v8129_v10, 128  ;;  %v15283_v10 = vld [vmem:[#allocation55_spill] sm:$0xff]  ;;  %v8162_v42 = vsel %vm442_vm2, %v14333_v48, %v14106_v25  ;;  %v8164_v48 = vsel %vm442_vm2, %v14348_v22, %v14124_v36 }
 0x6b5   : > { %8254 = vxpose.xlu1.b32.cont [3/16] %v8158_v55, 128  ;;  %v4927_v50 = vmax.f32 %v15283_v10, 0.0 }
 0x6b6   : > { %v14476_v51 = vpop.permute.xlu1 %8042 }
 0x6b7   : > { %v8131_v31 = vsel %vm498_vm4, %v4927_v50, %v14336_v8  ;;  %v8161_v50 = vsel %vm442_vm2, %v14342_v11, %v14084_v7  ;;  %v8163_v11 = vsel %vm442_vm2, %v14336_v8, %v14104_v26  ;;  %v8165_v8 = vsel %vm442_vm2, %v14350_v35, %v14120_v17 }
 0x6b8   : > { %v14481_v49 = vpop.permute.xlu0 %7828  ;;  %8226 = vxpose.xlu0.b32.cont [7/16] %v8130_v60, 128  ;;  %v4928_v60 = vmax.f32 %v15284_v30, 0.0 }
 0x6b9   : > { %8255 = vxpose.xlu1.b32.cont [4/16] %v8159_v21, 128  ;;  %v14490_v55 = vsel %vm498_vm4, %v4948_v52, %v14481_v49  ;;  %v15285_v21 = vld [vmem:[#allocation10_spill] sm:$0xff] }
 0x6ba   : > { %v14492_v47 = vpop.permute.xlu1 %7830  ;;  %v8132_v52 = vsel %vm498_vm4, %v4928_v60, %v14348_v22  ;;  %v4929_v10 = vmax.f32 %v15285_v21, 0.0 }
 0x6bb   : > { %v14498_v2 = vsel %vm498_vm4, %v4949_v34, %v14492_v47 }
 0x6bc   : > { %8227 = vxpose.xlu0.b32.cont [8/16] %v8131_v31, 128  ;;  %v8133_v34 = vsel %vm498_vm4, %v4929_v10, %v14350_v35  ;;  %v15286_v31 = vld [vmem:[#allocation8_spill] sm:$0xff]  ;;  %v8037_v60 = vpop.permute.xlu0 %8036 }
 0x6bd   : > { %8256 = vxpose.xlu1.b32.cont [5/16] %v8160_v56, 128  ;;  %v4930_v56 = vmax.f32 %v15286_v31, 0.0  ;;  %v15288_v10 = vld [vmem:[#allocation16_spill] sm:$0xff] }
 0x6bf   : > { %v8134_v30 = vsel %vm498_vm4, %v4930_v56, %v14344_v38 }
 0x6c0   : > { %8228 = vxpose.xlu0.b32.cont [9/16] %v8132_v52, 128  ;;  %v15287_v52 = vld [vmem:[#allocation12_spill] sm:$0xff]  ;;  %v8033_v31 = vpop.permute.xlu0 %8032 }
 0x6c1   : > { %8257 = vxpose.xlu1.b32.cont [6/16] %v8161_v50, 128  ;;  %v4931_v50 = vmax.f32 %v15287_v52, 0.0 }
 0x6c3   : > { %v8135_v21 = vsel %vm498_vm4, %v4931_v50, %v14346_v44 }
 0x6c4   : > { %8229 = vxpose.xlu0.b32.cont [10/16] %v8133_v34, 128  ;;  %v4932_v34 = vmax.f32 %v15288_v10, 0.0  ;;  %v14536_v50 = vpop.permute.xlu0 %8048 }
 0x6c5   : > { %8258 = vxpose.xlu1.b32.cont [7/16] %v8162_v42, 128  ;;  %v8039_v42 = vpop.permute.xlu1 %8038 }
 0x6c6   : > { %v8136_v56 = vsel %vm498_vm4, %v4932_v34, %v14356_v40  ;;  %v8167_v34 = vsel %vm442_vm2, %v14346_v44, %v14140_v6  ;;  %v8169_v44 = vsel %vm442_vm2, %v14358_v57, %v14171_v27 }
 0x6c8   : > { %8230 = vxpose.xlu0.b32.cont [11/16] %v8134_v30, 128  ;;  %v15289_v30 = vld [vmem:[#allocation18_spill] sm:$0xff] }
 0x6c9   : > { %8259 = vxpose.xlu1.b32.cont [8/16] %v8163_v11, 128  ;;  %v4933_v11 = vmax.f32 %v15289_v30, 0.0  ;;  %v8035_v22 = vpop.permute.xlu1 %8034 }
 0x6cb   : > { %v8137_v52 = vsel %vm498_vm4, %v4933_v11, %v14358_v57  ;;  %v8029_v11 = vpop.permute.xlu0 %8028  ;;  %v15292_v57 = vld [vmem:[#allocation11_spill] sm:$0xff] }
 0x6cc   : > { %8231 = vxpose.xlu0.b32.cont [12/16] %v8135_v21, 128  ;;  %v8166_v21 = vsel %vm442_vm2, %v14344_v38, %v14149_v63  ;;  %v8168_v38 = vsel %vm442_vm2, %v14356_v40, %v14165_v54  ;;  %v8170_v40 = vsel %vm442_vm2, %v14352_v53, %v14181_v62 }
 0x6cd   : > { %8260 = vxpose.xlu1.b32.cont [9/16] %v8164_v48, 128  ;;  %v15290_v48 = vld [vmem:[#allocation20_spill] sm:$0xff]  ;;  %v8051_v30 = vpop.permute.xlu1 %8050 }
 0x6ce   : > { %v4934_v10 = vmax.f32 %v15290_v48, 0.0 }
 0x6d0   : > { %8232 = vxpose.xlu0.b32.cont [13/16] %v8136_v56, 128  ;;  %v8138_v35 = vsel %vm498_vm4, %v4934_v10, %v14352_v53  ;;  %v15291_v56 = vld [vmem:[#allocation9_spill] sm:$0xff]  ;;  %v8045_v10 = vpop.permute.xlu0 %8044 }
 0x6d1   : > { %8261 = vxpose.xlu1.b32.cont [10/16] %v8165_v8, 128  ;;  %v4935_v8 = vmax.f32 %v15291_v56, 0.0  ;;  %v8031_v48 = vpop.permute.xlu1 %8030  ;;  %v8171_v56 = vsel %vm442_vm2, %v14354_v39, %v14186_v45 }
 0x6d4   : > { %8233 = vxpose.xlu0.b32.cont [14/16] %v8137_v52, 128  ;;  %v8139_v52 = vsel %vm498_vm4, %v4935_v8, %v14354_v39  ;;  %v4936_v8 = vmax.f32 %v15292_v57, 0.0 }
 0x6d5   : > { %8262 = vxpose.xlu1.b32.cont [11/16] %v8166_v21, 128  ;;  %v8188_v21 = vsel %vm386_vm0, %v14046_v23, %v8029_v11  ;;  %v8190_v23 = vsel %vm386_vm0, %v14066_v20, %v8033_v31  ;;  %v8192_v31 = vsel %vm386_vm0, %v14086_v1, %v8037_v60  ;;  %v8195_v60 = vsel %vm386_vm0, %v14104_v26, %v14476_v51 }
 0x6d6   : > { %v8140_v53 = vsel %vm498_vm4, %v4936_v8, %v14374_v59 }
 0x6d8   : > { %8234 = vxpose.xlu0.b32.cont [15/16] %v8138_v35, 128  ;;  %v8189_v35 = vsel %vm386_vm0, %v14044_v32, %v8031_v48  ;;  %v8191_v32 = vsel %vm386_vm0, %v14064_v14, %v8035_v22  ;;  %v8193_v22 = vsel %vm386_vm0, %v14084_v7, %v8039_v42  ;;  %v8194_v48 = vsel %vm386_vm0, %v14106_v25, %v14470_v43 }
 0x6d9   : > { %8263 = vxpose.xlu1.b32.cont [12/16] %v8167_v34, 128  ;;  %v8057_v34 = vpop.permute.xlu0 %8056  ;;  %v8196_v25 = vsel %vm386_vm0, %v14124_v36, %v8045_v10  ;;  %v15294_v10 = vld [vmem:[#allocation50_spill] sm:$0xff] }
 0x6dc   : > { %8235 = vxpose.xlu0.b32.end [16/16] %v8139_v52, 128  ;;  %v8047_v52 = vpop.permute.xlu1 %8046 }
 0x6dd   : > { %8264 = vxpose.xlu1.b32.cont [13/16] %v8168_v38, 128  ;;  %v8053_v11 = vpop.permute.xlu0 %8052  ;;  %v15293_v38 = vld [vmem:[#allocation28_spill] sm:$0xff] }
 0x6de   : > { %v4937_v20 = vmax.f32 %v15293_v38, 0.0 }
 0x6e0   : > { %8284 = vxpose.xlu0.b32.start [1/16] %v8188_v21, 128  ;;  %v8141_v39 = vsel %vm498_vm4, %v4937_v20, %v14377_v41  ;;  %v8059_v14 = vpop.permute.xlu1 %8058 }
 0x6e1   : > { %8265 = vxpose.xlu1.b32.cont [14/16] %v8169_v44, 128  ;;  %v14578_v21 = vpop.permute.xlu0 %8064 }
 0x6e2   : > { %v8206_v57 = vsel %vm386_vm0, %v14215_v19, %v14578_v21 }
 0x6e4   : > { %8285 = vxpose.xlu0.b32.cont [2/16] %v8189_v35, 128  ;;  %v8055_v1 = vpop.permute.xlu1 %8054 }
 0x6e5   : > { %8266 = vxpose.xlu1.b32.cont [15/16] %v8170_v40, 128  ;;  %v14586_v44 = vpop.permute.xlu0 %8060 }
 0x6e8   : > { %8286 = vxpose.xlu0.b32.cont [3/16] %v8190_v23, 128  ;;  %v15297_v23 = vld [vmem:[#allocation60_spill] sm:$0xff] }
 0x6e9   : > { %8267 = vxpose.xlu1.b32.end [16/16] %v8171_v56, 128  ;;  %v14593_v7 = vpop.permute.xlu0 %8072 }
 0x6ec   : > { %8287 = vxpose.xlu0.b32.cont [4/16] %v8191_v32, 128 }
 0x6ed   : > { %8316 = vxpose.xlu1.b32.start [1/16] %v8140_v53, 128  ;;  %v14602_v43 = vpop.permute.xlu0 %8068 }
 0x6ee   : > { %v8208_v21 = vsel %vm386_vm0, %v15294_v10, %v14602_v43 }
 0x6f0   : > { %8288 = vxpose.xlu0.b32.cont [5/16] %v8192_v31, 128  ;;  %v15301_v31 = vld [vmem:[#allocation25_spill] sm:$0xff] }
 0x6f1   : > { %8317 = vxpose.xlu1.b32.cont [2/16] %v8141_v39, 128  ;;  %v14609_v36 = vpop.permute.xlu0 %8080 }
 0x6f4   : > { %8289 = vxpose.xlu0.b32.cont [6/16] %v8193_v22, 128 }
 0x6f5   : > { %8318 = vxpose.xlu1.b32.cont [3/16] %v14366_v18, 128  ;;  %v14595_v18 = vpop.permute.xlu1 %8066  ;;  %v14618_v51 = vpop.permute.xlu0 %8076 }
 0x6f8   : > { %8290 = vxpose.xlu0.b32.cont [7/16] %v8194_v48, 128 }
 0x6f9   : > { %8319 = vxpose.xlu1.b32.cont [4/16] %v14372_v61, 128  ;;  %v8197_v61 = vsel %vm386_vm0, %v14120_v17, %v8047_v52  ;;  %v8063_v26 = vpop.permute.xlu1 %8062  ;;  %v8199_v17 = vsel %vm386_vm0, %v14140_v6, %v8051_v30  ;;  %v14626_v6 = vpop.permute.xlu0 %8088  ;;  %v8207_v52 = vsel %vm386_vm0, %v14223_v5, %v14595_v18  ;;  %v15303_v18 = vld [vmem:[#allocation61_spill] sm:$0xff] }
 0x6fc   : > { %8291 = vxpose.xlu0.b32.cont [8/16] %v8195_v60, 128 }
 0x6fd   : > { %8320 = vxpose.xlu1.b32.cont [5/16] %v14404_v9, 128  ;;  %v8198_v9 = vsel %vm386_vm0, %v14149_v63, %v14536_v50 }
 0x700   : > { %8292 = vxpose.xlu0.b32.cont [9/16] %v8196_v25, 128  ;;  %v15304_v25 = vld [vmem:[#allocation19_spill] sm:$0xff] }
 0x701   : > { %8321 = vxpose.xlu1.b32.cont [6/16] %v14413_v13, 128  ;;  %v14611_v13 = vpop.permute.xlu1 %8074 }
 0x704   : > { %8293 = vxpose.xlu0.b32.cont [10/16] %v8197_v61, 128  ;;  %v8181_v61 = vsel %vm442_vm2, %v15304_v25, %v15303_v18 }
 0x705   : > { %8322 = vxpose.xlu1.b32.cont [7/16] %v14387_v29, 128  ;;  %v8200_v29 = vsel %vm386_vm0, %v14165_v54, %v8053_v11  ;;  %v14620_v63 = vpop.permute.xlu1 %8070  ;;  %v8202_v54 = vsel %vm386_vm0, %v14181_v62, %v8057_v34  ;;  %v8172_v62 = vsel %vm442_vm2, %v14374_v59, %v14199_v24  ;;  %v8174_v59 = vsel %vm442_vm2, %v14361_v12, %v14215_v19  ;;  %v15299_v11 = vld [vmem:[#allocation13_spill] sm:$0xff]  ;;  %v15300_v19 = vld [vmem:[#allocation54_spill] sm:$0xff] }
 0x706   : > { %v8179_v39 = vsel %vm442_vm2, %v15301_v31, %v15300_v19 }
 0x708   : > { %8294 = vxpose.xlu0.b32.cont [11/16] %v8198_v9, 128  ;;  %v15305_v9 = vld [vmem:[#allocation31_spill] sm:$0xff] }
 0x709   : > { %8323 = vxpose.xlu1.b32.cont [8/16] %v14396_v33, 128  ;;  %v8201_v33 = vsel %vm386_vm0, %v14171_v27, %v8055_v1  ;;  %v14628_v42 = vpop.permute.xlu1 %8082  ;;  %v14638_v27 = vpop.permute.xlu0 %8084 }
 0x70c   : > { %8295 = vxpose.xlu0.b32.cont [12/16] %v8199_v17, 128  ;;  %v15306_v17 = vld [vmem:[#allocation67_spill] sm:$0xff] }
 0x70d   : > { %8324 = vxpose.xlu1.b32.cont [9/16] %v14440_v3, 128  ;;  %v8203_v3 = vsel %vm386_vm0, %v14186_v45, %v8059_v14 }
 0x710   : > { %8296 = vxpose.xlu0.b32.cont [13/16] %v8200_v29, 128  ;;  %v8182_v29 = vsel %vm442_vm2, %v15306_v17, %v15305_v9 }
 0x711   : > { %8325 = vxpose.xlu1.b32.cont [10/16] %v14449_v0, 128 }
 0x714   : > { %8297 = vxpose.xlu0.b32.cont [14/16] %v8201_v33, 128 }
 0x715   : > { %8326 = vxpose.xlu1.b32.cont [11/16] %v14421_v4, 128  ;;  %v14640_v4 = vpop.permute.xlu1 %8078 }
 0x718   : > { %8298 = vxpose.xlu0.b32.cont [15/16] %v8202_v54, 128 }
 0x719   : > { %8327 = vxpose.xlu1.b32.cont [12/16] %v14430_v58, 128  ;;  %v14650_v45 = vpop.permute.xlu1 %8090  ;;  %v8173_v58 = vsel %vm442_vm2, %v14377_v41, %v14207_v28  ;;  %v8175_v41 = vsel %vm442_vm2, %v14368_v16, %v14223_v5  ;;  %v8205_v16 = vsel %vm386_vm0, %v14207_v28, %v8063_v26  ;;  %v15298_v28 = vld [vmem:[#allocation21_spill] sm:$0xff] }
 0x71a   : > { %v8178_v53 = vsel %vm442_vm2, %v15299_v11, %v15298_v28  ;;  %v15302_v5 = vld [vmem:[#allocation45_spill] sm:$0xff] }
 0x71b   : > { %v8180_v48 = vsel %vm442_vm2, %v14432_v37, %v15302_v5  ;;  %v8210_v37 = vsel %vm386_vm0, %v15298_v28, %v14593_v7  ;;  %v15307_v7 = vld [vmem:[#allocation59_spill] sm:$0xff] }
 0x71c   : > { %8299 = vxpose.xlu0.b32.end [16/16] %v8203_v3, 128  ;;  %v15308_v3 = vld [vmem:[#allocation29_spill] sm:$0xff] }
 0x71d   : > { %8328 = vxpose.xlu1.b32.cont [13/16] %v14490_v55, 128  ;;  %v14660_v50 = vpop.permute.xlu1 %8086 }
 0x720   : > { %8348 = vxpose.xlu0.b32.start [1/16] %v8172_v62, 128  ;;  %v8236_v0 = vpop.trf.xlu0  ;;  %v8183_v62 = vsel %vm442_vm2, %v15308_v3, %v15307_v7 }
 0x721   : > { %8329 = vxpose.xlu1.b32.cont [14/16] %v14498_v2, 128  ;;  %8412 = vst [vmem:[%s14647_s15] sm:$0xff] %v8236_v0  ;;  %v8212_v0 = vsel %vm386_vm0, %v15302_v5, %v14618_v51  ;;  %v15310_v51 = vld [vmem:[#allocation24_spill] sm:$0xff] }
 0x724   : > { %8349 = vxpose.xlu0.b32.cont [2/16] %v8173_v58, 128  ;;  %v8237_v55 = vpop.trf.xlu0 }
 0x725   : > { %8330 = vxpose.xlu1.b32.cont [15/16] %v14460_v15, 128  ;;  %8414 = vst [vmem:[%s14647_s15 + $0x10] sm:$0xff] %v8237_v55  ;;  %v8204_v15 = vsel %vm386_vm0, %v14199_v24, %v14586_v44  ;;  %v15296_v24 = vld [vmem:[#allocation34_spill] sm:$0xff] }
 0x726   : > { %v8177_v56 = vsel %vm442_vm2, %v15297_v23, %v15296_v24  ;;  %v8209_v44 = vsel %vm386_vm0, %v15296_v24, %v14620_v63  ;;  %v8211_v63 = vsel %vm386_vm0, %v15300_v19, %v14611_v13  ;;  %v15309_v13 = vld [vmem:[#allocation14_spill] sm:$0xff] }
 0x727   : > { %v8216_v23 = vsel %vm386_vm0, %v15309_v13, %v14638_v27 }
 0x728   : > { %8350 = vxpose.xlu0.b32.cont [3/16] %v8174_v59, 128  ;;  %v8238_v2 = vpop.trf.xlu0  ;;  %v8184_v59 = vsel %vm442_vm2, %v14481_v49, %v15309_v13  ;;  %v8214_v49 = vsel %vm386_vm0, %v15305_v9, %v14609_v36  ;;  %v15313_v36 = vld [vmem:[#allocation27_spill] sm:$0xff] }
 0x729   : > { %8331 = vxpose.xlu1.b32.end [16/16] %v14468_v46, 128  ;;  %8416 = vst [vmem:[%s14647_s15 + $0x20] sm:$0xff] %v8238_v2  ;;  %v15295_v46 = vld [vmem:[#allocation32_spill] sm:$0xff]  ;;  %v8213_v2 = vsel %vm386_vm0, %v15303_v18, %v14640_v4  ;;  %v15311_v4 = vld [vmem:[#allocation17_spill] sm:$0xff] }
 0x72a   : > { %v8176_v35 = vsel %vm442_vm2, %v15295_v46, %v15294_v10  ;;  %v15312_v46 = vld [vmem:[#allocation65_spill] sm:$0xff]  ;;  %v8218_v27 = vsel %vm386_vm0, %v15311_v4, %v14626_v6 }
 0x72c   : > { %8351 = vxpose.xlu0.b32.cont [4/16] %v8175_v41, 128  ;;  %v8239_v30 = vpop.trf.xlu0 }
 0x72d   : > { %v8268_v12 = vpop.trf.xlu1  ;;  %8380 = vxpose.xlu1.b32.start [1/16] %v8204_v15, 128  ;;  %8418 = vst [vmem:[%s14647_s15 + $0x30] sm:$0xff] %v8239_v30  ;;  %v8185_v30 = vsel %vm442_vm2, %v14492_v47, %v15310_v51  ;;  %v8215_v47 = vsel %vm386_vm0, %v15307_v7, %v14628_v42 }
 0x72e   : > { %8444 = vst [vmem:[%s14647_s15 + $0x100] sm:$0xff] %v8268_v12 }
 0x730   : > { %8352 = vxpose.xlu0.b32.cont [5/16] %v8176_v35, 128  ;;  %v8240_v40 = vpop.trf.xlu0  ;;  %v8186_v35 = vsel %vm442_vm2, %v15312_v46, %v15311_v4 }
 0x731   : > { %v8269_v34 = vpop.trf.xlu1  ;;  %8381 = vxpose.xlu1.b32.cont [2/16] %v8205_v16, 128  ;;  %8420 = vst [vmem:[%s14647_s15 + $0x40] sm:$0xff] %v8240_v40 }
 0x732   : > { %8446 = vst [vmem:[%s14647_s15 + $0x110] sm:$0xff] %v8269_v34  ;;  %v15314_v34 = vld [vmem:[#allocation66_spill] sm:$0xff] }
 0x733   : > { %v8187_v24 = vsel %vm442_vm2, %v15314_v34, %v15313_v36 }
 0x734   : > { %8353 = vxpose.xlu0.b32.cont [6/16] %v8177_v56, 128  ;;  %v8241_v8 = vpop.trf.xlu0 }
 0x735   : > { %v8270_v32 = vpop.trf.xlu1  ;;  %8382 = vxpose.xlu1.b32.cont [3/16] %v8206_v57, 128  ;;  %8422 = vst [vmem:[%s14647_s15 + $0x50] sm:$0xff] %v8241_v8  ;;  %v8217_v57 = vsel %vm386_vm0, %v15310_v51, %v14660_v50  ;;  %v8219_v50 = vsel %vm386_vm0, %v15313_v36, %v14650_v45 }
 0x736   : > { %8448 = vst [vmem:[%s14647_s15 + $0x120] sm:$0xff] %v8270_v32 }
 0x738   : > { %8354 = vxpose.xlu0.b32.cont [7/16] %v8178_v53, 128  ;;  %v8242_v38 = vpop.trf.xlu0 }
 0x739   : > { %v8271_v20 = vpop.trf.xlu1  ;;  %8383 = vxpose.xlu1.b32.cont [4/16] %v8207_v52, 128  ;;  %8424 = vst [vmem:[%s14647_s15 + $0x60] sm:$0xff] %v8242_v38 }
 0x73a   : > { %8450 = vst [vmem:[%s14647_s15 + $0x130] sm:$0xff] %v8271_v20 }
 0x73c   : > { %8355 = vxpose.xlu0.b32.cont [8/16] %v8179_v39, 128  ;;  %v8243_v14 = vpop.trf.xlu0 }
 0x73d   : > { %v8272_v22 = vpop.trf.xlu1  ;;  %8384 = vxpose.xlu1.b32.cont [5/16] %v8208_v21, 128  ;;  %8426 = vst [vmem:[%s14647_s15 + $0x70] sm:$0xff] %v8243_v14 }
 0x73e   : > { %8452 = vst [vmem:[%s14647_s15 + $0x140] sm:$0xff] %v8272_v22 }
 0x740   : > { %8356 = vxpose.xlu0.b32.cont [9/16] %v8180_v48, 128  ;;  %v8244_v1 = vpop.trf.xlu0 }
 0x741   : > { %v8273_v60 = vpop.trf.xlu1  ;;  %8385 = vxpose.xlu1.b32.cont [6/16] %v8209_v44, 128  ;;  %8428 = vst [vmem:[%s14647_s15 + $0x80] sm:$0xff] %v8244_v1 }
 0x742   : > { %8454 = vst [vmem:[%s14647_s15 + $0x150] sm:$0xff] %v8273_v60 }
 0x744   : > { %8357 = vxpose.xlu0.b32.cont [10/16] %v8181_v61, 128  ;;  %v8245_v43 = vpop.trf.xlu0 }
 0x745   : > { %v8274_v26 = vpop.trf.xlu1  ;;  %8386 = vxpose.xlu1.b32.cont [7/16] %v8210_v37, 128  ;;  %8430 = vst [vmem:[%s14647_s15 + $0x90] sm:$0xff] %v8245_v43 }
 0x746   : > { %8456 = vst [vmem:[%s14647_s15 + $0x160] sm:$0xff] %v8274_v26 }
 0x748   : > { %8358 = vxpose.xlu0.b32.cont [11/16] %v8182_v29, 128  ;;  %v8246_v33 = vpop.trf.xlu0 }
 0x749   : > { %v8275_v54 = vpop.trf.xlu1  ;;  %8387 = vxpose.xlu1.b32.cont [8/16] %v8211_v63, 128  ;;  %8432 = vst [vmem:[%s14647_s15 + $0xa0] sm:$0xff] %v8246_v33 }
 0x74a   : > { %8458 = vst [vmem:[%s14647_s15 + $0x170] sm:$0xff] %v8275_v54 }
 0x74c   : > { %8359 = vxpose.xlu0.b32.cont [12/16] %v8183_v62, 128  ;;  %v8247_v58 = vpop.trf.xlu0 }
 0x74d   : > { %v8276_v55 = vpop.trf.xlu1  ;;  %8388 = vxpose.xlu1.b32.cont [9/16] %v8212_v0, 128  ;;  %8434 = vst [vmem:[%s14647_s15 + $0xb0] sm:$0xff] %v8247_v58 }
 0x74e   : > { %8460 = vst [vmem:[%s14647_s15 + $0x180] sm:$0xff] %v8276_v55 }
 0x750   : > { %8360 = vxpose.xlu0.b32.cont [13/16] %v8184_v59, 128  ;;  %v8248_v41 = vpop.trf.xlu0 }
 0x751   : > { %v8277_v15 = vpop.trf.xlu1  ;;  %8389 = vxpose.xlu1.b32.cont [10/16] %v8213_v2, 128  ;;  %8436 = vst [vmem:[%s14647_s15 + $0xc0] sm:$0xff] %v8248_v41 }
 0x752   : > { %8462 = vst [vmem:[%s14647_s15 + $0x190] sm:$0xff] %v8277_v15 }
 0x754   : > { %8361 = vxpose.xlu0.b32.cont [14/16] %v8185_v30, 128  ;;  %v8249_v12 = vpop.trf.xlu0 }
 0x755   : > { %v8278_v10 = vpop.trf.xlu1  ;;  %8390 = vxpose.xlu1.b32.cont [11/16] %v8214_v49, 128  ;;  %8438 = vst [vmem:[%s14647_s15 + $0xd0] sm:$0xff] %v8249_v12 }
 0x756   : > { %8464 = vst [vmem:[%s14647_s15 + $0x1a0] sm:$0xff] %v8278_v10 }
 0x758   : > { %8362 = vxpose.xlu0.b32.cont [15/16] %v8186_v35, 128  ;;  %v8250_v16 = vpop.trf.xlu0 }
 0x759   : > { %v8279_v40 = vpop.trf.xlu1  ;;  %8391 = vxpose.xlu1.b32.cont [12/16] %v8215_v47, 128  ;;  %8440 = vst [vmem:[%s14647_s15 + $0xe0] sm:$0xff] %v8250_v16 }
 0x75a   : > { %8466 = vst [vmem:[%s14647_s15 + $0x1b0] sm:$0xff] %v8279_v40 }
 0x75c   : > { %8363 = vxpose.xlu0.b32.end [16/16] %v8187_v24, 128  ;;  %v8251_v56 = vpop.trf.xlu0 }
 0x75d   : > { %v8280_v42 = vpop.trf.xlu1  ;;  %8392 = vxpose.xlu1.b32.cont [13/16] %v8216_v23, 128  ;;  %8442 = vst [vmem:[%s14647_s15 + $0xf0] sm:$0xff] %v8251_v56 }
 0x75e   : > { %8468 = vst [vmem:[%s14647_s15 + $0x1c0] sm:$0xff] %v8280_v42 }
 0x760   : > { %v8300_v8 = vpop.trf.xlu0 }
 0x761   : > { %v8281_v32 = vpop.trf.xlu1  ;;  %8393 = vxpose.xlu1.b32.cont [14/16] %v8217_v57, 128  ;;  %8476 = vst [vmem:[%s14647_s15 + $0x200] sm:$0xff] %v8300_v8 }
 0x762   : > { %8470 = vst [vmem:[%s14647_s15 + $0x1d0] sm:$0xff] %v8281_v32 }
 0x764   : > { %v8301_v28 = vpop.trf.xlu0 }
 0x765   : > { %v8282_v11 = vpop.trf.xlu1  ;;  %8394 = vxpose.xlu1.b32.cont [15/16] %v8218_v27, 128  ;;  %8478 = vst [vmem:[%s14647_s15 + $0x210] sm:$0xff] %v8301_v28 }
 0x766   : > { %8472 = vst [vmem:[%s14647_s15 + $0x1e0] sm:$0xff] %v8282_v11 }
 0x768   : > { %v8302_v53 = vpop.trf.xlu0 }
 0x769   : > { %v8283_v52 = vpop.trf.xlu1  ;;  %8395 = vxpose.xlu1.b32.end [16/16] %v8219_v50, 128  ;;  %8480 = vst [vmem:[%s14647_s15 + $0x220] sm:$0xff] %v8302_v53 }
 0x76a   : > { %8474 = vst [vmem:[%s14647_s15 + $0x1f0] sm:$0xff] %v8283_v52 }
 0x76c   : > { %v8303_v6 = vpop.trf.xlu0 }
 0x76d   : > { %v8332_v38 = vpop.trf.xlu1  ;;  %8482 = vst [vmem:[%s14647_s15 + $0x230] sm:$0xff] %v8303_v6 }
 0x76e   : > { %8413 = vst [vmem:[%s14647_s15 + $0x8] sm:$0xff] %v8332_v38 }
 0x770   : > { %v8304_v20 = vpop.trf.xlu0 }
 0x771   : > { %v8333_v19 = vpop.trf.xlu1  ;;  %8484 = vst [vmem:[%s14647_s15 + $0x240] sm:$0xff] %v8304_v20 }
 0x772   : > { %8415 = vst [vmem:[%s14647_s15 + $0x18] sm:$0xff] %v8333_v19 }
 0x774   : > { %v8305_v45 = vpop.trf.xlu0 }
 0x775   : > { %v8334_v31 = vpop.trf.xlu1  ;;  %8486 = vst [vmem:[%s14647_s15 + $0x250] sm:$0xff] %v8305_v45 }
 0x776   : > { %8417 = vst [vmem:[%s14647_s15 + $0x28] sm:$0xff] %v8334_v31 }
 0x778   : > { %v8306_v39 = vpop.trf.xlu0 }
 0x779   : > { %v8335_v21 = vpop.trf.xlu1  ;;  %8488 = vst [vmem:[%s14647_s15 + $0x260] sm:$0xff] %v8306_v39 }
 0x77a   : > { %8419 = vst [vmem:[%s14647_s15 + $0x38] sm:$0xff] %v8335_v21 }
 0x77c   : > { %v8307_v14 = vpop.trf.xlu0 }
 0x77d   : > { %v8336_v22 = vpop.trf.xlu1  ;;  %8490 = vst [vmem:[%s14647_s15 + $0x270] sm:$0xff] %v8307_v14 }
 0x77e   : > { %8421 = vst [vmem:[%s14647_s15 + $0x48] sm:$0xff] %v8336_v22 }
 0x780   : > { %v8308_v5 = vpop.trf.xlu0 }
 0x781   : > { %v8337_v48 = vpop.trf.xlu1  ;;  %8492 = vst [vmem:[%s14647_s15 + $0x280] sm:$0xff] %v8308_v5 }
 0x782   : > { %8423 = vst [vmem:[%s14647_s15 + $0x58] sm:$0xff] %v8337_v48 }
 0x784   : > { %v8309_v44 = vpop.trf.xlu0 }
 0x785   : > { %v8338_v1 = vpop.trf.xlu1  ;;  %8494 = vst [vmem:[%s14647_s15 + $0x290] sm:$0xff] %v8309_v44 }
 0x786   : > { %8425 = vst [vmem:[%s14647_s15 + $0x68] sm:$0xff] %v8338_v1 }
 0x788   : > { %v8310_v60 = vpop.trf.xlu0 }
 0x789   : > { %v8339_v18 = vpop.trf.xlu1  ;;  %8496 = vst [vmem:[%s14647_s15 + $0x2a0] sm:$0xff] %v8310_v60 }
 0x78a   : > { %8427 = vst [vmem:[%s14647_s15 + $0x78] sm:$0xff] %v8339_v18 }
 0x78c   : > { %v8311_v25 = vpop.trf.xlu0 }
 0x78d   : > { %v8340_v61 = vpop.trf.xlu1  ;;  %8498 = vst [vmem:[%s14647_s15 + $0x2b0] sm:$0xff] %v8311_v25 }
 0x78e   : > { %8429 = vst [vmem:[%s14647_s15 + $0x88] sm:$0xff] %v8340_v61 }
 0x790   : > { %v8312_v37 = vpop.trf.xlu0 }
 0x791   : > { %v8341_v43 = vpop.trf.xlu1  ;;  %8500 = vst [vmem:[%s14647_s15 + $0x2c0] sm:$0xff] %v8312_v37 }
 0x792   : > { %8431 = vst [vmem:[%s14647_s15 + $0x98] sm:$0xff] %v8341_v43 }
 0x794   : > { %v8313_v26 = vpop.trf.xlu0 }
 0x795   : > { %v8342_v9 = vpop.trf.xlu1  ;;  %8502 = vst [vmem:[%s14647_s15 + $0x2d0] sm:$0xff] %v8313_v26 }
 0x796   : > { %8433 = vst [vmem:[%s14647_s15 + $0xa8] sm:$0xff] %v8342_v9 }
 0x798   : > { %v8314_v17 = vpop.trf.xlu0 }
 0x799   : > { %v8343_v29 = vpop.trf.xlu1  ;;  %8504 = vst [vmem:[%s14647_s15 + $0x2e0] sm:$0xff] %v8314_v17 }
 0x79a   : > { %8435 = vst [vmem:[%s14647_s15 + $0xb8] sm:$0xff] %v8343_v29 }
 0x79c   : > { %v8315_v63 = vpop.trf.xlu0 }
 0x79d   : > { %v8344_v33 = vpop.trf.xlu1  ;;  %8506 = vst [vmem:[%s14647_s15 + $0x2f0] sm:$0xff] %v8315_v63 }
 0x79e   : > { %8437 = vst [vmem:[%s14647_s15 + $0xc8] sm:$0xff] %v8344_v33 }
 0x7a0   : > { %v8364_v54 = vpop.trf.xlu0 }
 0x7a1   : > { %v8345_v7 = vpop.trf.xlu1  ;;  %8445 = vst [vmem:[%s14647_s15 + $0x108] sm:$0xff] %v8364_v54 }
 0x7a2   : > { %8439 = vst [vmem:[%s14647_s15 + $0xd8] sm:$0xff] %v8345_v7 }
 0x7a4   : > { %v8365_v3 = vpop.trf.xlu0 }
 0x7a5   : > { %v8346_v62 = vpop.trf.xlu1  ;;  %8447 = vst [vmem:[%s14647_s15 + $0x118] sm:$0xff] %v8365_v3 }
 0x7a6   : > { %8441 = vst [vmem:[%s14647_s15 + $0xe8] sm:$0xff] %v8346_v62 }
 0x7a8   : > { %v8366_v0 = vpop.trf.xlu0 }
 0x7a9   : > { %v8347_v58 = vpop.trf.xlu1  ;;  %8449 = vst [vmem:[%s14647_s15 + $0x128] sm:$0xff] %v8366_v0 }
 0x7aa   : > { %8443 = vst [vmem:[%s14647_s15 + $0xf8] sm:$0xff] %v8347_v58 }
 0x7ac   : > { %v8367_v55 = vpop.trf.xlu0 }
 0x7ad   : > { %v8396_v13 = vpop.trf.xlu1  ;;  %8451 = vst [vmem:[%s14647_s15 + $0x138] sm:$0xff] %v8367_v55 }
 0x7ae   : > { %8477 = vst [vmem:[%s14647_s15 + $0x208] sm:$0xff] %v8396_v13 }
 0x7b0   : > { %v8368_v59 = vpop.trf.xlu0 }
 0x7b1   : > { %v8397_v2 = vpop.trf.xlu1  ;;  %8453 = vst [vmem:[%s14647_s15 + $0x148] sm:$0xff] %v8368_v59 }
 0x7b2   : > { %8479 = vst [vmem:[%s14647_s15 + $0x218] sm:$0xff] %v8397_v2 }
 0x7b4   : > { %v8369_v41 = vpop.trf.xlu0 }
 0x7b5   : > { %v8398_v15 = vpop.trf.xlu1  ;;  %8455 = vst [vmem:[%s14647_s15 + $0x158] sm:$0xff] %v8369_v41 }
 0x7b6   : > { %8481 = vst [vmem:[%s14647_s15 + $0x228] sm:$0xff] %v8398_v15 }
 0x7b8   : > { %v8370_v51 = vpop.trf.xlu0 }
 0x7b9   : > { %v8399_v30 = vpop.trf.xlu1  ;;  %8457 = vst [vmem:[%s14647_s15 + $0x168] sm:$0xff] %v8370_v51 }
 0x7ba   : > { %8483 = vst [vmem:[%s14647_s15 + $0x238] sm:$0xff] %v8399_v30 }
 0x7bc   : > { %v8371_v49 = vpop.trf.xlu0 }
 0x7bd   : > { %v8400_v12 = vpop.trf.xlu1  ;;  %8459 = vst [vmem:[%s14647_s15 + $0x178] sm:$0xff] %v8371_v49 }
 0x7be   : > { %8485 = vst [vmem:[%s14647_s15 + $0x248] sm:$0xff] %v8400_v12 }
 0x7c0   : > { %v8372_v10 = vpop.trf.xlu0 }
 0x7c1   : > { %v8401_v4 = vpop.trf.xlu1  ;;  %8461 = vst [vmem:[%s14647_s15 + $0x188] sm:$0xff] %v8372_v10 }
 0x7c2   : > { %8487 = vst [vmem:[%s14647_s15 + $0x258] sm:$0xff] %v8401_v4 }
 0x7c4   : > { %v8373_v46 = vpop.trf.xlu0 }
 0x7c5   : > { %v8402_v35 = vpop.trf.xlu1  ;;  %8463 = vst [vmem:[%s14647_s15 + $0x198] sm:$0xff] %v8373_v46 }
 0x7c6   : > { %8489 = vst [vmem:[%s14647_s15 + $0x268] sm:$0xff] %v8402_v35 }
 0x7c8   : > { %v8374_v47 = vpop.trf.xlu0 }
 0x7c9   : > { %v8403_v16 = vpop.trf.xlu1  ;;  %8465 = vst [vmem:[%s14647_s15 + $0x1a8] sm:$0xff] %v8374_v47 }
 0x7ca   : > { %8491 = vst [vmem:[%s14647_s15 + $0x278] sm:$0xff] %v8403_v16 }
 0x7cc   : > { %v8375_v40 = vpop.trf.xlu0 }
 0x7cd   : > { %v8404_v36 = vpop.trf.xlu1  ;;  %8467 = vst [vmem:[%s14647_s15 + $0x1b8] sm:$0xff] %v8375_v40 }
 0x7ce   : > { %8493 = vst [vmem:[%s14647_s15 + $0x288] sm:$0xff] %v8404_v36 }
 0x7d0   : > { %v8376_v34 = vpop.trf.xlu0 }
 0x7d1   : > { %v8405_v24 = vpop.trf.xlu1  ;;  %8469 = vst [vmem:[%s14647_s15 + $0x1c8] sm:$0xff] %v8376_v34 }
 0x7d2   : > { %8495 = vst [vmem:[%s14647_s15 + $0x298] sm:$0xff] %v8405_v24 }
 0x7d4   : > { %v8377_v23 = vpop.trf.xlu0 }
 0x7d5   : > { %v8406_v56 = vpop.trf.xlu1  ;;  %8471 = vst [vmem:[%s14647_s15 + $0x1d8] sm:$0xff] %v8377_v23 }
 0x7d6   : > { %8497 = vst [vmem:[%s14647_s15 + $0x2a8] sm:$0xff] %v8406_v56 }
 0x7d8   : > { %v8378_v42 = vpop.trf.xlu0 }
 0x7d9   : > { %v8407_v57 = vpop.trf.xlu1  ;;  %8473 = vst [vmem:[%s14647_s15 + $0x1e8] sm:$0xff] %v8378_v42 }
 0x7da   : > { %8499 = vst [vmem:[%s14647_s15 + $0x2b8] sm:$0xff] %v8407_v57 }
 0x7dc   : > { %v8379_v8 = vpop.trf.xlu0 }
 0x7dd   : > { %v8408_v32 = vpop.trf.xlu1  ;;  %8475 = vst [vmem:[%s14647_s15 + $0x1f8] sm:$0xff] %v8379_v8 }
 0x7de   : > { %8501 = vst [vmem:[%s14647_s15 + $0x2c8] sm:$0xff] %v8408_v32 }
 0x7e1   : > { %v8409_v27 = vpop.trf.xlu1 }
 0x7e2   : > { %8503 = vst [vmem:[%s14647_s15 + $0x2d8] sm:$0xff] %v8409_v27 }
 0x7e5   : > { %v8410_v28 = vpop.trf.xlu1 }
 0x7e6   : > { %8505 = vst [vmem:[%s14647_s15 + $0x2e8] sm:$0xff] %v8410_v28 }
 0x7e9   : > { %v8411_v11 = vpop.trf.xlu1 }
 0x7ea   : > { %8507 = vst [vmem:[%s14647_s15 + $0x2f8] sm:$0xff] %v8411_v11 }
 0x7eb   : > { %10037 = shalt.err (!%p10034_p3)
}
 0x7ec   : > { %s10038_s30 = scalar_lea.hbm %s14847_s29, 12288  ;;  %s10042_s25 = scalar_lea.hbm %s14906_s11, 24576 }
 0x7ed   : > { %p10039_p4 = scmp.ne.s32.totalorder %s14847_s29, %s10038_s30  ;;  %p10043_p9 = scmp.lt.u32.totalorder %s14847_s29, %s14906_s11 }
 0x7ee   : > { %p10044_p10 = scmp.lt.u32.totalorder %s10042_s25, %s10038_s30  ;;  %p10046_p12 = scmp.lt.u32.totalorder %s10038_s30, %s14847_s29 }
 0x7ef   : > { %p10040_p7 = pnand %p10039_p4, %p10194_p5 }
 0x7f0   : > { %p10045_p11 = por %p10044_p10, %p10043_p9 }
 0x7f1   : > { %p10041_p8 = pneg %p10040_p7 }
 0x7f2   : > { %p10047_p13 = por %p10046_p12, %p10045_p11 }
 0x7f4   : > { %p10048_p0 = pnand %p10047_p13, %p10041_p8 }
 0x7f6   : > { %10051 = shalt.err (!%p10048_p0)
}
 0x7f7   : > { %s10094_s13 = smov 256   ;;  %s10095_s16 = smov 16  }
 0x7f8   : > { %9840 = dma.vmem_to_hbm [thread:$0]  (%p10194_p5), %s14849_s22, 12288, %s14847_s29, %s14854_s12, %s10094_s13, %s10094_s13, %s10095_s16  }
 0x7f9 PF: > { %p9846_p1 = scmp.ge.s32.totalorder %s10086_s20, 2  ;;  %s8537_s15 = sand.u32 1, %s10074_s17  }
 0x7fa   : > { %s8538_s30 = scalar_lea.sflag [#allocation6], %s8537_s15 }
 0x7fb   : > { %p9843_p2 = pnand %p9846_p1, %p10198_p6 }
 0x7fd   : > { %10069 = dma.done.wait (!%p9843_p2), %s8538_s30, 12288  }
 0x7fe   : > { %10071 = vsyncadd (!%p9843_p2), %s8538_s30, 4294955008  ;;  %p21_p3 = scmp.ge.s32.totalorder %s10181_s23, 4   ;;  %s15315_s17 = smov %s10078_s18 }
 0x7ff   : > { %s15316_s18 = smov %s10082_s19  ;;  %s15317_s19 = smov %s10192_s26 }
 0x800   : > { %s15318_s20 = smov %s10181_s23  ;;  %23 = sbr.rel (!%p21_p3) target bundleno = 3 (0x3), region = 105 }
 0x807   :  { %8543 = vsyncpa [#allocation6], 1 }
 0x808   :  { %8545 = vsyncpa [#allocation6 + $0x1], 1 }

</bundles_post_ra>
